<compile_context>
chip_gen: v7x
topology: tpu7x:2x2x1
jax: 0.10.0
libtpu: 0.0.40
codegen_flags: <defaults>
</compile_context>

<pallas_src>
import functools

import jax
import jax.numpy as jnp
from jax.experimental import pallas as pl
from jax.experimental.pallas import tpu as pltpu

NUM_CLASSES = 7


def _round_up(x, m):
    return ((x + m - 1) // m) * m


# --------------------------------------------------------------------------
# Fused matmul kernels:  out = act((x @ w) * scale + bias)
# scale / bias are per-output-column (folds conv-bias + BatchNorm eval affine).
# --------------------------------------------------------------------------
def _matmul_single_k_kernel(x_ref, w_ref, s_ref, b_ref, o_ref, *, relu):
    y = jnp.dot(x_ref[...], w_ref[...], preferred_element_type=jnp.float32)
    y = y * s_ref[...] + b_ref[...]
    if relu:
        y = jnp.maximum(y, 0.0)
    o_ref[...] = y.astype(o_ref.dtype)


def _matmul_multi_k_kernel(x_ref, w_ref, s_ref, b_ref, o_ref, acc_ref, *, relu):
    k = pl.program_id(2)

    @pl.when(k == 0)
    def _():
        acc_ref[...] = jnp.zeros_like(acc_ref)

    acc_ref[...] += jnp.dot(x_ref[...], w_ref[...],
                            preferred_element_type=jnp.float32)

    @pl.when(k == pl.num_programs(2) - 1)
    def _():
        y = acc_ref[...] * s_ref[...] + b_ref[...]
        if relu:
            y = jnp.maximum(y, 0.0)
        o_ref[...] = y.astype(o_ref.dtype)


def fused_matmul(x, w, scale, bias, *, relu, out_dtype=jnp.bfloat16):
    """y[m, n] = act(sum_k x[m,k] w[k,n] * scale[n] + bias[n]), bf16 MXU, f32 acc."""
    M, K = x.shape
    K2, N = w.shape
    assert K == K2

    # ----- tile selection ---------------------------------------------------
    tm = _round_up(M, 8) if M <= 512 else 256
    Mp = _round_up(M, tm)

    Np0 = _round_up(N, 128)
    tn = min(Np0, 1024)           # keep fc1 N-grid >= 2 so megacore splits it
    Np = _round_up(Np0, tn)

    Kp = _round_up(K, 128)
    if Kp <= 2048:                # whole K in one tile -> drop acc + K grid
        tk = Kp
    else:
        tk = 128
        for cand in (2048, 1792, 1536, 1280, 1024, 896, 768, 640, 512, 384, 256):
            if Kp % cand == 0:
                tk = cand
                break

    # ----- pad + cast to bf16 for the MXU (accumulation stays f32) ----------
    xp = jnp.pad(x, ((0, Mp - M), (0, Kp - K))).astype(jnp.bfloat16)
    wp = jnp.pad(w, ((0, Kp - K), (0, Np - N))).astype(jnp.bfloat16)
    sp = jnp.zeros((1, Np), jnp.float32).at[0, :N].set(scale.astype(jnp.float32))
    bp = jnp.zeros((1, Np), jnp.float32).at[0, :N].set(bias.astype(jnp.float32))

    if tk == Kp:
        cparams = pltpu.CompilerParams(
            dimension_semantics=("parallel", "parallel"),
            vmem_limit_bytes=32 * 1024 * 1024)
        out = pl.pallas_call(
            functools.partial(_matmul_single_k_kernel, relu=relu),
            out_shape=jax.ShapeDtypeStruct((Mp, Np), out_dtype),
            grid_spec=pltpu.PrefetchScalarGridSpec(
                num_scalar_prefetch=0,
                grid=(Mp // tm, Np // tn),
                in_specs=[
                    pl.BlockSpec((tm, Kp), lambda i, j: (i, 0)),
                    pl.BlockSpec((Kp, tn), lambda i, j: (0, j)),
                    pl.BlockSpec((1, tn), lambda i, j: (0, j)),
                    pl.BlockSpec((1, tn), lambda i, j: (0, j)),
                ],
                out_specs=pl.BlockSpec((tm, tn), lambda i, j: (i, j)),
            ),
            compiler_params=cparams,
        )(xp, wp, sp, bp)
    else:
        cparams = pltpu.CompilerParams(
            dimension_semantics=("parallel", "parallel", "arbitrary"),
            vmem_limit_bytes=32 * 1024 * 1024)
        out = pl.pallas_call(
            functools.partial(_matmul_multi_k_kernel, relu=relu),
            out_shape=jax.ShapeDtypeStruct((Mp, Np), out_dtype),
            grid_spec=pltpu.PrefetchScalarGridSpec(
                num_scalar_prefetch=0,
                grid=(Mp // tm, Np // tn, Kp // tk),
                in_specs=[
                    pl.BlockSpec((tm, tk), lambda i, j, k: (i, k)),
                    pl.BlockSpec((tk, tn), lambda i, j, k: (k, j)),
                    pl.BlockSpec((1, tn), lambda i, j, k: (0, j)),
                    pl.BlockSpec((1, tn), lambda i, j, k: (0, j)),
                ],
                out_specs=pl.BlockSpec((tm, tn), lambda i, j, k: (i, j)),
                scratch_shapes=[pltpu.VMEM((tm, tn), jnp.float32)],
            ),
            compiler_params=cparams,
        )(xp, wp, sp, bp)

    return out[:M, :N]


# --------------------------------------------------------------------------
# Classifier head:  softmax(x @ w + b, axis=1), classes padded to 128 lanes.
# --------------------------------------------------------------------------
def _head_softmax_kernel(x_ref, w_ref, b_ref, o_ref):
    logits = jnp.dot(x_ref[...], w_ref[...],
                     preferred_element_type=jnp.float32) + b_ref[...]
    m = jnp.max(logits, axis=1, keepdims=True)
    e = jnp.exp(logits - m)
    o_ref[...] = (e / jnp.sum(e, axis=1, keepdims=True)).astype(o_ref.dtype)


def head_softmax(x, w_pad, b_pad, num_classes):
    B, K = x.shape
    Np = w_pad.shape[1]
    Bp = _round_up(B, 8)
    xp = jnp.pad(x, ((0, Bp - B), (0, 0))).astype(jnp.bfloat16)
    out = pl.pallas_call(
        _head_softmax_kernel,
        out_shape=jax.ShapeDtypeStruct((Bp, Np), jnp.float32),
        grid=(1,),
        in_specs=[
            pl.BlockSpec((Bp, K), lambda i: (0, 0)),
            pl.BlockSpec((K, Np), lambda i: (0, 0)),
            pl.BlockSpec((1, Np), lambda i: (0, 0)),
        ],
        out_specs=pl.BlockSpec((Bp, Np), lambda i: (0, 0)),
    )(xp, w_pad, b_pad.reshape(1, Np))
    return out[:B, :num_classes]


# --------------------------------------------------------------------------
# Conv2d(valid) + BatchNorm2d(eval) + ReLU, channels-last im2col + Pallas matmul
# --------------------------------------------------------------------------
def conv_bn_relu(x_nhwc, w, b, bn, *, stride, eps=1e-5):
    gamma, beta, mean, var = bn
    B, H, W, C = x_nhwc.shape
    OC, _, KH, KW = w.shape
    OH = (H - KH) // stride + 1
    OW = (W - KW) // stride + 1

    # im2col directly in the channels-last layout; columns ordered (kh, kw, c)
    # to match w.transpose(2, 3, 1, 0).reshape(KH*KW*C, OC).
    parts = []
    for kh in range(KH):
        for kw in range(KW):
            parts.append(x_nhwc[:, kh:kh + stride * (OH - 1) + 1:stride,
                                 kw:kw + stride * (OW - 1) + 1:stride, :])
    patches = jnp.concatenate(parts, axis=-1).reshape(B * OH * OW, KH * KW * C)
    wmat = jnp.transpose(w, (2, 3, 1, 0)).reshape(KH * KW * C, OC)

    bn_scale = gamma / jnp.sqrt(var + eps)          # eval-mode BN affine
    eff_bias = (b - mean) * bn_scale + beta

    y = fused_matmul(patches, wmat, bn_scale, eff_bias, relu=True,
                     out_dtype=jnp.bfloat16)
    return y.reshape(B, OH, OW, OC)                 # stays channels-last


# --------------------------------------------------------------------------
# Full forward pass (eval mode: Dropout is identity)
# --------------------------------------------------------------------------
@jax.jit
def forward(params, observation):
    # observation: NCHW (B, 3, H, W) -- the layout nn.Conv2d consumes.
    x = jnp.transpose(observation, (0, 2, 3, 1))    # one-time NCHW -> NHWC
    x = conv_bn_relu(x, params["c1_w"], params["c1_b"], params["bn1"], stride=2)
    x = conv_bn_relu(x, params["c2_w"], params["c2_b"], params["bn2"], stride=1)
    x = conv_bn_relu(x, params["c3_w"], params["c3_b"], params["bn3"], stride=1)

    B = x.shape[0]
    # Channels-last flatten; fc1_w rows are stored in the same order (a fixed
    # permutation of the PyTorch NCHW-flatten in-feature order).
    xf = x.reshape(B, -1)

    ones = jnp.ones((params["fc1_w"].shape[1],), jnp.float32)
    h = fused_matmul(xf, params["fc1_w"], ones, params["fc1_b"], relu=True,
                     out_dtype=jnp.bfloat16)
    # Dropout(0.5) is identity in eval mode.
    return head_softmax(h, params["fc2_w"], params["fc2_b"], NUM_CLASSES)


# --------------------------------------------------------------------------
# Pure-JAX reference (f32 convs) for a loose numerical sanity check
# --------------------------------------------------------------------------
def reference_forward(params, observation, eps=1e-5):
    x = observation.astype(jnp.float32)

    def cbr(x, w, b, bn, stride):
        gamma, beta, mean, var = bn
        y = jax.lax.conv_general_dilated(
            x, w, window_strides=(stride, stride), padding="VALID",
            dimension_numbers=("NCHW", "OIHW", "NCHW"))
        scale = gamma / jnp.sqrt(var + eps)
        y = y * scale.reshape(1, -1, 1, 1) + \
            ((b - mean) * scale + beta).reshape(1, -1, 1, 1)
        return jnp.maximum(y, 0.0)

    x = cbr(x, params["c1_w"], params["c1_b"], params["bn1"], 2)
    x = cbr(x, params["c2_w"], params["c2_b"], params["bn2"], 1)
    x = cbr(x, params["c3_w"], params["c3_b"], params["bn3"], 1)
    xf = jnp.transpose(x, (0, 2, 3, 1)).reshape(x.shape[0], -1)
    h = jnp.maximum(xf @ params["fc1_w"].astype(jnp.float32) + params["fc1_b"], 0.0)
    logits = h @ params["fc2_w"].astype(jnp.float32)[:, :NUM_CLASSES] + \
        params["fc2_b"][:NUM_CLASSES]
    return jax.nn.softmax(logits, axis=1)


# --------------------------------------------------------------------------
# Parameter init (same architecture; fc1 in-features derived from input size)
# --------------------------------------------------------------------------
def init_params(key, *, input_hw=(32, 32), num_filters=32, hidden=2048):
    H, W = input_hw
    oh = ((H - 5) // 2 + 1) - 2 - 2
    ow = ((W - 5) // 2 + 1) - 2 - 2
    flat = oh * ow * num_filters * 4

    ks = jax.random.split(key, 10)

    def conv_w(k, oc, ic, kh, kw):
        fan = ic * kh * kw
        return jax.random.normal(k, (oc, ic, kh, kw), jnp.float32) / jnp.sqrt(fan)

    def bn(c):
        # (gamma, beta, running_mean, running_var) — non-trivial values so the
        # eval-mode BN fold is actually exercised.
        return (jnp.full((c,), 0.9, jnp.float32), jnp.full((c,), 0.05, jnp.float32),
                jnp.full((c,), 0.02, jnp.float32), jnp.full((c,), 1.1, jnp.float32))

    fc2_w = jax.random.normal(ks[8], (hidden, NUM_CLASSES), jnp.float32) / jnp.sqrt(hidden)
    fc2_b = 0.01 * jax.random.normal(ks[9], (NUM_CLASSES,), jnp.float32)
    ncp = _round_up(NUM_CLASSES, 128)

    params = {
        "c1_w": conv_w(ks[0], num_filters, 3, 5, 5),
        "c1_b": 0.01 * jax.random.normal(ks[1], (num_filters,), jnp.float32),
        "bn1": bn(num_filters),
        "c2_w": conv_w(ks[2], num_filters * 2, num_filters, 3, 3),
        "c2_b": 0.01 * jax.random.normal(ks[3], (num_filters * 2,), jnp.float32),
        "bn2": bn(num_filters * 2),
        "c3_w": conv_w(ks[4], num_filters * 4, num_filters * 2, 3, 3),
        "c3_b": 0.01 * jax.random.normal(ks[5], (num_filters * 4,), jnp.float32),
        "bn3": bn(num_filters * 4),
        # fc1 weight stored pre-transposed (in, out) AND in bf16: halves HBM
        # bytes on the layer that dominates the forward pass.
        "fc1_w": (jax.random.normal(ks[6], (flat, hidden), jnp.float32)
                  / jnp.sqrt(flat)).astype(jnp.bfloat16),
        "fc1_b": 0.01 * jax.random.normal(ks[7], (hidden,), jnp.float32),
        # fc2 padded to 128 lanes; padded classes get a -1e30 bias (prob ~ 0).
        "fc2_w": jnp.zeros((hidden, ncp), jnp.float32)
                    .at[:, :NUM_CLASSES].set(fc2_w).astype(jnp.bfloat16),
        "fc2_b": jnp.full((ncp,), -1e30, jnp.float32).at[:NUM_CLASSES].set(fc2_b),
    }
    return params


if __name__ == "__main__":
    key = jax.random.PRNGKey(0)
    pkey, xkey = jax.random.split(key)

    # SMALL shapes consistent with the module: NCHW (batch=2, channels=3, 32, 32).
    # (The module's hard-coded Linear(225792, 2048) corresponds to 96x96 input;
    #  fc1 in-features here follow from the small input instead.)
    H = W = 32
    params = init_params(pkey, input_hw=(H, W))
    x = jax.random.normal(xkey, (2, 3, H, W), jnp.float32)

    probs = jax.block_until_ready(forward(params, x))

    assert probs.shape == (2, NUM_CLASSES), probs.shape
    assert bool(jnp.all(jnp.isfinite(probs)))
    row_sums = jnp.sum(probs, axis=1)
    assert bool(jnp.all(jnp.abs(row_sums - 1.0) < 1e-3)), row_sums

    # Loose check vs. f32 reference (bf16 MXU inputs -> small expected drift).
    ref = jax.block_until_ready(reference_forward(params, x))
    assert bool(jnp.max(jnp.abs(probs - ref)) < 5e-2), (probs, ref)

    print("KERNEL_OK")
</pallas_src>

<mosaic_0001>
module attributes {stable_mosaic.version = 11 : i64} {
  func.func @_matmul_single_k_kernel(%arg0: i32, %arg1: i32, %arg2: memref<392x128xbf16, #tpu.memory_space<vmem>>, %arg3: memref<128x128xbf16, #tpu.memory_space<vmem>>, %arg4: memref<1x128xf32, #tpu.memory_space<vmem>>, %arg5: memref<1x128xf32, #tpu.memory_space<vmem>>, %arg6: memref<392x128xbf16, #tpu.memory_space<vmem>>) attributes {dimension_semantics = [#tpu.dimension_semantics<parallel>, #tpu.dimension_semantics<parallel>], iteration_bounds = array<i64: 1, 1>, scalar_prefetch = 0 : i64, scratch_operands = 0 : i64, tpu.core_type = #tpu.core_type<tc>, window_params = [{transform_indices = @transform_0, window_bounds = array<i64: 392, 128>}, {transform_indices = @transform_1, window_bounds = array<i64: 128, 128>}, {transform_indices = @transform_2, window_bounds = array<i64: 1, 128>}, {transform_indices = @transform_3, window_bounds = array<i64: 1, 128>}, {transform_indices = @transform_4, window_bounds = array<i64: 392, 128>}]} {
    %c0 = arith.constant 0 : index
    %c0_0 = arith.constant 0 : index
    %0 = vector.load %arg2[%c0, %c0_0] : memref<392x128xbf16, #tpu.memory_space<vmem>>, vector<392x128xbf16>
    %c0_1 = arith.constant 0 : index
    %c0_2 = arith.constant 0 : index
    %1 = vector.load %arg3[%c0_1, %c0_2] : memref<128x128xbf16, #tpu.memory_space<vmem>>, vector<128x128xbf16>
    %cst = arith.constant dense<0.000000e+00> : vector<392x128xf32>
    %2 = tpu.matmul %0, %1, %cst {dimension_numbers = #tpu.dot_dimension_numbers<[1], [0], [0], [1], [0, 0, 1, 1], [], []>} : vector<392x128xbf16>, vector<128x128xbf16>, vector<392x128xf32> -> vector<392x128xf32>
    %c0_3 = arith.constant 0 : index
    %c0_4 = arith.constant 0 : index
    %3 = vector.load %arg4[%c0_3, %c0_4] : memref<1x128xf32, #tpu.memory_space<vmem>>, vector<1x128xf32>
    %4 = vector.broadcast %3 : vector<1x128xf32> to vector<392x128xf32>
    %5 = arith.mulf %2, %4 : vector<392x128xf32>
    %c0_5 = arith.constant 0 : index
    %c0_6 = arith.constant 0 : index
    %6 = vector.load %arg5[%c0_5, %c0_6] : memref<1x128xf32, #tpu.memory_space<vmem>>, vector<1x128xf32>
    %7 = vector.broadcast %6 : vector<1x128xf32> to vector<392x128xf32>
    %8 = arith.addf %5, %7 : vector<392x128xf32>
    %cst_7 = arith.constant 0.000000e+00 : f32
    %9 = vector.broadcast %cst_7 : f32 to vector<392x128xf32>
    %10 = arith.maximumf %8, %9 : vector<392x128xf32>
    %11 = arith.truncf %10 : vector<392x128xf32> to vector<392x128xbf16>
    %c0_8 = arith.constant 0 : index
    %c0_9 = arith.constant 0 : index
    %12 = vector.load %arg6[%c0_8, %c0_9] : memref<392x128xbf16, #tpu.memory_space<vmem>>, vector<392x128xbf16>
    tpu.vector_store %arg6[%c0_8, %c0_9], %11 {strides = array<i32>} : memref<392x128xbf16, #tpu.memory_space<vmem>>, vector<392x128xbf16>,
    return
  }
  func.func @transform_0(%arg0: i32, %arg1: i32) -> (i32, i32) {
    %c0_i32 = arith.constant 0 : i32
    %c0_i32_0 = arith.constant 0 : i32
    return %arg0, %c0_i32 : i32, i32
  }
  func.func @transform_1(%arg0: i32, %arg1: i32) -> (i32, i32) {
    %c0_i32 = arith.constant 0 : i32
    %c0_i32_0 = arith.constant 0 : i32
    return %c0_i32, %arg1 : i32, i32
  }
  func.func @transform_2(%arg0: i32, %arg1: i32) -> (i32, i32) {
    %c0_i32 = arith.constant 0 : i32
    %c0_i32_0 = arith.constant 0 : i32
    return %c0_i32, %arg1 : i32, i32
  }
  func.func @transform_3(%arg0: i32, %arg1: i32) -> (i32, i32) {
    %c0_i32 = arith.constant 0 : i32
    %c0_i32_0 = arith.constant 0 : i32
    return %c0_i32, %arg1 : i32, i32
  }
  func.func @transform_4(%arg0: i32, %arg1: i32) -> (i32, i32) {
    %c0_i32 = arith.constant 0 : i32
    return %arg0, %arg1 : i32, i32
  }
}

module attributes {stable_mosaic.version = 11 : i64} {
  func.func @_matmul_single_k_kernel(%arg0: i32, %arg1: i32, %arg2: memref<288x384xbf16, #tpu.memory_space<vmem>>, %arg3: memref<384x128xbf16, #tpu.memory_space<vmem>>, %arg4: memref<1x128xf32, #tpu.memory_space<vmem>>, %arg5: memref<1x128xf32, #tpu.memory_space<vmem>>, %arg6: memref<288x128xbf16, #tpu.memory_space<vmem>>) attributes {dimension_semantics = [#tpu.dimension_semantics<parallel>, #tpu.dimension_semantics<parallel>], iteration_bounds = array<i64: 1, 1>, scalar_prefetch = 0 : i64, scratch_operands = 0 : i64, tpu.core_type = #tpu.core_type<tc>, window_params = [{transform_indices = @transform_0, window_bounds = array<i64: 288, 384>}, {transform_indices = @transform_1, window_bounds = array<i64: 384, 128>}, {transform_indices = @transform_2, window_bounds = array<i64: 1, 128>}, {transform_indices = @transform_3, window_bounds = array<i64: 1, 128>}, {transform_indices = @transform_4, window_bounds = array<i64: 288, 128>}]} {
    %c0 = arith.constant 0 : index
    %c0_0 = arith.constant 0 : index
    %0 = vector.load %arg2[%c0, %c0_0] : memref<288x384xbf16, #tpu.memory_space<vmem>>, vector<288x384xbf16>
    %c0_1 = arith.constant 0 : index
    %c0_2 = arith.constant 0 : index
    %1 = vector.load %arg3[%c0_1, %c0_2] : memref<384x128xbf16, #tpu.memory_space<vmem>>, vector<384x128xbf16>
    %cst = arith.constant dense<0.000000e+00> : vector<288x128xf32>
    %2 = tpu.matmul %0, %1, %cst {dimension_numbers = #tpu.dot_dimension_numbers<[1], [0], [0], [1], [0, 0, 1, 1], [], []>} : vector<288x384xbf16>, vector<384x128xbf16>, vector<288x128xf32> -> vector<288x128xf32>
    %c0_3 = arith.constant 0 : index
    %c0_4 = arith.constant 0 : index
    %3 = vector.load %arg4[%c0_3, %c0_4] : memref<1x128xf32, #tpu.memory_space<vmem>>, vector<1x128xf32>
    %4 = vector.broadcast %3 : vector<1x128xf32> to vector<288x128xf32>
    %5 = arith.mulf %2, %4 : vector<288x128xf32>
    %c0_5 = arith.constant 0 : index
    %c0_6 = arith.constant 0 : index
    %6 = vector.load %arg5[%c0_5, %c0_6] : memref<1x128xf32, #tpu.memory_space<vmem>>, vector<1x128xf32>
    %7 = vector.broadcast %6 : vector<1x128xf32> to vector<288x128xf32>
    %8 = arith.addf %5, %7 : vector<288x128xf32>
    %cst_7 = arith.constant 0.000000e+00 : f32
    %9 = vector.broadcast %cst_7 : f32 to vector<288x128xf32>
    %10 = arith.maximumf %8, %9 : vector<288x128xf32>
    %11 = arith.truncf %10 : vector<288x128xf32> to vector<288x128xbf16>
    %c0_8 = arith.constant 0 : index
    %c0_9 = arith.constant 0 : index
    %12 = vector.load %arg6[%c0_8, %c0_9] : memref<288x128xbf16, #tpu.memory_space<vmem>>, vector<288x128xbf16>
    tpu.vector_store %arg6[%c0_8, %c0_9], %11 {strides = array<i32>} : memref<288x128xbf16, #tpu.memory_space<vmem>>, vector<288x128xbf16>,
    return
  }
  func.func @transform_0(%arg0: i32, %arg1: i32) -> (i32, i32) {
    %c0_i32 = arith.constant 0 : i32
    %c0_i32_0 = arith.constant 0 : i32
    return %arg0, %c0_i32 : i32, i32
  }
  func.func @transform_1(%arg0: i32, %arg1: i32) -> (i32, i32) {
    %c0_i32 = arith.constant 0 : i32
    %c0_i32_0 = arith.constant 0 : i32
    return %c0_i32, %arg1 : i32, i32
  }
  func.func @transform_2(%arg0: i32, %arg1: i32) -> (i32, i32) {
    %c0_i32 = arith.constant 0 : i32
    %c0_i32_0 = arith.constant 0 : i32
    return %c0_i32, %arg1 : i32, i32
  }
  func.func @transform_3(%arg0: i32, %arg1: i32) -> (i32, i32) {
    %c0_i32 = arith.constant 0 : i32
    %c0_i32_0 = arith.constant 0 : i32
    return %c0_i32, %arg1 : i32, i32
  }
  func.func @transform_4(%arg0: i32, %arg1: i32) -> (i32, i32) {
    %c0_i32 = arith.constant 0 : i32
    return %arg0, %arg1 : i32, i32
  }
}

module attributes {stable_mosaic.version = 11 : i64} {
  func.func @_matmul_single_k_kernel(%arg0: i32, %arg1: i32, %arg2: memref<200x640xbf16, #tpu.memory_space<vmem>>, %arg3: memref<640x128xbf16, #tpu.memory_space<vmem>>, %arg4: memref<1x128xf32, #tpu.memory_space<vmem>>, %arg5: memref<1x128xf32, #tpu.memory_space<vmem>>, %arg6: memref<200x128xbf16, #tpu.memory_space<vmem>>) attributes {dimension_semantics = [#tpu.dimension_semantics<parallel>, #tpu.dimension_semantics<parallel>], iteration_bounds = array<i64: 1, 1>, scalar_prefetch = 0 : i64, scratch_operands = 0 : i64, tpu.core_type = #tpu.core_type<tc>, window_params = [{transform_indices = @transform_0, window_bounds = array<i64: 200, 640>}, {transform_indices = @transform_1, window_bounds = array<i64: 640, 128>}, {transform_indices = @transform_2, window_bounds = array<i64: 1, 128>}, {transform_indices = @transform_3, window_bounds = array<i64: 1, 128>}, {transform_indices = @transform_4, window_bounds = array<i64: 200, 128>}]} {
    %c0 = arith.constant 0 : index
    %c0_0 = arith.constant 0 : index
    %0 = vector.load %arg2[%c0, %c0_0] : memref<200x640xbf16, #tpu.memory_space<vmem>>, vector<200x640xbf16>
    %c0_1 = arith.constant 0 : index
    %c0_2 = arith.constant 0 : index
    %1 = vector.load %arg3[%c0_1, %c0_2] : memref<640x128xbf16, #tpu.memory_space<vmem>>, vector<640x128xbf16>
    %cst = arith.constant dense<0.000000e+00> : vector<200x128xf32>
    %2 = tpu.matmul %0, %1, %cst {dimension_numbers = #tpu.dot_dimension_numbers<[1], [0], [0], [1], [0, 0, 1, 1], [], []>} : vector<200x640xbf16>, vector<640x128xbf16>, vector<200x128xf32> -> vector<200x128xf32>
    %c0_3 = arith.constant 0 : index
    %c0_4 = arith.constant 0 : index
    %3 = vector.load %arg4[%c0_3, %c0_4] : memref<1x128xf32, #tpu.memory_space<vmem>>, vector<1x128xf32>
    %4 = vector.broadcast %3 : vector<1x128xf32> to vector<200x128xf32>
    %5 = arith.mulf %2, %4 : vector<200x128xf32>
    %c0_5 = arith.constant 0 : index
    %c0_6 = arith.constant 0 : index
    %6 = vector.load %arg5[%c0_5, %c0_6] : memref<1x128xf32, #tpu.memory_space<vmem>>, vector<1x128xf32>
    %7 = vector.broadcast %6 : vector<1x128xf32> to vector<200x128xf32>
    %8 = arith.addf %5, %7 : vector<200x128xf32>
    %cst_7 = arith.constant 0.000000e+00 : f32
    %9 = vector.broadcast %cst_7 : f32 to vector<200x128xf32>
    %10 = arith.maximumf %8, %9 : vector<200x128xf32>
    %11 = arith.truncf %10 : vector<200x128xf32> to vector<200x128xbf16>
    %c0_8 = arith.constant 0 : index
    %c0_9 = arith.constant 0 : index
    %12 = vector.load %arg6[%c0_8, %c0_9] : memref<200x128xbf16, #tpu.memory_space<vmem>>, vector<200x128xbf16>
    tpu.vector_store %arg6[%c0_8, %c0_9], %11 {strides = array<i32>} : memref<200x128xbf16, #tpu.memory_space<vmem>>, vector<200x128xbf16>,
    return
  }
  func.func @transform_0(%arg0: i32, %arg1: i32) -> (i32, i32) {
    %c0_i32 = arith.constant 0 : i32
    %c0_i32_0 = arith.constant 0 : i32
    return %arg0, %c0_i32 : i32, i32
  }
  func.func @transform_1(%arg0: i32, %arg1: i32) -> (i32, i32) {
    %c0_i32 = arith.constant 0 : i32
    %c0_i32_0 = arith.constant 0 : i32
    return %c0_i32, %arg1 : i32, i32
  }
  func.func @transform_2(%arg0: i32, %arg1: i32) -> (i32, i32) {
    %c0_i32 = arith.constant 0 : i32
    %c0_i32_0 = arith.constant 0 : i32
    return %c0_i32, %arg1 : i32, i32
  }
  func.func @transform_3(%arg0: i32, %arg1: i32) -> (i32, i32) {
    %c0_i32 = arith.constant 0 : i32
    %c0_i32_0 = arith.constant 0 : i32
    return %c0_i32, %arg1 : i32, i32
  }
  func.func @transform_4(%arg0: i32, %arg1: i32) -> (i32, i32) {
    %c0_i32 = arith.constant 0 : i32
    return %arg0, %arg1 : i32, i32
  }
}

module attributes {stable_mosaic.version = 11 : i64} {
  func.func @_matmul_multi_k_kernel(%arg0: i32, %arg1: i32, %arg2: i32, %arg3: memref<8x1280xbf16, #tpu.memory_space<vmem>>, %arg4: memref<1280x1024xbf16, #tpu.memory_space<vmem>>, %arg5: memref<1x1024xf32, #tpu.memory_space<vmem>>, %arg6: memref<1x1024xf32, #tpu.memory_space<vmem>>, %arg7: memref<8x1024xbf16, #tpu.memory_space<vmem>>, %arg8: memref<8x1024xf32, #tpu.memory_space<vmem>>) attributes {dimension_semantics = [#tpu.dimension_semantics<parallel>, #tpu.dimension_semantics<parallel>, #tpu.dimension_semantics<arbitrary>], iteration_bounds = array<i64: 1, 2, 10>, scalar_prefetch = 0 : i64, scratch_operands = 1 : i64, tpu.core_type = #tpu.core_type<tc>, window_params = [{transform_indices = @transform_0, window_bounds = array<i64: 8, 1280>}, {transform_indices = @transform_1, window_bounds = array<i64: 1280, 1024>}, {transform_indices = @transform_2, window_bounds = array<i64: 1, 1024>}, {transform_indices = @transform_3, window_bounds = array<i64: 1, 1024>}, {transform_indices = @transform_4, window_bounds = array<i64: 8, 1024>}]} {
    %c0_i32 = arith.constant 0 : i32
    %0 = arith.cmpi eq, %arg2, %c0_i32 : i32
    %1 = arith.extui %0 : i1 to i32
    %c0_i32_0 = arith.constant 0 : i32
    %2 = arith.cmpi ne, %1, %c0_i32_0 : i32
    scf.if %2 {
      %cst_9 = arith.constant 0.000000e+00 : f32
      %12 = vector.broadcast %cst_9 : f32 to vector<8x1024xf32>
      %c0_10 = arith.constant 0 : index
      %c0_11 = arith.constant 0 : index
      %13 = vector.load %arg8[%c0_10, %c0_11] : memref<8x1024xf32, #tpu.memory_space<vmem>>, vector<8x1024xf32>
      tpu.vector_store %arg8[%c0_10, %c0_11], %12 {strides = array<i32>} : memref<8x1024xf32, #tpu.memory_space<vmem>>, vector<8x1024xf32>,
    } else {
    }
    %c0 = arith.constant 0 : index
    %c0_1 = arith.constant 0 : index
    %3 = vector.load %arg8[%c0, %c0_1] : memref<8x1024xf32, #tpu.memory_space<vmem>>, vector<8x1024xf32>
    %c0_2 = arith.constant 0 : index
    %c0_3 = arith.constant 0 : index
    %4 = vector.load %arg3[%c0_2, %c0_3] : memref<8x1280xbf16, #tpu.memory_space<vmem>>, vector<8x1280xbf16>
    %c0_4 = arith.constant 0 : index
    %c0_5 = arith.constant 0 : index
    %5 = vector.load %arg4[%c0_4, %c0_5] : memref<1280x1024xbf16, #tpu.memory_space<vmem>>, vector<1280x1024xbf16>
    %cst = arith.constant dense<0.000000e+00> : vector<8x1024xf32>
    %6 = tpu.matmul %4, %5, %cst {dimension_numbers = #tpu.dot_dimension_numbers<[1], [0], [0], [1], [0, 0, 1, 1], [], []>} : vector<8x1280xbf16>, vector<1280x1024xbf16>, vector<8x1024xf32> -> vector<8x1024xf32>
    %7 = arith.addf %3, %6 : vector<8x1024xf32>
    %c0_6 = arith.constant 0 : index
    %c0_7 = arith.constant 0 : index
    %8 = vector.load %arg8[%c0_6, %c0_7] : memref<8x1024xf32, #tpu.memory_space<vmem>>, vector<8x1024xf32>
    tpu.vector_store %arg8[%c0_6, %c0_7], %7 {strides = array<i32>} : memref<8x1024xf32, #tpu.memory_space<vmem>>, vector<8x1024xf32>,
    %c9_i32 = arith.constant 9 : i32
    %9 = arith.cmpi eq, %arg2, %c9_i32 : i32
    %10 = arith.extui %9 : i1 to i32
    %c0_i32_8 = arith.constant 0 : i32
    %11 = arith.cmpi ne, %10, %c0_i32_8 : i32
    scf.if %11 {
      %c0_9 = arith.constant 0 : index
      %c0_10 = arith.constant 0 : index
      %12 = vector.load %arg8[%c0_9, %c0_10] : memref<8x1024xf32, #tpu.memory_space<vmem>>, vector<8x1024xf32>
      %c0_11 = arith.constant 0 : index
      %c0_12 = arith.constant 0 : index
      %13 = vector.load %arg5[%c0_11, %c0_12] : memref<1x1024xf32, #tpu.memory_space<vmem>>, vector<1x1024xf32>
      %14 = vector.broadcast %13 : vector<1x1024xf32> to vector<8x1024xf32>
      %15 = arith.mulf %12, %14 : vector<8x1024xf32>
      %c0_13 = arith.constant 0 : index
      %c0_14 = arith.constant 0 : index
      %16 = vector.load %arg6[%c0_13, %c0_14] : memref<1x1024xf32, #tpu.memory_space<vmem>>, vector<1x1024xf32>
      %17 = vector.broadcast %16 : vector<1x1024xf32> to vector<8x1024xf32>
      %18 = arith.addf %15, %17 : vector<8x1024xf32>
      %cst_15 = arith.constant 0.000000e+00 : f32
      %19 = vector.broadcast %cst_15 : f32 to vector<8x1024xf32>
      %20 = arith.maximumf %18, %19 : vector<8x1024xf32>
      %21 = arith.truncf %20 : vector<8x1024xf32> to vector<8x1024xbf16>
      %c0_16 = arith.constant 0 : index
      %c0_17 = arith.constant 0 : index
      %22 = vector.load %arg7[%c0_16, %c0_17] : memref<8x1024xbf16, #tpu.memory_space<vmem>>, vector<8x1024xbf16>
      tpu.vector_store %arg7[%c0_16, %c0_17], %21 {strides = array<i32>} : memref<8x1024xbf16, #tpu.memory_space<vmem>>, vector<8x1024xbf16>,
    } else {
    }
    return
  }
  func.func @transform_0(%arg0: i32, %arg1: i32, %arg2: i32) -> (i32, i32) {
    %c0_i32 = arith.constant 0 : i32
    return %arg0, %arg2 : i32, i32
  }
  func.func @transform_1(%arg0: i32, %arg1: i32, %arg2: i32) -> (i32, i32) {
    %c0_i32 = arith.constant 0 : i32
    return %arg2, %arg1 : i32, i32
  }
  func.func @transform_2(%arg0: i32, %arg1: i32, %arg2: i32) -> (i32, i32) {
    %c0_i32 = arith.constant 0 : i32
    %c0_i32_0 = arith.constant 0 : i32
    return %c0_i32, %arg1 : i32, i32
  }
  func.func @transform_3(%arg0: i32, %arg1: i32, %arg2: i32) -> (i32, i32) {
    %c0_i32 = arith.constant 0 : i32
    %c0_i32_0 = arith.constant 0 : i32
    return %c0_i32, %arg1 : i32, i32
  }
  func.func @transform_4(%arg0: i32, %arg1: i32, %arg2: i32) -> (i32, i32) {
    %c0_i32 = arith.constant 0 : i32
    return %arg0, %arg1 : i32, i32
  }
}

module attributes {stable_mosaic.version = 11 : i64} {
  func.func @_head_softmax_kernel(%arg0: i32, %arg1: memref<8x2048xbf16, #tpu.memory_space<vmem>>, %arg2: memref<2048x128xbf16, #tpu.memory_space<vmem>>, %arg3: memref<1x128xf32, #tpu.memory_space<vmem>>, %arg4: memref<8x128xf32, #tpu.memory_space<vmem>>) attributes {dimension_semantics = [#tpu.dimension_semantics<arbitrary>], iteration_bounds = array<i64: 1>, scalar_prefetch = 0 : i64, scratch_operands = 0 : i64, tpu.core_type = #tpu.core_type<tc>, window_params = [{pipeline_mode = #tpu.pipeline_mode<synchronous>, transform_indices = @transform_0, window_bounds = array<i64: 8, 2048>}, {pipeline_mode = #tpu.pipeline_mode<synchronous>, transform_indices = @transform_1, window_bounds = array<i64: 2048, 128>}, {pipeline_mode = #tpu.pipeline_mode<synchronous>, transform_indices = @transform_2, window_bounds = array<i64: 1, 128>}, {pipeline_mode = #tpu.pipeline_mode<synchronous>, transform_indices = @transform_3, window_bounds = array<i64: 8, 128>}]} {
    %c0 = arith.constant 0 : index
    %c0_0 = arith.constant 0 : index
    %0 = vector.load %arg1[%c0, %c0_0] : memref<8x2048xbf16, #tpu.memory_space<vmem>>, vector<8x2048xbf16>
    %c0_1 = arith.constant 0 : index
    %c0_2 = arith.constant 0 : index
    %1 = vector.load %arg2[%c0_1, %c0_2] : memref<2048x128xbf16, #tpu.memory_space<vmem>>, vector<2048x128xbf16>
    %cst = arith.constant dense<0.000000e+00> : vector<8x128xf32>
    %2 = tpu.matmul %0, %1, %cst {dimension_numbers = #tpu.dot_dimension_numbers<[1], [0], [0], [1], [0, 0, 1, 1], [], []>} : vector<8x2048xbf16>, vector<2048x128xbf16>, vector<8x128xf32> -> vector<8x128xf32>
    %c0_3 = arith.constant 0 : index
    %c0_4 = arith.constant 0 : index
    %3 = vector.load %arg3[%c0_3, %c0_4] : memref<1x128xf32, #tpu.memory_space<vmem>>, vector<1x128xf32>
    %4 = vector.broadcast %3 : vector<1x128xf32> to vector<8x128xf32>
    %5 = arith.addf %2, %4 : vector<8x128xf32>
    %cst_5 = arith.constant dense<0xFF800000> : vector<8xf32>
    %6 = vector.multi_reduction <maximumf>, %5, %cst_5 [1] : vector<8x128xf32> to vector<8xf32>
    %7 = vector.shape_cast %6 : vector<8xf32> to vector<8x1xf32>
    %8 = vector.broadcast %7 : vector<8x1xf32> to vector<8x128xf32>
    %9 = arith.subf %5, %8 : vector<8x128xf32>
    %10 = math.exp %9 : vector<8x128xf32>
    %cst_6 = arith.constant dense<0.000000e+00> : vector<8xf32>
    %11 = vector.multi_reduction <add>, %10, %cst_6 [1] : vector<8x128xf32> to vector<8xf32>
    %12 = vector.shape_cast %11 : vector<8xf32> to vector<8x1xf32>
    %13 = vector.broadcast %12 : vector<8x1xf32> to vector<8x128xf32>
    %14 = arith.divf %10, %13 : vector<8x128xf32>
    %c0_7 = arith.constant 0 : index
    %c0_8 = arith.constant 0 : index
    %15 = vector.load %arg4[%c0_7, %c0_8] : memref<8x128xf32, #tpu.memory_space<vmem>>, vector<8x128xf32>
    tpu.vector_store %arg4[%c0_7, %c0_8], %14 {strides = array<i32>} : memref<8x128xf32, #tpu.memory_space<vmem>>, vector<8x128xf32>,
    return
  }
  func.func @transform_0(%arg0: i32) -> (i32, i32) {
    %c0_i32 = arith.constant 0 : i32
    %c0_i32_0 = arith.constant 0 : i32
    %c0_i32_1 = arith.constant 0 : i32
    return %c0_i32, %c0_i32_0 : i32, i32
  }
  func.func @transform_1(%arg0: i32) -> (i32, i32) {
    %c0_i32 = arith.constant 0 : i32
    %c0_i32_0 = arith.constant 0 : i32
    %c0_i32_1 = arith.constant 0 : i32
    return %c0_i32, %c0_i32_0 : i32, i32
  }
  func.func @transform_2(%arg0: i32) -> (i32, i32) {
    %c0_i32 = arith.constant 0 : i32
    %c0_i32_0 = arith.constant 0 : i32
    %c0_i32_1 = arith.constant 0 : i32
    return %c0_i32, %c0_i32_0 : i32, i32
  }
  func.func @transform_3(%arg0: i32) -> (i32, i32) {
    %c0_i32 = arith.constant 0 : i32
    %c0_i32_0 = arith.constant 0 : i32
    %c0_i32_1 = arith.constant 0 : i32
    return %c0_i32, %c0_i32_0 : i32, i32
  }
}

</mosaic_0001>

<bundles_post_ra>
// kernel: forward.5
= control target key start
LH: loop header
LB: loop body
LE: loop exit
PB: predicated region body
PF: predicated region fallthrough
CT: control target
= control target key end

     0   :  { %v1398_v0 = vmov 0.0   ;;  %vm1399_vm0 = vmmov 0   ;;  %s1773_s1 = inlined_call_operand.vmem [shape: bf16[128,128], index: 1, kind: input, shape index: {}]   ;;  %s1774_s0 = inlined_call_operand.vmem [shape: bf16[392,128], index: 0, kind: input, shape index: {}]   ;;  %s1775_s2 = inlined_call_operand.vmem [shape: f32[1,128], index: 2, kind: input, shape index: {}]   ;;  %s1776_s3 = inlined_call_operand.vmem [shape: f32[1,128], index: 3, kind: input, shape index: {}]   ;;  %s1777_s4 = inlined_call_operand.vmem [shape: bf16[392,128], index: 4, kind: output, shape index: {}]  }
   0x1   :  { %1231 = vmatprep.subr.bf16.mxu0 %v1398_v0  ;;  %v1365_v1 = vld [vmem:[%s1773_s1] sm:$0xff]   ;;  %1347 = vmatprep.subr.bf16.mxu1 %v1398_v0  ;;  %v1366_v2 = vld [vmem:[%s1773_s1 + $0x8] sm:$0xff]   ;;  %v1367_v3 = vld [vmem:[%s1773_s1 + $0x10] sm:$0xff]  }
   0x2   :  { %1247 = vmatprep.mubr.msk.bf16.mxu0 %vm1399_vm0, %v1398_v0  ;;  %1299 = vmatprep.mubr.msk.bf16.mxu1 %vm1399_vm0, %v1398_v0  ;;  %v1368_v4 = vld [vmem:[%s1773_s1 + $0x18] sm:$0xff]   ;;  %v1369_v5 = vld [vmem:[%s1773_s1 + $0x20] sm:$0xff]   ;;  %v1370_v6 = vld [vmem:[%s1773_s1 + $0x28] sm:$0xff]  }
   0x3   :  { %1232 = vmatpush3.bf16.msra.mxu0 %v1365_v1  ;;  %1355 = vmatpush3.bf16.msra.mxu1 %v1365_v1  ;;  %v1371_v7 = vld [vmem:[%s1773_s1 + $0x30] sm:$0xff]   ;;  %v1372_v8 = vld [vmem:[%s1773_s1 + $0x38] sm:$0xff]   ;;  %v1373_v9 = vld [vmem:[%s1774_s0] sm:$0xff]  }
   0x4   :  { %1233 = vmatprep.subr.bf16.mxu0 %v1398_v0  ;;  %1348 = vmatprep.subr.bf16.mxu1 %v1398_v0  ;;  %v1374_v10 = vld [vmem:[%s1774_s0 + $0x68] sm:$0xff]   ;;  %v1376_v12 = vld [vmem:[%s1774_s0 + $0x70] sm:$0xff]   ;;  %v1378_v14 = vld [vmem:[%s1774_s0 + $0x78] sm:$0xff]  }
   0x5   :  { %v1375_v11 = vld [vmem:[%s1774_s0 + $0x8] sm:$0xff]   ;;  %v1377_v13 = vld [vmem:[%s1774_s0 + $0x10] sm:$0xff]   ;;  %v1379_v15 = vld [vmem:[%s1774_s0 + $0x18] sm:$0xff]  }
   0x6   :  { %v1380_v16 = vld [vmem:[%s1774_s0 + $0x80] sm:$0xff]   ;;  %v1382_v18 = vld [vmem:[%s1774_s0 + $0x88] sm:$0xff]   ;;  %v1384_v20 = vld [vmem:[%s1774_s0 + $0x90] sm:$0xff]  }
   0x7   :  { %1234 = vmatpush3.bf16.msra.mxu0 %v1366_v2  ;;  %1356 = vmatpush3.bf16.msra.mxu1 %v1366_v2  ;;  %v1381_v17 = vld [vmem:[%s1774_s0 + $0x20] sm:$0xff]   ;;  %v1383_v19 = vld [vmem:[%s1774_s0 + $0x28] sm:$0xff]   ;;  %v1385_v21 = vld [vmem:[%s1774_s0 + $0x30] sm:$0xff]  }
   0x8   :  { %1235 = vmatprep.subr.bf16.mxu0 %v1398_v0  ;;  %1349 = vmatprep.subr.bf16.mxu1 %v1398_v0  ;;  %v1386_v22 = vld [vmem:[%s1774_s0 + $0x98] sm:$0xff]   ;;  %v1388_v24 = vld [vmem:[%s1774_s0 + $0xa0] sm:$0xff]   ;;  %v1390_v26 = vld [vmem:[%s1774_s0 + $0xa8] sm:$0xff]  }
   0x9   :  { %v1387_v23 = vld [vmem:[%s1774_s0 + $0x38] sm:$0xff]   ;;  %v1389_v25 = vld [vmem:[%s1774_s0 + $0x40] sm:$0xff]   ;;  %v1391_v27 = vld [vmem:[%s1774_s0 + $0x48] sm:$0xff]  }
   0xa   :  { %v1392_v28 = vld [vmem:[%s1774_s0 + $0xb0] sm:$0xff]   ;;  %v1394_v30 = vld [vmem:[%s1774_s0 + $0xb8] sm:$0xff]   ;;  %v1396_v32 = vld [vmem:[%s1774_s0 + $0xc0] ss:$0 sps:$4 sm:$0xff]  }
   0xb   :  { %1236 = vmatpush3.bf16.msra.mxu0 %v1367_v3  ;;  %1357 = vmatpush3.bf16.msra.mxu1 %v1367_v3  ;;  %v1393_v29 = vld [vmem:[%s1774_s0 + $0x50] sm:$0xff]   ;;  %v1395_v31 = vld [vmem:[%s1774_s0 + $0x58] sm:$0xff]   ;;  %v1397_v33 = vld [vmem:[%s1774_s0 + $0x60] sm:$0xff]  }
   0xc   :  { %1237 = vmatprep.subr.bf16.mxu0 %v1398_v0  ;;  %1350 = vmatprep.subr.bf16.mxu1 %v1398_v0  ;;  %v1593_v34 = vld [vmem:[%s1775_s2] ss:$0 sm:$0xff] }
   0xd   :  { %v1598_v36 = vld [vmem:[%s1776_s3] ss:$0 sm:$0xff] }
   0xf   :  { %1238 = vmatpush3.bf16.msra.mxu0 %v1368_v4  ;;  %1358 = vmatpush3.bf16.msra.mxu1 %v1368_v4 }
  0x10   :  { %1239 = vmatprep.subr.bf16.mxu0 %v1398_v0  ;;  %1351 = vmatprep.subr.bf16.mxu1 %v1398_v0 }
  0x13   :  { %1240 = vmatpush3.bf16.msra.mxu0 %v1369_v5  ;;  %1359 = vmatpush3.bf16.msra.mxu1 %v1369_v5 }
  0x14   :  { %1241 = vmatprep.subr.bf16.mxu0 %v1398_v0  ;;  %1352 = vmatprep.subr.bf16.mxu1 %v1398_v0 }
  0x17   :  { %1242 = vmatpush3.bf16.msra.mxu0 %v1370_v6  ;;  %1360 = vmatpush3.bf16.msra.mxu1 %v1370_v6 }
  0x18   :  { %1243 = vmatprep.subr.bf16.mxu0 %v1398_v0  ;;  %1353 = vmatprep.subr.bf16.mxu1 %v1398_v0 }
  0x1b   :  { %1244 = vmatpush3.bf16.msra.mxu0 %v1371_v7  ;;  %1361 = vmatpush3.bf16.msra.mxu1 %v1371_v7 }
  0x1c   :  { %1245 = vmatprep.subr.bf16.mxu0 %v1398_v0  ;;  %1354 = vmatprep.subr.bf16.mxu1 %v1398_v0 }
  0x1f   :  { %1246 = vmatpush3.bf16.msra.mxu0 %v1372_v8  ;;  %1362 = vmatpush3.bf16.msra.mxu1 %v1372_v8 }
  0x22   :  { %1248 = vmatmul.mubr.bf16.vlgmr.msra.gmra.mrb[0].mxu0 %v1373_v9  ;;  %1300 = vmatmul.mubr.bf16.vlgmr.msra.gmra.mrb[0].mxu1 %v1374_v10 }
  0x23   :  { %1251 = vmatprep.mubr.msk.bf16.mxu0 %vm1399_vm0, %v1398_v0  ;;  %1303 = vmatprep.mubr.msk.bf16.mxu1 %vm1399_vm0, %v1398_v0 }
  0x2a   :  { %1252 = vmatmul.mubr.bf16.gmra.mrb[4].mxu0 %v1375_v11  ;;  %1304 = vmatmul.mubr.bf16.gmra.mrb[4].mxu1 %v1376_v12 }
  0x2b   :  { %1255 = vmatprep.mubr.msk.bf16.mxu0 %vm1399_vm0, %v1398_v0  ;;  %1307 = vmatprep.mubr.msk.bf16.mxu1 %vm1399_vm0, %v1398_v0 }
  0x32   :  { %1256 = vmatmul.mubr.bf16.gmra.mrb[8].mxu0 %v1377_v13  ;;  %1308 = vmatmul.mubr.bf16.gmra.mrb[8].mxu1 %v1378_v14 }
  0x33   :  { %1259 = vmatprep.mubr.msk.bf16.mxu0 %vm1399_vm0, %v1398_v0  ;;  %1311 = vmatprep.mubr.msk.bf16.mxu1 %vm1399_vm0, %v1398_v0 }
  0x3a   :  { %1260 = vmatmul.mubr.bf16.gmra.mrb[12].mxu0 %v1379_v15  ;;  %1312 = vmatmul.mubr.bf16.gmra.mrb[12].mxu1 %v1380_v16 }
  0x3b   :  { %1263 = vmatprep.mubr.msk.bf16.mxu0 %vm1399_vm0, %v1398_v0  ;;  %1315 = vmatprep.mubr.msk.bf16.mxu1 %vm1399_vm0, %v1398_v0 }
  0x42   :  { %1264 = vmatmul.mubr.bf16.gmra.mrb[16].mxu0 %v1381_v17  ;;  %1316 = vmatmul.mubr.bf16.gmra.mrb[16].mxu1 %v1382_v18 }
  0x43   :  { %1267 = vmatprep.mubr.msk.bf16.mxu0 %vm1399_vm0, %v1398_v0  ;;  %1319 = vmatprep.mubr.msk.bf16.mxu1 %vm1399_vm0, %v1398_v0 }
  0x4a   :  { %1268 = vmatmul.mubr.bf16.gmra.mrb[20].mxu0 %v1383_v19  ;;  %1320 = vmatmul.mubr.bf16.gmra.mrb[20].mxu1 %v1384_v20 }
  0x4b   :  { %1271 = vmatprep.mubr.msk.bf16.mxu0 %vm1399_vm0, %v1398_v0  ;;  %1323 = vmatprep.mubr.msk.bf16.mxu1 %vm1399_vm0, %v1398_v0 }
  0x52   :  { %1272 = vmatmul.mubr.bf16.gmra.mrb[24].mxu0 %v1385_v21  ;;  %1324 = vmatmul.mubr.bf16.gmra.mrb[24].mxu1 %v1386_v22 }
  0x53   :  { %1275 = vmatprep.mubr.msk.bf16.mxu0 %vm1399_vm0, %v1398_v0  ;;  %1327 = vmatprep.mubr.msk.bf16.mxu1 %vm1399_vm0, %v1398_v0 }
  0x5a   :  { %1276 = vmatmul.mubr.bf16.gmra.mrb[28].mxu0 %v1387_v23  ;;  %1328 = vmatmul.mubr.bf16.gmra.mrb[28].mxu1 %v1388_v24 }
  0x5b   :  { %1279 = vmatprep.mubr.msk.bf16.mxu0 %vm1399_vm0, %v1398_v0  ;;  %1331 = vmatprep.mubr.msk.bf16.mxu1 %vm1399_vm0, %v1398_v0 }
  0x62   :  { %1280 = vmatmul.mubr.bf16.gmra.mrb[32].mxu0 %v1389_v25  ;;  %1332 = vmatmul.mubr.bf16.gmra.mrb[32].mxu1 %v1390_v26 }
  0x63   :  { %1283 = vmatprep.mubr.msk.bf16.mxu0 %vm1399_vm0, %v1398_v0  ;;  %1335 = vmatprep.mubr.msk.bf16.mxu1 %vm1399_vm0, %v1398_v0 }
  0x6a   :  { %1284 = vmatmul.mubr.bf16.gmra.mrb[36].mxu0 %v1391_v27  ;;  %1336 = vmatmul.mubr.bf16.gmra.mrb[36].mxu1 %v1392_v28 }
  0x6b   :  { %1287 = vmatprep.mubr.msk.bf16.mxu0 %vm1399_vm0, %v1398_v0  ;;  %1339 = vmatprep.mubr.msk.bf16.mxu1 %vm1399_vm0, %v1398_v0 }
  0x72   :  { %1288 = vmatmul.mubr.bf16.gmra.mrb[40].mxu0 %v1393_v29  ;;  %1340 = vmatmul.mubr.bf16.gmra.mrb[40].mxu1 %v1394_v30 }
  0x73   :  { %1291 = vmatprep.mubr.msk.bf16.mxu0 %vm1399_vm0, %v1398_v0  ;;  %1343 = vmatprep.mubr.msk.bf16.mxu1 %vm1399_vm0, %v1398_v0 }
  0x7a   :  { %1292 = vmatmul.mubr.bf16.gmra.mrb[44].mxu0 %v1395_v31  ;;  %1344 = vmatmul.mubr.bf16.gmra.mrb[44].mxu1 %v1396_v32 }
  0x7b   :  { %1295 = vmatprep.mubr.msk.bf16.mxu0 %vm1399_vm0, %v1398_v0 }
  0x82   :  { %1296 = vmatmul.mubr.bf16.gmra.mrb[48].mxu0 %v1397_v33 }
  0xf5   :  { %v313_v35 = vpop.f32.mrb[0].mxu0  ;;  %v417_v37 = vpop.f32.mrb[0].mxu1 }
  0xf6   :  { %v518_v38 = vmul.f32 %v1593_v34, %v313_v35  ;;  %v1249_v39 = vpop.f32.mrb[1].mxu0  ;;  %v544_v40 = vmul.f32 %v1593_v34, %v417_v37  ;;  %v1301_v41 = vpop.f32.mrb[1].mxu1 }
  0xf7   :  { %v316_v42 = vpop.f32.mrb[2].mxu0  ;;  %v420_v43 = vpop.f32.mrb[2].mxu1 }
  0xf8   :  { %v574_v44 = vadd.f32 %v1598_v36, %v518_v38  ;;  %v519_v45 = vmul.f32 %v1593_v34, %v316_v42  ;;  %v1250_v46 = vpop.f32.mrb[3].mxu0  ;;  %v600_v47 = vadd.f32 %v1598_v36, %v544_v40  ;;  %v545_v48 = vmul.f32 %v1593_v34, %v420_v43  ;;  %v1302_v49 = vpop.f32.mrb[3].mxu1 }
  0xfa   :  { %v575_v50 = vadd.f32 %v1598_v36, %v519_v45  ;;  %v649_v51 = vmax.f32 %v600_v47, 0.0  ;;  %v601_v52 = vadd.f32 %v1598_v36, %v545_v48  ;;  %v623_v53 = vmax.f32 %v574_v44, 0.0 }
  0xfc   :  { %v624_v54 = vmax.f32 %v575_v50, 0.0  ;;  %v650_v55 = vmax.f32 %v601_v52, 0.0 }
  0xfd   :  { %v321_v56 = vpop.f32.mrb[4].mxu0  ;;  %v425_v57 = vpop.f32.mrb[4].mxu1 }
  0xfe   :  { %v1058_v58 = vpack.c.bf16 %v624_v54, %v623_v53  ;;  %v520_v59 = vmul.f32 %v1593_v34, %v321_v56  ;;  %v1253_v60 = vpop.f32.mrb[5].mxu0  ;;  %v1123_v61 = vpack.c.bf16 %v650_v55, %v649_v51  ;;  %v546_v62 = vmul.f32 %v1593_v34, %v425_v57  ;;  %v1305_v63 = vpop.f32.mrb[5].mxu1 }
  0xff   :  { %v324_v0 = vpop.f32.mrb[6].mxu0  ;;  %v428_v1 = vpop.f32.mrb[6].mxu1 }
 0x100   :  { %1059 = vst [vmem:[%s1777_s4] sm:$0xff] %v1058_v58   ;;  %v576_v2 = vadd.f32 %v1598_v36, %v520_v59  ;;  %1187 = vst [vmem:[%s1777_s4 + $0x68] sm:$0xff] %v1123_v61   ;;  %v521_v3 = vmul.f32 %v1593_v34, %v324_v0  ;;  %v1254_v4 = vpop.f32.mrb[7].mxu0  ;;  %v602_v5 = vadd.f32 %v1598_v36, %v546_v62  ;;  %v1306_v7 = vpop.f32.mrb[7].mxu1 }
 0x101   :  { %v547_v6 = vmul.f32 %v1593_v34, %v428_v1 }
 0x102   :  { %v577_v8 = vadd.f32 %v1598_v36, %v521_v3  ;;  %v651_v9 = vmax.f32 %v602_v5, 0.0  ;;  %v625_v11 = vmax.f32 %v576_v2, 0.0 }
 0x103   :  { %v603_v10 = vadd.f32 %v1598_v36, %v547_v6 }
 0x104   :  { %v626_v12 = vmax.f32 %v577_v8, 0.0 }
 0x105   :  { %v652_v13 = vmax.f32 %v603_v10, 0.0  ;;  %v329_v14 = vpop.f32.mrb[8].mxu0  ;;  %v433_v15 = vpop.f32.mrb[8].mxu1 }
 0x106   :  { %v1063_v16 = vpack.c.bf16 %v626_v12, %v625_v11  ;;  %v522_v17 = vmul.f32 %v1593_v34, %v329_v14  ;;  %v1257_v18 = vpop.f32.mrb[9].mxu0  ;;  %v548_v20 = vmul.f32 %v1593_v34, %v433_v15  ;;  %v1309_v21 = vpop.f32.mrb[9].mxu1 }
 0x107   :  { %v1128_v19 = vpack.c.bf16 %v652_v13, %v651_v9  ;;  %v332_v22 = vpop.f32.mrb[10].mxu0  ;;  %v436_v23 = vpop.f32.mrb[10].mxu1 }
 0x108   :  { %1175 = vst [vmem:[%s1777_s4 + $0x8] sm:$0xff] %v1063_v16   ;;  %v578_v24 = vadd.f32 %v1598_v36, %v522_v17  ;;  %v523_v25 = vmul.f32 %v1593_v34, %v332_v22  ;;  %v1258_v26 = vpop.f32.mrb[11].mxu0  ;;  %v604_v27 = vadd.f32 %v1598_v36, %v548_v20  ;;  %v549_v28 = vmul.f32 %v1593_v34, %v436_v23  ;;  %v1310_v29 = vpop.f32.mrb[11].mxu1 }
 0x109   :  { %1188 = vst [vmem:[%s1777_s4 + $0x70] sm:$0xff] %v1128_v19  }
 0x10a   :  { %v579_v30 = vadd.f32 %v1598_v36, %v523_v25  ;;  %v653_v31 = vmax.f32 %v604_v27, 0.0  ;;  %v605_v32 = vadd.f32 %v1598_v36, %v549_v28  ;;  %v627_v33 = vmax.f32 %v578_v24, 0.0 }
 0x10c   :  { %v628_v35 = vmax.f32 %v579_v30, 0.0  ;;  %v654_v37 = vmax.f32 %v605_v32, 0.0 }
 0x10d   :  { %v337_v38 = vpop.f32.mrb[12].mxu0  ;;  %v441_v39 = vpop.f32.mrb[12].mxu1 }
 0x10e   :  { %v1068_v40 = vpack.c.bf16 %v628_v35, %v627_v33  ;;  %v524_v41 = vmul.f32 %v1593_v34, %v337_v38  ;;  %v1261_v42 = vpop.f32.mrb[13].mxu0  ;;  %v1133_v43 = vpack.c.bf16 %v654_v37, %v653_v31  ;;  %v550_v44 = vmul.f32 %v1593_v34, %v441_v39  ;;  %v1313_v45 = vpop.f32.mrb[13].mxu1 }
 0x10f   :  { %v340_v46 = vpop.f32.mrb[14].mxu0  ;;  %v444_v47 = vpop.f32.mrb[14].mxu1 }
 0x110   :  { %1176 = vst [vmem:[%s1777_s4 + $0x10] sm:$0xff] %v1068_v40   ;;  %v580_v48 = vadd.f32 %v1598_v36, %v524_v41  ;;  %1189 = vst [vmem:[%s1777_s4 + $0x78] sm:$0xff] %v1133_v43   ;;  %v525_v49 = vmul.f32 %v1593_v34, %v340_v46  ;;  %v1262_v50 = vpop.f32.mrb[15].mxu0  ;;  %v606_v51 = vadd.f32 %v1598_v36, %v550_v44  ;;  %v1314_v53 = vpop.f32.mrb[15].mxu1 }
 0x111   :  { %v551_v52 = vmul.f32 %v1593_v34, %v444_v47 }
 0x112   :  { %v581_v54 = vadd.f32 %v1598_v36, %v525_v49  ;;  %v655_v55 = vmax.f32 %v606_v51, 0.0  ;;  %v629_v57 = vmax.f32 %v580_v48, 0.0 }
 0x113   :  { %v607_v56 = vadd.f32 %v1598_v36, %v551_v52 }
 0x114   :  { %v630_v58 = vmax.f32 %v581_v54, 0.0 }
 0x115   :  { %v656_v59 = vmax.f32 %v607_v56, 0.0  ;;  %v345_v60 = vpop.f32.mrb[16].mxu0  ;;  %v449_v61 = vpop.f32.mrb[16].mxu1 }
 0x116   :  { %v1073_v62 = vpack.c.bf16 %v630_v58, %v629_v57  ;;  %v526_v63 = vmul.f32 %v1593_v34, %v345_v60  ;;  %v1265_v0 = vpop.f32.mrb[17].mxu0  ;;  %v552_v2 = vmul.f32 %v1593_v34, %v449_v61  ;;  %v1317_v3 = vpop.f32.mrb[17].mxu1 }
 0x117   :  { %v1138_v1 = vpack.c.bf16 %v656_v59, %v655_v55  ;;  %v348_v4 = vpop.f32.mrb[18].mxu0  ;;  %v452_v5 = vpop.f32.mrb[18].mxu1 }
 0x118   :  { %1177 = vst [vmem:[%s1777_s4 + $0x18] sm:$0xff] %v1073_v62   ;;  %v582_v6 = vadd.f32 %v1598_v36, %v526_v63  ;;  %v527_v7 = vmul.f32 %v1593_v34, %v348_v4  ;;  %v1266_v8 = vpop.f32.mrb[19].mxu0  ;;  %v608_v9 = vadd.f32 %v1598_v36, %v552_v2  ;;  %v553_v10 = vmul.f32 %v1593_v34, %v452_v5  ;;  %v1318_v11 = vpop.f32.mrb[19].mxu1 }
 0x119   :  { %1190 = vst [vmem:[%s1777_s4 + $0x80] sm:$0xff] %v1138_v1  }
 0x11a   :  { %v583_v12 = vadd.f32 %v1598_v36, %v527_v7  ;;  %v657_v13 = vmax.f32 %v608_v9, 0.0  ;;  %v609_v14 = vadd.f32 %v1598_v36, %v553_v10  ;;  %v631_v15 = vmax.f32 %v582_v6, 0.0 }
 0x11c   :  { %v632_v16 = vmax.f32 %v583_v12, 0.0  ;;  %v658_v17 = vmax.f32 %v609_v14, 0.0 }
 0x11d   :  { %v353_v18 = vpop.f32.mrb[20].mxu0  ;;  %v457_v19 = vpop.f32.mrb[20].mxu1 }
 0x11e   :  { %v1078_v20 = vpack.c.bf16 %v632_v16, %v631_v15  ;;  %v528_v21 = vmul.f32 %v1593_v34, %v353_v18  ;;  %v1269_v22 = vpop.f32.mrb[21].mxu0  ;;  %v1143_v23 = vpack.c.bf16 %v658_v17, %v657_v13  ;;  %v554_v24 = vmul.f32 %v1593_v34, %v457_v19  ;;  %v1321_v25 = vpop.f32.mrb[21].mxu1 }
 0x11f   :  { %v356_v26 = vpop.f32.mrb[22].mxu0  ;;  %v460_v27 = vpop.f32.mrb[22].mxu1 }
 0x120   :  { %1178 = vst [vmem:[%s1777_s4 + $0x20] sm:$0xff] %v1078_v20   ;;  %v584_v28 = vadd.f32 %v1598_v36, %v528_v21  ;;  %1191 = vst [vmem:[%s1777_s4 + $0x88] sm:$0xff] %v1143_v23   ;;  %v529_v29 = vmul.f32 %v1593_v34, %v356_v26  ;;  %v1270_v30 = vpop.f32.mrb[23].mxu0  ;;  %v610_v31 = vadd.f32 %v1598_v36, %v554_v24  ;;  %v1322_v33 = vpop.f32.mrb[23].mxu1 }
 0x121   :  { %v555_v32 = vmul.f32 %v1593_v34, %v460_v27 }
 0x122   :  { %v585_v35 = vadd.f32 %v1598_v36, %v529_v29  ;;  %v659_v37 = vmax.f32 %v610_v31, 0.0  ;;  %v633_v39 = vmax.f32 %v584_v28, 0.0 }
 0x123   :  { %v611_v38 = vadd.f32 %v1598_v36, %v555_v32 }
 0x124   :  { %v634_v40 = vmax.f32 %v585_v35, 0.0 }
 0x125   :  { %v660_v41 = vmax.f32 %v611_v38, 0.0  ;;  %v361_v42 = vpop.f32.mrb[24].mxu0  ;;  %v465_v43 = vpop.f32.mrb[24].mxu1 }
 0x126   :  { %v1083_v44 = vpack.c.bf16 %v634_v40, %v633_v39  ;;  %v530_v45 = vmul.f32 %v1593_v34, %v361_v42  ;;  %v1273_v46 = vpop.f32.mrb[25].mxu0  ;;  %v556_v48 = vmul.f32 %v1593_v34, %v465_v43  ;;  %v1325_v49 = vpop.f32.mrb[25].mxu1 }
 0x127   :  { %v1148_v47 = vpack.c.bf16 %v660_v41, %v659_v37  ;;  %v364_v50 = vpop.f32.mrb[26].mxu0  ;;  %v468_v51 = vpop.f32.mrb[26].mxu1 }
 0x128   :  { %1179 = vst [vmem:[%s1777_s4 + $0x28] sm:$0xff] %v1083_v44   ;;  %v586_v52 = vadd.f32 %v1598_v36, %v530_v45  ;;  %v531_v53 = vmul.f32 %v1593_v34, %v364_v50  ;;  %v1274_v54 = vpop.f32.mrb[27].mxu0  ;;  %v612_v55 = vadd.f32 %v1598_v36, %v556_v48  ;;  %v557_v56 = vmul.f32 %v1593_v34, %v468_v51  ;;  %v1326_v57 = vpop.f32.mrb[27].mxu1 }
 0x129   :  { %1192 = vst [vmem:[%s1777_s4 + $0x90] sm:$0xff] %v1148_v47  }
 0x12a   :  { %v587_v58 = vadd.f32 %v1598_v36, %v531_v53  ;;  %v661_v59 = vmax.f32 %v612_v55, 0.0  ;;  %v613_v60 = vadd.f32 %v1598_v36, %v557_v56  ;;  %v635_v61 = vmax.f32 %v586_v52, 0.0 }
 0x12c   :  { %v636_v62 = vmax.f32 %v587_v58, 0.0  ;;  %v662_v63 = vmax.f32 %v613_v60, 0.0 }
 0x12d   :  { %v369_v0 = vpop.f32.mrb[28].mxu0  ;;  %v473_v1 = vpop.f32.mrb[28].mxu1 }
 0x12e   :  { %v1088_v2 = vpack.c.bf16 %v636_v62, %v635_v61  ;;  %v532_v3 = vmul.f32 %v1593_v34, %v369_v0  ;;  %v1277_v4 = vpop.f32.mrb[29].mxu0  ;;  %v1153_v5 = vpack.c.bf16 %v662_v63, %v661_v59  ;;  %v558_v6 = vmul.f32 %v1593_v34, %v473_v1  ;;  %v1329_v7 = vpop.f32.mrb[29].mxu1 }
 0x12f   :  { %v372_v8 = vpop.f32.mrb[30].mxu0  ;;  %v476_v9 = vpop.f32.mrb[30].mxu1 }
 0x130   :  { %1180 = vst [vmem:[%s1777_s4 + $0x30] sm:$0xff] %v1088_v2   ;;  %v588_v10 = vadd.f32 %v1598_v36, %v532_v3  ;;  %1193 = vst [vmem:[%s1777_s4 + $0x98] sm:$0xff] %v1153_v5   ;;  %v533_v11 = vmul.f32 %v1593_v34, %v372_v8  ;;  %v1278_v12 = vpop.f32.mrb[31].mxu0  ;;  %v614_v13 = vadd.f32 %v1598_v36, %v558_v6  ;;  %v1330_v15 = vpop.f32.mrb[31].mxu1 }
 0x131   :  { %v559_v14 = vmul.f32 %v1593_v34, %v476_v9 }
 0x132   :  { %v589_v16 = vadd.f32 %v1598_v36, %v533_v11  ;;  %v663_v17 = vmax.f32 %v614_v13, 0.0  ;;  %v637_v19 = vmax.f32 %v588_v10, 0.0 }
 0x133   :  { %v615_v18 = vadd.f32 %v1598_v36, %v559_v14 }
 0x134   :  { %v638_v20 = vmax.f32 %v589_v16, 0.0 }
 0x135   :  { %v664_v21 = vmax.f32 %v615_v18, 0.0  ;;  %v377_v22 = vpop.f32.mrb[32].mxu0  ;;  %v481_v23 = vpop.f32.mrb[32].mxu1 }
 0x136   :  { %v1093_v24 = vpack.c.bf16 %v638_v20, %v637_v19  ;;  %v534_v25 = vmul.f32 %v1593_v34, %v377_v22  ;;  %v1281_v26 = vpop.f32.mrb[33].mxu0  ;;  %v560_v28 = vmul.f32 %v1593_v34, %v481_v23  ;;  %v1333_v29 = vpop.f32.mrb[33].mxu1 }
 0x137   :  { %v1158_v27 = vpack.c.bf16 %v664_v21, %v663_v17  ;;  %v380_v30 = vpop.f32.mrb[34].mxu0  ;;  %v484_v31 = vpop.f32.mrb[34].mxu1 }
 0x138   :  { %1181 = vst [vmem:[%s1777_s4 + $0x38] sm:$0xff] %v1093_v24   ;;  %v590_v32 = vadd.f32 %v1598_v36, %v534_v25  ;;  %v535_v33 = vmul.f32 %v1593_v34, %v380_v30  ;;  %v1282_v35 = vpop.f32.mrb[35].mxu0  ;;  %v616_v37 = vadd.f32 %v1598_v36, %v560_v28  ;;  %v561_v38 = vmul.f32 %v1593_v34, %v484_v31  ;;  %v1334_v39 = vpop.f32.mrb[35].mxu1 }
 0x139   :  { %1194 = vst [vmem:[%s1777_s4 + $0xa0] sm:$0xff] %v1158_v27  }
 0x13a   :  { %v591_v40 = vadd.f32 %v1598_v36, %v535_v33  ;;  %v665_v41 = vmax.f32 %v616_v37, 0.0  ;;  %v617_v42 = vadd.f32 %v1598_v36, %v561_v38  ;;  %v639_v43 = vmax.f32 %v590_v32, 0.0 }
 0x13c   :  { %v640_v44 = vmax.f32 %v591_v40, 0.0  ;;  %v666_v45 = vmax.f32 %v617_v42, 0.0 }
 0x13d   :  { %v385_v46 = vpop.f32.mrb[36].mxu0  ;;  %v489_v47 = vpop.f32.mrb[36].mxu1 }
 0x13e   :  { %v1098_v48 = vpack.c.bf16 %v640_v44, %v639_v43  ;;  %v536_v49 = vmul.f32 %v1593_v34, %v385_v46  ;;  %v1285_v50 = vpop.f32.mrb[37].mxu0  ;;  %v1163_v51 = vpack.c.bf16 %v666_v45, %v665_v41  ;;  %v562_v52 = vmul.f32 %v1593_v34, %v489_v47  ;;  %v1337_v53 = vpop.f32.mrb[37].mxu1 }
 0x13f   :  { %v388_v54 = vpop.f32.mrb[38].mxu0  ;;  %v492_v55 = vpop.f32.mrb[38].mxu1 }
 0x140   :  { %1182 = vst [vmem:[%s1777_s4 + $0x40] sm:$0xff] %v1098_v48   ;;  %v592_v56 = vadd.f32 %v1598_v36, %v536_v49  ;;  %1195 = vst [vmem:[%s1777_s4 + $0xa8] sm:$0xff] %v1163_v51   ;;  %v537_v57 = vmul.f32 %v1593_v34, %v388_v54  ;;  %v1286_v58 = vpop.f32.mrb[39].mxu0  ;;  %v618_v59 = vadd.f32 %v1598_v36, %v562_v52  ;;  %v1338_v61 = vpop.f32.mrb[39].mxu1 }
 0x141   :  { %v563_v60 = vmul.f32 %v1593_v34, %v492_v55 }
 0x142   :  { %v593_v62 = vadd.f32 %v1598_v36, %v537_v57  ;;  %v667_v63 = vmax.f32 %v618_v59, 0.0  ;;  %v641_v1 = vmax.f32 %v592_v56, 0.0 }
 0x143   :  { %v619_v0 = vadd.f32 %v1598_v36, %v563_v60 }
 0x144   :  { %v642_v2 = vmax.f32 %v593_v62, 0.0 }
 0x145   :  { %v668_v3 = vmax.f32 %v619_v0, 0.0  ;;  %v393_v4 = vpop.f32.mrb[40].mxu0  ;;  %v497_v5 = vpop.f32.mrb[40].mxu1 }
 0x146   :  { %v1103_v6 = vpack.c.bf16 %v642_v2, %v641_v1  ;;  %v538_v7 = vmul.f32 %v1593_v34, %v393_v4  ;;  %v1289_v8 = vpop.f32.mrb[41].mxu0  ;;  %v564_v10 = vmul.f32 %v1593_v34, %v497_v5  ;;  %v1341_v11 = vpop.f32.mrb[41].mxu1 }
 0x147   :  { %v1168_v9 = vpack.c.bf16 %v668_v3, %v667_v63  ;;  %v396_v12 = vpop.f32.mrb[42].mxu0  ;;  %v500_v13 = vpop.f32.mrb[42].mxu1 }
 0x148   :  { %1183 = vst [vmem:[%s1777_s4 + $0x48] sm:$0xff] %v1103_v6   ;;  %v594_v14 = vadd.f32 %v1598_v36, %v538_v7  ;;  %v539_v15 = vmul.f32 %v1593_v34, %v396_v12  ;;  %v1290_v16 = vpop.f32.mrb[43].mxu0  ;;  %v620_v17 = vadd.f32 %v1598_v36, %v564_v10  ;;  %v565_v18 = vmul.f32 %v1593_v34, %v500_v13  ;;  %v1342_v19 = vpop.f32.mrb[43].mxu1 }
 0x149   :  { %1196 = vst [vmem:[%s1777_s4 + $0xb0] sm:$0xff] %v1168_v9  }
 0x14a   :  { %v595_v20 = vadd.f32 %v1598_v36, %v539_v15  ;;  %v669_v21 = vmax.f32 %v620_v17, 0.0  ;;  %v621_v22 = vadd.f32 %v1598_v36, %v565_v18  ;;  %v643_v23 = vmax.f32 %v594_v14, 0.0 }
 0x14c   :  { %v644_v24 = vmax.f32 %v595_v20, 0.0  ;;  %v670_v25 = vmax.f32 %v621_v22, 0.0 }
 0x14d   :  { %v401_v26 = vpop.f32.mrb[44].mxu0  ;;  %v505_v27 = vpop.f32.mrb[44].mxu1 }
 0x14e   :  { %v1108_v28 = vpack.c.bf16 %v644_v24, %v643_v23  ;;  %v540_v29 = vmul.f32 %v1593_v34, %v401_v26  ;;  %v1293_v30 = vpop.f32.mrb[45].mxu0  ;;  %v1173_v31 = vpack.c.bf16 %v670_v25, %v669_v21  ;;  %v566_v32 = vmul.f32 %v1593_v34, %v505_v27  ;;  %v1345_v33 = vpop.f32.mrb[45].mxu1 }
 0x14f   :  { %v404_v35 = vpop.f32.mrb[46].mxu0  ;;  %v508_v37 = vpop.f32.mrb[46].mxu1 }
 0x150   :  { %1184 = vst [vmem:[%s1777_s4 + $0x50] sm:$0xff] %v1108_v28   ;;  %v596_v38 = vadd.f32 %v1598_v36, %v540_v29  ;;  %1197 = vst [vmem:[%s1777_s4 + $0xb8] sm:$0xff] %v1173_v31   ;;  %v541_v39 = vmul.f32 %v1593_v34, %v404_v35  ;;  %v1294_v40 = vpop.f32.mrb[47].mxu0  ;;  %v622_v41 = vadd.f32 %v1598_v36, %v566_v32  ;;  %v1346_v42 = vpop.f32.mrb[47].mxu1 }
 0x152   :  { %v597_v43 = vadd.f32 %v1598_v36, %v541_v39  ;;  %v671_v44 = vmax.f32 %v622_v41, 0.0  ;;  %v645_v45 = vmax.f32 %v596_v38, 0.0 }
 0x154   :  { %v646_v46 = vmax.f32 %v597_v43, 0.0  ;;  %v1054_v47 = vpack.c.bf16 %v671_v44, %v671_v44 }
 0x155   :  { %v409_v48 = vpop.f32.mrb[48].mxu0 }
 0x156   :  { %v1113_v49 = vpack.c.bf16 %v646_v46, %v645_v45  ;;  %917 = vst [vmem:[%s1777_s4 + $0xc0] sm:$0xf] %v1054_v47  ;;  %v542_v50 = vmul.f32 %v1593_v34, %v409_v48  ;;  %v1297_v51 = vpop.f32.mrb[49].mxu0 }
 0x157   :  { %v412_v52 = vpop.f32.mrb[50].mxu0 }
 0x158   :  { %1185 = vst [vmem:[%s1777_s4 + $0x58] sm:$0xff] %v1113_v49   ;;  %v598_v53 = vadd.f32 %v1598_v36, %v542_v50  ;;  %v543_v54 = vmul.f32 %v1593_v34, %v412_v52  ;;  %v1298_v55 = vpop.f32.mrb[51].mxu0 }
 0x15a   :  { %v599_v56 = vadd.f32 %v1598_v36, %v543_v54  ;;  %v647_v57 = vmax.f32 %v598_v53, 0.0 }
 0x15c   :  { %v648_v58 = vmax.f32 %v599_v56, 0.0 }
 0x15e   :  { %v1118_v59 = vpack.c.bf16 %v648_v58, %v647_v57 }
 0x160   :  { %1186 = vst [vmem:[%s1777_s4 + $0x60] sm:$0xff] %v1118_v59  }

// kernel: forward.6
= control target key start
LH: loop header
LB: loop body
LE: loop exit
PB: predicated region body
PF: predicated region fallthrough
CT: control target
= control target key end

     0   :  { %v1696_v0 = vmov 0   ;;  %s2154_s1 = inlined_call_operand.vmem [shape: bf16[384,128], index: 1, kind: input, shape index: {}]   ;;  %s2155_s0 = inlined_call_operand.vmem [shape: bf16[288,384], index: 0, kind: input, shape index: {}]   ;;  %s2156_s2 = inlined_call_operand.vmem [shape: f32[1,128], index: 2, kind: input, shape index: {}]   ;;  %s2157_s3 = inlined_call_operand.vmem [shape: f32[1,128], index: 3, kind: input, shape index: {}]   ;;  %s2158_s4 = inlined_call_operand.vmem [shape: bf16[288,128], index: 4, kind: output, shape index: {}]  }
   0x1   :  { %570 = vmatprep.subr.bf16.mxu0 %v1696_v0  ;;  %1567 = vmatprep.subr.bf16.mxu1 %v1696_v0  ;;  %v1600_v1 = vld [vmem:[%s2154_s1] sm:$0xff]   ;;  %v1601_v2 = vld [vmem:[%s2154_s1 + $0x8] sm:$0xff]   ;;  %v1602_v3 = vld [vmem:[%s2154_s1 + $0x10] sm:$0xff]  }
   0x2   :  { %571 = vmatpush1.bf16.msra.mxu0 %v1600_v1  ;;  %1583 = vmatpush1.bf16.msra.mxu1 %v1600_v1  ;;  %v1603_v4 = vld [vmem:[%s2154_s1 + $0x18] sm:$0xff]   ;;  %v1604_v5 = vld [vmem:[%s2154_s1 + $0x20] sm:$0xff]   ;;  %v1605_v7 = vld [vmem:[%s2154_s1 + $0x28] sm:$0xff]  }
   0x3   :  { %572 = vmatprep.subr.bf16.mxu0 %v1696_v0  ;;  %1568 = vmatprep.subr.bf16.mxu1 %v1696_v0  ;;  %v1618_v6 = vld [vmem:[%s2155_s0 + $0x4] ss:$12 sps:$4 sm:$0xff]   ;;  %v1621_v8 = vld [vmem:[%s2155_s0 + $0x154] ss:$12 sps:$4 sm:$0xff]   ;;  %v1607_v10 = vld [vmem:[%s2154_s1 + $0x38] sm:$0xff]  }
   0x4   :  { %602 = vmatprep.mubr.bf16.mxu0 %v1618_v6  ;;  %714 = vmatprep.mubr.bf16.mxu1 %v1621_v8  ;;  %v1606_v9 = vld [vmem:[%s2154_s1 + $0x30] sm:$0xff]   ;;  %v1608_v11 = vld [vmem:[%s2154_s1 + $0x40] sm:$0xff]   ;;  %v1609_v12 = vld [vmem:[%s2154_s1 + $0x48] sm:$0xff]  }
   0x5   :  { %v1610_v13 = vld [vmem:[%s2154_s1 + $0x50] sm:$0xff]   ;;  %v1611_v14 = vld [vmem:[%s2154_s1 + $0x58] sm:$0xff]   ;;  %v1612_v15 = vld [vmem:[%s2154_s1 + $0x60] sm:$0xff]  }
   0x6   :  { %573 = vmatpush1.bf16.msra.mxu0 %v1601_v2  ;;  %1584 = vmatpush1.bf16.msra.mxu1 %v1601_v2  ;;  %v1613_v16 = vld [vmem:[%s2154_s1 + $0x68] sm:$0xff]   ;;  %v1614_v17 = vld [vmem:[%s2154_s1 + $0x70] sm:$0xff]   ;;  %v1615_v18 = vld [vmem:[%s2154_s1 + $0x78] sm:$0xff]  }
   0x7   :  { %574 = vmatprep.subr.bf16.mxu0 %v1696_v0  ;;  %1569 = vmatprep.subr.bf16.mxu1 %v1696_v0  ;;  %v1622_v19 = vld [vmem:[%s2154_s1 + $0x80] sm:$0xff]   ;;  %v1619_v21 = vld [vmem:[%s2155_s0 + $0x150] ss:$12 sps:$4 sm:$0xff]   ;;  %v1623_v23 = vld [vmem:[%s2154_s1 + $0x88] sm:$0xff]  }
   0x8   :  { %v1616_v20 = vld [vmem:[%s2155_s0] ss:$12 sps:$4 sm:$0xff]   ;;  %v1624_v22 = vld [vmem:[%s2155_s0 + $0x1c] ss:$12 sps:$4 sm:$0xff]   ;;  %v1630_v25 = vld [vmem:[%s2154_s1 + $0x90] sm:$0xff]  }
   0x9   :  { %v1626_v24 = vld [vmem:[%s2155_s0 + $0x16c] ss:$12 sps:$4 sm:$0xff]   ;;  %v1629_v27 = vld [vmem:[%s2155_s0 + $0x168] ss:$12 sps:$4 sm:$0xff]   ;;  %v1634_v30 = vld [vmem:[%s2155_s0 + $0x184] ss:$12 sps:$4 sm:$0xff]  }
   0xa   :  { %575 = vmatpush1.bf16.msra.mxu0 %v1602_v3  ;;  %1585 = vmatpush1.bf16.msra.mxu1 %v1602_v3  ;;  %v1628_v26 = vld [vmem:[%s2155_s0 + $0x18] ss:$12 sps:$4 sm:$0xff]   ;;  %v1632_v28 = vld [vmem:[%s2155_s0 + $0x34] ss:$12 sps:$4 sm:$0xff]   ;;  %v1636_v32 = vld [vmem:[%s2155_s0 + $0x30] ss:$12 sps:$4 sm:$0xff]  }
   0xb   :  { %576 = vmatprep.subr.bf16.mxu0 %v1696_v0  ;;  %1570 = vmatprep.subr.bf16.mxu1 %v1696_v0  ;;  %v1631_v29 = vld [vmem:[%s2154_s1 + $0x98] sm:$0xff]   ;;  %v1638_v31 = vld [vmem:[%s2154_s1 + $0xa0] sm:$0xff]   ;;  %v1639_v35 = vld [vmem:[%s2154_s1 + $0xa8] sm:$0xff]  }
   0xc   :  { %v1637_v33 = vld [vmem:[%s2155_s0 + $0x180] ss:$12 sps:$4 sm:$0xff]   ;;  %v1642_v36 = vld [vmem:[%s2155_s0 + $0x19c] ss:$12 sps:$4 sm:$0xff]   ;;  %v1646_v37 = vld [vmem:[%s2154_s1 + $0xb0] sm:$0xff]  }
   0xd   :  { %v1640_v34 = vld [vmem:[%s2155_s0 + $0x4c] ss:$12 sps:$4 sm:$0xff]   ;;  %v1644_v38 = vld [vmem:[%s2155_s0 + $0x48] ss:$12 sps:$4 sm:$0xff]   ;;  %v1648_v40 = vld [vmem:[%s2155_s0 + $0x64] ss:$12 sps:$4 sm:$0xff]  }
   0xe   :  { %577 = vmatpush1.bf16.msra.mxu0 %v1603_v4  ;;  %1586 = vmatpush1.bf16.msra.mxu1 %v1603_v4  ;;  %v1645_v39 = vld [vmem:[%s2155_s0 + $0x198] ss:$12 sps:$4 sm:$0xff]   ;;  %v1650_v42 = vld [vmem:[%s2155_s0 + $0x8] ss:$12 sps:$4 sm:$0xff]   ;;  %v1651_v43 = vld [vmem:[%s2155_s0 + $0x60] ss:$12 sps:$4 sm:$0xff]  }
   0xf   :  { %578 = vmatprep.subr.bf16.mxu0 %v1696_v0  ;;  %1571 = vmatprep.subr.bf16.mxu1 %v1696_v0  ;;  %v1647_v41 = vld [vmem:[%s2154_s1 + $0xb8] sm:$0xff]   ;;  %v1652_v44 = vld [vmem:[%s2155_s0 + $0x20] ss:$12 sps:$4 sm:$0xff]   ;;  %v1660_v50 = vld [vmem:[%s2155_s0 + $0x68] ss:$12 sps:$4 sm:$0xff]  }
  0x10   :  { %v1653_v45 = vld [vmem:[%s2155_s0 + $0x7c] ss:$12 sps:$4 sm:$0xff]   ;;  %v1655_v46 = vld [vmem:[%s2155_s0 + $0x38] ss:$12 sps:$4 sm:$0xff]   ;;  %v1658_v49 = vld [vmem:[%s2155_s0 + $0x94] ss:$12 sps:$4 sm:$0xff]  }
  0x11   :  { %v1656_v47 = vld [vmem:[%s2155_s0 + $0x78] ss:$12 sps:$4 sm:$0xff]   ;;  %v1657_v48 = vld [vmem:[%s2155_s0 + $0x50] ss:$12 sps:$4 sm:$0xff]   ;;  %v1662_v52 = vld [vmem:[%s2155_s0 + $0x80] ss:$12 sps:$4 sm:$0xff]  }
  0x12   :  { %579 = vmatpush1.bf16.msra.mxu0 %v1604_v5  ;;  %1587 = vmatpush1.bf16.msra.mxu1 %v1604_v5  ;;  %v1661_v51 = vld [vmem:[%s2155_s0 + $0x90] ss:$12 sps:$4 sm:$0xff]   ;;  %v1663_v53 = vld [vmem:[%s2155_s0 + $0xac] ss:$12 sps:$4 sm:$0xff]   ;;  %v1666_v55 = vld [vmem:[%s2155_s0 + $0xa8] ss:$12 sps:$4 sm:$0xff]  }
  0x13   :  { %580 = vmatprep.subr.bf16.mxu0 %v1696_v0  ;;  %1572 = vmatprep.subr.bf16.mxu1 %v1696_v0  ;;  %v1665_v54 = vld [vmem:[%s2155_s0 + $0x98] ss:$12 sps:$4 sm:$0xff]   ;;  %v1667_v56 = vld [vmem:[%s2155_s0 + $0xb0] ss:$12 sps:$4 sm:$0xff]   ;;  %v1670_v58 = vld [vmem:[%s2155_s0 + $0xc8] ss:$12 sps:$4 sm:$0xff]  }
  0x14   :  { %v1668_v57 = vld [vmem:[%s2155_s0 + $0xc4] ss:$12 sps:$4 sm:$0xff]   ;;  %v1671_v59 = vld [vmem:[%s2155_s0 + $0xc0] ss:$12 sps:$4 sm:$0xff]   ;;  %v1673_v61 = vld [vmem:[%s2155_s0 + $0xdc] ss:$12 sps:$4 sm:$0xff]  }
  0x15   :  { %v1672_v60 = vld [vmem:[%s2155_s0 + $0xe0] ss:$12 sps:$4 sm:$0xff]   ;;  %v1675_v62 = vld [vmem:[%s2155_s0 + $0xf8] ss:$12 sps:$4 sm:$0xff]   ;;  %v1680_v2 = vld [vmem:[%s2155_s0 + $0x128] ss:$12 sps:$4 sm:$0xff]  }
  0x16   :  { %581 = vmatpush1.bf16.msra.mxu0 %v1605_v7  ;;  %1588 = vmatpush1.bf16.msra.mxu1 %v1605_v7  ;;  %v1676_v63 = vld [vmem:[%s2155_s0 + $0xd8] ss:$12 sps:$4 sm:$0xff]   ;;  %v1678_v1 = vld [vmem:[%s2155_s0 + $0xf4] ss:$12 sps:$4 sm:$0xff]   ;;  %v1681_v3 = vld [vmem:[%s2155_s0 + $0xf0] ss:$12 sps:$4 sm:$0xff]  }
  0x17   :  { %582 = vmatprep.subr.bf16.mxu0 %v1696_v0  ;;  %1573 = vmatprep.subr.bf16.mxu1 %v1696_v0  ;;  %v1682_v4 = vld [vmem:[%s2155_s0 + $0x140] ss:$12 sps:$4 sm:$0xff]   ;;  %v1685_v6 = vld [vmem:[%s2155_s0 + $0x158] ss:$12 sps:$4 sm:$0xff]   ;;  %v1686_v7 = vld [vmem:[%s2155_s0 + $0x108] ss:$12 sps:$4 sm:$0xff]  }
  0x18   :  { %v1683_v5 = vld [vmem:[%s2155_s0 + $0x10c] ss:$12 sps:$4 sm:$0xff]   ;;  %v1687_v8 = vld [vmem:[%s2155_s0 + $0x170] ss:$12 sps:$4 sm:$0xff]  }
  0x1a   :  { %583 = vmatpush1.bf16.msra.mxu0 %v1606_v9  ;;  %1589 = vmatpush1.bf16.msra.mxu1 %v1606_v9  ;;  %v1688_v9 = vld [vmem:[%s2155_s0 + $0x124] ss:$12 sps:$4 sm:$0xff]  }
  0x1b   :  { %584 = vmatprep.subr.bf16.mxu0 %v1696_v0  ;;  %1574 = vmatprep.subr.bf16.mxu1 %v1696_v0 }
  0x1e   :  { %585 = vmatpush1.bf16.msra.mxu0 %v1607_v10  ;;  %1590 = vmatpush1.bf16.msra.mxu1 %v1607_v10  ;;  %v1690_v10 = vld [vmem:[%s2155_s0 + $0x188] ss:$12 sps:$4 sm:$0xff]  }
  0x1f   :  { %586 = vmatprep.subr.bf16.mxu0 %v1696_v0  ;;  %1575 = vmatprep.subr.bf16.mxu1 %v1696_v0 }
  0x22   :  { %587 = vmatpush1.bf16.msra.mxu0 %v1608_v11  ;;  %1591 = vmatpush1.bf16.msra.mxu1 %v1608_v11  ;;  %v1691_v11 = vld [vmem:[%s2155_s0 + $0x120] ss:$12 sps:$4 sm:$0xff]  }
  0x23   :  { %588 = vmatprep.subr.bf16.mxu0 %v1696_v0  ;;  %1576 = vmatprep.subr.bf16.mxu1 %v1696_v0 }
  0x26   :  { %589 = vmatpush1.bf16.msra.mxu0 %v1609_v12  ;;  %1592 = vmatpush1.bf16.msra.mxu1 %v1609_v12  ;;  %v1692_v12 = vld [vmem:[%s2155_s0 + $0x1a0] ss:$12 sps:$4 sm:$0xff]  }
  0x27   :  { %590 = vmatprep.subr.bf16.mxu0 %v1696_v0  ;;  %1577 = vmatprep.subr.bf16.mxu1 %v1696_v0 }
  0x2a   :  { %591 = vmatpush1.bf16.msra.mxu0 %v1610_v13  ;;  %1593 = vmatpush1.bf16.msra.mxu1 %v1610_v13  ;;  %v1693_v13 = vld [vmem:[%s2155_s0 + $0x13c] ss:$12 sps:$4 sm:$0xff]  }
  0x2b   :  { %592 = vmatprep.subr.bf16.mxu0 %v1696_v0  ;;  %1578 = vmatprep.subr.bf16.mxu1 %v1696_v0 }
  0x2e   :  { %593 = vmatpush1.bf16.msra.mxu0 %v1611_v14  ;;  %1594 = vmatpush1.bf16.msra.mxu1 %v1611_v14  ;;  %v1695_v14 = vld [vmem:[%s2155_s0 + $0x138] ss:$12 sps:$4 sm:$0xff]  }
  0x2f   :  { %594 = vmatprep.subr.bf16.mxu0 %v1696_v0  ;;  %1579 = vmatprep.subr.bf16.mxu1 %v1696_v0 }
  0x32   :  { %595 = vmatpush1.bf16.msra.mxu0 %v1612_v15  ;;  %1595 = vmatpush1.bf16.msra.mxu1 %v1612_v15 }
  0x33   :  { %596 = vmatprep.subr.bf16.mxu0 %v1696_v0  ;;  %1580 = vmatprep.subr.bf16.mxu1 %v1696_v0 }
  0x36   :  { %597 = vmatpush1.bf16.msra.mxu0 %v1613_v16  ;;  %1596 = vmatpush1.bf16.msra.mxu1 %v1613_v16 }
  0x37   :  { %598 = vmatprep.subr.bf16.mxu0 %v1696_v0  ;;  %1581 = vmatprep.subr.bf16.mxu1 %v1696_v0 }
  0x3a   :  { %599 = vmatpush1.bf16.msra.mxu0 %v1614_v17  ;;  %1597 = vmatpush1.bf16.msra.mxu1 %v1614_v17 }
  0x3b   :  { %600 = vmatprep.subr.bf16.mxu0 %v1696_v0  ;;  %1582 = vmatprep.subr.bf16.mxu1 %v1696_v0  ;;  %v1677_v0 = vld [vmem:[%s2155_s0 + $0x110] ss:$12 sps:$4 sm:$0xff]  }
  0x3e   :  { %601 = vmatpush1.bf16.msra.mxu0 %v1615_v18  ;;  %1598 = vmatpush1.bf16.msra.mxu1 %v1615_v18 }
  0x3f   :  { %1515 = vmatprep.subr.bf16.mxu1 %v1622_v19 }
  0x41   :  { %603 = vmatmul.mubr.bf16.vlgmr.msra.gmra.mrb[0].mxu0 %v1616_v20  ;;  %715 = vmatmul.mubr.bf16.vlgmr.msra.gmra.mrb[0].mxu1 %v1619_v21 }
  0x42   :  { %1516 = vmatpush3.bf16.msra.mxu1 %v1622_v19  ;;  %610 = vmatprep.mubr.bf16.mxu0 %v1624_v22 }
  0x43   :  { %1517 = vmatprep.subr.bf16.mxu1 %v1623_v23  ;;  %722 = vmatprep.mubr.bf16.mxu1 %v1626_v24 }
  0x46   :  { %1518 = vmatpush3.bf16.msra.mxu1 %v1623_v23 }
  0x47   :  { %1519 = vmatprep.subr.bf16.mxu1 %v1630_v25 }
  0x49   :  { %611 = vmatmul.mubr.bf16.gmra.mrb[4].mxu0 %v1628_v26  ;;  %723 = vmatmul.mubr.bf16.gmra.mrb[4].mxu1 %v1629_v27 }
  0x4a   :  { %1520 = vmatpush3.bf16.msra.mxu1 %v1630_v25  ;;  %618 = vmatprep.mubr.bf16.mxu0 %v1632_v28 }
  0x4b   :  { %1521 = vmatprep.subr.bf16.mxu1 %v1631_v29  ;;  %730 = vmatprep.mubr.bf16.mxu1 %v1634_v30 }
  0x4e   :  { %1522 = vmatpush3.bf16.msra.mxu1 %v1631_v29 }
  0x4f   :  { %1523 = vmatprep.subr.bf16.mxu1 %v1638_v31 }
  0x51   :  { %619 = vmatmul.mubr.bf16.gmra.mrb[8].mxu0 %v1636_v32  ;;  %731 = vmatmul.mubr.bf16.gmra.mrb[8].mxu1 %v1637_v33 }
  0x52   :  { %1524 = vmatpush3.bf16.msra.mxu1 %v1638_v31  ;;  %626 = vmatprep.mubr.bf16.mxu0 %v1640_v34 }
  0x53   :  { %1525 = vmatprep.subr.bf16.mxu1 %v1639_v35  ;;  %738 = vmatprep.mubr.bf16.mxu1 %v1642_v36 }
  0x56   :  { %1526 = vmatpush3.bf16.msra.mxu1 %v1639_v35 }
  0x57   :  { %1527 = vmatprep.subr.bf16.mxu1 %v1646_v37 }
  0x59   :  { %627 = vmatmul.mubr.bf16.gmra.mrb[12].mxu0 %v1644_v38  ;;  %739 = vmatmul.mubr.bf16.gmra.mrb[12].mxu1 %v1645_v39 }
  0x5a   :  { %1528 = vmatpush3.bf16.msra.mxu1 %v1646_v37  ;;  %634 = vmatprep.mubr.bf16.mxu0 %v1648_v40 }
  0x5b   :  { %1529 = vmatprep.subr.bf16.mxu1 %v1647_v41  ;;  %1531 = vmatprep.mubr.bf16.mxu1 %v1650_v42 }
  0x5e   :  { %1530 = vmatpush3.bf16.msra.mxu1 %v1647_v41 }
  0x61   :  { %635 = vmatmul.mubr.bf16.gmra.mrb[16].mxu0 %v1651_v43  ;;  %1532 = vmatmul.mubr.bf16.vlgmr.msra.gmra.mrb[16].mxu1 %v1652_v44 }
  0x62   :  { %642 = vmatprep.mubr.bf16.mxu0 %v1653_v45  ;;  %1535 = vmatprep.mubr.bf16.mxu1 %v1655_v46 }
  0x69   :  { %643 = vmatmul.mubr.bf16.gmra.mrb[20].mxu0 %v1656_v47  ;;  %1536 = vmatmul.mubr.bf16.gmra.mrb[20].mxu1 %v1657_v48 }
  0x6a   :  { %650 = vmatprep.mubr.bf16.mxu0 %v1658_v49  ;;  %1539 = vmatprep.mubr.bf16.mxu1 %v1660_v50  ;;  %v2007_v49 = vld [vmem:[%s2156_s2] ss:$0 sm:$0xff] }
  0x71   :  { %651 = vmatmul.mubr.bf16.gmra.mrb[24].mxu0 %v1661_v51  ;;  %1540 = vmatmul.mubr.bf16.gmra.mrb[24].mxu1 %v1662_v52 }
  0x72   :  { %658 = vmatprep.mubr.bf16.mxu0 %v1663_v53  ;;  %1543 = vmatprep.mubr.bf16.mxu1 %v1665_v54  ;;  %v2012_v53 = vld [vmem:[%s2157_s3] ss:$0 sm:$0xff] }
  0x79   :  { %659 = vmatmul.mubr.bf16.gmra.mrb[28].mxu0 %v1666_v55  ;;  %1544 = vmatmul.mubr.bf16.gmra.mrb[28].mxu1 %v1667_v56 }
  0x7a   :  { %666 = vmatprep.mubr.bf16.mxu0 %v1668_v57  ;;  %1547 = vmatprep.mubr.bf16.mxu1 %v1670_v58 }
  0x81   :  { %667 = vmatmul.mubr.bf16.gmra.mrb[32].mxu0 %v1671_v59  ;;  %1548 = vmatmul.mubr.bf16.gmra.mrb[32].mxu1 %v1672_v60 }
  0x82   :  { %674 = vmatprep.mubr.bf16.mxu0 %v1673_v61  ;;  %1551 = vmatprep.mubr.bf16.mxu1 %v1675_v62 }
  0x89   :  { %675 = vmatmul.mubr.bf16.gmra.mrb[36].mxu0 %v1676_v63  ;;  %1552 = vmatmul.mubr.bf16.gmra.mrb[36].mxu1 %v1677_v0 }
  0x8a   :  { %682 = vmatprep.mubr.bf16.mxu0 %v1678_v1  ;;  %1555 = vmatprep.mubr.bf16.mxu1 %v1680_v2 }
  0x91   :  { %683 = vmatmul.mubr.bf16.gmra.mrb[40].mxu0 %v1681_v3  ;;  %1556 = vmatmul.mubr.bf16.gmra.mrb[40].mxu1 %v1682_v4 }
  0x92   :  { %690 = vmatprep.mubr.bf16.mxu0 %v1683_v5  ;;  %1559 = vmatprep.mubr.bf16.mxu1 %v1685_v6 }
  0x99   :  { %691 = vmatmul.mubr.bf16.gmra.mrb[44].mxu0 %v1686_v7  ;;  %1560 = vmatmul.mubr.bf16.gmra.mrb[44].mxu1 %v1687_v8 }
  0x9a   :  { %698 = vmatprep.mubr.bf16.mxu0 %v1688_v9  ;;  %1563 = vmatprep.mubr.bf16.mxu1 %v1690_v10 }
  0xa1   :  { %699 = vmatmul.mubr.bf16.gmra.mrb[48].mxu0 %v1691_v11  ;;  %1564 = vmatmul.mubr.bf16.gmra.mrb[48].mxu1 %v1692_v12 }
  0xa2   :  { %706 = vmatprep.mubr.bf16.mxu0 %v1693_v13 }
  0xa9   :  { %707 = vmatmul.mubr.bf16.gmra.mrb[52].mxu0 %v1695_v14 }
 0x114   :  { %v604_v15 = vpop.f32.mrb[0].mxu0  ;;  %v1988_v16 = vpop.f32.mrb[0].mxu1 }
 0x115   :  { %v606_v17 = vpop.f32.mrb[1].mxu0  ;;  %v718_v18 = vpop.f32.mrb[1].mxu1 }
 0x116   :  { %v607_v19 = vpop.f32.mrb[2].mxu0  ;;  %v1990_v20 = vpop.f32.mrb[2].mxu1 }
 0x117   :  { %v609_v21 = vpop.f32.mrb[3].mxu0  ;;  %v721_v22 = vpop.f32.mrb[3].mxu1 }
 0x11c   :  { %v612_v23 = vpop.f32.mrb[4].mxu0  ;;  %v1992_v24 = vpop.f32.mrb[4].mxu1 }
 0x11d   :  { %v614_v25 = vpop.f32.mrb[5].mxu0  ;;  %v726_v26 = vpop.f32.mrb[5].mxu1 }
 0x11e   :  { %v615_v27 = vpop.f32.mrb[6].mxu0  ;;  %v1994_v28 = vpop.f32.mrb[6].mxu1 }
 0x11f   :  { %v617_v29 = vpop.f32.mrb[7].mxu0  ;;  %v729_v30 = vpop.f32.mrb[7].mxu1 }
 0x124   :  { %v620_v31 = vpop.f32.mrb[8].mxu0  ;;  %v1996_v32 = vpop.f32.mrb[8].mxu1 }
 0x125   :  { %v622_v33 = vpop.f32.mrb[9].mxu0  ;;  %v734_v34 = vpop.f32.mrb[9].mxu1 }
 0x126   :  { %v623_v35 = vpop.f32.mrb[10].mxu0  ;;  %v1998_v36 = vpop.f32.mrb[10].mxu1 }
 0x127   :  { %v625_v37 = vpop.f32.mrb[11].mxu0  ;;  %v737_v38 = vpop.f32.mrb[11].mxu1 }
 0x12c   :  { %v628_v39 = vpop.f32.mrb[12].mxu0  ;;  %v2000_v40 = vpop.f32.mrb[12].mxu1 }
 0x12d   :  { %v630_v41 = vpop.f32.mrb[13].mxu0  ;;  %v742_v42 = vpop.f32.mrb[13].mxu1 }
 0x12e   :  { %v631_v43 = vpop.f32.mrb[14].mxu0  ;;  %v2002_v44 = vpop.f32.mrb[14].mxu1 }
 0x12f   :  { %v633_v45 = vpop.f32.mrb[15].mxu0  ;;  %v745_v46 = vpop.f32.mrb[15].mxu1 }
 0x134   :  { %v636_v47 = vpop.f32.mrb[16].mxu0  ;;  %v1533_v48 = vpop.f32.mrb[16].mxu1 }
 0x135   :  { %v790_v50 = vadd.f32 %v1533_v48, %v612_v23  ;;  %v638_v51 = vpop.f32.mrb[17].mxu0  ;;  %v781_v52 = vpop.f32.mrb[17].mxu1 }
 0x136   :  { %v782_v54 = vadd.f32 %v781_v52, %v604_v15  ;;  %v639_v55 = vpop.f32.mrb[18].mxu0  ;;  %v1534_v56 = vpop.f32.mrb[18].mxu1 }
 0x137   :  { %v933_v57 = vmul.f32 %v2007_v49, %v790_v50  ;;  %v793_v58 = vadd.f32 %v1534_v56, %v615_v27  ;;  %v641_v59 = vpop.f32.mrb[19].mxu0  ;;  %v784_v60 = vpop.f32.mrb[19].mxu1 }
 0x138   :  { %v931_v61 = vmul.f32 %v2007_v49, %v782_v54  ;;  %v785_v62 = vadd.f32 %v784_v60, %v607_v19 }
 0x139   :  { %v976_v63 = vadd.f32 %v2012_v53, %v933_v57  ;;  %v934_v0 = vmul.f32 %v2007_v49, %v793_v58 }
 0x13a   :  { %v974_v1 = vadd.f32 %v2012_v53, %v931_v61  ;;  %v932_v2 = vmul.f32 %v2007_v49, %v785_v62 }
 0x13b   :  { %v977_v3 = vadd.f32 %v2012_v53, %v934_v0  ;;  %v1012_v7 = vmax.f32 %v976_v63, 0.0 }
 0x13c   :  { %v975_v4 = vadd.f32 %v2012_v53, %v932_v2  ;;  %v644_v5 = vpop.f32.mrb[20].mxu0  ;;  %v1537_v6 = vpop.f32.mrb[20].mxu1  ;;  %v1010_v12 = vmax.f32 %v974_v1, 0.0 }
 0x13d   :  { %v1013_v8 = vmax.f32 %v977_v3, 0.0  ;;  %v806_v9 = vadd.f32 %v1537_v6, %v628_v39  ;;  %v646_v10 = vpop.f32.mrb[21].mxu0  ;;  %v797_v11 = vpop.f32.mrb[21].mxu1 }
 0x13e   :  { %v1011_v13 = vmax.f32 %v975_v4, 0.0  ;;  %v798_v14 = vadd.f32 %v797_v11, %v620_v31  ;;  %v647_v15 = vpop.f32.mrb[22].mxu0  ;;  %v1538_v17 = vpop.f32.mrb[22].mxu1 }
 0x13f   :  { %v1390_v18 = vpack.c.bf16 %v1013_v8, %v1012_v7  ;;  %v937_v19 = vmul.f32 %v2007_v49, %v806_v9  ;;  %v809_v21 = vadd.f32 %v1538_v17, %v631_v43  ;;  %v649_v22 = vpop.f32.mrb[23].mxu0  ;;  %v800_v23 = vpop.f32.mrb[23].mxu1 }
 0x140   :  { %v1385_v25 = vpack.c.bf16 %v1011_v13, %v1010_v12  ;;  %v935_v26 = vmul.f32 %v2007_v49, %v798_v14  ;;  %v801_v27 = vadd.f32 %v800_v23, %v623_v35 }
 0x141   :  { %1472 = vst [vmem:[%s2158_s4 + $0x8] sm:$0xff] %v1390_v18   ;;  %v980_v29 = vadd.f32 %v2012_v53, %v937_v19  ;;  %v938_v30 = vmul.f32 %v2007_v49, %v809_v21 }
 0x142   :  { %1386 = vst [vmem:[%s2158_s4] sm:$0xff] %v1385_v25   ;;  %v978_v31 = vadd.f32 %v2012_v53, %v935_v26  ;;  %v936_v33 = vmul.f32 %v2007_v49, %v801_v27 }
 0x143   :  { %v981_v34 = vadd.f32 %v2012_v53, %v938_v30  ;;  %v1016_v39 = vmax.f32 %v980_v29, 0.0 }
 0x144   :  { %v979_v35 = vadd.f32 %v2012_v53, %v936_v33  ;;  %v652_v37 = vpop.f32.mrb[24].mxu0  ;;  %v1541_v38 = vpop.f32.mrb[24].mxu1  ;;  %v1014_v46 = vmax.f32 %v978_v31, 0.0 }
 0x145   :  { %v1017_v41 = vmax.f32 %v981_v34, 0.0  ;;  %v822_v42 = vadd.f32 %v1541_v38, %v644_v5  ;;  %v654_v43 = vpop.f32.mrb[25].mxu0  ;;  %v813_v45 = vpop.f32.mrb[25].mxu1 }
 0x146   :  { %v1015_v48 = vmax.f32 %v979_v35, 0.0  ;;  %v814_v50 = vadd.f32 %v813_v45, %v636_v47  ;;  %v655_v51 = vpop.f32.mrb[26].mxu0  ;;  %v1542_v52 = vpop.f32.mrb[26].mxu1 }
 0x147   :  { %v1400_v54 = vpack.c.bf16 %v1017_v41, %v1016_v39  ;;  %v941_v56 = vmul.f32 %v2007_v49, %v822_v42  ;;  %v825_v57 = vadd.f32 %v1542_v52, %v647_v15  ;;  %v657_v58 = vpop.f32.mrb[27].mxu0  ;;  %v816_v59 = vpop.f32.mrb[27].mxu1 }
 0x148   :  { %v1395_v60 = vpack.c.bf16 %v1015_v48, %v1014_v46  ;;  %v939_v61 = vmul.f32 %v2007_v49, %v814_v50  ;;  %v817_v62 = vadd.f32 %v816_v59, %v639_v55 }
 0x149   :  { %1474 = vst [vmem:[%s2158_s4 + $0x18] sm:$0xff] %v1400_v54   ;;  %v984_v63 = vadd.f32 %v2012_v53, %v941_v56  ;;  %v942_v47 = vmul.f32 %v2007_v49, %v825_v57 }
 0x14a   :  { %1473 = vst [vmem:[%s2158_s4 + $0x10] sm:$0xff] %v1395_v60   ;;  %v982_v0 = vadd.f32 %v2012_v53, %v939_v61  ;;  %v940_v1 = vmul.f32 %v2007_v49, %v817_v62 }
 0x14b   :  { %v985_v2 = vadd.f32 %v2012_v53, %v942_v47  ;;  %v1020_v5 = vmax.f32 %v984_v63, 0.0 }
 0x14c   :  { %v983_v55 = vadd.f32 %v2012_v53, %v940_v1  ;;  %v660_v3 = vpop.f32.mrb[28].mxu0  ;;  %v1545_v4 = vpop.f32.mrb[28].mxu1  ;;  %v1018_v10 = vmax.f32 %v982_v0, 0.0 }
 0x14d   :  { %v1021_v6 = vmax.f32 %v985_v2, 0.0  ;;  %v838_v7 = vadd.f32 %v1545_v4, %v660_v3  ;;  %v662_v8 = vpop.f32.mrb[29].mxu0  ;;  %v829_v9 = vpop.f32.mrb[29].mxu1 }
 0x14e   :  { %v1019_v11 = vmax.f32 %v983_v55, 0.0  ;;  %v830_v12 = vadd.f32 %v829_v9, %v652_v37  ;;  %v663_v13 = vpop.f32.mrb[30].mxu0  ;;  %v1546_v14 = vpop.f32.mrb[30].mxu1 }
 0x14f   :  { %v1410_v15 = vpack.c.bf16 %v1021_v6, %v1020_v5  ;;  %v945_v17 = vmul.f32 %v2007_v49, %v838_v7  ;;  %v841_v18 = vadd.f32 %v1546_v14, %v663_v13  ;;  %v665_v19 = vpop.f32.mrb[31].mxu0  ;;  %v832_v21 = vpop.f32.mrb[31].mxu1 }
 0x150   :  { %v1405_v22 = vpack.c.bf16 %v1019_v11, %v1018_v10  ;;  %v943_v23 = vmul.f32 %v2007_v49, %v830_v12  ;;  %v833_v25 = vadd.f32 %v832_v21, %v655_v51 }
 0x151   :  { %1476 = vst [vmem:[%s2158_s4 + $0x28] sm:$0xff] %v1410_v15   ;;  %v988_v26 = vadd.f32 %v2012_v53, %v945_v17  ;;  %v946_v27 = vmul.f32 %v2007_v49, %v841_v18 }
 0x152   :  { %1475 = vst [vmem:[%s2158_s4 + $0x20] sm:$0xff] %v1405_v22   ;;  %v986_v29 = vadd.f32 %v2012_v53, %v943_v23  ;;  %v944_v30 = vmul.f32 %v2007_v49, %v833_v25 }
 0x153   :  { %v989_v31 = vadd.f32 %v2012_v53, %v946_v27  ;;  %v1024_v37 = vmax.f32 %v988_v26, 0.0 }
 0x154   :  { %v987_v33 = vadd.f32 %v2012_v53, %v944_v30  ;;  %v668_v34 = vpop.f32.mrb[32].mxu0  ;;  %v1549_v35 = vpop.f32.mrb[32].mxu1  ;;  %v1022_v42 = vmax.f32 %v986_v29, 0.0 }
 0x155   :  { %v1025_v38 = vmax.f32 %v989_v31, 0.0  ;;  %v670_v39 = vpop.f32.mrb[33].mxu0  ;;  %v845_v41 = vpop.f32.mrb[33].mxu1 }
 0x156   :  { %v1023_v43 = vmax.f32 %v987_v33, 0.0  ;;  %v846_v45 = vadd.f32 %v845_v41, %v668_v34  ;;  %v671_v46 = vpop.f32.mrb[34].mxu0  ;;  %v1550_v48 = vpop.f32.mrb[34].mxu1 }
 0x157   :  { %v1420_v50 = vpack.c.bf16 %v1025_v38, %v1024_v37  ;;  %v673_v51 = vpop.f32.mrb[35].mxu0  ;;  %v848_v52 = vpop.f32.mrb[35].mxu1 }
 0x158   :  { %v1415_v54 = vpack.c.bf16 %v1023_v43, %v1022_v42  ;;  %v947_v56 = vmul.f32 %v2007_v49, %v846_v45  ;;  %v849_v57 = vadd.f32 %v848_v52, %v671_v46 }
 0x159   :  { %1478 = vst [vmem:[%s2158_s4 + $0x38] sm:$0xff] %v1420_v50  }
 0x15a   :  { %1477 = vst [vmem:[%s2158_s4 + $0x30] sm:$0xff] %v1415_v54   ;;  %v990_v58 = vadd.f32 %v2012_v53, %v947_v56  ;;  %v948_v59 = vmul.f32 %v2007_v49, %v849_v57 }
 0x15c   :  { %v991_v60 = vadd.f32 %v2012_v53, %v948_v59  ;;  %v676_v61 = vpop.f32.mrb[36].mxu0  ;;  %v1553_v62 = vpop.f32.mrb[36].mxu1  ;;  %v1026_v1 = vmax.f32 %v990_v58, 0.0 }
 0x15d   :  { %v854_v63 = vadd.f32 %v1549_v35, %v676_v61  ;;  %v678_v47 = vpop.f32.mrb[37].mxu0  ;;  %v861_v0 = vpop.f32.mrb[37].mxu1 }
 0x15e   :  { %v1027_v2 = vmax.f32 %v991_v60, 0.0  ;;  %v679_v55 = vpop.f32.mrb[38].mxu0  ;;  %v1554_v3 = vpop.f32.mrb[38].mxu1 }
 0x15f   :  { %v949_v4 = vmul.f32 %v2007_v49, %v854_v63  ;;  %v857_v5 = vadd.f32 %v1550_v48, %v679_v55  ;;  %v681_v6 = vpop.f32.mrb[39].mxu0  ;;  %v864_v7 = vpop.f32.mrb[39].mxu1 }
 0x160   :  { %v1425_v8 = vpack.c.bf16 %v1027_v2, %v1026_v1 }
 0x161   :  { %v992_v9 = vadd.f32 %v2012_v53, %v949_v4  ;;  %v950_v10 = vmul.f32 %v2007_v49, %v857_v5 }
 0x162   :  { %1479 = vst [vmem:[%s2158_s4 + $0x40] sm:$0xff] %v1425_v8  }
 0x163   :  { %v993_v11 = vadd.f32 %v2012_v53, %v950_v10  ;;  %v1028_v14 = vmax.f32 %v992_v9, 0.0 }
 0x164   :  { %v684_v12 = vpop.f32.mrb[40].mxu0  ;;  %v2081_v13 = vpop.f32.mrb[40].mxu1 }
 0x165   :  { %v1029_v15 = vmax.f32 %v993_v11, 0.0  ;;  %v862_v17 = vadd.f32 %v861_v0, %v684_v12  ;;  %v686_v18 = vpop.f32.mrb[41].mxu0  ;;  %v877_v19 = vpop.f32.mrb[41].mxu1 }
 0x166   :  { %v687_v21 = vpop.f32.mrb[42].mxu0  ;;  %v2083_v22 = vpop.f32.mrb[42].mxu1 }
 0x167   :  { %v1430_v23 = vpack.c.bf16 %v1029_v15, %v1028_v14  ;;  %v951_v25 = vmul.f32 %v2007_v49, %v862_v17  ;;  %v865_v26 = vadd.f32 %v864_v7, %v687_v21  ;;  %v689_v27 = vpop.f32.mrb[43].mxu0  ;;  %v880_v29 = vpop.f32.mrb[43].mxu1 }
 0x169   :  { %1480 = vst [vmem:[%s2158_s4 + $0x48] sm:$0xff] %v1430_v23   ;;  %v994_v30 = vadd.f32 %v2012_v53, %v951_v25  ;;  %v952_v31 = vmul.f32 %v2007_v49, %v865_v26 }
 0x16b   :  { %v995_v33 = vadd.f32 %v2012_v53, %v952_v31  ;;  %v1030_v37 = vmax.f32 %v994_v30, 0.0 }
 0x16c   :  { %v692_v34 = vpop.f32.mrb[44].mxu0  ;;  %v1561_v35 = vpop.f32.mrb[44].mxu1 }
 0x16d   :  { %v1031_v38 = vmax.f32 %v995_v33, 0.0  ;;  %v870_v39 = vadd.f32 %v1553_v62, %v692_v34  ;;  %v902_v41 = vadd.f32 %v1561_v35, %v1992_v24  ;;  %v694_v42 = vpop.f32.mrb[45].mxu0  ;;  %v893_v43 = vpop.f32.mrb[45].mxu1 }
 0x16e   :  { %v894_v45 = vadd.f32 %v893_v43, %v1988_v16  ;;  %v695_v46 = vpop.f32.mrb[46].mxu0  ;;  %v1562_v48 = vpop.f32.mrb[46].mxu1 }
 0x16f   :  { %v1435_v50 = vpack.c.bf16 %v1031_v38, %v1030_v37  ;;  %v953_v51 = vmul.f32 %v2007_v49, %v870_v39  ;;  %v961_v52 = vmul.f32 %v2007_v49, %v902_v41  ;;  %v873_v54 = vadd.f32 %v1554_v3, %v695_v46  ;;  %v697_v56 = vpop.f32.mrb[47].mxu0  ;;  %v896_v57 = vpop.f32.mrb[47].mxu1 }
 0x170   :  { %v959_v58 = vmul.f32 %v2007_v49, %v894_v45  ;;  %v905_v59 = vadd.f32 %v1562_v48, %v1994_v28  ;;  %v897_v24 = vadd.f32 %v896_v57, %v1990_v20 }
 0x171   :  { %1481 = vst [vmem:[%s2158_s4 + $0x50] sm:$0xff] %v1435_v50   ;;  %v996_v16 = vadd.f32 %v2012_v53, %v953_v51  ;;  %v1004_v60 = vadd.f32 %v2012_v53, %v961_v52  ;;  %v954_v61 = vmul.f32 %v2007_v49, %v873_v54 }
 0x172   :  { %v1002_v62 = vadd.f32 %v2012_v53, %v959_v58  ;;  %v962_v63 = vmul.f32 %v2007_v49, %v905_v59  ;;  %v960_v47 = vmul.f32 %v2007_v49, %v897_v24 }
 0x173   :  { %v997_v28 = vadd.f32 %v2012_v53, %v954_v61  ;;  %v1032_v0 = vmax.f32 %v996_v16, 0.0  ;;  %v1040_v3 = vmax.f32 %v1004_v60, 0.0 }
 0x174   :  { %v1005_v20 = vadd.f32 %v2012_v53, %v962_v63  ;;  %v1003_v1 = vadd.f32 %v2012_v53, %v960_v47  ;;  %v700_v2 = vpop.f32.mrb[48].mxu0  ;;  %v1565_v55 = vpop.f32.mrb[48].mxu1  ;;  %v1038_v9 = vmax.f32 %v1002_v62, 0.0 }
 0x175   :  { %v1033_v4 = vmax.f32 %v997_v28, 0.0  ;;  %v878_v5 = vadd.f32 %v877_v19, %v700_v2  ;;  %v918_v6 = vadd.f32 %v1565_v55, %v2000_v40  ;;  %v702_v7 = vpop.f32.mrb[49].mxu0  ;;  %v909_v8 = vpop.f32.mrb[49].mxu1 }
 0x176   :  { %v1041_v10 = vmax.f32 %v1005_v20, 0.0  ;;  %v1039_v11 = vmax.f32 %v1003_v1, 0.0  ;;  %v910_v12 = vadd.f32 %v909_v8, %v1996_v32  ;;  %v703_v14 = vpop.f32.mrb[50].mxu0  ;;  %v1566_v15 = vpop.f32.mrb[50].mxu1 }
 0x177   :  { %v1440_v17 = vpack.c.bf16 %v1033_v4, %v1032_v0  ;;  %v955_v18 = vmul.f32 %v2007_v49, %v878_v5  ;;  %v965_v21 = vmul.f32 %v2007_v49, %v918_v6  ;;  %v881_v23 = vadd.f32 %v880_v29, %v703_v14  ;;  %v705_v25 = vpop.f32.mrb[51].mxu0  ;;  %v912_v26 = vpop.f32.mrb[51].mxu1 }
 0x178   :  { %v1460_v19 = vpack.c.bf16 %v1041_v10, %v1040_v3  ;;  %v1455_v27 = vpack.c.bf16 %v1039_v11, %v1038_v9  ;;  %v963_v40 = vmul.f32 %v2007_v49, %v910_v12  ;;  %v921_v30 = vadd.f32 %v1566_v15, %v2002_v44 }
 0x179   :  { %1482 = vst [vmem:[%s2158_s4 + $0x58] sm:$0xff] %v1440_v17   ;;  %v998_v32 = vadd.f32 %v2012_v53, %v955_v18  ;;  %v956_v31 = vmul.f32 %v2007_v49, %v881_v23  ;;  %v913_v33 = vadd.f32 %v912_v26, %v1998_v36  ;;  %v1008_v44 = vadd.f32 %v2012_v53, %v965_v21 }
 0x17a   :  { %1486 = vst [vmem:[%s2158_s4 + $0x78] sm:$0xff] %v1460_v19   ;;  %1485 = vst [vmem:[%s2158_s4 + $0x70] sm:$0xff] %v1455_v27   ;;  %v1006_v29 = vadd.f32 %v2012_v53, %v963_v40  ;;  %v966_v34 = vmul.f32 %v2007_v49, %v921_v30 }
 0x17b   :  { %v999_v35 = vadd.f32 %v2012_v53, %v956_v31  ;;  %v964_v37 = vmul.f32 %v2007_v49, %v913_v33  ;;  %v1034_v39 = vmax.f32 %v998_v32, 0.0  ;;  %v1044_v46 = vmax.f32 %v1008_v44, 0.0 }
 0x17c   :  { %v1009_v36 = vadd.f32 %v2012_v53, %v966_v34  ;;  %v708_v38 = vpop.f32.mrb[52].mxu0  ;;  %v1042_v48 = vmax.f32 %v1006_v29, 0.0 }
 0x17d   :  { %v1035_v41 = vmax.f32 %v999_v35, 0.0  ;;  %v1007_v42 = vadd.f32 %v2012_v53, %v964_v37  ;;  %v886_v43 = vadd.f32 %v2081_v13, %v708_v38  ;;  %v710_v45 = vpop.f32.mrb[53].mxu0 }
 0x17e   :  { %v1045_v50 = vmax.f32 %v1009_v36, 0.0  ;;  %v711_v51 = vpop.f32.mrb[54].mxu0 }
 0x17f   :  { %v1445_v52 = vpack.c.bf16 %v1035_v41, %v1034_v39  ;;  %v1043_v54 = vmax.f32 %v1007_v42, 0.0  ;;  %v957_v56 = vmul.f32 %v2007_v49, %v886_v43  ;;  %v889_v57 = vadd.f32 %v2083_v22, %v711_v51  ;;  %v713_v58 = vpop.f32.mrb[55].mxu0 }
 0x180   :  { %v1470_v59 = vpack.c.bf16 %v1045_v50, %v1044_v46 }
 0x181   :  { %1483 = vst [vmem:[%s2158_s4 + $0x60] sm:$0xff] %v1445_v52   ;;  %v1465_v24 = vpack.c.bf16 %v1043_v54, %v1042_v48  ;;  %v1000_v13 = vadd.f32 %v2012_v53, %v957_v56  ;;  %v958_v16 = vmul.f32 %v2007_v49, %v889_v57 }
 0x182   :  { %1488 = vst [vmem:[%s2158_s4 + $0x88] sm:$0xff] %v1470_v59  }
 0x183   :  { %1487 = vst [vmem:[%s2158_s4 + $0x80] sm:$0xff] %v1465_v24   ;;  %v1001_v22 = vadd.f32 %v2012_v53, %v958_v16  ;;  %v1036_v60 = vmax.f32 %v1000_v13, 0.0 }
 0x185   :  { %v1037_v61 = vmax.f32 %v1001_v22, 0.0 }
 0x187   :  { %v1450_v62 = vpack.c.bf16 %v1037_v61, %v1036_v60 }
 0x189   :  { %1484 = vst [vmem:[%s2158_s4 + $0x68] sm:$0xff] %v1450_v62  }

// kernel: forward.9
= control target key start
LH: loop header
LB: loop body
LE: loop exit
PB: predicated region body
PF: predicated region fallthrough
CT: control target
= control target key end

     0   :  { %s2347_s1 = inlined_call_operand.vmem [shape: bf16[2048,128], index: 1, kind: input, shape index: {}]   ;;  %s2348_s0 = inlined_call_operand.vmem [shape: bf16[8,2048], index: 0, kind: input, shape index: {}]   ;;  %s2349_s2 = inlined_call_operand.vmem [shape: f32[1,128], index: 2, kind: input, shape index: {}]   ;;  %s2350_s3 = inlined_call_operand.vmem [shape: f32[8,128], index: 3, kind: output, shape index: {}]  }
   0x1   :  { %v1765_v0 = vld [vmem:[%s2347_s1 + $0x40] sm:$0xff]   ;;  %v1769_v4 = vld [vmem:[%s2347_s1 + $0x48] sm:$0xff]   ;;  %v1773_v8 = vld [vmem:[%s2347_s1 + $0x50] sm:$0xff]  }
   0x2   :  { %v1766_v1 = vld [vmem:[%s2347_s1 + $0xc0] sm:$0xff]   ;;  %1589 = vmatprep.subr.bf16.mxu0 %v1765_v0  ;;  %v1770_v5 = vld [vmem:[%s2347_s1 + $0xc8] sm:$0xff]   ;;  %v1774_v9 = vld [vmem:[%s2347_s1 + $0xd0] sm:$0xff]  }
   0x3   :  { %v1767_v2 = vld [vmem:[%s2347_s1] sm:$0xff]   ;;  %1611 = vmatprep.subr.bf16.mxu1 %v1766_v1  ;;  %v1771_v6 = vld [vmem:[%s2347_s1 + $0x8] sm:$0xff]   ;;  %v1775_v10 = vld [vmem:[%s2347_s1 + $0x10] sm:$0xff]  }
   0x4   :  { %v1768_v3 = vld [vmem:[%s2347_s1 + $0x80] sm:$0xff]   ;;  %1590 = vmatpush3.bf16.msra.mxu0 %v1767_v2  ;;  %v1772_v7 = vld [vmem:[%s2347_s1 + $0x88] sm:$0xff]   ;;  %v1776_v11 = vld [vmem:[%s2347_s1 + $0x90] sm:$0xff]  }
   0x5   :  { %1612 = vmatpush3.bf16.msra.mxu1 %v1768_v3  ;;  %1591 = vmatprep.subr.bf16.mxu0 %v1769_v4  ;;  %v1777_v12 = vld [vmem:[%s2347_s1 + $0x58] sm:$0xff]   ;;  %v1781_v16 = vld [vmem:[%s2347_s1 + $0x60] sm:$0xff]   ;;  %v1785_v20 = vld [vmem:[%s2347_s1 + $0x68] sm:$0xff]  }
   0x6   :  { %1613 = vmatprep.subr.bf16.mxu1 %v1770_v5  ;;  %v1778_v13 = vld [vmem:[%s2347_s1 + $0xd8] sm:$0xff]   ;;  %v1782_v17 = vld [vmem:[%s2347_s1 + $0xe0] sm:$0xff]   ;;  %v1786_v21 = vld [vmem:[%s2347_s1 + $0xe8] sm:$0xff]  }
   0x7   :  { %v1779_v14 = vld [vmem:[%s2347_s1 + $0x18] sm:$0xff]   ;;  %v1783_v18 = vld [vmem:[%s2347_s1 + $0x20] sm:$0xff]   ;;  %v1787_v22 = vld [vmem:[%s2347_s1 + $0x28] sm:$0xff]  }
   0x8   :  { %1592 = vmatpush3.bf16.msra.mxu0 %v1771_v6  ;;  %v1780_v15 = vld [vmem:[%s2347_s1 + $0x98] sm:$0xff]   ;;  %v1784_v19 = vld [vmem:[%s2347_s1 + $0xa0] sm:$0xff]   ;;  %v1788_v23 = vld [vmem:[%s2347_s1 + $0xa8] sm:$0xff]  }
   0x9   :  { %1614 = vmatpush3.bf16.msra.mxu1 %v1772_v7  ;;  %1593 = vmatprep.subr.bf16.mxu0 %v1773_v8  ;;  %v1789_v24 = vld [vmem:[%s2347_s1 + $0x70] sm:$0xff]   ;;  %v1793_v28 = vld [vmem:[%s2347_s1 + $0x78] sm:$0xff]   ;;  %v15_v32 = vld [vmem:[%s2348_s0] sm:$0xff] }
   0xa   :  { %1615 = vmatprep.subr.bf16.mxu1 %v1774_v9  ;;  %v1790_v25 = vld [vmem:[%s2347_s1 + $0xf0] sm:$0xff]   ;;  %v1794_v29 = vld [vmem:[%s2347_s1 + $0xf8] sm:$0xff]   ;;  %v16_v33 = vld [vmem:[%s2348_s0 + $0x8] sm:$0xff]  ;;  %v1445_v34 = vcombine.low %v15_v32, %v15_v32  ;;  %v1446_v35 = vcombine.high %v15_v32, %v15_v32 }
   0xb   :  { %v1791_v26 = vld [vmem:[%s2347_s1 + $0x30] sm:$0xff]   ;;  %v1795_v30 = vld [vmem:[%s2347_s1 + $0x38] sm:$0xff]   ;;  %v1447_v36 = vcombine.low %v16_v33, %v16_v33  ;;  %v1448_v37 = vcombine.high %v16_v33, %v16_v33  ;;  %v1801_v38 = vld [vmem:[%s2347_s1 + $0x140] sm:$0xff]  }
   0xc   :  { %1594 = vmatpush3.bf16.msra.mxu0 %v1775_v10  ;;  %v1792_v27 = vld [vmem:[%s2347_s1 + $0xb0] sm:$0xff]   ;;  %v1796_v31 = vld [vmem:[%s2347_s1 + $0xb8] sm:$0xff]   ;;  %v1802_v39 = vld [vmem:[%s2347_s1 + $0x1c0] sm:$0xff]   ;;  %1142 = vmatprep.mubr.bf16.mxu0 %v1446_v35 }
   0xd   :  { %1616 = vmatpush3.bf16.msra.mxu1 %v1776_v11  ;;  %1595 = vmatprep.subr.bf16.mxu0 %v1777_v12  ;;  %v1803_v40 = vld [vmem:[%s2347_s1 + $0x100] sm:$0xff]   ;;  %v1805_v42 = vld [vmem:[%s2347_s1 + $0x148] sm:$0xff]   ;;  %v1809_v46 = vld [vmem:[%s2347_s1 + $0x150] sm:$0xff]  }
   0xe   :  { %1617 = vmatprep.subr.bf16.mxu1 %v1778_v13  ;;  %1182 = vmatprep.mubr.bf16.mxu1 %v1448_v37  ;;  %v1804_v41 = vld [vmem:[%s2347_s1 + $0x180] sm:$0xff]   ;;  %v1806_v43 = vld [vmem:[%s2347_s1 + $0x1c8] sm:$0xff]   ;;  %v1810_v47 = vld [vmem:[%s2347_s1 + $0x1d0] sm:$0xff]  }
   0xf   :  { %v1807_v44 = vld [vmem:[%s2347_s1 + $0x108] sm:$0xff]   ;;  %v1811_v48 = vld [vmem:[%s2347_s1 + $0x110] sm:$0xff]   ;;  %v1813_v50 = vld [vmem:[%s2347_s1 + $0x158] sm:$0xff]  }
  0x10   :  { %1596 = vmatpush3.bf16.msra.mxu0 %v1779_v14  ;;  %v1808_v45 = vld [vmem:[%s2347_s1 + $0x188] sm:$0xff]   ;;  %v1812_v49 = vld [vmem:[%s2347_s1 + $0x190] sm:$0xff]   ;;  %v1814_v51 = vld [vmem:[%s2347_s1 + $0x1d8] sm:$0xff]  }
  0x11   :  { %1618 = vmatpush3.bf16.msra.mxu1 %v1780_v15  ;;  %1597 = vmatprep.subr.bf16.mxu0 %v1781_v16  ;;  %v1815_v52 = vld [vmem:[%s2347_s1 + $0x118] sm:$0xff]   ;;  %v1817_v54 = vld [vmem:[%s2347_s1 + $0x160] sm:$0xff]   ;;  %v1821_v58 = vld [vmem:[%s2347_s1 + $0x168] sm:$0xff]  }
  0x12   :  { %1619 = vmatprep.subr.bf16.mxu1 %v1782_v17  ;;  %v1816_v53 = vld [vmem:[%s2347_s1 + $0x198] sm:$0xff]   ;;  %v1818_v55 = vld [vmem:[%s2347_s1 + $0x1e0] sm:$0xff]   ;;  %v1822_v59 = vld [vmem:[%s2347_s1 + $0x1e8] sm:$0xff]  }
  0x13   :  { %v1819_v56 = vld [vmem:[%s2347_s1 + $0x120] sm:$0xff]   ;;  %v1823_v60 = vld [vmem:[%s2347_s1 + $0x128] sm:$0xff]   ;;  %v1825_v62 = vld [vmem:[%s2347_s1 + $0x170] sm:$0xff]  }
  0x14   :  { %1598 = vmatpush3.bf16.msra.mxu0 %v1783_v18  ;;  %v1820_v57 = vld [vmem:[%s2347_s1 + $0x1a0] sm:$0xff]   ;;  %v1824_v61 = vld [vmem:[%s2347_s1 + $0x1a8] sm:$0xff]   ;;  %v1826_v63 = vld [vmem:[%s2347_s1 + $0x1f0] sm:$0xff]  }
  0x15   :  { %1620 = vmatpush3.bf16.msra.mxu1 %v1784_v19  ;;  %1599 = vmatprep.subr.bf16.mxu0 %v1785_v20  ;;  %v1827_v0 = vld [vmem:[%s2347_s1 + $0x130] sm:$0xff]   ;;  %v1829_v2 = vld [vmem:[%s2347_s1 + $0x178] sm:$0xff]   ;;  %v1837_v12 = vld [vmem:[%s2347_s1 + $0x240] sm:$0xff]  }
  0x16   :  { %1621 = vmatprep.subr.bf16.mxu1 %v1786_v21  ;;  %v1828_v1 = vld [vmem:[%s2347_s1 + $0x1b0] sm:$0xff]   ;;  %v1830_v3 = vld [vmem:[%s2347_s1 + $0x1f8] sm:$0xff]   ;;  %v1838_v13 = vld [vmem:[%s2347_s1 + $0x2c0] sm:$0xff]  }
  0x17   :  { %v1831_v4 = vld [vmem:[%s2347_s1 + $0x138] sm:$0xff]   ;;  %v17_v6 = vld [vmem:[%s2348_s0 + $0x10] sm:$0xff]  ;;  %v1839_v14 = vld [vmem:[%s2347_s1 + $0x200] sm:$0xff]  }
  0x18   :  { %1600 = vmatpush3.bf16.msra.mxu0 %v1787_v22  ;;  %v1832_v5 = vld [vmem:[%s2347_s1 + $0x1b8] sm:$0xff]   ;;  %v1449_v7 = vcombine.low %v17_v6, %v17_v6  ;;  %v1450_v8 = vcombine.high %v17_v6, %v17_v6  ;;  %v1840_v15 = vld [vmem:[%s2347_s1 + $0x280] sm:$0xff]   ;;  %v1841_v16 = vld [vmem:[%s2347_s1 + $0x248] sm:$0xff]  }
  0x19   :  { %1622 = vmatpush3.bf16.msra.mxu1 %v1788_v23  ;;  %1601 = vmatprep.subr.bf16.mxu0 %v1789_v24  ;;  %v18_v9 = vld [vmem:[%s2348_s0 + $0x18] sm:$0xff]  ;;  %v1842_v17 = vld [vmem:[%s2347_s1 + $0x2c8] sm:$0xff]   ;;  %v1845_v20 = vld [vmem:[%s2347_s1 + $0x250] sm:$0xff]  }
  0x1a   :  { %1623 = vmatprep.subr.bf16.mxu1 %v1790_v25  ;;  %v1451_v10 = vcombine.low %v18_v9, %v18_v9  ;;  %v1452_v11 = vcombine.high %v18_v9, %v18_v9  ;;  %v1843_v18 = vld [vmem:[%s2347_s1 + $0x208] sm:$0xff]   ;;  %v1846_v21 = vld [vmem:[%s2347_s1 + $0x2d0] sm:$0xff]   ;;  %v1849_v24 = vld [vmem:[%s2347_s1 + $0x258] sm:$0xff]  }
  0x1b   :  { %v1844_v19 = vld [vmem:[%s2347_s1 + $0x288] sm:$0xff]   ;;  %v1847_v22 = vld [vmem:[%s2347_s1 + $0x210] sm:$0xff]   ;;  %v1850_v25 = vld [vmem:[%s2347_s1 + $0x2d8] sm:$0xff]  }
  0x1c   :  { %1602 = vmatpush3.bf16.msra.mxu0 %v1791_v26  ;;  %v1848_v23 = vld [vmem:[%s2347_s1 + $0x290] sm:$0xff]   ;;  %v1851_v26 = vld [vmem:[%s2347_s1 + $0x218] sm:$0xff]   ;;  %v1857_v32 = vld [vmem:[%s2347_s1 + $0x268] sm:$0xff]  }
  0x1d   :  { %1624 = vmatpush3.bf16.msra.mxu1 %v1792_v27  ;;  %1603 = vmatprep.subr.bf16.mxu0 %v1793_v28  ;;  %v1852_v27 = vld [vmem:[%s2347_s1 + $0x298] sm:$0xff]   ;;  %v1853_v28 = vld [vmem:[%s2347_s1 + $0x260] sm:$0xff]   ;;  %v1858_v33 = vld [vmem:[%s2347_s1 + $0x2e8] sm:$0xff]  }
  0x1e   :  { %1625 = vmatprep.subr.bf16.mxu1 %v1794_v29  ;;  %v1854_v29 = vld [vmem:[%s2347_s1 + $0x2e0] sm:$0xff]   ;;  %v1860_v35 = vld [vmem:[%s2347_s1 + $0x2a8] sm:$0xff]   ;;  %v1862_v37 = vld [vmem:[%s2347_s1 + $0x2f0] sm:$0xff]  }
  0x1f   :  { %v1893_v6 = vld [vmem:[%s2347_s1 + $0x368] sm:$0xff]  }
  0x20   :  { %1604 = vmatpush3.bf16.msra.mxu0 %v1795_v30  ;;  %v1855_v30 = vld [vmem:[%s2347_s1 + $0x220] sm:$0xff]   ;;  %v1896_v9 = vld [vmem:[%s2347_s1 + $0x3a8] sm:$0xff]  }
  0x21   :  { %1626 = vmatpush3.bf16.msra.mxu1 %v1796_v31  ;;  %1633 = vmatprep.subr.bf16.mxu0 %v1801_v38  ;;  %v1856_v31 = vld [vmem:[%s2347_s1 + $0x2a0] sm:$0xff]   ;;  %v1863_v38 = vld [vmem:[%s2347_s1 + $0x230] sm:$0xff]  }
  0x22   :  { %1655 = vmatprep.subr.bf16.mxu1 %v1802_v39  ;;  %v1864_v39 = vld [vmem:[%s2347_s1 + $0x2b0] sm:$0xff]  }
  0x23   :  { %1143 = vmatmul.mubr.bf16.vlgmr.msra.gmra.mrb[0].mxu0 %v1445_v34  ;;  %v1859_v34 = vld [vmem:[%s2347_s1 + $0x228] sm:$0xff]  }
  0x24   :  { %1183 = vmatmul.mubr.bf16.vlgmr.msra.gmra.mrb[0].mxu1 %v1447_v36  ;;  %1634 = vmatpush3.bf16.msra.mxu0 %v1803_v40  ;;  %v1861_v36 = vld [vmem:[%s2347_s1 + $0x270] sm:$0xff]   ;;  %v1865_v40 = vld [vmem:[%s2347_s1 + $0x278] sm:$0xff]  }
  0x25   :  { %1656 = vmatpush3.bf16.msra.mxu1 %v1804_v41  ;;  %1635 = vmatprep.subr.bf16.mxu0 %v1805_v42  ;;  %v1866_v41 = vld [vmem:[%s2347_s1 + $0x2f8] sm:$0xff]  }
  0x26   :  { %1657 = vmatprep.subr.bf16.mxu1 %v1806_v43  ;;  %1222 = vmatprep.mubr.bf16.mxu0 %v1450_v8  ;;  %v1867_v42 = vld [vmem:[%s2347_s1 + $0x238] sm:$0xff]   ;;  %v1895_v8 = vld [vmem:[%s2347_s1 + $0x328] sm:$0xff]  }
  0x27   :  { %1262 = vmatprep.mubr.bf16.mxu1 %v1452_v11  ;;  %v1868_v43 = vld [vmem:[%s2347_s1 + $0x2b8] sm:$0xff]   ;;  %v1898_v11 = vld [vmem:[%s2347_s1 + $0x3f0] sm:$0xff]  }
  0x28   :  { %1636 = vmatpush3.bf16.msra.mxu0 %v1807_v44  ;;  %v19_v44 = vld [vmem:[%s2348_s0 + $0x20] sm:$0xff] }
  0x29   :  { %1658 = vmatpush3.bf16.msra.mxu1 %v1808_v45  ;;  %1637 = vmatprep.subr.bf16.mxu0 %v1809_v46  ;;  %v20_v45 = vld [vmem:[%s2348_s0 + $0x28] sm:$0xff]  ;;  %v1453_v46 = vcombine.low %v19_v44, %v19_v44 }
  0x2a   :  { %1659 = vmatprep.subr.bf16.mxu1 %v1810_v47  ;;  %v1454_v47 = vcombine.high %v19_v44, %v19_v44 }
  0x2c   :  { %1638 = vmatpush3.bf16.msra.mxu0 %v1811_v48  ;;  %v1455_v48 = vcombine.low %v20_v45, %v20_v45 }
  0x2d   :  { %1660 = vmatpush3.bf16.msra.mxu1 %v1812_v49  ;;  %1639 = vmatprep.subr.bf16.mxu0 %v1813_v50  ;;  %v1456_v49 = vcombine.high %v20_v45, %v20_v45  ;;  %v1873_v50 = vld [vmem:[%s2347_s1 + $0x340] sm:$0xff]  }
  0x2e   :  { %1661 = vmatprep.subr.bf16.mxu1 %v1814_v51  ;;  %v1874_v51 = vld [vmem:[%s2347_s1 + $0x3c0] sm:$0xff]  }
  0x30   :  { %1640 = vmatpush3.bf16.msra.mxu0 %v1815_v52  ;;  %v1875_v52 = vld [vmem:[%s2347_s1 + $0x300] sm:$0xff]  }
  0x31   :  { %1662 = vmatpush3.bf16.msra.mxu1 %v1816_v53  ;;  %1641 = vmatprep.subr.bf16.mxu0 %v1817_v54  ;;  %v1876_v53 = vld [vmem:[%s2347_s1 + $0x380] sm:$0xff]   ;;  %v1877_v54 = vld [vmem:[%s2347_s1 + $0x348] sm:$0xff]  }
  0x32   :  { %1663 = vmatprep.subr.bf16.mxu1 %v1818_v55  ;;  %v1878_v55 = vld [vmem:[%s2347_s1 + $0x3c8] sm:$0xff]  }
  0x34   :  { %1642 = vmatpush3.bf16.msra.mxu0 %v1819_v56  ;;  %v1879_v56 = vld [vmem:[%s2347_s1 + $0x308] sm:$0xff]  }
  0x35   :  { %1664 = vmatpush3.bf16.msra.mxu1 %v1820_v57  ;;  %1643 = vmatprep.subr.bf16.mxu0 %v1821_v58  ;;  %v1880_v57 = vld [vmem:[%s2347_s1 + $0x388] sm:$0xff]   ;;  %v1881_v58 = vld [vmem:[%s2347_s1 + $0x350] sm:$0xff]  }
  0x36   :  { %1665 = vmatprep.subr.bf16.mxu1 %v1822_v59  ;;  %v1882_v59 = vld [vmem:[%s2347_s1 + $0x3d0] sm:$0xff]  }
  0x38   :  { %1644 = vmatpush3.bf16.msra.mxu0 %v1823_v60  ;;  %v1883_v60 = vld [vmem:[%s2347_s1 + $0x310] sm:$0xff]  }
  0x39   :  { %1666 = vmatpush3.bf16.msra.mxu1 %v1824_v61  ;;  %1645 = vmatprep.subr.bf16.mxu0 %v1825_v62  ;;  %v1884_v61 = vld [vmem:[%s2347_s1 + $0x390] sm:$0xff]   ;;  %v1885_v62 = vld [vmem:[%s2347_s1 + $0x358] sm:$0xff]  }
  0x3a   :  { %1667 = vmatprep.subr.bf16.mxu1 %v1826_v63  ;;  %v1886_v63 = vld [vmem:[%s2347_s1 + $0x3d8] sm:$0xff]  }
  0x3c   :  { %1646 = vmatpush3.bf16.msra.mxu0 %v1827_v0  ;;  %v1887_v0 = vld [vmem:[%s2347_s1 + $0x318] sm:$0xff]  }
  0x3d   :  { %1668 = vmatpush3.bf16.msra.mxu1 %v1828_v1  ;;  %1647 = vmatprep.subr.bf16.mxu0 %v1829_v2  ;;  %v1888_v1 = vld [vmem:[%s2347_s1 + $0x398] sm:$0xff]   ;;  %v1889_v2 = vld [vmem:[%s2347_s1 + $0x360] sm:$0xff]  }
  0x3e   :  { %1669 = vmatprep.subr.bf16.mxu1 %v1830_v3  ;;  %v1890_v3 = vld [vmem:[%s2347_s1 + $0x3e0] sm:$0xff]  }
  0x40   :  { %1648 = vmatpush3.bf16.msra.mxu0 %v1831_v4  ;;  %v1891_v4 = vld [vmem:[%s2347_s1 + $0x320] sm:$0xff]  }
  0x41   :  { %1670 = vmatpush3.bf16.msra.mxu1 %v1832_v5  ;;  %1677 = vmatprep.subr.bf16.mxu0 %v1837_v12  ;;  %v1892_v5 = vld [vmem:[%s2347_s1 + $0x3a0] sm:$0xff]   ;;  %v1899_v12 = vld [vmem:[%s2347_s1 + $0x330] sm:$0xff]  }
  0x42   :  { %1699 = vmatprep.subr.bf16.mxu1 %v1838_v13  ;;  %v1900_v13 = vld [vmem:[%s2347_s1 + $0x3b0] sm:$0xff]  }
  0x43   :  { %1223 = vmatmul.mubr.bf16.vlgmr.msra.gmra.mrb[4].mxu0 %v1449_v7  ;;  %v1894_v7 = vld [vmem:[%s2347_s1 + $0x3e8] sm:$0xff]  }
  0x44   :  { %1263 = vmatmul.mubr.bf16.vlgmr.msra.gmra.mrb[4].mxu1 %v1451_v10  ;;  %1678 = vmatpush3.bf16.msra.mxu0 %v1839_v14  ;;  %v1897_v10 = vld [vmem:[%s2347_s1 + $0x370] sm:$0xff]   ;;  %v1901_v14 = vld [vmem:[%s2347_s1 + $0x378] sm:$0xff]  }
  0x45   :  { %1700 = vmatpush3.bf16.msra.mxu1 %v1840_v15  ;;  %1679 = vmatprep.subr.bf16.mxu0 %v1841_v16  ;;  %v1902_v15 = vld [vmem:[%s2347_s1 + $0x3f8] sm:$0xff]  }
  0x46   :  { %1701 = vmatprep.subr.bf16.mxu1 %v1842_v17  ;;  %1302 = vmatprep.mubr.bf16.mxu0 %v1454_v47  ;;  %v1903_v16 = vld [vmem:[%s2347_s1 + $0x338] sm:$0xff]  }
  0x47   :  { %1342 = vmatprep.mubr.bf16.mxu1 %v1456_v49  ;;  %v1904_v17 = vld [vmem:[%s2347_s1 + $0x3b8] sm:$0xff]  }
  0x48   :  { %1680 = vmatpush3.bf16.msra.mxu0 %v1843_v18  ;;  %v21_v18 = vld [vmem:[%s2348_s0 + $0x30] sm:$0xff] }
  0x49   :  { %1702 = vmatpush3.bf16.msra.mxu1 %v1844_v19  ;;  %1681 = vmatprep.subr.bf16.mxu0 %v1845_v20  ;;  %v22_v19 = vld [vmem:[%s2348_s0 + $0x38] sm:$0xff]  ;;  %v1457_v20 = vcombine.low %v21_v18, %v21_v18 }
  0x4a   :  { %1703 = vmatprep.subr.bf16.mxu1 %v1846_v21  ;;  %v1458_v21 = vcombine.high %v21_v18, %v21_v18 }
  0x4c   :  { %1682 = vmatpush3.bf16.msra.mxu0 %v1847_v22  ;;  %v1459_v22 = vcombine.low %v22_v19, %v22_v19 }
  0x4d   :  { %1704 = vmatpush3.bf16.msra.mxu1 %v1848_v23  ;;  %1683 = vmatprep.subr.bf16.mxu0 %v1849_v24  ;;  %v1460_v23 = vcombine.high %v22_v19, %v22_v19 }
  0x4e   :  { %1705 = vmatprep.subr.bf16.mxu1 %v1850_v25 }
  0x50   :  { %1684 = vmatpush3.bf16.msra.mxu0 %v1851_v26  ;;  %v1444_v26 = vld [vmem:[%s2349_s2] ss:$0 sm:$0xff] }
  0x51   :  { %1706 = vmatpush3.bf16.msra.mxu1 %v1852_v27  ;;  %1685 = vmatprep.subr.bf16.mxu0 %v1853_v28 }
  0x52   :  { %1707 = vmatprep.subr.bf16.mxu1 %v1854_v29 }
  0x54   :  { %1686 = vmatpush3.bf16.msra.mxu0 %v1855_v30 }
  0x55   :  { %1708 = vmatpush3.bf16.msra.mxu1 %v1856_v31  ;;  %1687 = vmatprep.subr.bf16.mxu0 %v1857_v32 }
  0x56   :  { %1709 = vmatprep.subr.bf16.mxu1 %v1858_v33 }
  0x58   :  { %1688 = vmatpush3.bf16.msra.mxu0 %v1859_v34 }
  0x59   :  { %1710 = vmatpush3.bf16.msra.mxu1 %v1860_v35  ;;  %1689 = vmatprep.subr.bf16.mxu0 %v1861_v36 }
  0x5a   :  { %1711 = vmatprep.subr.bf16.mxu1 %v1862_v37 }
  0x5c   :  { %1690 = vmatpush3.bf16.msra.mxu0 %v1863_v38 }
  0x5d   :  { %1712 = vmatpush3.bf16.msra.mxu1 %v1864_v39  ;;  %1691 = vmatprep.subr.bf16.mxu0 %v1865_v40 }
  0x5e   :  { %1713 = vmatprep.subr.bf16.mxu1 %v1866_v41 }
  0x60   :  { %1692 = vmatpush3.bf16.msra.mxu0 %v1867_v42 }
  0x61   :  { %1714 = vmatpush3.bf16.msra.mxu1 %v1868_v43  ;;  %1721 = vmatprep.subr.bf16.mxu0 %v1873_v50 }
  0x62   :  { %1743 = vmatprep.subr.bf16.mxu1 %v1874_v51 }
  0x63   :  { %1303 = vmatmul.mubr.bf16.vlgmr.msra.gmra.mrb[8].mxu0 %v1453_v46 }
  0x64   :  { %1343 = vmatmul.mubr.bf16.vlgmr.msra.gmra.mrb[8].mxu1 %v1455_v48  ;;  %1722 = vmatpush3.bf16.msra.mxu0 %v1875_v52 }
  0x65   :  { %1744 = vmatpush3.bf16.msra.mxu1 %v1876_v53  ;;  %1723 = vmatprep.subr.bf16.mxu0 %v1877_v54 }
  0x66   :  { %1745 = vmatprep.subr.bf16.mxu1 %v1878_v55  ;;  %1382 = vmatprep.mubr.bf16.mxu0 %v1458_v21 }
  0x67   :  { %1422 = vmatprep.mubr.bf16.mxu1 %v1460_v23 }
  0x68   :  { %1724 = vmatpush3.bf16.msra.mxu0 %v1879_v56 }
  0x69   :  { %1746 = vmatpush3.bf16.msra.mxu1 %v1880_v57  ;;  %1725 = vmatprep.subr.bf16.mxu0 %v1881_v58 }
  0x6a   :  { %1747 = vmatprep.subr.bf16.mxu1 %v1882_v59 }
  0x6c   :  { %1726 = vmatpush3.bf16.msra.mxu0 %v1883_v60 }
  0x6d   :  { %1748 = vmatpush3.bf16.msra.mxu1 %v1884_v61  ;;  %1727 = vmatprep.subr.bf16.mxu0 %v1885_v62 }
  0x6e   :  { %1749 = vmatprep.subr.bf16.mxu1 %v1886_v63 }
  0x70   :  { %1728 = vmatpush3.bf16.msra.mxu0 %v1887_v0 }
  0x71   :  { %1750 = vmatpush3.bf16.msra.mxu1 %v1888_v1  ;;  %1729 = vmatprep.subr.bf16.mxu0 %v1889_v2 }
  0x72   :  { %1751 = vmatprep.subr.bf16.mxu1 %v1890_v3 }
  0x74   :  { %1730 = vmatpush3.bf16.msra.mxu0 %v1891_v4 }
  0x75   :  { %1752 = vmatpush3.bf16.msra.mxu1 %v1892_v5  ;;  %1731 = vmatprep.subr.bf16.mxu0 %v1893_v6 }
  0x76   :  { %1753 = vmatprep.subr.bf16.mxu1 %v1894_v7 }
  0x78   :  { %1732 = vmatpush3.bf16.msra.mxu0 %v1895_v8 }
  0x79   :  { %1754 = vmatpush3.bf16.msra.mxu1 %v1896_v9  ;;  %1733 = vmatprep.subr.bf16.mxu0 %v1897_v10 }
  0x7a   :  { %1755 = vmatprep.subr.bf16.mxu1 %v1898_v11 }
  0x7c   :  { %1734 = vmatpush3.bf16.msra.mxu0 %v1899_v12 }
  0x7d   :  { %1756 = vmatpush3.bf16.msra.mxu1 %v1900_v13  ;;  %1735 = vmatprep.subr.bf16.mxu0 %v1901_v14 }
  0x7e   :  { %1757 = vmatprep.subr.bf16.mxu1 %v1902_v15 }
  0x80   :  { %1736 = vmatpush3.bf16.msra.mxu0 %v1903_v16 }
  0x81   :  { %1758 = vmatpush3.bf16.msra.mxu1 %v1904_v17 }
  0x83   :  { %1383 = vmatmul.mubr.bf16.vlgmr.msra.gmra.mrb[12].mxu0 %v1457_v20 }
  0x84   :  { %1423 = vmatmul.mubr.bf16.vlgmr.msra.gmra.mrb[12].mxu1 %v1459_v22 }
  0xf6   :  { %v1605_v24 = vpop.f32.mrb[0].mxu0 }
  0xf7   :  { %v1627_v25 = vpop.f32.mrb[0].mxu1  ;;  %v1606_v27 = vpop.f32.mrb[1].mxu0 }
  0xf8   :  { %v1628_v28 = vpop.f32.mrb[1].mxu1  ;;  %v1607_v29 = vadd.f32 %v1606_v27, %v1605_v24  ;;  %v1608_v31 = vpop.f32.mrb[2].mxu0 }
  0xf9   :  { %v1629_v30 = vadd.f32 %v1628_v28, %v1627_v25  ;;  %v1630_v32 = vpop.f32.mrb[2].mxu1  ;;  %v1609_v33 = vpop.f32.mrb[3].mxu0 }
  0xfa   :  { %v1631_v34 = vpop.f32.mrb[3].mxu1  ;;  %v1145_v35 = vadd.f32 %v1607_v29, %v1444_v26 }
  0xfc   :  { %v1185_v36 = vadd.f32 %v1629_v30, %v1145_v35 }
 0x116   :  { %v1649_v37 = vpop.f32.mrb[4].mxu0 }
 0x117   :  { %v1671_v38 = vpop.f32.mrb[4].mxu1  ;;  %v1650_v39 = vpop.f32.mrb[5].mxu0 }
 0x118   :  { %v1672_v40 = vpop.f32.mrb[5].mxu1  ;;  %v1651_v41 = vadd.f32 %v1650_v39, %v1649_v37  ;;  %v1652_v43 = vpop.f32.mrb[6].mxu0 }
 0x119   :  { %v1673_v42 = vadd.f32 %v1672_v40, %v1671_v38  ;;  %v1674_v44 = vpop.f32.mrb[6].mxu1  ;;  %v1653_v45 = vpop.f32.mrb[7].mxu0 }
 0x11a   :  { %v1675_v46 = vpop.f32.mrb[7].mxu1  ;;  %v1225_v47 = vadd.f32 %v1651_v41, %v1185_v36 }
 0x11c   :  { %v1265_v48 = vadd.f32 %v1673_v42, %v1225_v47 }
 0x136   :  { %v1693_v49 = vpop.f32.mrb[8].mxu0 }
 0x137   :  { %v1715_v50 = vpop.f32.mrb[8].mxu1  ;;  %v1694_v51 = vpop.f32.mrb[9].mxu0 }
 0x138   :  { %v1695_v52 = vadd.f32 %v1694_v51, %v1693_v49  ;;  %v1716_v53 = vpop.f32.mrb[9].mxu1  ;;  %v1696_v54 = vpop.f32.mrb[10].mxu0 }
 0x139   :  { %v1717_v55 = vadd.f32 %v1716_v53, %v1715_v50  ;;  %v1718_v56 = vpop.f32.mrb[10].mxu1  ;;  %v1697_v57 = vpop.f32.mrb[11].mxu0 }
 0x13a   :  { %v1305_v58 = vadd.f32 %v1695_v52, %v1265_v48  ;;  %v1719_v59 = vpop.f32.mrb[11].mxu1 }
 0x13c   :  { %v1345_v60 = vadd.f32 %v1717_v55, %v1305_v58 }
 0x156   :  { %v1737_v61 = vpop.f32.mrb[12].mxu0 }
 0x157   :  { %v1759_v62 = vpop.f32.mrb[12].mxu1  ;;  %v1738_v63 = vpop.f32.mrb[13].mxu0 }
 0x158   :  { %v1739_v0 = vadd.f32 %v1738_v63, %v1737_v61  ;;  %v1760_v1 = vpop.f32.mrb[13].mxu1  ;;  %v1740_v2 = vpop.f32.mrb[14].mxu0 }
 0x159   :  { %v1761_v3 = vadd.f32 %v1760_v1, %v1759_v62  ;;  %v1762_v4 = vpop.f32.mrb[14].mxu1  ;;  %v1741_v5 = vpop.f32.mrb[15].mxu0 }
 0x15a   :  { %v1385_v6 = vadd.f32 %v1739_v0, %v1345_v60  ;;  %v1763_v7 = vpop.f32.mrb[15].mxu1 }
 0x15c   :  { %v1425_v8 = vadd.f32 %v1761_v3, %v1385_v6 }
 0x15e   :  { %1430 = vmax.xlane.f32.xlu0 %v1425_v8 }
 0x1eb   :  { %v1431_v9 = vpop.xlane.xlu0 %1430 }
 0x1ec   :  { %v1432_v10 = vsub.f32 %v1425_v8, %v1431_v9 }
 0x1ee   :  { %v1433_v11 = vmul.f32 1.442695, %v1432_v10 }
 0x1f0   :  { %1909 = vpow2.f32 %v1433_v11 }
 0x1fa   :  { %v1910_v12 = vpop.eup %1909 }
 0x1fb   :  { %1435 = vadd.xlane.f32.xlu0 %v1910_v12 }
 0x288   :  { %v1436_v13 = vpop.xlane.xlu0 %1435 }
 0x289   :  { %1911 = vrcp.f32 %v1436_v13 }
 0x293   :  { %v1912_v14 = vpop.eup %1911 }
 0x294   :  { %v1438_v15 = vmul.f32 %v1912_v14, %v1910_v12 }
 0x296   :  { %1439 = vst [vmem:[%s2350_s3] sm:$0xff] %v1438_v15 }

// kernel: forward.7
= control target key start
LH: loop header
LB: loop body
LE: loop exit
PB: predicated region body
PF: predicated region fallthrough
CT: control target
= control target key end

     0   :  { %v2022_v24 = vmov 0.0   ;;  %vm2023_vm0 = vmmov 0   ;;  %s2566_s1 = inlined_call_operand.vmem [shape: bf16[640,128], index: 1, kind: input, shape index: {}]   ;;  %s2567_s0 = inlined_call_operand.vmem [shape: bf16[200,640], index: 0, kind: input, shape index: {}]   ;;  %s2568_s2 = inlined_call_operand.vmem [shape: f32[1,128], index: 2, kind: input, shape index: {}]   ;;  %s2569_s3 = inlined_call_operand.vmem [shape: f32[1,128], index: 3, kind: input, shape index: {}]   ;;  %s2570_s4 = inlined_call_operand.vmem [shape: bf16[200,128], index: 4, kind: output, shape index: {}]  }
   0x1   :  { %v1893_v0 = vld [vmem:[%s2566_s1 + $0x40] sm:$0xff]   ;;  %v1895_v2 = vld [vmem:[%s2566_s1 + $0x48] sm:$0xff]   ;;  %v1897_v4 = vld [vmem:[%s2566_s1 + $0x50] sm:$0xff]  }
   0x2   :  { %v1894_v1 = vld [vmem:[%s2566_s1] sm:$0xff]   ;;  %1598 = vmatprep.subr.bf16.mxu0 %v1893_v0  ;;  %1875 = vmatprep.subr.bf16.mxu1 %v1893_v0  ;;  %v1896_v3 = vld [vmem:[%s2566_s1 + $0x8] sm:$0xff]   ;;  %v1898_v5 = vld [vmem:[%s2566_s1 + $0x10] sm:$0xff]  }
   0x3   :  { %1599 = vmatpush3.bf16.msra.mxu0 %v1894_v1  ;;  %1883 = vmatpush3.bf16.msra.mxu1 %v1894_v1  ;;  %v1899_v6 = vld [vmem:[%s2566_s1 + $0x58] sm:$0xff]   ;;  %v1901_v8 = vld [vmem:[%s2566_s1 + $0x60] sm:$0xff]   ;;  %v1903_v10 = vld [vmem:[%s2566_s1 + $0x68] sm:$0xff]  }
   0x4   :  { %1600 = vmatprep.subr.bf16.mxu0 %v1895_v2  ;;  %1876 = vmatprep.subr.bf16.mxu1 %v1895_v2  ;;  %v1900_v7 = vld [vmem:[%s2566_s1 + $0x18] sm:$0xff]   ;;  %v1902_v9 = vld [vmem:[%s2566_s1 + $0x20] sm:$0xff]   ;;  %v1904_v13 = vld [vmem:[%s2566_s1 + $0x28] sm:$0xff]  }
   0x5   :  { %v1911_v11 = vld [vmem:[%s2567_s0 + $0x4] ss:$20 sps:$4 sm:$0xff]   ;;  %v1914_v12 = vld [vmem:[%s2567_s0 + $0x11c] ss:$20 sps:$4 sm:$0xff]   ;;  %v1909_v19 = vld [vmem:[%s2567_s0] ss:$20 sps:$4 sm:$0xff]  }
   0x6   :  { %v1905_v14 = vld [vmem:[%s2566_s1 + $0x70] sm:$0xff]   ;;  %775 = vmatprep.mubr.bf16.mxu0 %v1911_v11  ;;  %831 = vmatprep.mubr.bf16.mxu1 %v1914_v12  ;;  %v1907_v16 = vld [vmem:[%s2566_s1 + $0x78] sm:$0xff]   ;;  %v1916_v18 = vld [vmem:[%s2566_s1 + $0xc0] sm:$0xff]  }
   0x7   :  { %1601 = vmatpush3.bf16.msra.mxu0 %v1896_v3  ;;  %1884 = vmatpush3.bf16.msra.mxu1 %v1896_v3  ;;  %v1906_v15 = vld [vmem:[%s2566_s1 + $0x30] sm:$0xff]   ;;  %v1908_v17 = vld [vmem:[%s2566_s1 + $0x38] sm:$0xff]   ;;  %v1915_v21 = vld [vmem:[%s2566_s1 + $0x100] sm:$0xff]  }
   0x8   :  { %1602 = vmatprep.subr.bf16.mxu0 %v1897_v4  ;;  %1877 = vmatprep.subr.bf16.mxu1 %v1897_v4  ;;  %v1912_v20 = vld [vmem:[%s2567_s0 + $0x118] ss:$20 sps:$4 sm:$0xff]   ;;  %v1917_v22 = vld [vmem:[%s2566_s1 + $0x80] sm:$0xff]   ;;  %v1922_v29 = vld [vmem:[%s2567_s0 + $0x28] ss:$20 sps:$4 sm:$0xff]  }
   0x9   :  { %v1918_v23 = vld [vmem:[%s2567_s0 + $0x2c] ss:$20 sps:$4 sm:$0xff]   ;;  %v1920_v25 = vld [vmem:[%s2567_s0 + $0x144] ss:$20 sps:$4 sm:$0xff]   ;;  %v1931_v30 = vld [vmem:[%s2566_s1 + $0xd0] sm:$0xff]  }
   0xa   :  { %v1925_v26 = vld [vmem:[%s2566_s1 + $0xc8] sm:$0xff]   ;;  %v1923_v31 = vld [vmem:[%s2567_s0 + $0x140] ss:$20 sps:$4 sm:$0xff]   ;;  %v1936_v36 = vld [vmem:[%s2566_s1 + $0xd8] sm:$0xff]  }
   0xb   :  { %1603 = vmatpush3.bf16.msra.mxu0 %v1898_v5  ;;  %1885 = vmatpush3.bf16.msra.mxu1 %v1898_v5  ;;  %v1924_v27 = vld [vmem:[%s2566_s1 + $0x108] sm:$0xff]   ;;  %v1932_v34 = vld [vmem:[%s2566_s1 + $0x110] sm:$0xff]   ;;  %v1937_v37 = vld [vmem:[%s2566_s1 + $0x98] sm:$0xff]  }
   0xc   :  { %1604 = vmatprep.subr.bf16.mxu0 %v1899_v6  ;;  %1878 = vmatprep.subr.bf16.mxu1 %v1899_v6  ;;  %v1926_v28 = vld [vmem:[%s2566_s1 + $0x88] sm:$0xff]   ;;  %v1935_v35 = vld [vmem:[%s2566_s1 + $0x90] sm:$0xff]   ;;  %v1938_v40 = vld [vmem:[%s2566_s1 + $0x118] sm:$0xff]  }
   0xd   :  { %v1927_v32 = vld [vmem:[%s2567_s0 + $0x54] ss:$20 sps:$4 sm:$0xff]   ;;  %v1929_v33 = vld [vmem:[%s2567_s0 + $0x16c] ss:$20 sps:$4 sm:$0xff]   ;;  %v1933_v38 = vld [vmem:[%s2567_s0 + $0x50] ss:$20 sps:$4 sm:$0xff]  }
   0xe   :  { %v1934_v39 = vld [vmem:[%s2567_s0 + $0x168] ss:$20 sps:$4 sm:$0xff]   ;;  %v1945_v41 = vld [vmem:[%s2566_s1 + $0xe0] sm:$0xff]   ;;  %v1943_v48 = vld [vmem:[%s2567_s0 + $0x78] ss:$20 sps:$4 sm:$0xff]  }
   0xf   :  { %1605 = vmatpush3.bf16.msra.mxu0 %v1900_v7  ;;  %1886 = vmatpush3.bf16.msra.mxu1 %v1900_v7  ;;  %v1939_v42 = vld [vmem:[%s2567_s0 + $0x7c] ss:$20 sps:$4 sm:$0xff]   ;;  %v1941_v43 = vld [vmem:[%s2567_s0 + $0x194] ss:$20 sps:$4 sm:$0xff]   ;;  %v1946_v44 = vld [vmem:[%s2566_s1 + $0xa0] sm:$0xff]  }
  0x10   :  { %1606 = vmatprep.subr.bf16.mxu0 %v1901_v8  ;;  %1879 = vmatprep.subr.bf16.mxu1 %v1901_v8  ;;  %v1947_v45 = vld [vmem:[%s2566_s1 + $0x120] sm:$0xff]   ;;  %v1954_v46 = vld [vmem:[%s2566_s1 + $0xe8] sm:$0xff]   ;;  %v1960_v51 = vld [vmem:[%s2566_s1 + $0xf0] sm:$0xff]  }
  0x11   :  { %v1955_v47 = vld [vmem:[%s2566_s1 + $0xa8] sm:$0xff]   ;;  %v1944_v49 = vld [vmem:[%s2567_s0 + $0x190] ss:$20 sps:$4 sm:$0xff]   ;;  %v1965_v56 = vld [vmem:[%s2566_s1 + $0xf8] sm:$0xff]  }
  0x12   :  { %v1956_v50 = vld [vmem:[%s2566_s1 + $0x128] sm:$0xff]   ;;  %v1948_v52 = vld [vmem:[%s2567_s0 + $0xa4] ss:$20 sps:$4 sm:$0xff]   ;;  %v1950_v53 = vld [vmem:[%s2567_s0 + $0x1bc] ss:$20 sps:$4 sm:$0xff]  }
  0x13   :  { %1607 = vmatpush3.bf16.msra.mxu0 %v1902_v9  ;;  %1887 = vmatpush3.bf16.msra.mxu1 %v1902_v9  ;;  %v1963_v54 = vld [vmem:[%s2566_s1 + $0xb0] sm:$0xff]   ;;  %v90_v57 = vld [vmem:[%s2567_s0 + $0x1e0] sm:$0xff]  ;;  %v1966_v58 = vld [vmem:[%s2566_s1 + $0xb8] sm:$0xff]  }
  0x14   :  { %1608 = vmatprep.subr.bf16.mxu0 %v1903_v10  ;;  %1880 = vmatprep.subr.bf16.mxu1 %v1903_v10  ;;  %v1964_v55 = vld [vmem:[%s2566_s1 + $0x130] sm:$0xff]   ;;  %v1973_v59 = vld [vmem:[%s2566_s1 + $0x138] sm:$0xff]   ;;  %v1957_v62 = vld [vmem:[%s2567_s0 + $0xcc] ss:$20 sps:$4 sm:$0xff]   ;;  %v1431_v63 = vcombine.high %v90_v57, %v90_v57  ;;  %v1430_v1 = vcombine.low %v90_v57, %v90_v57 }
  0x15   :  { %v1952_v60 = vld [vmem:[%s2567_s0 + $0xa0] ss:$20 sps:$4 sm:$0xff]   ;;  %v1953_v61 = vld [vmem:[%s2567_s0 + $0x1b8] ss:$20 sps:$4 sm:$0xff]   ;;  %v1961_v0 = vld [vmem:[%s2567_s0 + $0xc8] ss:$20 sps:$4 sm:$0xff]  }
  0x16   :  { %v1967_v2 = vld [vmem:[%s2567_s0 + $0xf4] ss:$20 sps:$4 sm:$0xff]   ;;  %v1971_v3 = vld [vmem:[%s2567_s0 + $0xc] ss:$20 sps:$4 sm:$0xff]   ;;  %v1972_v5 = vld [vmem:[%s2567_s0 + $0xf0] ss:$20 sps:$4 sm:$0xff]  }
  0x17   :  { %1609 = vmatpush3.bf16.msra.mxu0 %v1904_v13  ;;  %1888 = vmatpush3.bf16.msra.mxu1 %v1904_v13  ;;  %v1969_v4 = vld [vmem:[%s2567_s0 + $0x8] ss:$20 sps:$4 sm:$0xff]   ;;  %v1976_v7 = vld [vmem:[%s2567_s0 + $0x30] ss:$20 sps:$4 sm:$0xff]   ;;  %v1980_v10 = vld [vmem:[%s2567_s0 + $0x58] ss:$20 sps:$4 sm:$0xff]  }
  0x18   :  { %1610 = vmatprep.subr.bf16.mxu0 %v1905_v14  ;;  %1881 = vmatprep.subr.bf16.mxu1 %v1905_v14  ;;  %v1974_v6 = vld [vmem:[%s2567_s0 + $0x34] ss:$20 sps:$4 sm:$0xff]   ;;  %v1977_v8 = vld [vmem:[%s2567_s0 + $0x10] ss:$20 sps:$4 sm:$0xff]   ;;  %v1981_v11 = vld [vmem:[%s2567_s0 + $0x38] ss:$20 sps:$4 sm:$0xff]  }
  0x19   :  { %v1978_v9 = vld [vmem:[%s2567_s0 + $0x5c] ss:$20 sps:$4 sm:$0xff]   ;;  %v1982_v12 = vld [vmem:[%s2567_s0 + $0x84] ss:$20 sps:$4 sm:$0xff]   ;;  %v1984_v13 = vld [vmem:[%s2567_s0 + $0x80] ss:$20 sps:$4 sm:$0xff]  }
  0x1a   :  { %v1985_v14 = vld [vmem:[%s2567_s0 + $0x60] ss:$20 sps:$4 sm:$0xff]  }
  0x1b   :  { %1611 = vmatpush3.bf16.msra.mxu0 %v1906_v15  ;;  %1889 = vmatpush3.bf16.msra.mxu1 %v1906_v15  ;;  %v1986_v15 = vld [vmem:[%s2567_s0 + $0xac] ss:$20 sps:$4 sm:$0xff]  }
  0x1c   :  { %1612 = vmatprep.subr.bf16.mxu0 %v1907_v16  ;;  %1882 = vmatprep.subr.bf16.mxu1 %v1907_v16  ;;  %v1988_v16 = vld [vmem:[%s2567_s0 + $0xa8] ss:$20 sps:$4 sm:$0xff]  }
  0x1f   :  { %1613 = vmatpush3.bf16.msra.mxu0 %v1908_v17  ;;  %1890 = vmatpush3.bf16.msra.mxu1 %v1908_v17  ;;  %v1989_v17 = vld [vmem:[%s2567_s0 + $0x88] ss:$20 sps:$4 sm:$0xff]  }
  0x20   :  { %1807 = vmatprep.subr.bf16.mxu0 %v2022_v24  ;;  %1692 = vmatprep.subr.bf16.mxu1 %v1916_v18  ;;  %v1990_v18 = vld [vmem:[%s2567_s0 + $0xd4] ss:$20 sps:$4 sm:$0xff]  }
  0x22   :  { %776 = vmatmul.mubr.bf16.vlgmr.msra.gmra.mrb[0].mxu0 %v1909_v19  ;;  %832 = vmatmul.mubr.bf16.vlgmr.msra.gmra.mrb[0].mxu1 %v1912_v20  ;;  %v1992_v19 = vld [vmem:[%s2567_s0 + $0xd0] ss:$20 sps:$4 sm:$0xff]  }
  0x23   :  { %1808 = vmatpush3.bf16.msra.mxu0 %v1915_v21  ;;  %1693 = vmatpush3.bf16.msra.mxu1 %v1917_v22  ;;  %v1993_v20 = vld [vmem:[%s2567_s0 + $0xb0] ss:$20 sps:$4 sm:$0xff]   ;;  %v1996_v22 = vld [vmem:[%s2567_s0 + $0xf8] ss:$20 sps:$4 sm:$0xff]  }
  0x24   :  { %783 = vmatprep.mubr.bf16.mxu0 %v1918_v23  ;;  %839 = vmatprep.mubr.bf16.mxu1 %v1920_v25  ;;  %v1994_v21 = vld [vmem:[%s2567_s0 + $0xfc] ss:$20 sps:$4 sm:$0xff]   ;;  %v1997_v23 = vld [vmem:[%s2567_s0 + $0xd8] ss:$20 sps:$4 sm:$0xff]  }
  0x25   :  { %1809 = vmatprep.subr.bf16.mxu0 %v2022_v24  ;;  %1694 = vmatprep.subr.bf16.mxu1 %v1925_v26  ;;  %v1998_v25 = vld [vmem:[%s2567_s0 + $0x124] ss:$20 sps:$4 sm:$0xff]   ;;  %v2000_v26 = vld [vmem:[%s2567_s0 + $0x120] ss:$20 sps:$4 sm:$0xff]  }
  0x27   :  { %1810 = vmatpush3.bf16.msra.mxu0 %v1924_v27  ;;  %1695 = vmatpush3.bf16.msra.mxu1 %v1926_v28  ;;  %v2001_v27 = vld [vmem:[%s2567_s0 + $0x100] ss:$20 sps:$4 sm:$0xff]  }
  0x28   :  { %1811 = vmatprep.subr.bf16.mxu0 %v2022_v24  ;;  %1696 = vmatprep.subr.bf16.mxu1 %v1931_v30  ;;  %v2002_v28 = vld [vmem:[%s2567_s0 + $0x14c] ss:$20 sps:$4 sm:$0xff]   ;;  %v2005_v30 = vld [vmem:[%s2567_s0 + $0x128] ss:$20 sps:$4 sm:$0xff]  }
  0x2a   :  { %784 = vmatmul.mubr.bf16.gmra.mrb[4].mxu0 %v1922_v29  ;;  %840 = vmatmul.mubr.bf16.gmra.mrb[4].mxu1 %v1923_v31  ;;  %v2004_v29 = vld [vmem:[%s2567_s0 + $0x148] ss:$20 sps:$4 sm:$0xff]  }
  0x2b   :  { %791 = vmatprep.mubr.bf16.mxu0 %v1927_v32  ;;  %847 = vmatprep.mubr.bf16.mxu1 %v1929_v33  ;;  %v2006_v31 = vld [vmem:[%s2567_s0 + $0x174] ss:$20 sps:$4 sm:$0xff]   ;;  %v2008_v32 = vld [vmem:[%s2567_s0 + $0x170] ss:$20 sps:$4 sm:$0xff]  }
  0x2c   :  { %1812 = vmatpush3.bf16.msra.mxu0 %v1932_v34  ;;  %1697 = vmatpush3.bf16.msra.mxu1 %v1935_v35  ;;  %v2009_v33 = vld [vmem:[%s2567_s0 + $0x150] ss:$20 sps:$4 sm:$0xff]   ;;  %v2012_v35 = vld [vmem:[%s2567_s0 + $0x198] ss:$20 sps:$4 sm:$0xff]  }
  0x2d   :  { %1698 = vmatprep.subr.bf16.mxu1 %v1936_v36  ;;  %1813 = vmatprep.subr.bf16.mxu0 %v2022_v24  ;;  %v2010_v34 = vld [vmem:[%s2567_s0 + $0x19c] ss:$20 sps:$4 sm:$0xff]   ;;  %v2013_v36 = vld [vmem:[%s2567_s0 + $0x178] ss:$20 sps:$4 sm:$0xff]  }
  0x30   :  { %1699 = vmatpush3.bf16.msra.mxu1 %v1937_v37  ;;  %1814 = vmatpush3.bf16.msra.mxu0 %v1938_v40  ;;  %v2014_v37 = vld [vmem:[%s2567_s0 + $0x1c4] ss:$20 sps:$4 sm:$0xff]   ;;  %v2017_v40 = vld [vmem:[%s2567_s0 + $0x1a0] ss:$20 sps:$4 sm:$0xff]  }
  0x31   :  { %1700 = vmatprep.subr.bf16.mxu1 %v1945_v41  ;;  %1815 = vmatprep.subr.bf16.mxu0 %v2022_v24 }
  0x32   :  { %792 = vmatmul.mubr.bf16.gmra.mrb[8].mxu0 %v1933_v38  ;;  %848 = vmatmul.mubr.bf16.gmra.mrb[8].mxu1 %v1934_v39  ;;  %v91_v38 = vld [vmem:[%s2567_s0 + $0x1e8] sm:$0xff]  ;;  %v2016_v39 = vld [vmem:[%s2567_s0 + $0x1c0] ss:$20 sps:$4 sm:$0xff]  }
  0x33   :  { %799 = vmatprep.mubr.bf16.mxu0 %v1939_v42  ;;  %855 = vmatprep.mubr.bf16.mxu1 %v1941_v43  ;;  %v1433_v41 = vcombine.high %v91_v38, %v91_v38  ;;  %v1432_v42 = vcombine.low %v91_v38, %v91_v38  ;;  %v2020_v43 = vld [vmem:[%s2567_s0 + $0x1c8] ss:$20 sps:$4 sm:$0xff]  }
  0x34   :  { %1701 = vmatpush3.bf16.msra.mxu1 %v1946_v44  ;;  %1816 = vmatpush3.bf16.msra.mxu0 %v1947_v45  ;;  %v2021_v44 = vld [vmem:[%s2567_s0 + $0x1f0] ss:$0 sps:$4 sm:$0xff]  }
  0x35   :  { %1702 = vmatprep.subr.bf16.mxu1 %v1954_v46  ;;  %1817 = vmatprep.subr.bf16.mxu0 %v2022_v24 }
  0x38   :  { %1703 = vmatpush3.bf16.msra.mxu1 %v1955_v47  ;;  %1818 = vmatpush3.bf16.msra.mxu0 %v1956_v50 }
  0x39   :  { %1704 = vmatprep.subr.bf16.mxu1 %v1960_v51  ;;  %1819 = vmatprep.subr.bf16.mxu0 %v2022_v24 }
  0x3a   :  { %800 = vmatmul.mubr.bf16.gmra.mrb[12].mxu0 %v1943_v48  ;;  %856 = vmatmul.mubr.bf16.gmra.mrb[12].mxu1 %v1944_v49 }
  0x3b   :  { %807 = vmatprep.mubr.bf16.mxu0 %v1948_v52  ;;  %863 = vmatprep.mubr.bf16.mxu1 %v1950_v53 }
  0x3c   :  { %1705 = vmatpush3.bf16.msra.mxu1 %v1963_v54  ;;  %1820 = vmatpush3.bf16.msra.mxu0 %v1964_v55 }
  0x3d   :  { %1706 = vmatprep.subr.bf16.mxu1 %v1965_v56  ;;  %1821 = vmatprep.subr.bf16.mxu0 %v2022_v24 }
  0x40   :  { %1707 = vmatpush3.bf16.msra.mxu1 %v1966_v58  ;;  %1822 = vmatpush3.bf16.msra.mxu0 %v1973_v59 }
  0x42   :  { %808 = vmatmul.mubr.bf16.gmra.mrb[16].mxu0 %v1952_v60  ;;  %864 = vmatmul.mubr.bf16.gmra.mrb[16].mxu1 %v1953_v61 }
  0x43   :  { %815 = vmatprep.mubr.bf16.mxu0 %v1957_v62  ;;  %871 = vmatprep.mubr.bf16.mxu1 %v1431_v63 }
  0x4a   :  { %816 = vmatmul.mubr.bf16.gmra.mrb[20].mxu0 %v1961_v0  ;;  %872 = vmatmul.mubr.bf16.gmra.mrb[20].mxu1 %v1430_v1 }
  0x4b   :  { %823 = vmatprep.mubr.bf16.mxu0 %v1967_v2  ;;  %911 = vmatprep.mubr.bf16.mxu1 %v1971_v3 }
  0x52   :  { %824 = vmatmul.mubr.bf16.gmra.mrb[24].mxu0 %v1972_v5  ;;  %912 = vmatmul.mubr.bf16.vlgmr.msra.gmra.mrb[24].mxu1 %v1969_v4 }
  0x53   :  { %919 = vmatprep.mubr.bf16.mxu1 %v1974_v6  ;;  %1823 = vmatprep.mubr.msk.bf16.mxu0 %vm2023_vm0, %v2022_v24 }
  0x5a   :  { %920 = vmatmul.mubr.bf16.gmra.mrb[28].mxu1 %v1976_v7  ;;  %1824 = vmatmul.mubr.bf16.vlgmr.msra.gmra.mrb[28].mxu0 %v1977_v8 }
  0x5b   :  { %927 = vmatprep.mubr.bf16.mxu1 %v1978_v9  ;;  %1827 = vmatprep.mubr.msk.bf16.mxu0 %vm2023_vm0, %v2022_v24 }
  0x62   :  { %928 = vmatmul.mubr.bf16.gmra.mrb[32].mxu1 %v1980_v10  ;;  %1828 = vmatmul.mubr.bf16.gmra.mrb[32].mxu0 %v1981_v11 }
  0x63   :  { %935 = vmatprep.mubr.bf16.mxu1 %v1982_v12  ;;  %1831 = vmatprep.mubr.msk.bf16.mxu0 %vm2023_vm0, %v2022_v24 }
  0x6a   :  { %936 = vmatmul.mubr.bf16.gmra.mrb[36].mxu1 %v1984_v13  ;;  %1832 = vmatmul.mubr.bf16.gmra.mrb[36].mxu0 %v1985_v14 }
  0x6b   :  { %943 = vmatprep.mubr.bf16.mxu1 %v1986_v15  ;;  %1835 = vmatprep.mubr.msk.bf16.mxu0 %vm2023_vm0, %v2022_v24 }
  0x72   :  { %944 = vmatmul.mubr.bf16.gmra.mrb[40].mxu1 %v1988_v16  ;;  %1836 = vmatmul.mubr.bf16.gmra.mrb[40].mxu0 %v1989_v17 }
  0x73   :  { %951 = vmatprep.mubr.bf16.mxu1 %v1990_v18  ;;  %1839 = vmatprep.mubr.msk.bf16.mxu0 %vm2023_vm0, %v2022_v24 }
  0x7a   :  { %952 = vmatmul.mubr.bf16.gmra.mrb[44].mxu1 %v1992_v19  ;;  %1840 = vmatmul.mubr.bf16.gmra.mrb[44].mxu0 %v1993_v20 }
  0x7b   :  { %959 = vmatprep.mubr.bf16.mxu1 %v1994_v21  ;;  %1843 = vmatprep.mubr.msk.bf16.mxu0 %vm2023_vm0, %v2022_v24 }
  0x82   :  { %960 = vmatmul.mubr.bf16.gmra.mrb[48].mxu1 %v1996_v22  ;;  %1844 = vmatmul.mubr.bf16.gmra.mrb[48].mxu0 %v1997_v23 }
  0x83   :  { %967 = vmatprep.mubr.bf16.mxu1 %v1998_v25  ;;  %1847 = vmatprep.mubr.msk.bf16.mxu0 %vm2023_vm0, %v2022_v24 }
  0x8a   :  { %968 = vmatmul.mubr.bf16.gmra.mrb[52].mxu1 %v2000_v26  ;;  %1848 = vmatmul.mubr.bf16.gmra.mrb[52].mxu0 %v2001_v27 }
  0x8b   :  { %975 = vmatprep.mubr.bf16.mxu1 %v2002_v28  ;;  %1851 = vmatprep.mubr.msk.bf16.mxu0 %vm2023_vm0, %v2022_v24 }
  0x92   :  { %976 = vmatmul.mubr.bf16.gmra.mrb[56].mxu1 %v2004_v29  ;;  %1852 = vmatmul.mubr.bf16.gmra.mrb[56].mxu0 %v2005_v30 }
  0x93   :  { %983 = vmatprep.mubr.bf16.mxu1 %v2006_v31  ;;  %1855 = vmatprep.mubr.msk.bf16.mxu0 %vm2023_vm0, %v2022_v24 }
  0x9a   :  { %984 = vmatmul.mubr.bf16.gmra.mrb[60].mxu1 %v2008_v32  ;;  %1856 = vmatmul.mubr.bf16.gmra.mrb[60].mxu0 %v2009_v33 }
  0x9b   :  { %991 = vmatprep.mubr.bf16.mxu1 %v2010_v34  ;;  %1859 = vmatprep.mubr.msk.bf16.mxu0 %vm2023_vm0, %v2022_v24 }
  0xa2   :  { %992 = vmatmul.mubr.bf16.gmra.mrb[64].mxu1 %v2012_v35  ;;  %1860 = vmatmul.mubr.bf16.gmra.mrb[64].mxu0 %v2013_v36 }
  0xa3   :  { %999 = vmatprep.mubr.bf16.mxu1 %v2014_v37  ;;  %1863 = vmatprep.mubr.msk.bf16.mxu0 %vm2023_vm0, %v2022_v24 }
  0xaa   :  { %1000 = vmatmul.mubr.bf16.gmra.mrb[68].mxu1 %v2016_v39  ;;  %1864 = vmatmul.mubr.bf16.gmra.mrb[68].mxu0 %v2017_v40 }
  0xab   :  { %1007 = vmatprep.mubr.bf16.mxu1 %v1433_v41  ;;  %1867 = vmatprep.mubr.msk.bf16.mxu0 %vm2023_vm0, %v2022_v24 }
  0xb2   :  { %1008 = vmatmul.mubr.bf16.gmra.mrb[72].mxu1 %v1432_v42  ;;  %1868 = vmatmul.mubr.bf16.gmra.mrb[72].mxu0 %v2020_v43 }
  0xb3   :  { %1871 = vmatprep.mubr.msk.bf16.mxu0 %vm2023_vm0, %v2022_v24 }
  0xba   :  { %1872 = vmatmul.mubr.bf16.gmra.mrb[76].mxu0 %v2021_v44 }
  0xf5   :  { %v1614_v45 = vpop.f32.mrb[0].mxu0  ;;  %v1656_v46 = vpop.f32.mrb[0].mxu1 }
  0xf6   :  { %v1615_v47 = vpop.f32.mrb[1].mxu0  ;;  %v1657_v48 = vpop.f32.mrb[1].mxu1 }
  0xf7   :  { %v2392_v49 = vadd.f32 %v1615_v47, %v1614_v45  ;;  %v1617_v50 = vpop.f32.mrb[2].mxu0  ;;  %v2394_v51 = vadd.f32 %v1657_v48, %v1656_v46  ;;  %v1659_v52 = vpop.f32.mrb[2].mxu1 }
  0xf8   :  { %v1618_v53 = vpop.f32.mrb[3].mxu0  ;;  %v1660_v54 = vpop.f32.mrb[3].mxu1 }
  0xf9   :  { %v2396_v55 = vadd.f32 %v1618_v53, %v1617_v50  ;;  %v2398_v24 = vadd.f32 %v1660_v54, %v1659_v52 }
  0xfd   :  { %v1620_v56 = vpop.f32.mrb[4].mxu0  ;;  %v1662_v57 = vpop.f32.mrb[4].mxu1 }
  0xfe   :  { %v1621_v58 = vpop.f32.mrb[5].mxu0  ;;  %v1663_v59 = vpop.f32.mrb[5].mxu1 }
  0xff   :  { %v2400_v60 = vadd.f32 %v1621_v58, %v1620_v56  ;;  %v1623_v61 = vpop.f32.mrb[6].mxu0  ;;  %v2402_v62 = vadd.f32 %v1663_v59, %v1662_v57  ;;  %v1665_v63 = vpop.f32.mrb[6].mxu1 }
 0x100   :  { %v1624_v0 = vpop.f32.mrb[7].mxu0  ;;  %v1666_v1 = vpop.f32.mrb[7].mxu1 }
 0x101   :  { %v2404_v2 = vadd.f32 %v1624_v0, %v1623_v61  ;;  %v2406_v3 = vadd.f32 %v1666_v1, %v1665_v63 }
 0x105   :  { %v1626_v4 = vpop.f32.mrb[8].mxu0  ;;  %v1668_v5 = vpop.f32.mrb[8].mxu1 }
 0x106   :  { %v1627_v6 = vpop.f32.mrb[9].mxu0  ;;  %v1669_v7 = vpop.f32.mrb[9].mxu1 }
 0x107   :  { %v2408_v8 = vadd.f32 %v1627_v6, %v1626_v4  ;;  %v1629_v9 = vpop.f32.mrb[10].mxu0  ;;  %v2410_v10 = vadd.f32 %v1669_v7, %v1668_v5  ;;  %v1671_v11 = vpop.f32.mrb[10].mxu1 }
 0x108   :  { %v1630_v12 = vpop.f32.mrb[11].mxu0  ;;  %v1672_v13 = vpop.f32.mrb[11].mxu1 }
 0x109   :  { %v2412_v14 = vadd.f32 %v1630_v12, %v1629_v9  ;;  %v2414_v15 = vadd.f32 %v1672_v13, %v1671_v11  ;;  %v2447_v13 = vld [vmem:[%s2568_s2] ss:$0 sm:$0xff] }
 0x10d   :  { %v1632_v16 = vpop.f32.mrb[12].mxu0  ;;  %v1674_v17 = vpop.f32.mrb[12].mxu1 }
 0x10e   :  { %v1633_v18 = vpop.f32.mrb[13].mxu0  ;;  %v1675_v19 = vpop.f32.mrb[13].mxu1 }
 0x10f   :  { %v2416_v20 = vadd.f32 %v1633_v18, %v1632_v16  ;;  %v1635_v21 = vpop.f32.mrb[14].mxu0  ;;  %v2418_v22 = vadd.f32 %v1675_v19, %v1674_v17  ;;  %v1677_v23 = vpop.f32.mrb[14].mxu1  ;;  %v2452_v19 = vld [vmem:[%s2569_s3] ss:$0 sm:$0xff] }
 0x110   :  { %v1636_v25 = vpop.f32.mrb[15].mxu0  ;;  %v1678_v26 = vpop.f32.mrb[15].mxu1 }
 0x111   :  { %v2420_v27 = vadd.f32 %v1636_v25, %v1635_v21  ;;  %v2422_v28 = vadd.f32 %v1678_v26, %v1677_v23 }
 0x115   :  { %v1638_v29 = vpop.f32.mrb[16].mxu0  ;;  %v1680_v30 = vpop.f32.mrb[16].mxu1 }
 0x116   :  { %v1639_v31 = vpop.f32.mrb[17].mxu0  ;;  %v1681_v32 = vpop.f32.mrb[17].mxu1 }
 0x117   :  { %v2424_v33 = vadd.f32 %v1639_v31, %v1638_v29  ;;  %v1641_v34 = vpop.f32.mrb[18].mxu0  ;;  %v2426_v35 = vadd.f32 %v1681_v32, %v1680_v30  ;;  %v1683_v36 = vpop.f32.mrb[18].mxu1 }
 0x118   :  { %v1642_v37 = vpop.f32.mrb[19].mxu0  ;;  %v1684_v38 = vpop.f32.mrb[19].mxu1 }
 0x119   :  { %v2428_v39 = vadd.f32 %v1642_v37, %v1641_v34  ;;  %v2430_v40 = vadd.f32 %v1684_v38, %v1683_v36 }
 0x11d   :  { %v1644_v41 = vpop.f32.mrb[20].mxu0  ;;  %v1686_v42 = vpop.f32.mrb[20].mxu1 }
 0x11e   :  { %v1645_v43 = vpop.f32.mrb[21].mxu0  ;;  %v1687_v44 = vpop.f32.mrb[21].mxu1 }
 0x11f   :  { %v2432_v45 = vadd.f32 %v1645_v43, %v1644_v41  ;;  %v1647_v46 = vpop.f32.mrb[22].mxu0  ;;  %v2434_v47 = vadd.f32 %v1687_v44, %v1686_v42  ;;  %v1689_v48 = vpop.f32.mrb[22].mxu1 }
 0x120   :  { %v1648_v50 = vpop.f32.mrb[23].mxu0  ;;  %v1690_v52 = vpop.f32.mrb[23].mxu1 }
 0x121   :  { %v2436_v53 = vadd.f32 %v1648_v50, %v1647_v46 }
 0x125   :  { %v1650_v54 = vpop.f32.mrb[24].mxu0  ;;  %v1708_v56 = vpop.f32.mrb[24].mxu1 }
 0x126   :  { %v1651_v57 = vpop.f32.mrb[25].mxu0  ;;  %v1709_v58 = vpop.f32.mrb[25].mxu1 }
 0x127   :  { %v2438_v59 = vadd.f32 %v1651_v57, %v1650_v54  ;;  %v1710_v61 = vadd.f32 %v1709_v58, %v1708_v56  ;;  %v1653_v63 = vpop.f32.mrb[26].mxu0  ;;  %v1711_v0 = vpop.f32.mrb[26].mxu1 }
 0x128   :  { %v1654_v1 = vpop.f32.mrb[27].mxu0  ;;  %v1712_v4 = vpop.f32.mrb[27].mxu1 }
 0x129   :  { %v2440_v5 = vadd.f32 %v1654_v1, %v1653_v63  ;;  %v1713_v6 = vadd.f32 %v1712_v4, %v1711_v0  ;;  %v914_v7 = vadd.f32 %v1710_v61, %v2392_v49 }
 0x12b   :  { %v917_v9 = vadd.f32 %v1713_v6, %v2396_v55 }
 0x12d   :  { %v1714_v11 = vpop.f32.mrb[28].mxu1  ;;  %v1049_v12 = vpop.f32.mrb[28].mxu0 }
 0x12e   :  { %v1050_v16 = vadd.f32 %v1049_v12, %v914_v7  ;;  %v1715_v17 = vpop.f32.mrb[29].mxu1  ;;  %v1825_v18 = vpop.f32.mrb[29].mxu0 }
 0x12f   :  { %v1716_v21 = vadd.f32 %v1715_v17, %v1714_v11  ;;  %v1717_v23 = vpop.f32.mrb[30].mxu1  ;;  %v1052_v49 = vpop.f32.mrb[30].mxu0 }
 0x130   :  { %v1158_v55 = vmul.f32 %v2447_v13, %v1050_v16  ;;  %v1053_v25 = vadd.f32 %v1052_v49, %v917_v9  ;;  %v1718_v26 = vpop.f32.mrb[31].mxu1  ;;  %v1826_v29 = vpop.f32.mrb[31].mxu0 }
 0x131   :  { %v1719_v30 = vadd.f32 %v1718_v26, %v1717_v23  ;;  %v922_v31 = vadd.f32 %v1716_v21, %v2400_v60 }
 0x132   :  { %v1190_v32 = vadd.f32 %v2452_v19, %v1158_v55  ;;  %v1159_v34 = vmul.f32 %v2447_v13, %v1053_v25 }
 0x133   :  { %v925_v36 = vadd.f32 %v1719_v30, %v2404_v2 }
 0x134   :  { %v1191_v37 = vadd.f32 %v2452_v19, %v1159_v34  ;;  %v1215_v42 = vmax.f32 %v1190_v32, 0.0 }
 0x135   :  { %v1720_v38 = vpop.f32.mrb[32].mxu1  ;;  %v1057_v41 = vpop.f32.mrb[32].mxu0 }
 0x136   :  { %v1216_v43 = vmax.f32 %v1191_v37, 0.0  ;;  %v1058_v44 = vadd.f32 %v1057_v41, %v922_v31  ;;  %v1721_v46 = vpop.f32.mrb[33].mxu1  ;;  %v1829_v48 = vpop.f32.mrb[33].mxu0 }
 0x137   :  { %v1722_v50 = vadd.f32 %v1721_v46, %v1720_v38  ;;  %v1723_v52 = vpop.f32.mrb[34].mxu1  ;;  %v1060_v54 = vpop.f32.mrb[34].mxu0 }
 0x138   :  { %v1530_v56 = vpack.c.bf16 %v1216_v43, %v1215_v42  ;;  %v1160_v60 = vmul.f32 %v2447_v13, %v1058_v44  ;;  %v1061_v57 = vadd.f32 %v1060_v54, %v925_v36  ;;  %v1724_v58 = vpop.f32.mrb[35].mxu1  ;;  %v1830_v61 = vpop.f32.mrb[35].mxu0 }
 0x139   :  { %v1725_v63 = vadd.f32 %v1724_v58, %v1723_v52  ;;  %v930_v2 = vadd.f32 %v1722_v50, %v2408_v8 }
 0x13a   :  { %1531 = vst [vmem:[%s2570_s4] sm:$0xff] %v1530_v56   ;;  %v1192_v0 = vadd.f32 %v2452_v19, %v1160_v60  ;;  %v1161_v1 = vmul.f32 %v2447_v13, %v1061_v57 }
 0x13b   :  { %v933_v4 = vadd.f32 %v1725_v63, %v2412_v14 }
 0x13c   :  { %v1193_v6 = vadd.f32 %v2452_v19, %v1161_v1  ;;  %v1217_v11 = vmax.f32 %v1192_v0, 0.0 }
 0x13d   :  { %v1726_v7 = vpop.f32.mrb[36].mxu1  ;;  %v1065_v9 = vpop.f32.mrb[36].mxu0 }
 0x13e   :  { %v1218_v12 = vmax.f32 %v1193_v6, 0.0  ;;  %v1066_v16 = vadd.f32 %v1065_v9, %v930_v2  ;;  %v1727_v17 = vpop.f32.mrb[37].mxu1  ;;  %v1833_v18 = vpop.f32.mrb[37].mxu0 }
 0x13f   :  { %v1728_v8 = vadd.f32 %v1727_v17, %v1726_v7  ;;  %v1729_v21 = vpop.f32.mrb[38].mxu1  ;;  %v1068_v23 = vpop.f32.mrb[38].mxu0 }
 0x140   :  { %v1535_v49 = vpack.c.bf16 %v1218_v12, %v1217_v11  ;;  %v1162_v55 = vmul.f32 %v2447_v13, %v1066_v16  ;;  %v1069_v25 = vadd.f32 %v1068_v23, %v933_v4  ;;  %v1730_v26 = vpop.f32.mrb[39].mxu1  ;;  %v1834_v29 = vpop.f32.mrb[39].mxu0 }
 0x141   :  { %v1731_v30 = vadd.f32 %v1730_v26, %v1729_v21  ;;  %v938_v14 = vadd.f32 %v1728_v8, %v2416_v20 }
 0x142   :  { %1587 = vst [vmem:[%s2570_s4 + $0x8] sm:$0xff] %v1535_v49   ;;  %v1194_v31 = vadd.f32 %v2452_v19, %v1162_v55  ;;  %v1163_v32 = vmul.f32 %v2447_v13, %v1069_v25 }
 0x143   :  { %v941_v34 = vadd.f32 %v1731_v30, %v2420_v27 }
 0x144   :  { %v1195_v36 = vadd.f32 %v2452_v19, %v1163_v32  ;;  %v1219_v41 = vmax.f32 %v1194_v31, 0.0 }
 0x145   :  { %v1732_v37 = vpop.f32.mrb[40].mxu1  ;;  %v1073_v38 = vpop.f32.mrb[40].mxu0 }
 0x146   :  { %v1220_v42 = vmax.f32 %v1195_v36, 0.0  ;;  %v1074_v43 = vadd.f32 %v1073_v38, %v938_v14  ;;  %v1733_v44 = vpop.f32.mrb[41].mxu1  ;;  %v1837_v46 = vpop.f32.mrb[41].mxu0 }
 0x147   :  { %v1734_v20 = vadd.f32 %v1733_v44, %v1732_v37  ;;  %v1735_v48 = vpop.f32.mrb[42].mxu1  ;;  %v1076_v50 = vpop.f32.mrb[42].mxu0 }
 0x148   :  { %v1540_v52 = vpack.c.bf16 %v1220_v42, %v1219_v41  ;;  %v1164_v54 = vmul.f32 %v2447_v13, %v1074_v43  ;;  %v1077_v56 = vadd.f32 %v1076_v50, %v941_v34  ;;  %v1736_v60 = vpop.f32.mrb[43].mxu1  ;;  %v1838_v57 = vpop.f32.mrb[43].mxu0 }
 0x149   :  { %v1737_v58 = vadd.f32 %v1736_v60, %v1735_v48  ;;  %v946_v27 = vadd.f32 %v1734_v20, %v2424_v33 }
 0x14a   :  { %1588 = vst [vmem:[%s2570_s4 + $0x10] sm:$0xff] %v1540_v52   ;;  %v1196_v61 = vadd.f32 %v2452_v19, %v1164_v54  ;;  %v1165_v63 = vmul.f32 %v2447_v13, %v1077_v56 }
 0x14b   :  { %v949_v2 = vadd.f32 %v1737_v58, %v2428_v39 }
 0x14c   :  { %v1197_v0 = vadd.f32 %v2452_v19, %v1165_v63  ;;  %v1221_v6 = vmax.f32 %v1196_v61, 0.0 }
 0x14d   :  { %v1738_v1 = vpop.f32.mrb[44].mxu1  ;;  %v1081_v4 = vpop.f32.mrb[44].mxu0 }
 0x14e   :  { %v1222_v7 = vmax.f32 %v1197_v0, 0.0  ;;  %v1082_v9 = vadd.f32 %v1081_v4, %v946_v27  ;;  %v1739_v11 = vpop.f32.mrb[45].mxu1  ;;  %v1841_v12 = vpop.f32.mrb[45].mxu0 }
 0x14f   :  { %v1740_v33 = vadd.f32 %v1739_v11, %v1738_v1  ;;  %v1741_v16 = vpop.f32.mrb[46].mxu1  ;;  %v1084_v17 = vpop.f32.mrb[46].mxu0 }
 0x150   :  { %v1545_v18 = vpack.c.bf16 %v1222_v7, %v1221_v6  ;;  %v1166_v8 = vmul.f32 %v2447_v13, %v1082_v9  ;;  %v1085_v21 = vadd.f32 %v1084_v17, %v949_v2  ;;  %v1742_v23 = vpop.f32.mrb[47].mxu1  ;;  %v1842_v49 = vpop.f32.mrb[47].mxu0 }
 0x151   :  { %v1743_v55 = vadd.f32 %v1742_v23, %v1741_v16  ;;  %v954_v39 = vadd.f32 %v1740_v33, %v2432_v45 }
 0x152   :  { %1589 = vst [vmem:[%s2570_s4 + $0x18] sm:$0xff] %v1545_v18   ;;  %v1198_v25 = vadd.f32 %v2452_v19, %v1166_v8  ;;  %v1167_v26 = vmul.f32 %v2447_v13, %v1085_v21 }
 0x153   :  { %v957_v29 = vadd.f32 %v1743_v55, %v2436_v53 }
 0x154   :  { %v1199_v30 = vadd.f32 %v2452_v19, %v1167_v26  ;;  %v1223_v32 = vmax.f32 %v1198_v25, 0.0 }
 0x155   :  { %v1744_v14 = vpop.f32.mrb[48].mxu1  ;;  %v1089_v31 = vpop.f32.mrb[48].mxu0 }
 0x156   :  { %v1224_v34 = vmax.f32 %v1199_v30, 0.0  ;;  %v1090_v36 = vadd.f32 %v1089_v31, %v954_v39  ;;  %v1745_v37 = vpop.f32.mrb[49].mxu1  ;;  %v1845_v38 = vpop.f32.mrb[49].mxu0 }
 0x157   :  { %v1746_v45 = vadd.f32 %v1745_v37, %v1744_v14  ;;  %v1747_v41 = vpop.f32.mrb[50].mxu1  ;;  %v1092_v42 = vpop.f32.mrb[50].mxu0 }
 0x158   :  { %v1550_v43 = vpack.c.bf16 %v1224_v34, %v1223_v32  ;;  %v1168_v44 = vmul.f32 %v2447_v13, %v1090_v36  ;;  %v1093_v46 = vadd.f32 %v1092_v42, %v957_v29  ;;  %v1748_v20 = vpop.f32.mrb[51].mxu1  ;;  %v1846_v48 = vpop.f32.mrb[51].mxu0 }
 0x159   :  { %v1749_v50 = vadd.f32 %v1748_v20, %v1747_v41  ;;  %v962_v53 = vadd.f32 %v1746_v45, %v2438_v59 }
 0x15a   :  { %1590 = vst [vmem:[%s2570_s4 + $0x20] sm:$0xff] %v1550_v43   ;;  %v1200_v52 = vadd.f32 %v2452_v19, %v1168_v44  ;;  %v1169_v54 = vmul.f32 %v2447_v13, %v1093_v46 }
 0x15b   :  { %v965_v56 = vadd.f32 %v1749_v50, %v2440_v5 }
 0x15c   :  { %v1201_v60 = vadd.f32 %v2452_v19, %v1169_v54  ;;  %v1225_v27 = vmax.f32 %v1200_v52, 0.0 }
 0x15d   :  { %v1750_v57 = vpop.f32.mrb[52].mxu1  ;;  %v1097_v58 = vpop.f32.mrb[52].mxu0 }
 0x15e   :  { %v1226_v61 = vmax.f32 %v1201_v60, 0.0  ;;  %v1098_v63 = vadd.f32 %v1097_v58, %v962_v53  ;;  %v1751_v2 = vpop.f32.mrb[53].mxu1  ;;  %v1849_v0 = vpop.f32.mrb[53].mxu0 }
 0x15f   :  { %v1752_v59 = vadd.f32 %v1751_v2, %v1750_v57  ;;  %v1753_v1 = vpop.f32.mrb[54].mxu1  ;;  %v1100_v4 = vpop.f32.mrb[54].mxu0 }
 0x160   :  { %v1555_v6 = vpack.c.bf16 %v1226_v61, %v1225_v27  ;;  %v1170_v7 = vmul.f32 %v2447_v13, %v1098_v63  ;;  %v1101_v9 = vadd.f32 %v1100_v4, %v965_v56  ;;  %v1754_v11 = vpop.f32.mrb[55].mxu1  ;;  %v1850_v12 = vpop.f32.mrb[55].mxu0 }
 0x161   :  { %v1755_v33 = vadd.f32 %v1754_v11, %v1753_v1  ;;  %v970_v5 = vadd.f32 %v1752_v59, %v2394_v51 }
 0x162   :  { %1591 = vst [vmem:[%s2570_s4 + $0x28] sm:$0xff] %v1555_v6   ;;  %v1202_v16 = vadd.f32 %v2452_v19, %v1170_v7  ;;  %v1171_v17 = vmul.f32 %v2447_v13, %v1101_v9 }
 0x163   :  { %v973_v18 = vadd.f32 %v1755_v33, %v2398_v24 }
 0x164   :  { %v1203_v8 = vadd.f32 %v2452_v19, %v1171_v17  ;;  %v1227_v49 = vmax.f32 %v1202_v16, 0.0 }
 0x165   :  { %v1756_v21 = vpop.f32.mrb[56].mxu1  ;;  %v1105_v23 = vpop.f32.mrb[56].mxu0 }
 0x166   :  { %v1228_v55 = vmax.f32 %v1203_v8, 0.0  ;;  %v1106_v39 = vadd.f32 %v1105_v23, %v970_v5  ;;  %v1757_v25 = vpop.f32.mrb[57].mxu1  ;;  %v1853_v26 = vpop.f32.mrb[57].mxu0 }
 0x167   :  { %v1758_v51 = vadd.f32 %v1757_v25, %v1756_v21  ;;  %v1759_v29 = vpop.f32.mrb[58].mxu1  ;;  %v1108_v30 = vpop.f32.mrb[58].mxu0 }
 0x168   :  { %v1560_v14 = vpack.c.bf16 %v1228_v55, %v1227_v49  ;;  %v1172_v31 = vmul.f32 %v2447_v13, %v1106_v39  ;;  %v1109_v32 = vadd.f32 %v1108_v30, %v973_v18  ;;  %v1760_v34 = vpop.f32.mrb[59].mxu1  ;;  %v1854_v36 = vpop.f32.mrb[59].mxu0 }
 0x169   :  { %v1761_v37 = vadd.f32 %v1760_v34, %v1759_v29  ;;  %v978_v24 = vadd.f32 %v1758_v51, %v2402_v62 }
 0x16a   :  { %1592 = vst [vmem:[%s2570_s4 + $0x30] sm:$0xff] %v1560_v14   ;;  %v1204_v38 = vadd.f32 %v2452_v19, %v1172_v31  ;;  %v1173_v45 = vmul.f32 %v2447_v13, %v1109_v32 }
 0x16b   :  { %v981_v41 = vadd.f32 %v1761_v37, %v2406_v3 }
 0x16c   :  { %v1205_v42 = vadd.f32 %v2452_v19, %v1173_v45  ;;  %v1229_v46 = vmax.f32 %v1204_v38, 0.0 }
 0x16d   :  { %v1762_v43 = vpop.f32.mrb[60].mxu1  ;;  %v1113_v44 = vpop.f32.mrb[60].mxu0 }
 0x16e   :  { %v1230_v20 = vmax.f32 %v1205_v42, 0.0  ;;  %v1114_v48 = vadd.f32 %v1113_v44, %v978_v24  ;;  %v1763_v50 = vpop.f32.mrb[61].mxu1  ;;  %v1857_v53 = vpop.f32.mrb[61].mxu0 }
 0x16f   :  { %v1764_v62 = vadd.f32 %v1763_v50, %v1762_v43  ;;  %v1765_v52 = vpop.f32.mrb[62].mxu1  ;;  %v1116_v54 = vpop.f32.mrb[62].mxu0 }
 0x170   :  { %v1565_v56 = vpack.c.bf16 %v1230_v20, %v1229_v46  ;;  %v1174_v60 = vmul.f32 %v2447_v13, %v1114_v48  ;;  %v1117_v57 = vadd.f32 %v1116_v54, %v981_v41  ;;  %v1766_v58 = vpop.f32.mrb[63].mxu1  ;;  %v1858_v27 = vpop.f32.mrb[63].mxu0 }
 0x171   :  { %v1767_v61 = vadd.f32 %v1766_v58, %v1765_v52  ;;  %v986_v3 = vadd.f32 %v1764_v62, %v2410_v10 }
 0x172   :  { %1593 = vst [vmem:[%s2570_s4 + $0x38] sm:$0xff] %v1565_v56   ;;  %v1206_v63 = vadd.f32 %v2452_v19, %v1174_v60  ;;  %v1175_v2 = vmul.f32 %v2447_v13, %v1117_v57 }
 0x173   :  { %v989_v0 = vadd.f32 %v1767_v61, %v2414_v15 }
 0x174   :  { %v1207_v59 = vadd.f32 %v2452_v19, %v1175_v2  ;;  %v1231_v6 = vmax.f32 %v1206_v63, 0.0 }
 0x175   :  { %v1768_v1 = vpop.f32.mrb[64].mxu1  ;;  %v1121_v4 = vpop.f32.mrb[64].mxu0 }
 0x176   :  { %v1232_v7 = vmax.f32 %v1207_v59, 0.0  ;;  %v1122_v9 = vadd.f32 %v1121_v4, %v986_v3  ;;  %v1769_v11 = vpop.f32.mrb[65].mxu1  ;;  %v1861_v12 = vpop.f32.mrb[65].mxu0 }
 0x177   :  { %v1770_v10 = vadd.f32 %v1769_v11, %v1768_v1  ;;  %v1771_v33 = vpop.f32.mrb[66].mxu1  ;;  %v1124_v5 = vpop.f32.mrb[66].mxu0 }
 0x178   :  { %v1570_v16 = vpack.c.bf16 %v1232_v7, %v1231_v6  ;;  %v1176_v17 = vmul.f32 %v2447_v13, %v1122_v9  ;;  %v1125_v18 = vadd.f32 %v1124_v5, %v989_v0  ;;  %v1772_v8 = vpop.f32.mrb[67].mxu1  ;;  %v1862_v21 = vpop.f32.mrb[67].mxu0 }
 0x179   :  { %v1773_v23 = vadd.f32 %v1772_v8, %v1771_v33  ;;  %v994_v15 = vadd.f32 %v1770_v10, %v2418_v22 }
 0x17a   :  { %1594 = vst [vmem:[%s2570_s4 + $0x40] sm:$0xff] %v1570_v16   ;;  %v1208_v49 = vadd.f32 %v2452_v19, %v1176_v17  ;;  %v1177_v55 = vmul.f32 %v2447_v13, %v1125_v18 }
 0x17b   :  { %v997_v39 = vadd.f32 %v1773_v23, %v2422_v28 }
 0x17c   :  { %v1209_v25 = vadd.f32 %v2452_v19, %v1177_v55  ;;  %v1233_v29 = vmax.f32 %v1208_v49, 0.0 }
 0x17d   :  { %v1774_v26 = vpop.f32.mrb[68].mxu1  ;;  %v1129_v51 = vpop.f32.mrb[68].mxu0 }
 0x17e   :  { %v1234_v30 = vmax.f32 %v1209_v25, 0.0  ;;  %v1130_v14 = vadd.f32 %v1129_v51, %v994_v15  ;;  %v1775_v31 = vpop.f32.mrb[69].mxu1  ;;  %v1865_v32 = vpop.f32.mrb[69].mxu0 }
 0x17f   :  { %v1776_v22 = vadd.f32 %v1775_v31, %v1774_v26  ;;  %v1777_v34 = vpop.f32.mrb[70].mxu1  ;;  %v1132_v36 = vpop.f32.mrb[70].mxu0 }
 0x180   :  { %v1575_v37 = vpack.c.bf16 %v1234_v30, %v1233_v29  ;;  %v1178_v24 = vmul.f32 %v2447_v13, %v1130_v14  ;;  %v1133_v38 = vadd.f32 %v1132_v36, %v997_v39  ;;  %v1778_v45 = vpop.f32.mrb[71].mxu1  ;;  %v1866_v41 = vpop.f32.mrb[71].mxu0 }
 0x181   :  { %v1779_v42 = vadd.f32 %v1778_v45, %v1777_v34  ;;  %v1002_v28 = vadd.f32 %v1776_v22, %v2426_v35 }
 0x182   :  { %1595 = vst [vmem:[%s2570_s4 + $0x48] sm:$0xff] %v1575_v37   ;;  %v1210_v43 = vadd.f32 %v2452_v19, %v1178_v24  ;;  %v1179_v44 = vmul.f32 %v2447_v13, %v1133_v38 }
 0x183   :  { %v1005_v46 = vadd.f32 %v1779_v42, %v2430_v40 }
 0x184   :  { %v1211_v20 = vadd.f32 %v2452_v19, %v1179_v44  ;;  %v1235_v53 = vmax.f32 %v1210_v43, 0.0 }
 0x185   :  { %v1780_v48 = vpop.f32.mrb[72].mxu1  ;;  %v1137_v50 = vpop.f32.mrb[72].mxu0 }
 0x186   :  { %v1236_v62 = vmax.f32 %v1211_v20, 0.0  ;;  %v1138_v52 = vadd.f32 %v1137_v50, %v1002_v28  ;;  %v1781_v54 = vpop.f32.mrb[73].mxu1  ;;  %v1869_v56 = vpop.f32.mrb[73].mxu0 }
 0x187   :  { %v1782_v35 = vadd.f32 %v1781_v54, %v1780_v48  ;;  %v1140_v60 = vpop.f32.mrb[74].mxu0  ;;  %v1783_v57 = vpop.f32.mrb[74].mxu1 }
 0x188   :  { %v1580_v58 = vpack.c.bf16 %v1236_v62, %v1235_v53  ;;  %v1180_v27 = vmul.f32 %v2447_v13, %v1138_v52  ;;  %v1141_v61 = vadd.f32 %v1140_v60, %v1005_v46  ;;  %v1870_v3 = vpop.f32.mrb[75].mxu0  ;;  %v1784_v63 = vpop.f32.mrb[75].mxu1 }
 0x189   :  { %v1010_v40 = vadd.f32 %v1782_v35, %v2434_v47 }
 0x18a   :  { %1596 = vst [vmem:[%s2570_s4 + $0x50] sm:$0xff] %v1580_v58   ;;  %v1212_v2 = vadd.f32 %v2452_v19, %v1180_v27  ;;  %v1181_v0 = vmul.f32 %v2447_v13, %v1141_v61 }
 0x18c   :  { %v1213_v59 = vadd.f32 %v2452_v19, %v1181_v0  ;;  %v1237_v4 = vmax.f32 %v1212_v2, 0.0 }
 0x18d   :  { %v1145_v1 = vpop.f32.mrb[76].mxu0 }
 0x18e   :  { %v1238_v6 = vmax.f32 %v1213_v59, 0.0  ;;  %v1146_v7 = vadd.f32 %v1145_v1, %v1010_v40  ;;  %v1873_v9 = vpop.f32.mrb[77].mxu0 }
 0x18f   :  { %v1148_v11 = vpop.f32.mrb[78].mxu0 }
 0x190   :  { %v1585_v12 = vpack.c.bf16 %v1238_v6, %v1237_v4  ;;  %v1182_v10 = vmul.f32 %v2447_v13, %v1146_v7  ;;  %v1874_v47 = vpop.f32.mrb[79].mxu0 }
 0x192   :  { %1597 = vst [vmem:[%s2570_s4 + $0x58] sm:$0xff] %v1585_v12   ;;  %v1214_v33 = vadd.f32 %v2452_v19, %v1182_v10 }
 0x194   :  { %v1239_v5 = vmax.f32 %v1214_v33, 0.0 }
 0x196   :  { %v1526_v16 = vpack.c.bf16 %v1239_v5, %v1239_v5 }
 0x198   :  { %1365 = vst [vmem:[%s2570_s4 + $0x60] sm:$0xf] %v1526_v16 }

// kernel: forward.8
= control target key start
LH: loop header
LB: loop body
LE: loop exit
PB: predicated region body
PF: predicated region fallthrough
CT: control target
= control target key end

     0   :  { %s7438_s0 = inlined_call_operand.vmem [shape: bf16[8,12800], index: 0, kind: input, shape index: {}]   ;;  %s7439_s1 = inlined_call_operand.hbm [shape: bf16[12800,2048], index: 1, kind: input, shape index: {}]   ;;  %s7440_s2 = inlined_call_operand.vmem [shape: f32[1,2048], index: 2, kind: input, shape index: {}]   ;;  %s7441_s3 = inlined_call_operand.hbm [shape: f32[1,2048], index: 3, kind: input, shape index: {}]   ;;  %s7442_s4 = inlined_call_operand.vmem [shape: bf16[8,2048], index: 4, kind: output, shape index: {}]  }
   0x1   :  { %7448 = sst [smem:[#allocation10_spill]] %s7438_s0 }
   0x2   :  { %7449 = sst [smem:[#allocation11_spill]] %s7439_s1 }
   0x3   :  { %9 = vsyncpa [#allocation4], 0 }
   0x4   :  { %11 = vsyncpa [#allocation4 + $0x1], 0 }
   0x5   :  { %12 = vsyncpa [#allocation6], 0 }
   0x6   :  { %14 = vsyncpa [#allocation6 + $0x1], 0  ;;  %s6375_s15 = smov 0   ;;  %s6377_s16 = smov 0  }
   0x7   :  { %s6379_s17 = smov 0   ;;  %s6381_s18 = smov 0  }
   0x8   :  { %s6383_s19 = smov 0   ;;  %s6385_s20 = smov 0  }
   0x9   :  { %s6387_s21 = smov 0   ;;  %s6389_s22 = smov 0  }
   0xa   :  { %s6391_s23 = smov 0   ;;  %s6393_s24 = smov 0  }
   0xb   :  { %s6395_s25 = smov 0  }
   0xc LB: > { %s32_s26 = sadd.s32 1, %s6334_s23  ;;  %p83_p1 = scmp.ne.s32.totalorder %s6322_s20, %s6318_s19  ;;  %s6342_s25 = sphi %s6395_s25, %s20_s25   ;;  %s6338_s24 = sphi %s6393_s24, %s7478_s24   ;;  %s6334_s23 = sphi %s6391_s23, %s7477_s23   ;;  %s6330_s22 = sphi %s6389_s22, %s7476_s22   ;;  %s6326_s21 = sphi %s6387_s21, %s7475_s21   ;;  %s6322_s20 = sphi %s6385_s20, %s7474_s20   ;;  %s6318_s19 = sphi %s6383_s19, %s7473_s19   ;;  %s6314_s18 = sphi %s6381_s18, %s7472_s18   ;;  %s6310_s17 = sphi %s6379_s17, %s7471_s17   ;;  %s6306_s16 = sphi %s6377_s16, %s7470_s16   ;;  %s6302_s15 = sphi %s6375_s15, %s7469_s15  }
   0xd   : > { %p6432_p0 = scmp.ge.s32.totalorder %s32_s26, 10  ;;  %p7444_p2 = scmp.eq.s32.totalorder %s6342_s25, 0 }
   0xe   : > { %p7443_p4 = scmp.lt.s32.totalorder %s6342_s25, 20  ;;  %s206_s30 = sand.u32 1, %s6322_s20  }
   0xf   : > { %s7480_s26 = smov (%p6432_p0, %s32_s26), 0  ;;  %p85_p3 = por %p7444_p2, %p83_p1 }
  0x10   : > { %s6072_s5 = smul.u32 5120, %s206_s30  ;;  %s5396_s6 = sshll.u32 %s6338_s24, 3 }
  0x11   : > { %s6066_s7 = smul.u32 2560, %s6334_s23  ;;  %p6453_p5 = pnand %p7443_p4, %p85_p3 }
  0x12   : > { %s210_s10 = scalar_lea.vmem [#allocation3], %s6072_s5  ;;  %s7452_s1 = sld [smem:[#allocation11_spill]] }
  0x13   : > { %s217_s9 = sadd.s32 %s6066_s7, %s5396_s6  ;;  %s220_s11 = sshll.u32 %s210_s10, 4  ;;  %s6457_s11 = int_to_ptr.vmem [resolvable:$true] %s220_s11 }
  0x14   : > { %s5398_s12 = sshll.u32 %s217_s9, 6  ;;  %s6465_s29 = scalar_lea.sflag [#allocation4], %s206_s30 }
  0x15   : > { %p6190_p8 = pneg %p6453_p5 }
  0x18   : > { %s6462_s27 = scalar_lea.hbm %s7452_s1, %s5398_s12  ;;  %s6193_s7 = scalar_lea.hbm %s7452_s1, 1638400 }
  0x19   : > { %s6188_s0 = scalar_lea.hbm %s6462_s27, 81920  ;;  %p6194_p11 = scmp.lt.u32.totalorder %s6462_s27, %s7452_s1 }
  0x1a   : > { %p6189_p7 = scmp.ne.s32.totalorder %s6462_s27, %s6188_s0  ;;  %p6195_p12 = scmp.lt.u32.totalorder %s6193_s7, %s6188_s0 }
  0x1b   : > { %p6197_p1 = scmp.lt.u32.totalorder %s6188_s0, %s6462_s27 }
  0x1c   : > { %p6191_p9 = pnand %p6190_p8, %p6189_p7  ;;  %p6196_p13 = por %p6195_p12, %p6194_p11 }
  0x1e   : > { %p6192_p10 = pneg %p6191_p9  ;;  %p6198_p3 = por %p6197_p1, %p6196_p13 }
  0x20   : > { %p6199_p4 = pnand %p6198_p3, %p6192_p10 }
  0x22   : > { %6202 = shalt.err (!%p6199_p4)
}
  0x23   : > { %s6203_s30 = scalar_lea.vmem %s6457_s11, 81920  ;;  %s6344_s12 = smov [#allocation3]  }
  0x24   : > { %p6204_p7 = scmp.ne.s32.totalorder %s6457_s11, %s6203_s30  ;;  %s6208_s13 = sshll.u32 %s6344_s12, 4  ;;  %s6209_s13 = int_to_ptr.vmem [resolvable:$false] %s6208_s13 }
  0x25   : > { %s6210_s14 = scalar_lea.vmem %s6209_s13, 163840  ;;  %p6211_p6 = scmp.lt.s32.totalorder %s6457_s11, %s6209_s13 }
  0x26   : > { %p6206_p9 = pnand %p6204_p7, %p6190_p8  ;;  %p6212_p11 = scmp.lt.s32.totalorder %s6210_s14, %s6203_s30 }
  0x28   : > { %p6207_p2 = pneg %p6206_p9  ;;  %p6213_p12 = por %p6212_p11, %p6211_p6 }
  0x2a   : > { %p6214_p13 = pnand %p6213_p12, %p6207_p2 }
  0x2c   : > { %6217 = shalt.err (!%p6214_p13)
}
  0x2d   : > { %s6345_s0 = smov 1024   ;;  %s6346_s5 = smov 512  }
  0x2e   : > { %s6347_s6 = smov 32   ;;  %p255_p2 = scmp.lt.s32.totalorder %s6342_s25, 21 }
  0x2f   : > { %6081 = dma.hbm_to_vmem [thread:$0]  (!%p6453_p5), %s6462_s27, 81920, %s6457_s11, %s6465_s29, %s6345_s0, %s6346_s5, %s6347_s6  }
  0x30   : > { %p7453_p4 = scmp.ge.s32.totalorder %s6342_s25, 1  ;;  %s5392_s9 = sadd.s32 4294967295, %s6342_s25  }
  0x31   : > { %s35_s10 = sadd.s32 1, %s6338_s24  ;;  %p89_p8 = scmp.ne.s32.totalorder %s6318_s19, %s6314_s18 }
  0x32   : > { %p6496_p6 = pnand %p7453_p4, %p255_p2  ;;  %s7482_s10 = smov (!%p6432_p0, %s35_s10), %s6338_s24 }
  0x33   : > { %p6507_p10 = scmp.eq.s32.totalorder %s5392_s9, 0  ;;  %p37_p5 = scmp.ge.s32.totalorder %s7482_s10, 2 }
  0x34   : > { %s128_s27 = sadd.s32 1, %s6310_s17  ;;  %p135_p3 = scmp.ne.s32.totalorder %s6310_s17, %s6306_s16 }
  0x35   : > { %p6514_p1 = por %p6507_p10, %p89_p8  ;;  %s7484_s10 = smov (%p37_p5, %s7482_s10), 0 }
  0x36   : > { %7457 = sst [smem:[#allocation9_spill]] %s7484_s10  ;;  %p7458_p0 = scmp.eq.s32.totalorder %s6342_s25, 0 }
  0x37   : > { %s7456_s29 = scalar_select %p6514_p1, 1, 0 }
  0x38   : > { %p6524_p7 = por %p135_p3, %p7458_p0  ;;  %p141_p9 = scmp.ne.s32.totalorder %s6306_s16, %s6302_s15 }
  0x39   : > { %s72_s28 = ssub.s32 %s6338_s24, %s7484_s10  ;;  %s238_s11 = sand.u32 1, %s6310_s17  }
  0x3a   : > { %s7460_s30 = ssub.s32 %s6334_s23, %s7480_s26  ;;  %p126_p11 = scmp.eq.s32.totalorder %s72_s28, 0 }
  0x3b   : > { %s73_s12 = sor.u32 %s72_s28, %s7460_s30  ;;  %p6538_p13 = por %p141_p9, %p6507_p10 }
  0x3c   : > { %p74_p12 = scmp.eq.s32.totalorder %s73_s12, 0  ;;  %s7462_s0 = sadd.s32 1, %s6322_s20 }
  0x3d   : > { %s7461_s13 = scalar_select %p6538_p13, 1, 0 }
  0x3e   : > { %s6543_s14 = scalar_select %p126_p11, %s6310_s17, %s128_s27  }
  0x3f   : > { %s6548_s5 = scalar_select %p74_p12, %s6322_s20, %s7462_s0  }
  0x40   : > { %s5399_s6 = sshll.u32 %s238_s11, 3  ;;  %s6067_s9 = sshll.u32 %s6338_s24, 7 }
  0x41   : > { %s6554_s10 = scalar_lea.hbm %s7441_s3, %s6067_s9  ;;  %s242_s8 = scalar_lea.vmem [#allocation5], %s5399_s6 }
  0x42   : > { %s250_s28 = sshll.u32 %s242_s8, 4  ;;  %p7463_p2 = scmp.lt.s32.totalorder %s6342_s25, 20  ;;  %s6556_s28 = int_to_ptr.vmem [resolvable:$true] %s250_s28 }
  0x43   : > { %s239_s30 = scalar_lea.sflag [#allocation6], %s238_s11  ;;  %s6218_s1 = scalar_lea.hbm %s6554_s10, 128 }
  0x44   : > { %p6562_p4 = pnand %p7463_p2, %p6524_p7  ;;  %p6219_p8 = scmp.ne.s32.totalorder %s6554_s10, %s6218_s1 }
  0x45   : > { %s6223_s18 = scalar_lea.hbm %s7441_s3, 256  ;;  %p6224_p0 = scmp.lt.u32.totalorder %s6554_s10, %s7441_s3 }
  0x46   : > { %p6220_p10 = pneg %p6562_p4  ;;  %p6225_p7 = scmp.lt.u32.totalorder %s6223_s18, %s6218_s1 }
  0x47   : > { %p6227_p11 = scmp.lt.u32.totalorder %s6218_s1, %s6554_s10 }
  0x48   : > { %p6221_p5 = pnand %p6220_p10, %p6219_p8  ;;  %p6226_p9 = por %p6225_p7, %p6224_p0 }
  0x4a   : > { %p6222_p3 = pneg %p6221_p5  ;;  %p6228_p12 = por %p6227_p11, %p6226_p9 }
  0x4c   : > { %p6229_p2 = pnand %p6228_p12, %p6222_p3 }
  0x4e   : > { %6232 = shalt.err (!%p6229_p2)
}
  0x4f   : > { %s6233_s11 = scalar_lea.vmem %s6556_s28, 128  ;;  %s6348_s15 = smov [#allocation5]  }
  0x50   : > { %p6234_p8 = scmp.ne.s32.totalorder %s6556_s28, %s6233_s11  ;;  %s6238_s8 = sshll.u32 %s6348_s15, 4  ;;  %s6239_s8 = int_to_ptr.vmem [resolvable:$false] %s6238_s8 }
  0x51   : > { %s6240_s12 = scalar_lea.vmem %s6239_s8, 256  ;;  %p6241_p1 = scmp.lt.s32.totalorder %s6556_s28, %s6239_s8 }
  0x52   : > { %p6236_p5 = pnand %p6234_p8, %p6220_p10  ;;  %p6242_p0 = scmp.lt.s32.totalorder %s6240_s12, %s6233_s11 }
  0x54   : > { %p6237_p13 = pneg %p6236_p5  ;;  %p6243_p7 = por %p6242_p0, %p6241_p1 }
  0x56   : > { %p6244_p9 = pnand %p6243_p7, %p6237_p13 }
  0x58   : > { %6247 = shalt.err (!%p6244_p9)
}
  0x59   : > { %6084 = dma.hbm_to_vmem [thread:$0]  (!%p6562_p4), %s6554_s10, 128, %s6556_s28, %s239_s30  }
  0x5a   : > { %259 = sbr.rel (%p6496_p6) target bundleno = 997 (0x3e5), region = 36  ;;  %s261_s1 = sand.u32 (!%p6496_p6), 1, %s6318_s19  }
  0x5b   : > { %s6073_s0 = smul.u32 (!%p6496_p6), 5120, %s261_s1  ;;  %s262_s18 = scalar_lea.sflag (!%p6496_p6), [#allocation4], %s261_s1 }
  0x5c   : > { %p7465_p10 = scmp.ne.s32.totalorder (!%p6496_p6), %s7456_s29, 0 }
  0x5d   : > { %s6594_s6 = scalar_lea.vmem (!%p6496_p6), [#allocation3], %s6073_s0 }
  0x61   : > { %6293 = dma.done.wait (%p7465_p10), %s262_s18, 81920  }
  0x62   : > { %6295 = vsyncadd (%p7465_p10), %s262_s18, 4294885376  ;;  %s270_s27 = sand.u32 1, %s6306_s16   ;;  %p7466_p6 = scmp.ne.s32.totalorder %s7461_s13, 0 }
  0x63   : > { %s6601_s9 = sshll.u32 %s270_s27, 3  ;;  %s271_s7 = scalar_lea.sflag [#allocation6], %s270_s27 }
  0x64   : > { %s274_s10 = scalar_lea.vmem [#allocation5], %s6601_s9 }
  0x65   : > { %6297 = dma.done.wait (%p7466_p6), %s271_s7, 128  }
  0x66   : > { %6299 = vsyncadd (%p7466_p6), %s271_s7, 4294967168  ;;  %s321_s28 = smul.u32 10, %s6326_s21  ;;  %s5405_s30 = sshll.u32 %s6330_s22, 3 }
  0x67   : > { %p334_p1 = scmp.lt.s32.totalorder %s5405_s30, 15  ;;  %s7467_s27 = sld [smem:[#allocation10_spill]] }
  0x68   : > { %p324_p13 = scmp.lt.s32.totalorder %s321_s28, 99  ;;  %p5408_p4 = scmp.ne.s32.totalorder %s6326_s21, 0 }
  0x69   : > { %s7486_s30 = smov (!%p334_p1, %s5405_s30), 15  ;;  %v6349_v0 = vmov (!%p5408_p4), 0.0  }
  0x6a   : > { %s7488_s28 = smov (!%p324_p13, %s321_s28), 99  ;;  %s336_s15 = scalar_lea.vmem %s7440_s2, %s7486_s30  ;;  %353 = vst [vmem:[#allocation2] sm:$0xff] (!%p5408_p4), %v6349_v0  ;;  %354 = vst [vmem:[#allocation2 + $0x8] sm:$0xff] (!%p5408_p4), %v6349_v0 }
  0x6b   : > { %s5407_s8 = sshll.u32 %s7486_s30, 2  ;;  %s5404_s12 = sshll.u32 %s7488_s28, 2  ;;  %355 = vst [vmem:[#allocation2 + $0x10] sm:$0xff] (!%p5408_p4), %v6349_v0  ;;  %356 = vst [vmem:[#allocation2 + $0x18] sm:$0xff] (!%p5408_p4), %v6349_v0 }
  0x6c   : > { %s6620_s0 = scalar_lea.vmem %s7442_s4, %s5407_s8  ;;  %352 = sbr.rel (%p5408_p4) target bundleno = 115 (0x73), region = 48  ;;  %357 = vst [vmem:[#allocation2 + $0x20] sm:$0xff] (!%p5408_p4), %v6349_v0  ;;  %358 = vst [vmem:[#allocation2 + $0x28] sm:$0xff] (!%p5408_p4), %v6349_v0 }
  0x6d   : > { %s6625_s7 = scalar_lea.vmem %s7467_s27, %s5404_s12  ;;  %359 = vst [vmem:[#allocation2 + $0x30] sm:$0xff] (!%p5408_p4), %v6349_v0  ;;  %360 = vst [vmem:[#allocation2 + $0x38] sm:$0xff] (!%p5408_p4), %v6349_v0 }
  0x73 PF: > { %v374_v1 = vld [vmem:[%s6594_s6] sm:$0xff]  ;;  %v6660_v55 = vld [vmem:[%s6625_s7 + $0x8] sm:$0xff]  ;;  %p6059_p3 = scmp.ne.s32.totalorder %s6326_s21, 9 }
  0x74   : > { %v378_v2 = vld [vmem:[%s6594_s6 + $0x20] sm:$0xff]  ;;  %v6670_v60 = vcombine.high %v6660_v55, %v6660_v55 }
  0x75   : > { %v502_v3 = vld [vmem:[%s6594_s6 + $0x400] sm:$0xff]  ;;  %v5420_v4 = vcombine.high %v374_v1, %v378_v2  ;;  %v5419_v6 = vcombine.low %v374_v1, %v378_v2 }
  0x76   : > { %v506_v5 = vld [vmem:[%s6594_s6 + $0x420] sm:$0xff]  ;;  %4322 = vmatprep.mubr.bf16.mxu1 %v6670_v60 }
  0x77   : > { %v382_v7 = vld [vmem:[%s6594_s6 + $0x40] sm:$0xff]  ;;  %v5548_v9 = vcombine.high %v502_v3, %v506_v5  ;;  %v5547_v10 = vcombine.low %v502_v3, %v506_v5  ;;  %4249 = vmatprep.subr.bf16.mxu0 %v5420_v4 }
  0x78   : > { %v386_v8 = vld [vmem:[%s6594_s6 + $0x60] sm:$0xff]  ;;  %4250 = vmatpush1.bf16.msra.mxu0 %v5419_v6 }
  0x79   : > { %v5428_v11 = vcombine.high %v382_v7, %v386_v8  ;;  %v510_v12 = vld [vmem:[%s6594_s6 + $0x440] sm:$0xff]  ;;  %4290 = vmatprep.subr.bf16.mxu1 %v5548_v9  ;;  %v5427_v19 = vcombine.low %v382_v7, %v386_v8 }
  0x7a   : > { %v514_v13 = vld [vmem:[%s6594_s6 + $0x460] sm:$0xff]  ;;  %4291 = vmatpush1.bf16.msra.mxu1 %v5547_v10 }
  0x7b   : > { %v390_v14 = vld [vmem:[%s6594_s6 + $0x80] sm:$0xff]  ;;  %v5556_v15 = vcombine.high %v510_v12, %v514_v13  ;;  %4251 = vmatprep.subr.bf16.mxu0 %v5428_v11  ;;  %v5555_v20 = vcombine.low %v510_v12, %v514_v13 }
  0x7c   : > { %v394_v16 = vld [vmem:[%s6594_s6 + $0xa0] sm:$0xff]  ;;  %4252 = vmatpush1.bf16.msra.mxu0 %v5427_v19 }
  0x7d   : > { %v518_v17 = vld [vmem:[%s6594_s6 + $0x480] sm:$0xff]  ;;  %v5436_v21 = vcombine.high %v390_v14, %v394_v16  ;;  %4292 = vmatprep.subr.bf16.mxu1 %v5556_v15  ;;  %v5435_v27 = vcombine.low %v390_v14, %v394_v16 }
  0x7e   : > { %v522_v18 = vld [vmem:[%s6594_s6 + $0x4a0] sm:$0xff]  ;;  %4293 = vmatpush1.bf16.msra.mxu1 %v5555_v20 }
  0x7f   : > { %v5564_v22 = vcombine.high %v518_v17, %v522_v18  ;;  %v398_v23 = vld [vmem:[%s6594_s6 + $0xc0] sm:$0xff]  ;;  %4253 = vmatprep.subr.bf16.mxu0 %v5436_v21  ;;  %v5563_v28 = vcombine.low %v518_v17, %v522_v18 }
  0x80   : > { %v402_v24 = vld [vmem:[%s6594_s6 + $0xe0] sm:$0xff]  ;;  %4254 = vmatpush1.bf16.msra.mxu0 %v5435_v27 }
  0x81   : > { %v526_v25 = vld [vmem:[%s6594_s6 + $0x4c0] sm:$0xff]  ;;  %v5444_v29 = vcombine.high %v398_v23, %v402_v24  ;;  %4294 = vmatprep.subr.bf16.mxu1 %v5564_v22  ;;  %v5443_v35 = vcombine.low %v398_v23, %v402_v24 }
  0x82   : > { %v530_v26 = vld [vmem:[%s6594_s6 + $0x4e0] sm:$0xff]  ;;  %4295 = vmatpush1.bf16.msra.mxu1 %v5563_v28 }
  0x83   : > { %v5572_v30 = vcombine.high %v526_v25, %v530_v26  ;;  %v406_v31 = vld [vmem:[%s6594_s6 + $0x100] sm:$0xff]  ;;  %4255 = vmatprep.subr.bf16.mxu0 %v5444_v29  ;;  %v5571_v36 = vcombine.low %v526_v25, %v530_v26 }
  0x84   : > { %v410_v32 = vld [vmem:[%s6594_s6 + $0x120] sm:$0xff]  ;;  %4256 = vmatpush1.bf16.msra.mxu0 %v5443_v35 }
  0x85   : > { %v534_v33 = vld [vmem:[%s6594_s6 + $0x500] sm:$0xff]  ;;  %v5452_v37 = vcombine.high %v406_v31, %v410_v32  ;;  %4296 = vmatprep.subr.bf16.mxu1 %v5572_v30  ;;  %v5451_v43 = vcombine.low %v406_v31, %v410_v32 }
  0x86   : > { %v538_v34 = vld [vmem:[%s6594_s6 + $0x520] sm:$0xff]  ;;  %4297 = vmatpush1.bf16.msra.mxu1 %v5571_v36 }
  0x87   : > { %v5580_v38 = vcombine.high %v534_v33, %v538_v34  ;;  %v414_v39 = vld [vmem:[%s6594_s6 + $0x140] sm:$0xff]  ;;  %4257 = vmatprep.subr.bf16.mxu0 %v5452_v37  ;;  %v5579_v44 = vcombine.low %v534_v33, %v538_v34 }
  0x88   : > { %v418_v40 = vld [vmem:[%s6594_s6 + $0x160] sm:$0xff]  ;;  %4258 = vmatpush1.bf16.msra.mxu0 %v5451_v43 }
  0x89   : > { %v542_v41 = vld [vmem:[%s6594_s6 + $0x540] sm:$0xff]  ;;  %v5460_v45 = vcombine.high %v414_v39, %v418_v40  ;;  %4298 = vmatprep.subr.bf16.mxu1 %v5580_v38  ;;  %v5459_v51 = vcombine.low %v414_v39, %v418_v40 }
  0x8a   : > { %v546_v42 = vld [vmem:[%s6594_s6 + $0x560] sm:$0xff]  ;;  %4299 = vmatpush1.bf16.msra.mxu1 %v5579_v44 }
  0x8b   : > { %v5588_v46 = vcombine.high %v542_v41, %v546_v42  ;;  %v422_v47 = vld [vmem:[%s6594_s6 + $0x180] sm:$0xff]  ;;  %4259 = vmatprep.subr.bf16.mxu0 %v5460_v45  ;;  %v5587_v52 = vcombine.low %v542_v41, %v546_v42 }
  0x8c   : > { %v426_v48 = vld [vmem:[%s6594_s6 + $0x1a0] sm:$0xff]  ;;  %4260 = vmatpush1.bf16.msra.mxu0 %v5459_v51 }
  0x8d   : > { %v550_v49 = vld [vmem:[%s6594_s6 + $0x580] sm:$0xff]  ;;  %v5468_v53 = vcombine.high %v422_v47, %v426_v48  ;;  %4300 = vmatprep.subr.bf16.mxu1 %v5588_v46  ;;  %v5467_v63 = vcombine.low %v422_v47, %v426_v48 }
  0x8e   : > { %v554_v50 = vld [vmem:[%s6594_s6 + $0x5a0] sm:$0xff]  ;;  %4301 = vmatpush1.bf16.msra.mxu1 %v5587_v52 }
  0x8f   : > { %v6657_v54 = vld [vmem:[%s6625_s7] sm:$0xff]  ;;  %v5596_v56 = vcombine.high %v550_v49, %v554_v50  ;;  %4261 = vmatprep.subr.bf16.mxu0 %v5468_v53  ;;  %v5595_v0 = vcombine.low %v550_v49, %v554_v50 }
  0x90   : > { %v430_v57 = vld [vmem:[%s6594_s6 + $0x1c0] sm:$0xff]  ;;  %v6666_v59 = vcombine.high %v6657_v54, %v6657_v54  ;;  %4262 = vmatpush1.bf16.msra.mxu0 %v5467_v63 }
  0x91   : > { %v434_v58 = vld [vmem:[%s6594_s6 + $0x1e0] sm:$0xff]  ;;  %4302 = vmatprep.subr.bf16.mxu1 %v5596_v56 }
  0x92   : > { %v558_v61 = vld [vmem:[%s6594_s6 + $0x5c0] sm:$0xff]  ;;  %4281 = vmatprep.mubr.bf16.mxu0 %v6666_v59  ;;  %v5476_v1 = vcombine.high %v430_v57, %v434_v58  ;;  %v5475_v7 = vcombine.low %v430_v57, %v434_v58  ;;  %4303 = vmatpush1.bf16.msra.mxu1 %v5595_v0 }
  0x93   : > { %v562_v62 = vld [vmem:[%s6594_s6 + $0x5e0] sm:$0xff] }
  0x94   : > { %v5604_v2 = vcombine.high %v558_v61, %v562_v62  ;;  %v438_v3 = vld [vmem:[%s6594_s6 + $0x200] sm:$0xff]  ;;  %4263 = vmatprep.subr.bf16.mxu0 %v5476_v1  ;;  %v5603_v8 = vcombine.low %v558_v61, %v562_v62 }
  0x95   : > { %v442_v4 = vld [vmem:[%s6594_s6 + $0x220] sm:$0xff]  ;;  %4264 = vmatpush1.bf16.msra.mxu0 %v5475_v7 }
  0x96   : > { %v566_v5 = vld [vmem:[%s6594_s6 + $0x600] sm:$0xff]  ;;  %v5484_v9 = vcombine.high %v438_v3, %v442_v4  ;;  %4304 = vmatprep.subr.bf16.mxu1 %v5604_v2  ;;  %v5483_v15 = vcombine.low %v438_v3, %v442_v4 }
  0x97   : > { %v570_v6 = vld [vmem:[%s6594_s6 + $0x620] sm:$0xff]  ;;  %4305 = vmatpush1.bf16.msra.mxu1 %v5603_v8 }
  0x98   : > { %v5612_v10 = vcombine.high %v566_v5, %v570_v6  ;;  %v446_v11 = vld [vmem:[%s6594_s6 + $0x240] sm:$0xff]  ;;  %4265 = vmatprep.subr.bf16.mxu0 %v5484_v9  ;;  %v5611_v16 = vcombine.low %v566_v5, %v570_v6 }
  0x99   : > { %v450_v12 = vld [vmem:[%s6594_s6 + $0x260] sm:$0xff]  ;;  %4266 = vmatpush1.bf16.msra.mxu0 %v5483_v15 }
  0x9a   : > { %v574_v13 = vld [vmem:[%s6594_s6 + $0x640] sm:$0xff]  ;;  %v5492_v17 = vcombine.high %v446_v11, %v450_v12  ;;  %4306 = vmatprep.subr.bf16.mxu1 %v5612_v10  ;;  %v5491_v23 = vcombine.low %v446_v11, %v450_v12 }
  0x9b   : > { %v578_v14 = vld [vmem:[%s6594_s6 + $0x660] sm:$0xff]  ;;  %4307 = vmatpush1.bf16.msra.mxu1 %v5611_v16 }
  0x9c   : > { %v5620_v18 = vcombine.high %v574_v13, %v578_v14  ;;  %v454_v19 = vld [vmem:[%s6594_s6 + $0x280] sm:$0xff]  ;;  %4267 = vmatprep.subr.bf16.mxu0 %v5492_v17  ;;  %v5619_v24 = vcombine.low %v574_v13, %v578_v14  ;;  %v6716_v17 = vcombine.low %v6657_v54, %v6657_v54 }
  0x9d   : > { %v458_v20 = vld [vmem:[%s6594_s6 + $0x2a0] sm:$0xff]  ;;  %4268 = vmatpush1.bf16.msra.mxu0 %v5491_v23  ;;  %v6728_v23 = vld [vmem:[%s6625_s7 + $0x18] sm:$0xff] }
  0x9e   : > { %v582_v21 = vld [vmem:[%s6594_s6 + $0x680] sm:$0xff]  ;;  %v5500_v25 = vcombine.high %v454_v19, %v458_v20  ;;  %4308 = vmatprep.subr.bf16.mxu1 %v5620_v18  ;;  %v5499_v31 = vcombine.low %v454_v19, %v458_v20  ;;  %v6721_v20 = vld [vmem:[%s6625_s7 + $0x10] sm:$0xff] }
  0x9f   : > { %v586_v22 = vld [vmem:[%s6594_s6 + $0x6a0] sm:$0xff]  ;;  %4309 = vmatpush1.bf16.msra.mxu1 %v5619_v24 }
  0xa0   : > { %v5628_v26 = vcombine.high %v582_v21, %v586_v22  ;;  %v462_v27 = vld [vmem:[%s6594_s6 + $0x2c0] sm:$0xff]  ;;  %4269 = vmatprep.subr.bf16.mxu0 %v5500_v25  ;;  %v5627_v32 = vcombine.low %v582_v21, %v586_v22  ;;  %v6725_v21 = vcombine.low %v6660_v55, %v6660_v55 }
  0xa1   : > { %v466_v28 = vld [vmem:[%s6594_s6 + $0x2e0] sm:$0xff]  ;;  %4270 = vmatpush1.bf16.msra.mxu0 %v5499_v31 }
  0xa2   : > { %v590_v29 = vld [vmem:[%s6594_s6 + $0x6c0] sm:$0xff]  ;;  %v5508_v33 = vcombine.high %v462_v27, %v466_v28  ;;  %4310 = vmatprep.subr.bf16.mxu1 %v5628_v26  ;;  %v5507_v39 = vcombine.low %v462_v27, %v466_v28  ;;  %v6734_v28 = vcombine.high %v6721_v20, %v6721_v20 }
  0xa3   : > { %v594_v30 = vld [vmem:[%s6594_s6 + $0x6e0] sm:$0xff]  ;;  %4311 = vmatpush1.bf16.msra.mxu1 %v5627_v32 }
  0xa4   : > { %v5636_v34 = vcombine.high %v590_v29, %v594_v30  ;;  %v470_v35 = vld [vmem:[%s6594_s6 + $0x300] sm:$0xff]  ;;  %4271 = vmatprep.subr.bf16.mxu0 %v5508_v33  ;;  %v5635_v40 = vcombine.low %v590_v29, %v594_v30  ;;  %v6741_v30 = vcombine.high %v6728_v23, %v6728_v23 }
  0xa5   : > { %v474_v36 = vld [vmem:[%s6594_s6 + $0x320] sm:$0xff]  ;;  %4272 = vmatpush1.bf16.msra.mxu0 %v5507_v39 }
  0xa6   : > { %v598_v37 = vld [vmem:[%s6594_s6 + $0x700] sm:$0xff]  ;;  %v5516_v41 = vcombine.high %v470_v35, %v474_v36  ;;  %4312 = vmatprep.subr.bf16.mxu1 %v5636_v34  ;;  %v5515_v47 = vcombine.low %v470_v35, %v474_v36 }
  0xa7   : > { %v602_v38 = vld [vmem:[%s6594_s6 + $0x720] sm:$0xff]  ;;  %4313 = vmatpush1.bf16.msra.mxu1 %v5635_v40 }
  0xa8   : > { %v5644_v42 = vcombine.high %v598_v37, %v602_v38  ;;  %v478_v43 = vld [vmem:[%s6594_s6 + $0x340] sm:$0xff]  ;;  %4273 = vmatprep.subr.bf16.mxu0 %v5516_v41  ;;  %v5643_v48 = vcombine.low %v598_v37, %v602_v38 }
  0xa9   : > { %v482_v44 = vld [vmem:[%s6594_s6 + $0x360] sm:$0xff]  ;;  %4274 = vmatpush1.bf16.msra.mxu0 %v5515_v47 }
  0xaa   : > { %v606_v45 = vld [vmem:[%s6594_s6 + $0x740] sm:$0xff]  ;;  %v5524_v49 = vcombine.high %v478_v43, %v482_v44  ;;  %4314 = vmatprep.subr.bf16.mxu1 %v5644_v42  ;;  %v5523_v57 = vcombine.low %v478_v43, %v482_v44 }
  0xab   : > { %v610_v46 = vld [vmem:[%s6594_s6 + $0x760] sm:$0xff]  ;;  %4315 = vmatpush1.bf16.msra.mxu1 %v5643_v48 }
  0xac   : > { %v5652_v50 = vcombine.high %v606_v45, %v610_v46  ;;  %v486_v51 = vld [vmem:[%s6594_s6 + $0x380] sm:$0xff]  ;;  %4275 = vmatprep.subr.bf16.mxu0 %v5524_v49  ;;  %v5651_v58 = vcombine.low %v606_v45, %v610_v46 }
  0xad   : > { %v490_v52 = vld [vmem:[%s6594_s6 + $0x3a0] sm:$0xff]  ;;  %4276 = vmatpush1.bf16.msra.mxu0 %v5523_v57 }
  0xae   : > { %v614_v53 = vld [vmem:[%s6594_s6 + $0x780] sm:$0xff]  ;;  %v5532_v61 = vcombine.high %v486_v51, %v490_v52  ;;  %4316 = vmatprep.subr.bf16.mxu1 %v5652_v50  ;;  %v5531_v3 = vcombine.low %v486_v51, %v490_v52 }
  0xaf   : > { %v618_v56 = vld [vmem:[%s6594_s6 + $0x7a0] sm:$0xff]  ;;  %4317 = vmatpush1.bf16.msra.mxu1 %v5651_v58 }
  0xb0   : > { %v5660_v62 = vcombine.high %v614_v53, %v618_v56  ;;  %v494_v63 = vld [vmem:[%s6594_s6 + $0x3c0] sm:$0xff]  ;;  %4277 = vmatprep.subr.bf16.mxu0 %v5532_v61  ;;  %v5659_v4 = vcombine.low %v614_v53, %v618_v56 }
  0xb1   : > { %v498_v0 = vld [vmem:[%s6594_s6 + $0x3e0] sm:$0xff]  ;;  %4278 = vmatpush1.bf16.msra.mxu0 %v5531_v3 }
  0xb2   : > { %v622_v1 = vld [vmem:[%s6594_s6 + $0x7c0] sm:$0xff]  ;;  %v5540_v5 = vcombine.high %v494_v63, %v498_v0  ;;  %4318 = vmatprep.subr.bf16.mxu1 %v5660_v62  ;;  %v5539_v11 = vcombine.low %v494_v63, %v498_v0 }
  0xb3   : > { %v626_v2 = vld [vmem:[%s6594_s6 + $0x7e0] sm:$0xff]  ;;  %4319 = vmatpush1.bf16.msra.mxu1 %v5659_v4 }
  0xb4   : > { %v5668_v6 = vcombine.high %v622_v1, %v626_v2  ;;  %v630_v7 = vld [vmem:[%s6594_s6 + $0x800] sm:$0xff]  ;;  %4279 = vmatprep.subr.bf16.mxu0 %v5540_v5  ;;  %v5667_v12 = vcombine.low %v622_v1, %v626_v2 }
  0xb5   : > { %v634_v8 = vld [vmem:[%s6594_s6 + $0x820] sm:$0xff]  ;;  %4280 = vmatpush1.bf16.msra.mxu0 %v5539_v11 }
  0xb6   : > { %v758_v9 = vld [vmem:[%s6594_s6 + $0xc00] sm:$0xff]  ;;  %v5676_v13 = vcombine.high %v630_v7, %v634_v8  ;;  %4320 = vmatprep.subr.bf16.mxu1 %v5668_v6  ;;  %v5675_v22 = vcombine.low %v630_v7, %v634_v8 }
  0xb7   : > { %v762_v10 = vld [vmem:[%s6594_s6 + $0xc20] sm:$0xff]  ;;  %4321 = vmatpush1.bf16.msra.mxu1 %v5667_v12 }
  0xb8   : > { %v5804_v14 = vcombine.high %v758_v9, %v762_v10  ;;  %v638_v15 = vld [vmem:[%s6594_s6 + $0x840] sm:$0xff]  ;;  %4331 = vmatprep.subr.bf16.mxu0 %v5676_v13  ;;  %v5803_v24 = vcombine.low %v758_v9, %v762_v10  ;;  %4282 = vmatmul.mubr.bf16.vlgmr.msra.gmra.mrb[0].mxu0 %v6716_v17 }
  0xb9   : > { %v642_v16 = vld [vmem:[%s6594_s6 + $0x860] sm:$0xff]  ;;  %4332 = vmatpush1.bf16.msra.mxu0 %v5675_v22  ;;  %4363 = vmatprep.mubr.bf16.mxu0 %v6734_v28 }
  0xba   : > { %v766_v18 = vld [vmem:[%s6594_s6 + $0xc40] sm:$0xff]  ;;  %v5684_v25 = vcombine.high %v638_v15, %v642_v16  ;;  %4372 = vmatprep.subr.bf16.mxu1 %v5804_v14  ;;  %4323 = vmatmul.mubr.bf16.vlgmr.msra.gmra.mrb[0].mxu1 %v6725_v21  ;;  %v5683_v31 = vcombine.low %v638_v15, %v642_v16 }
  0xbb   : > { %v770_v19 = vld [vmem:[%s6594_s6 + $0xc60] sm:$0xff]  ;;  %4373 = vmatpush1.bf16.msra.mxu1 %v5803_v24  ;;  %4404 = vmatprep.mubr.bf16.mxu1 %v6741_v30 }
  0xbc   : > { %v5812_v54 = vcombine.high %v766_v18, %v770_v19  ;;  %v646_v26 = vld [vmem:[%s6594_s6 + $0x880] sm:$0xff]  ;;  %4333 = vmatprep.subr.bf16.mxu0 %v5684_v25  ;;  %v5811_v32 = vcombine.low %v766_v18, %v770_v19 }
  0xbd   : > { %v650_v27 = vld [vmem:[%s6594_s6 + $0x8a0] sm:$0xff]  ;;  %4334 = vmatpush1.bf16.msra.mxu0 %v5683_v31 }
  0xbe   : > { %v774_v55 = vld [vmem:[%s6594_s6 + $0xc80] sm:$0xff]  ;;  %v5692_v33 = vcombine.high %v646_v26, %v650_v27  ;;  %4374 = vmatprep.subr.bf16.mxu1 %v5812_v54  ;;  %v5691_v39 = vcombine.low %v646_v26, %v650_v27 }
  0xbf   : > { %v778_v29 = vld [vmem:[%s6594_s6 + $0xca0] sm:$0xff]  ;;  %4375 = vmatpush1.bf16.msra.mxu1 %v5811_v32 }
  0xc0   : > { %v5820_v34 = vcombine.high %v774_v55, %v778_v29  ;;  %v654_v35 = vld [vmem:[%s6594_s6 + $0x8c0] sm:$0xff]  ;;  %4335 = vmatprep.subr.bf16.mxu0 %v5692_v33  ;;  %v5819_v40 = vcombine.low %v774_v55, %v778_v29 }
  0xc1   : > { %v658_v36 = vld [vmem:[%s6594_s6 + $0x8e0] sm:$0xff]  ;;  %4336 = vmatpush1.bf16.msra.mxu0 %v5691_v39 }
  0xc2   : > { %v782_v37 = vld [vmem:[%s6594_s6 + $0xcc0] sm:$0xff]  ;;  %v5700_v41 = vcombine.high %v654_v35, %v658_v36  ;;  %4376 = vmatprep.subr.bf16.mxu1 %v5820_v34  ;;  %v5699_v47 = vcombine.low %v654_v35, %v658_v36 }
  0xc3   : > { %v786_v38 = vld [vmem:[%s6594_s6 + $0xce0] sm:$0xff]  ;;  %4377 = vmatpush1.bf16.msra.mxu1 %v5819_v40 }
  0xc4   : > { %v5828_v42 = vcombine.high %v782_v37, %v786_v38  ;;  %v662_v43 = vld [vmem:[%s6594_s6 + $0x900] sm:$0xff]  ;;  %4337 = vmatprep.subr.bf16.mxu0 %v5700_v41  ;;  %v5827_v48 = vcombine.low %v782_v37, %v786_v38 }
  0xc5   : > { %v666_v44 = vld [vmem:[%s6594_s6 + $0x920] sm:$0xff]  ;;  %4338 = vmatpush1.bf16.msra.mxu0 %v5699_v47 }
  0xc6   : > { %v790_v45 = vld [vmem:[%s6594_s6 + $0xd00] sm:$0xff]  ;;  %v5708_v49 = vcombine.high %v662_v43, %v666_v44  ;;  %4378 = vmatprep.subr.bf16.mxu1 %v5828_v42  ;;  %v5707_v57 = vcombine.low %v662_v43, %v666_v44 }
  0xc7   : > { %v794_v46 = vld [vmem:[%s6594_s6 + $0xd20] sm:$0xff]  ;;  %4379 = vmatpush1.bf16.msra.mxu1 %v5827_v48 }
  0xc8   : > { %v5836_v50 = vcombine.high %v790_v45, %v794_v46  ;;  %v670_v51 = vld [vmem:[%s6594_s6 + $0x940] sm:$0xff]  ;;  %4339 = vmatprep.subr.bf16.mxu0 %v5708_v49  ;;  %v5835_v58 = vcombine.low %v790_v45, %v794_v46 }
  0xc9   : > { %v674_v52 = vld [vmem:[%s6594_s6 + $0x960] sm:$0xff]  ;;  %4340 = vmatpush1.bf16.msra.mxu0 %v5707_v57 }
  0xca   : > { %v798_v53 = vld [vmem:[%s6594_s6 + $0xd40] sm:$0xff]  ;;  %v5716_v61 = vcombine.high %v670_v51, %v674_v52  ;;  %4380 = vmatprep.subr.bf16.mxu1 %v5836_v50  ;;  %v5715_v3 = vcombine.low %v670_v51, %v674_v52 }
  0xcb   : > { %v802_v56 = vld [vmem:[%s6594_s6 + $0xd60] sm:$0xff]  ;;  %4381 = vmatpush1.bf16.msra.mxu1 %v5835_v58 }
  0xcc   : > { %v5844_v62 = vcombine.high %v798_v53, %v802_v56  ;;  %v678_v63 = vld [vmem:[%s6594_s6 + $0x980] sm:$0xff]  ;;  %4341 = vmatprep.subr.bf16.mxu0 %v5716_v61  ;;  %v5843_v4 = vcombine.low %v798_v53, %v802_v56 }
  0xcd   : > { %v682_v0 = vld [vmem:[%s6594_s6 + $0x9a0] sm:$0xff]  ;;  %4342 = vmatpush1.bf16.msra.mxu0 %v5715_v3 }
  0xce   : > { %v806_v1 = vld [vmem:[%s6594_s6 + $0xd80] sm:$0xff]  ;;  %v5724_v5 = vcombine.high %v678_v63, %v682_v0  ;;  %4382 = vmatprep.subr.bf16.mxu1 %v5844_v62  ;;  %v5723_v11 = vcombine.low %v678_v63, %v682_v0 }
  0xcf   : > { %v810_v2 = vld [vmem:[%s6594_s6 + $0xda0] sm:$0xff]  ;;  %4383 = vmatpush1.bf16.msra.mxu1 %v5843_v4 }
  0xd0   : > { %v5852_v6 = vcombine.high %v806_v1, %v810_v2  ;;  %v686_v7 = vld [vmem:[%s6594_s6 + $0x9c0] sm:$0xff]  ;;  %4343 = vmatprep.subr.bf16.mxu0 %v5724_v5  ;;  %v5851_v12 = vcombine.low %v806_v1, %v810_v2 }
  0xd1   : > { %v690_v8 = vld [vmem:[%s6594_s6 + $0x9e0] sm:$0xff]  ;;  %4344 = vmatpush1.bf16.msra.mxu0 %v5723_v11 }
  0xd2   : > { %v814_v9 = vld [vmem:[%s6594_s6 + $0xdc0] sm:$0xff]  ;;  %v5732_v13 = vcombine.high %v686_v7, %v690_v8  ;;  %4384 = vmatprep.subr.bf16.mxu1 %v5852_v6  ;;  %v5731_v22 = vcombine.low %v686_v7, %v690_v8 }
  0xd3   : > { %v818_v10 = vld [vmem:[%s6594_s6 + $0xde0] sm:$0xff]  ;;  %4385 = vmatpush1.bf16.msra.mxu1 %v5851_v12 }
  0xd4   : > { %v5860_v14 = vcombine.high %v814_v9, %v818_v10  ;;  %v694_v15 = vld [vmem:[%s6594_s6 + $0xa00] sm:$0xff]  ;;  %4345 = vmatprep.subr.bf16.mxu0 %v5732_v13  ;;  %v5859_v24 = vcombine.low %v814_v9, %v818_v10 }
  0xd5   : > { %v698_v16 = vld [vmem:[%s6594_s6 + $0xa20] sm:$0xff]  ;;  %4346 = vmatpush1.bf16.msra.mxu0 %v5731_v22 }
  0xd6   : > { %v822_v18 = vld [vmem:[%s6594_s6 + $0xe00] sm:$0xff]  ;;  %v5740_v25 = vcombine.high %v694_v15, %v698_v16  ;;  %4386 = vmatprep.subr.bf16.mxu1 %v5860_v14  ;;  %v5739_v31 = vcombine.low %v694_v15, %v698_v16 }
  0xd7   : > { %v826_v19 = vld [vmem:[%s6594_s6 + $0xe20] sm:$0xff]  ;;  %4387 = vmatpush1.bf16.msra.mxu1 %v5859_v24 }
  0xd8   : > { %v5868_v54 = vcombine.high %v822_v18, %v826_v19  ;;  %v702_v26 = vld [vmem:[%s6594_s6 + $0xa40] sm:$0xff]  ;;  %4347 = vmatprep.subr.bf16.mxu0 %v5740_v25  ;;  %v5867_v32 = vcombine.low %v822_v18, %v826_v19 }
  0xd9   : > { %v706_v27 = vld [vmem:[%s6594_s6 + $0xa60] sm:$0xff]  ;;  %4348 = vmatpush1.bf16.msra.mxu0 %v5739_v31 }
  0xda   : > { %v830_v55 = vld [vmem:[%s6594_s6 + $0xe40] sm:$0xff]  ;;  %v5748_v33 = vcombine.high %v702_v26, %v706_v27  ;;  %4388 = vmatprep.subr.bf16.mxu1 %v5868_v54  ;;  %v5747_v39 = vcombine.low %v702_v26, %v706_v27 }
  0xdb   : > { %v834_v29 = vld [vmem:[%s6594_s6 + $0xe60] sm:$0xff]  ;;  %4389 = vmatpush1.bf16.msra.mxu1 %v5867_v32 }
  0xdc   : > { %v5876_v34 = vcombine.high %v830_v55, %v834_v29  ;;  %v710_v35 = vld [vmem:[%s6594_s6 + $0xa80] sm:$0xff]  ;;  %4349 = vmatprep.subr.bf16.mxu0 %v5748_v33  ;;  %v5875_v40 = vcombine.low %v830_v55, %v834_v29  ;;  %v375_v55 = vld [vmem:[%s6594_s6 + $0x8] sm:$0xff] }
  0xdd   : > { %v714_v36 = vld [vmem:[%s6594_s6 + $0xaa0] sm:$0xff]  ;;  %4350 = vmatpush1.bf16.msra.mxu0 %v5747_v39  ;;  %v379_v29 = vld [vmem:[%s6594_s6 + $0x28] sm:$0xff] }
  0xde   : > { %v838_v37 = vld [vmem:[%s6594_s6 + $0xe80] sm:$0xff]  ;;  %v5756_v41 = vcombine.high %v710_v35, %v714_v36  ;;  %4390 = vmatprep.subr.bf16.mxu1 %v5876_v34  ;;  %v5755_v47 = vcombine.low %v710_v35, %v714_v36  ;;  %v5422_v34 = vcombine.high %v375_v55, %v379_v29  ;;  %v387_v39 = vld [vmem:[%s6594_s6 + $0x68] sm:$0xff] }
  0xdf   : > { %v842_v38 = vld [vmem:[%s6594_s6 + $0xea0] sm:$0xff]  ;;  %4391 = vmatpush1.bf16.msra.mxu1 %v5875_v40 }
  0xe0   : > { %v5884_v42 = vcombine.high %v838_v37, %v842_v38  ;;  %v718_v43 = vld [vmem:[%s6594_s6 + $0xac0] sm:$0xff]  ;;  %4351 = vmatprep.subr.bf16.mxu0 %v5756_v41  ;;  %v5883_v48 = vcombine.low %v838_v37, %v842_v38  ;;  %v6806_v37 = vcombine.low %v6721_v20, %v6721_v20  ;;  %v383_v38 = vld [vmem:[%s6594_s6 + $0x48] sm:$0xff]  ;;  %v6815_v41 = vcombine.low %v6728_v23, %v6728_v23 }
  0xe1   : > { %v722_v44 = vld [vmem:[%s6594_s6 + $0xae0] sm:$0xff]  ;;  %4352 = vmatpush1.bf16.msra.mxu0 %v5755_v47  ;;  %v391_v23 = vld [vmem:[%s6594_s6 + $0x88] sm:$0xff] }
  0xe2   : > { %v846_v45 = vld [vmem:[%s6594_s6 + $0xec0] sm:$0xff]  ;;  %v5764_v49 = vcombine.high %v718_v43, %v722_v44  ;;  %4392 = vmatprep.subr.bf16.mxu1 %v5884_v42  ;;  %v5763_v57 = vcombine.low %v718_v43, %v722_v44  ;;  %v5421_v43 = vcombine.low %v375_v55, %v379_v29 }
  0xe3   : > { %v850_v46 = vld [vmem:[%s6594_s6 + $0xee0] sm:$0xff]  ;;  %4393 = vmatpush1.bf16.msra.mxu1 %v5883_v48  ;;  %v395_v48 = vld [vmem:[%s6594_s6 + $0xa8] sm:$0xff] }
  0xe4   : > { %v5892_v50 = vcombine.high %v846_v45, %v850_v46  ;;  %v726_v51 = vld [vmem:[%s6594_s6 + $0xb00] sm:$0xff]  ;;  %4353 = vmatprep.subr.bf16.mxu0 %v5764_v49  ;;  %v5891_v58 = vcombine.low %v846_v45, %v850_v46  ;;  %v5430_v45 = vcombine.high %v383_v38, %v387_v39 }
  0xe5   : > { %v730_v52 = vld [vmem:[%s6594_s6 + $0xb20] sm:$0xff]  ;;  %4354 = vmatpush1.bf16.msra.mxu0 %v5763_v57  ;;  %v399_v57 = vld [vmem:[%s6594_s6 + $0xc8] sm:$0xff] }
  0xe6   : > { %v854_v53 = vld [vmem:[%s6594_s6 + $0xf00] sm:$0xff]  ;;  %v5772_v61 = vcombine.high %v726_v51, %v730_v52  ;;  %4394 = vmatprep.subr.bf16.mxu1 %v5892_v50  ;;  %v5771_v3 = vcombine.low %v726_v51, %v730_v52  ;;  %v5429_v50 = vcombine.low %v383_v38, %v387_v39  ;;  %v5438_v52 = vcombine.high %v391_v23, %v395_v48 }
  0xe7   : > { %v858_v56 = vld [vmem:[%s6594_s6 + $0xf20] sm:$0xff]  ;;  %4395 = vmatpush1.bf16.msra.mxu1 %v5891_v58  ;;  %v403_v58 = vld [vmem:[%s6594_s6 + $0xe8] sm:$0xff] }
  0xe8   : > { %v5900_v62 = vcombine.high %v854_v53, %v858_v56  ;;  %v734_v63 = vld [vmem:[%s6594_s6 + $0xb40] sm:$0xff]  ;;  %4355 = vmatprep.subr.bf16.mxu0 %v5772_v61  ;;  %v5899_v4 = vcombine.low %v854_v53, %v858_v56 }
  0xe9   : > { %v738_v0 = vld [vmem:[%s6594_s6 + $0xb60] sm:$0xff]  ;;  %4356 = vmatpush1.bf16.msra.mxu0 %v5771_v3  ;;  %v407_v3 = vld [vmem:[%s6594_s6 + $0x108] sm:$0xff] }
  0xea   : > { %v862_v1 = vld [vmem:[%s6594_s6 + $0xf40] sm:$0xff]  ;;  %v5780_v5 = vcombine.high %v734_v63, %v738_v0  ;;  %4396 = vmatprep.subr.bf16.mxu1 %v5900_v62  ;;  %v5779_v11 = vcombine.low %v734_v63, %v738_v0  ;;  %v5437_v62 = vcombine.low %v391_v23, %v395_v48  ;;  %v5446_v0 = vcombine.high %v399_v57, %v403_v58 }
  0xeb   : > { %v866_v2 = vld [vmem:[%s6594_s6 + $0xf60] sm:$0xff]  ;;  %4397 = vmatpush1.bf16.msra.mxu1 %v5899_v4  ;;  %v411_v4 = vld [vmem:[%s6594_s6 + $0x128] sm:$0xff] }
  0xec   : > { %v5908_v6 = vcombine.high %v862_v1, %v866_v2  ;;  %v742_v7 = vld [vmem:[%s6594_s6 + $0xb80] sm:$0xff]  ;;  %4357 = vmatprep.subr.bf16.mxu0 %v5780_v5  ;;  %v5907_v12 = vcombine.low %v862_v1, %v866_v2 }
  0xed   : > { %v746_v8 = vld [vmem:[%s6594_s6 + $0xba0] sm:$0xff]  ;;  %4358 = vmatpush1.bf16.msra.mxu0 %v5779_v11  ;;  %v415_v11 = vld [vmem:[%s6594_s6 + $0x148] sm:$0xff] }
  0xee   : > { %v870_v9 = vld [vmem:[%s6594_s6 + $0xf80] sm:$0xff]  ;;  %v5788_v13 = vcombine.high %v742_v7, %v746_v8  ;;  %4398 = vmatprep.subr.bf16.mxu1 %v5908_v6  ;;  %v5787_v22 = vcombine.low %v742_v7, %v746_v8  ;;  %v5445_v6 = vcombine.low %v399_v57, %v403_v58  ;;  %v5454_v8 = vcombine.high %v407_v3, %v411_v4 }
  0xef   : > { %v874_v10 = vld [vmem:[%s6594_s6 + $0xfa0] sm:$0xff]  ;;  %4399 = vmatpush1.bf16.msra.mxu1 %v5907_v12  ;;  %v419_v12 = vld [vmem:[%s6594_s6 + $0x168] sm:$0xff] }
  0xf0   : > { %v5916_v14 = vcombine.high %v870_v9, %v874_v10  ;;  %v750_v15 = vld [vmem:[%s6594_s6 + $0xbc0] sm:$0xff]  ;;  %4359 = vmatprep.subr.bf16.mxu0 %v5788_v13  ;;  %v5915_v24 = vcombine.low %v870_v9, %v874_v10 }
  0xf1   : > { %v754_v16 = vld [vmem:[%s6594_s6 + $0xbe0] sm:$0xff]  ;;  %4360 = vmatpush1.bf16.msra.mxu0 %v5787_v22  ;;  %v423_v22 = vld [vmem:[%s6594_s6 + $0x188] sm:$0xff] }
  0xf2   : > { %v878_v18 = vld [vmem:[%s6594_s6 + $0xfc0] sm:$0xff]  ;;  %v5796_v25 = vcombine.high %v750_v15, %v754_v16  ;;  %4400 = vmatprep.subr.bf16.mxu1 %v5916_v14  ;;  %v5795_v31 = vcombine.low %v750_v15, %v754_v16  ;;  %v5453_v14 = vcombine.low %v407_v3, %v411_v4  ;;  %v5462_v16 = vcombine.high %v415_v11, %v419_v12 }
  0xf3   : > { %v882_v19 = vld [vmem:[%s6594_s6 + $0xfe0] sm:$0xff]  ;;  %4401 = vmatpush1.bf16.msra.mxu1 %v5915_v24  ;;  %v427_v24 = vld [vmem:[%s6594_s6 + $0x1a8] sm:$0xff] }
  0xf4   : > { %v5924_v54 = vcombine.high %v878_v18, %v882_v19  ;;  %v886_v26 = vld [vmem:[%s6594_s6 + $0x1000] sm:$0xff]  ;;  %4361 = vmatprep.subr.bf16.mxu0 %v5796_v25  ;;  %v5923_v32 = vcombine.low %v878_v18, %v882_v19 }
  0xf5   : > { %v890_v27 = vld [vmem:[%s6594_s6 + $0x1020] sm:$0xff]  ;;  %4362 = vmatpush1.bf16.msra.mxu0 %v5795_v31  ;;  %v431_v31 = vld [vmem:[%s6594_s6 + $0x1c8] sm:$0xff] }
  0xf6   : > { %v5932_v33 = vcombine.high %v886_v26, %v890_v27  ;;  %4402 = vmatprep.subr.bf16.mxu1 %v5924_v54  ;;  %v894_v35 = vld [vmem:[%s6594_s6 + $0x1040] sm:$0xff]  ;;  %v5931_v42 = vcombine.low %v886_v26, %v890_v27  ;;  %v5461_v54 = vcombine.low %v415_v11, %v419_v12  ;;  %v5470_v27 = vcombine.high %v423_v22, %v427_v24 }
  0xf7   : > { %v898_v36 = vld [vmem:[%s6594_s6 + $0x1060] sm:$0xff]  ;;  %4403 = vmatpush1.bf16.msra.mxu1 %v5923_v32  ;;  %v435_v32 = vld [vmem:[%s6594_s6 + $0x1e8] sm:$0xff] }
  0xf8   : > { %v6811_v40 = vld [vmem:[%s6625_s7 + $0x20] sm:$0xff]  ;;  %4413 = vmatprep.subr.bf16.mxu0 %v5932_v33  ;;  %v5940_v44 = vcombine.high %v894_v35, %v898_v36  ;;  %4454 = vmatprep.subr.bf16.mxu1 %v5422_v34  ;;  %v5939_v49 = vcombine.low %v894_v35, %v898_v36  ;;  %v5469_v34 = vcombine.low %v423_v22, %v427_v24 }
  0xf9   : > { %v902_v20 = vld [vmem:[%s6594_s6 + $0x1080] sm:$0xff]  ;;  %v6821_v47 = vcombine.high %v6811_v40, %v6811_v40  ;;  %4364 = vmatmul.mubr.bf16.vlgmr.msra.gmra.mrb[4].mxu0 %v6806_v37  ;;  %v5478_v36 = vcombine.high %v431_v31, %v435_v32 }
  0xfa   : > { %v906_v46 = vld [vmem:[%s6594_s6 + $0x10a0] sm:$0xff]  ;;  %4405 = vmatmul.mubr.bf16.vlgmr.msra.gmra.mrb[4].mxu1 %v6815_v41  ;;  %4414 = vmatpush1.bf16.msra.mxu0 %v5931_v42  ;;  %v439_v42 = vld [vmem:[%s6594_s6 + $0x208] sm:$0xff] }
  0xfb   : > { %4455 = vmatpush1.bf16.msra.mxu1 %v5421_v43  ;;  %4415 = vmatprep.subr.bf16.mxu0 %v5940_v44  ;;  %v5948_v51 = vcombine.high %v902_v20, %v906_v46  ;;  %v910_v53 = vld [vmem:[%s6594_s6 + $0x10c0] sm:$0xff]  ;;  %v5947_v61 = vcombine.low %v902_v20, %v906_v46  ;;  %v443_v43 = vld [vmem:[%s6594_s6 + $0x228] sm:$0xff] }
  0xfc   : > { %4456 = vmatprep.subr.bf16.mxu1 %v5430_v45  ;;  %v914_v56 = vld [vmem:[%s6594_s6 + $0x10e0] sm:$0xff]  ;;  %4445 = vmatprep.mubr.bf16.mxu0 %v6821_v47  ;;  %v5477_v45 = vcombine.low %v431_v31, %v435_v32  ;;  %v5486_v46 = vcombine.high %v439_v42, %v443_v43 }
  0xfd   : > { %4486 = vmatprep.mubr.bf16.mxu1 %v6666_v59  ;;  %v5956_v63 = vcombine.high %v910_v53, %v914_v56  ;;  %v918_v1 = vld [vmem:[%s6594_s6 + $0x1100] sm:$0xff]  ;;  %v5955_v5 = vcombine.low %v910_v53, %v914_v56 }
  0xfe   : > { %4416 = vmatpush1.bf16.msra.mxu0 %v5939_v49  ;;  %v922_v2 = vld [vmem:[%s6594_s6 + $0x1120] sm:$0xff]  ;;  %v447_v49 = vld [vmem:[%s6594_s6 + $0x248] sm:$0xff] }
  0xff   : > { %4457 = vmatpush1.bf16.msra.mxu1 %v5429_v50  ;;  %4417 = vmatprep.subr.bf16.mxu0 %v5948_v51  ;;  %v5964_v7 = vcombine.high %v918_v1, %v922_v2  ;;  %v926_v9 = vld [vmem:[%s6594_s6 + $0x1140] sm:$0xff]  ;;  %v5963_v13 = vcombine.low %v918_v1, %v922_v2  ;;  %v451_v50 = vld [vmem:[%s6594_s6 + $0x268] sm:$0xff] }
 0x100   : > { %4458 = vmatprep.subr.bf16.mxu1 %v5438_v52  ;;  %v930_v10 = vld [vmem:[%s6594_s6 + $0x1160] sm:$0xff]  ;;  %v5485_v52 = vcombine.low %v439_v42, %v443_v43  ;;  %v5494_v56 = vcombine.high %v447_v49, %v451_v50 }
 0x101   : > { %v5972_v15 = vcombine.high %v926_v9, %v930_v10  ;;  %v934_v18 = vld [vmem:[%s6594_s6 + $0x1180] sm:$0xff]  ;;  %v5971_v25 = vcombine.low %v926_v9, %v930_v10 }
 0x102   : > { %4418 = vmatpush1.bf16.msra.mxu0 %v5947_v61  ;;  %v938_v19 = vld [vmem:[%s6594_s6 + $0x11a0] sm:$0xff]  ;;  %v455_v61 = vld [vmem:[%s6594_s6 + $0x288] sm:$0xff] }
 0x103   : > { %4459 = vmatpush1.bf16.msra.mxu1 %v5437_v62  ;;  %4419 = vmatprep.subr.bf16.mxu0 %v5956_v63  ;;  %v5980_v26 = vcombine.high %v934_v18, %v938_v19  ;;  %v942_v55 = vld [vmem:[%s6594_s6 + $0x11c0] sm:$0xff]  ;;  %v5979_v33 = vcombine.low %v934_v18, %v938_v19  ;;  %v459_v62 = vld [vmem:[%s6594_s6 + $0x2a8] sm:$0xff] }
 0x104   : > { %4460 = vmatprep.subr.bf16.mxu1 %v5446_v0  ;;  %v946_v29 = vld [vmem:[%s6594_s6 + $0x11e0] sm:$0xff]  ;;  %v5493_v0 = vcombine.low %v447_v49, %v451_v50  ;;  %v5502_v2 = vcombine.high %v455_v61, %v459_v62  ;;  %v503_v49 = vld [vmem:[%s6594_s6 + $0x408] sm:$0xff] }
 0x105   : > { %v5988_v35 = vcombine.high %v942_v55, %v946_v29  ;;  %v950_v38 = vld [vmem:[%s6594_s6 + $0x1200] sm:$0xff]  ;;  %v5987_v44 = vcombine.low %v942_v55, %v946_v29  ;;  %v507_v50 = vld [vmem:[%s6594_s6 + $0x428] sm:$0xff] }
 0x106   : > { %4420 = vmatpush1.bf16.msra.mxu0 %v5955_v5  ;;  %v954_v39 = vld [vmem:[%s6594_s6 + $0x1220] sm:$0xff]  ;;  %v463_v5 = vld [vmem:[%s6594_s6 + $0x2c8] sm:$0xff] }
 0x107   : > { %4461 = vmatpush1.bf16.msra.mxu1 %v5445_v6  ;;  %4421 = vmatprep.subr.bf16.mxu0 %v5964_v7  ;;  %v5996_v20 = vcombine.high %v950_v38, %v954_v39  ;;  %v958_v23 = vld [vmem:[%s6594_s6 + $0x1240] sm:$0xff]  ;;  %v5995_v51 = vcombine.low %v950_v38, %v954_v39  ;;  %v467_v6 = vld [vmem:[%s6594_s6 + $0x2e8] sm:$0xff] }
 0x108   : > { %4462 = vmatprep.subr.bf16.mxu1 %v5454_v8  ;;  %v962_v48 = vld [vmem:[%s6594_s6 + $0x1260] sm:$0xff]  ;;  %v5501_v8 = vcombine.low %v455_v61, %v459_v62  ;;  %v5510_v10 = vcombine.high %v463_v5, %v467_v6  ;;  %v511_v61 = vld [vmem:[%s6594_s6 + $0x448] sm:$0xff] }
 0x109   : > { %v6004_v53 = vcombine.high %v958_v23, %v962_v48  ;;  %v966_v57 = vld [vmem:[%s6594_s6 + $0x1280] sm:$0xff]  ;;  %v6003_v63 = vcombine.low %v958_v23, %v962_v48  ;;  %v515_v62 = vld [vmem:[%s6594_s6 + $0x468] sm:$0xff] }
 0x10a   : > { %4422 = vmatpush1.bf16.msra.mxu0 %v5963_v13  ;;  %v970_v58 = vld [vmem:[%s6594_s6 + $0x12a0] sm:$0xff]  ;;  %v471_v13 = vld [vmem:[%s6594_s6 + $0x308] sm:$0xff] }
 0x10b   : > { %4463 = vmatpush1.bf16.msra.mxu1 %v5453_v14  ;;  %4423 = vmatprep.subr.bf16.mxu0 %v5972_v15  ;;  %v6012_v1 = vcombine.high %v966_v57, %v970_v58  ;;  %v974_v3 = vld [vmem:[%s6594_s6 + $0x12c0] sm:$0xff]  ;;  %v6011_v7 = vcombine.low %v966_v57, %v970_v58  ;;  %v475_v14 = vld [vmem:[%s6594_s6 + $0x328] sm:$0xff]  ;;  %v5550_v57 = vcombine.high %v503_v49, %v507_v50 }
 0x10c   : > { %4464 = vmatprep.subr.bf16.mxu1 %v5462_v16  ;;  %v978_v4 = vld [vmem:[%s6594_s6 + $0x12e0] sm:$0xff]  ;;  %v5509_v16 = vcombine.low %v463_v5, %v467_v6  ;;  %v5518_v19 = vcombine.high %v471_v13, %v475_v14  ;;  %v519_v6 = vld [vmem:[%s6594_s6 + $0x488] sm:$0xff] }
 0x10d   : > { %v6020_v9 = vcombine.high %v974_v3, %v978_v4  ;;  %v982_v11 = vld [vmem:[%s6594_s6 + $0x1300] sm:$0xff]  ;;  %v6019_v15 = vcombine.low %v974_v3, %v978_v4  ;;  %v5558_v4 = vcombine.high %v511_v61, %v515_v62 }
 0x10e   : > { %4424 = vmatpush1.bf16.msra.mxu0 %v5971_v25  ;;  %v986_v12 = vld [vmem:[%s6594_s6 + $0x1320] sm:$0xff]  ;;  %v479_v25 = vld [vmem:[%s6594_s6 + $0x348] sm:$0xff] }
 0x10f   : > { %4465 = vmatpush1.bf16.msra.mxu1 %v5461_v54  ;;  %4425 = vmatprep.subr.bf16.mxu0 %v5980_v26  ;;  %v6028_v18 = vcombine.high %v982_v11, %v986_v12  ;;  %v990_v22 = vld [vmem:[%s6594_s6 + $0x1340] sm:$0xff]  ;;  %v483_v54 = vld [vmem:[%s6594_s6 + $0x368] sm:$0xff]  ;;  %v6027_v26 = vcombine.low %v982_v11, %v986_v12 }
 0x110   : > { %4466 = vmatprep.subr.bf16.mxu1 %v5470_v27  ;;  %v994_v24 = vld [vmem:[%s6594_s6 + $0x1360] sm:$0xff]  ;;  %v5517_v27 = vcombine.low %v471_v13, %v475_v14  ;;  %v5526_v29 = vcombine.high %v479_v25, %v483_v54  ;;  %v527_v13 = vld [vmem:[%s6594_s6 + $0x4c8] sm:$0xff] }
 0x111   : > { %v6036_v55 = vcombine.high %v990_v22, %v994_v24  ;;  %v998_v31 = vld [vmem:[%s6594_s6 + $0x1380] sm:$0xff]  ;;  %v531_v14 = vld [vmem:[%s6594_s6 + $0x4e8] sm:$0xff] }
 0x112   : > { %4426 = vmatpush1.bf16.msra.mxu0 %v5979_v33  ;;  %v1002_v32 = vld [vmem:[%s6594_s6 + $0x13a0] sm:$0xff]  ;;  %v487_v33 = vld [vmem:[%s6594_s6 + $0x388] sm:$0xff] }
 0x113   : > { %4467 = vmatpush1.bf16.msra.mxu1 %v5469_v34  ;;  %4427 = vmatprep.subr.bf16.mxu0 %v5988_v35  ;;  %v491_v34 = vld [vmem:[%s6594_s6 + $0x3a8] sm:$0xff]  ;;  %v6035_v35 = vcombine.low %v990_v22, %v994_v24  ;;  %v6044_v38 = vcombine.high %v998_v31, %v1002_v32  ;;  %v1006_v42 = vld [vmem:[%s6594_s6 + $0x13c0] sm:$0xff]  ;;  %v5574_v22 = vcombine.high %v527_v13, %v531_v14 }
 0x114   : > { %4468 = vmatprep.subr.bf16.mxu1 %v5478_v36  ;;  %v5525_v36 = vcombine.low %v479_v25, %v483_v54  ;;  %v5534_v39 = vcombine.high %v487_v33, %v491_v34  ;;  %v1010_v43 = vld [vmem:[%s6594_s6 + $0x13e0] sm:$0xff]  ;;  %v535_v25 = vld [vmem:[%s6594_s6 + $0x508] sm:$0xff] }
 0x115   : > { %v6052_v23 = vcombine.high %v1006_v42, %v1010_v43  ;;  %v539_v54 = vld [vmem:[%s6594_s6 + $0x528] sm:$0xff] }
 0x116   : > { %4428 = vmatpush1.bf16.msra.mxu0 %v5987_v44  ;;  %v495_v44 = vld [vmem:[%s6594_s6 + $0x3c8] sm:$0xff] }
 0x117   : > { %4469 = vmatpush1.bf16.msra.mxu1 %v5477_v45  ;;  %4429 = vmatprep.subr.bf16.mxu0 %v5996_v20  ;;  %v499_v45 = vld [vmem:[%s6594_s6 + $0x3e8] sm:$0xff]  ;;  %v6043_v20 = vcombine.low %v998_v31, %v1002_v32  ;;  %v5582_v31 = vcombine.high %v535_v25, %v539_v54 }
 0x118   : > { %4470 = vmatprep.subr.bf16.mxu1 %v5486_v46  ;;  %v5533_v46 = vcombine.low %v487_v33, %v491_v34  ;;  %v5542_v48 = vcombine.high %v495_v44, %v499_v45  ;;  %v543_v33 = vld [vmem:[%s6594_s6 + $0x548] sm:$0xff] }
 0x119   : > { %v547_v34 = vld [vmem:[%s6594_s6 + $0x568] sm:$0xff] }
 0x11a   : > { %4430 = vmatpush1.bf16.msra.mxu0 %v5995_v51  ;;  %v631_v51 = vld [vmem:[%s6594_s6 + $0x808] sm:$0xff] }
 0x11b   : > { %4471 = vmatpush1.bf16.msra.mxu1 %v5485_v52  ;;  %4431 = vmatprep.subr.bf16.mxu0 %v6004_v53  ;;  %v635_v52 = vld [vmem:[%s6594_s6 + $0x828] sm:$0xff]  ;;  %v6051_v53 = vcombine.low %v1006_v42, %v1010_v43  ;;  %v5590_v42 = vcombine.high %v543_v33, %v547_v34 }
 0x11c   : > { %4472 = vmatprep.subr.bf16.mxu1 %v5494_v56  ;;  %v5541_v56 = vcombine.low %v495_v44, %v499_v45  ;;  %v5678_v58 = vcombine.high %v631_v51, %v635_v52  ;;  %v5677_v3 = vcombine.low %v631_v51, %v635_v52  ;;  %v551_v44 = vld [vmem:[%s6594_s6 + $0x588] sm:$0xff] }
 0x11d   : > { %v555_v45 = vld [vmem:[%s6594_s6 + $0x5a8] sm:$0xff] }
 0x11e   : > { %4432 = vmatpush1.bf16.msra.mxu0 %v6003_v63  ;;  %v6889_v63 = vcombine.low %v6811_v40, %v6811_v40  ;;  %v647_v40 = vld [vmem:[%s6594_s6 + $0x888] sm:$0xff] }
 0x11f   : > { %4473 = vmatpush1.bf16.msra.mxu1 %v5493_v0  ;;  %4433 = vmatprep.subr.bf16.mxu0 %v6012_v1  ;;  %v639_v0 = vld [vmem:[%s6594_s6 + $0x848] sm:$0xff] }
 0x120   : > { %4474 = vmatprep.subr.bf16.mxu1 %v5502_v2  ;;  %v643_v1 = vld [vmem:[%s6594_s6 + $0x868] sm:$0xff]  ;;  %v5549_v2 = vcombine.low %v503_v49, %v507_v50  ;;  %v5598_v49 = vcombine.high %v551_v44, %v555_v45 }
 0x121   : > { %v5686_v5 = vcombine.high %v639_v0, %v643_v1  ;;  %v559_v51 = vld [vmem:[%s6594_s6 + $0x5c8] sm:$0xff] }
 0x122   : > { %4434 = vmatpush1.bf16.msra.mxu0 %v6011_v7  ;;  %v523_v7 = vld [vmem:[%s6594_s6 + $0x4a8] sm:$0xff] }
 0x123   : > { %4475 = vmatpush1.bf16.msra.mxu1 %v5501_v8  ;;  %4435 = vmatprep.subr.bf16.mxu0 %v6020_v9  ;;  %v651_v8 = vld [vmem:[%s6594_s6 + $0x8a8] sm:$0xff]  ;;  %v5557_v9 = vcombine.low %v511_v61, %v515_v62  ;;  %v5566_v11 = vcombine.high %v519_v6, %v523_v7 }
 0x124   : > { %4476 = vmatprep.subr.bf16.mxu1 %v5510_v10  ;;  %v5685_v10 = vcombine.low %v639_v0, %v643_v1  ;;  %v5694_v12 = vcombine.high %v647_v40, %v651_v8  ;;  %v563_v52 = vld [vmem:[%s6594_s6 + $0x5e8] sm:$0xff] }
 0x125   : > { %v5606_v61 = vcombine.high %v559_v51, %v563_v52  ;;  %v567_v0 = vld [vmem:[%s6594_s6 + $0x608] sm:$0xff] }
 0x126   : > { %4436 = vmatpush1.bf16.msra.mxu0 %v6019_v15  ;;  %v655_v15 = vld [vmem:[%s6594_s6 + $0x8c8] sm:$0xff] }
 0x127   : > { %4477 = vmatpush1.bf16.msra.mxu1 %v5509_v16  ;;  %4437 = vmatprep.subr.bf16.mxu0 %v6028_v18  ;;  %v659_v16 = vld [vmem:[%s6594_s6 + $0x8e8] sm:$0xff]  ;;  %v5565_v18 = vcombine.low %v519_v6, %v523_v7 }
 0x128   : > { %4478 = vmatprep.subr.bf16.mxu1 %v5518_v19  ;;  %v5693_v19 = vcombine.low %v647_v40, %v651_v8  ;;  %v5702_v24 = vcombine.high %v655_v15, %v659_v16  ;;  %v571_v1 = vld [vmem:[%s6594_s6 + $0x628] sm:$0xff] }
 0x129   : > { %v5614_v6 = vcombine.high %v567_v0, %v571_v1  ;;  %v575_v40 = vld [vmem:[%s6594_s6 + $0x648] sm:$0xff] }
 0x12a   : > { %4438 = vmatpush1.bf16.msra.mxu0 %v6027_v26  ;;  %v663_v26 = vld [vmem:[%s6594_s6 + $0x908] sm:$0xff] }
 0x12b   : > { %4479 = vmatpush1.bf16.msra.mxu1 %v5517_v27  ;;  %4439 = vmatprep.subr.bf16.mxu0 %v6036_v55  ;;  %v667_v27 = vld [vmem:[%s6594_s6 + $0x928] sm:$0xff]  ;;  %v5573_v55 = vcombine.low %v527_v13, %v531_v14 }
 0x12c   : > { %4480 = vmatprep.subr.bf16.mxu1 %v5526_v29  ;;  %v5701_v29 = vcombine.low %v655_v15, %v659_v16  ;;  %v5710_v32 = vcombine.high %v663_v26, %v667_v27  ;;  %v579_v8 = vld [vmem:[%s6594_s6 + $0x668] sm:$0xff] }
 0x12d   : > { %v5622_v13 = vcombine.high %v575_v40, %v579_v8  ;;  %v583_v15 = vld [vmem:[%s6594_s6 + $0x688] sm:$0xff] }
 0x12e   : > { %4440 = vmatpush1.bf16.msra.mxu0 %v6035_v35  ;;  %v671_v35 = vld [vmem:[%s6594_s6 + $0x948] sm:$0xff] }
 0x12f   : > { %4481 = vmatpush1.bf16.msra.mxu1 %v5525_v36  ;;  %4441 = vmatprep.subr.bf16.mxu0 %v6044_v38  ;;  %v675_v36 = vld [vmem:[%s6594_s6 + $0x968] sm:$0xff]  ;;  %v5581_v38 = vcombine.low %v535_v25, %v539_v54 }
 0x130   : > { %4482 = vmatprep.subr.bf16.mxu1 %v5534_v39  ;;  %v5709_v39 = vcombine.low %v663_v26, %v667_v27  ;;  %v5718_v43 = vcombine.high %v671_v35, %v675_v36  ;;  %v587_v16 = vld [vmem:[%s6594_s6 + $0x6a8] sm:$0xff] }
 0x131   : > { %v5630_v25 = vcombine.high %v583_v15, %v587_v16  ;;  %v591_v26 = vld [vmem:[%s6594_s6 + $0x6c8] sm:$0xff] }
 0x132   : > { %4442 = vmatpush1.bf16.msra.mxu0 %v6043_v20  ;;  %v679_v20 = vld [vmem:[%s6594_s6 + $0x988] sm:$0xff] }
 0x133   : > { %4483 = vmatpush1.bf16.msra.mxu1 %v5533_v46  ;;  %4443 = vmatprep.subr.bf16.mxu0 %v6052_v23  ;;  %v683_v46 = vld [vmem:[%s6594_s6 + $0x9a8] sm:$0xff]  ;;  %v5589_v23 = vcombine.low %v543_v33, %v547_v34 }
 0x134   : > { %4484 = vmatprep.subr.bf16.mxu1 %v5542_v48  ;;  %v5717_v48 = vcombine.low %v671_v35, %v675_v36  ;;  %v5726_v50 = vcombine.high %v679_v20, %v683_v46  ;;  %v595_v27 = vld [vmem:[%s6594_s6 + $0x6e8] sm:$0xff] }
 0x135   : > { %v5638_v33 = vcombine.high %v591_v26, %v595_v27  ;;  %v599_v35 = vld [vmem:[%s6594_s6 + $0x708] sm:$0xff] }
 0x136   : > { %4444 = vmatpush1.bf16.msra.mxu0 %v6051_v53  ;;  %v687_v53 = vld [vmem:[%s6594_s6 + $0x9c8] sm:$0xff] }
 0x137   : > { %4485 = vmatpush1.bf16.msra.mxu1 %v5541_v56  ;;  %4495 = vmatprep.subr.bf16.mxu0 %v5550_v57  ;;  %v691_v56 = vld [vmem:[%s6594_s6 + $0x9e8] sm:$0xff]  ;;  %v5597_v57 = vcombine.low %v551_v44, %v555_v45 }
 0x138   : > { %4536 = vmatprep.subr.bf16.mxu1 %v5678_v58  ;;  %v5725_v58 = vcombine.low %v679_v20, %v683_v46  ;;  %v5734_v62 = vcombine.high %v687_v53, %v691_v56  ;;  %v603_v36 = vld [vmem:[%s6594_s6 + $0x728] sm:$0xff] }
 0x139   : > { %4446 = vmatmul.mubr.bf16.vlgmr.msra.gmra.mrb[8].mxu0 %v6889_v63  ;;  %v5646_v44 = vcombine.high %v599_v35, %v603_v36  ;;  %v607_v20 = vld [vmem:[%s6594_s6 + $0x748] sm:$0xff] }
 0x13a   : > { %4487 = vmatmul.mubr.bf16.vlgmr.msra.gmra.mrb[8].mxu1 %v6716_v17  ;;  %4496 = vmatpush1.bf16.msra.mxu0 %v5549_v2  ;;  %v695_v2 = vld [vmem:[%s6594_s6 + $0xa08] sm:$0xff] }
 0x13b   : > { %4537 = vmatpush1.bf16.msra.mxu1 %v5677_v3  ;;  %4497 = vmatprep.subr.bf16.mxu0 %v5558_v4  ;;  %v699_v3 = vld [vmem:[%s6594_s6 + $0xa28] sm:$0xff]  ;;  %v5605_v4 = vcombine.low %v559_v51, %v563_v52 }
 0x13c   : > { %4538 = vmatprep.subr.bf16.mxu1 %v5686_v5  ;;  %4527 = vmatprep.mubr.bf16.mxu0 %v6670_v60  ;;  %v5733_v5 = vcombine.low %v687_v53, %v691_v56  ;;  %v5742_v7 = vcombine.high %v695_v2, %v699_v3  ;;  %v611_v46 = vld [vmem:[%s6594_s6 + $0x768] sm:$0xff] }
 0x13d   : > { %4568 = vmatprep.mubr.bf16.mxu1 %v6734_v28  ;;  %v5654_v51 = vcombine.high %v607_v20, %v611_v46  ;;  %v615_v53 = vld [vmem:[%s6594_s6 + $0x788] sm:$0xff] }
 0x13e   : > { %4498 = vmatpush1.bf16.msra.mxu0 %v5557_v9  ;;  %v703_v9 = vld [vmem:[%s6594_s6 + $0xa48] sm:$0xff] }
 0x13f   : > { %4539 = vmatpush1.bf16.msra.mxu1 %v5685_v10  ;;  %4499 = vmatprep.subr.bf16.mxu0 %v5566_v11  ;;  %v707_v10 = vld [vmem:[%s6594_s6 + $0xa68] sm:$0xff]  ;;  %v5613_v11 = vcombine.low %v567_v0, %v571_v1 }
 0x140   : > { %4540 = vmatprep.subr.bf16.mxu1 %v5694_v12  ;;  %v5741_v12 = vcombine.low %v695_v2, %v699_v3  ;;  %v5750_v14 = vcombine.high %v703_v9, %v707_v10  ;;  %v619_v56 = vld [vmem:[%s6594_s6 + $0x7a8] sm:$0xff] }
 0x141   : > { %v5662_v0 = vcombine.high %v615_v53, %v619_v56  ;;  %v623_v2 = vld [vmem:[%s6594_s6 + $0x7c8] sm:$0xff] }
 0x142   : > { %4500 = vmatpush1.bf16.msra.mxu0 %v5565_v18  ;;  %v711_v18 = vld [vmem:[%s6594_s6 + $0xa88] sm:$0xff] }
 0x143   : > { %4541 = vmatpush1.bf16.msra.mxu1 %v5693_v19  ;;  %4501 = vmatprep.subr.bf16.mxu0 %v5574_v22  ;;  %v715_v19 = vld [vmem:[%s6594_s6 + $0xaa8] sm:$0xff]  ;;  %v5621_v22 = vcombine.low %v575_v40, %v579_v8 }
 0x144   : > { %4542 = vmatprep.subr.bf16.mxu1 %v5702_v24  ;;  %v5749_v24 = vcombine.low %v703_v9, %v707_v10  ;;  %v5758_v54 = vcombine.high %v711_v18, %v715_v19  ;;  %v627_v3 = vld [vmem:[%s6594_s6 + $0x7e8] sm:$0xff] }
 0x145   : > { %v5670_v40 = vcombine.high %v623_v2, %v627_v3  ;;  %v759_v9 = vld [vmem:[%s6594_s6 + $0xc08] sm:$0xff] }
 0x146   : > { %4502 = vmatpush1.bf16.msra.mxu0 %v5573_v55  ;;  %v719_v55 = vld [vmem:[%s6594_s6 + $0xac8] sm:$0xff] }
 0x147   : > { %4543 = vmatpush1.bf16.msra.mxu1 %v5701_v29  ;;  %4503 = vmatprep.subr.bf16.mxu0 %v5582_v31  ;;  %v723_v29 = vld [vmem:[%s6594_s6 + $0xae8] sm:$0xff]  ;;  %v5629_v31 = vcombine.low %v583_v15, %v587_v16 }
 0x148   : > { %4544 = vmatprep.subr.bf16.mxu1 %v5710_v32  ;;  %v5757_v32 = vcombine.low %v711_v18, %v715_v19  ;;  %v5766_v34 = vcombine.high %v719_v55, %v723_v29  ;;  %v763_v10 = vld [vmem:[%s6594_s6 + $0xc28] sm:$0xff] }
 0x149   : > { %v5806_v15 = vcombine.high %v759_v9, %v763_v10  ;;  %v767_v18 = vld [vmem:[%s6594_s6 + $0xc48] sm:$0xff] }
 0x14a   : > { %4504 = vmatpush1.bf16.msra.mxu0 %v5581_v38  ;;  %v727_v38 = vld [vmem:[%s6594_s6 + $0xb08] sm:$0xff] }
 0x14b   : > { %4545 = vmatpush1.bf16.msra.mxu1 %v5709_v39  ;;  %4505 = vmatprep.subr.bf16.mxu0 %v5590_v42  ;;  %v731_v39 = vld [vmem:[%s6594_s6 + $0xb28] sm:$0xff]  ;;  %v5637_v42 = vcombine.low %v591_v26, %v595_v27 }
 0x14c   : > { %4546 = vmatprep.subr.bf16.mxu1 %v5718_v43  ;;  %v5765_v43 = vcombine.low %v719_v55, %v723_v29  ;;  %v5774_v45 = vcombine.high %v727_v38, %v731_v39  ;;  %v771_v19 = vld [vmem:[%s6594_s6 + $0xc68] sm:$0xff] }
 0x14d   : > { %v5814_v26 = vcombine.high %v767_v18, %v771_v19  ;;  %v775_v55 = vld [vmem:[%s6594_s6 + $0xc88] sm:$0xff] }
 0x14e   : > { %4506 = vmatpush1.bf16.msra.mxu0 %v5589_v23  ;;  %v735_v23 = vld [vmem:[%s6594_s6 + $0xb48] sm:$0xff] }
 0x14f   : > { %4547 = vmatpush1.bf16.msra.mxu1 %v5717_v48  ;;  %4507 = vmatprep.subr.bf16.mxu0 %v5598_v49  ;;  %v739_v48 = vld [vmem:[%s6594_s6 + $0xb68] sm:$0xff]  ;;  %v5645_v49 = vcombine.low %v599_v35, %v603_v36 }
 0x150   : > { %4548 = vmatprep.subr.bf16.mxu1 %v5726_v50  ;;  %v5773_v50 = vcombine.low %v727_v38, %v731_v39  ;;  %v5782_v52 = vcombine.high %v735_v23, %v739_v48  ;;  %v779_v29 = vld [vmem:[%s6594_s6 + $0xca8] sm:$0xff] }
 0x151   : > { %v5822_v35 = vcombine.high %v775_v55, %v779_v29  ;;  %v783_v38 = vld [vmem:[%s6594_s6 + $0xcc8] sm:$0xff] }
 0x152   : > { %4508 = vmatpush1.bf16.msra.mxu0 %v5597_v57  ;;  %v743_v57 = vld [vmem:[%s6594_s6 + $0xb88] sm:$0xff] }
 0x153   : > { %4549 = vmatpush1.bf16.msra.mxu1 %v5725_v58  ;;  %4509 = vmatprep.subr.bf16.mxu0 %v5606_v61  ;;  %v747_v58 = vld [vmem:[%s6594_s6 + $0xba8] sm:$0xff]  ;;  %v5653_v61 = vcombine.low %v607_v20, %v611_v46 }
 0x154   : > { %4550 = vmatprep.subr.bf16.mxu1 %v5734_v62  ;;  %v5781_v62 = vcombine.low %v735_v23, %v739_v48  ;;  %v5790_v1 = vcombine.high %v743_v57, %v747_v58  ;;  %v787_v39 = vld [vmem:[%s6594_s6 + $0xce8] sm:$0xff] }
 0x155   : > { %v5830_v20 = vcombine.high %v783_v38, %v787_v39  ;;  %v791_v23 = vld [vmem:[%s6594_s6 + $0xd08] sm:$0xff] }
 0x156   : > { %4510 = vmatpush1.bf16.msra.mxu0 %v5605_v4  ;;  %v751_v4 = vld [vmem:[%s6594_s6 + $0xbc8] sm:$0xff] }
 0x157   : > { %4551 = vmatpush1.bf16.msra.mxu1 %v5733_v5  ;;  %4511 = vmatprep.subr.bf16.mxu0 %v5614_v6  ;;  %v755_v5 = vld [vmem:[%s6594_s6 + $0xbe8] sm:$0xff]  ;;  %v5661_v6 = vcombine.low %v615_v53, %v619_v56 }
 0x158   : > { %4552 = vmatprep.subr.bf16.mxu1 %v5742_v7  ;;  %v5789_v7 = vcombine.low %v743_v57, %v747_v58  ;;  %v5798_v8 = vcombine.high %v751_v4, %v755_v5  ;;  %v795_v48 = vld [vmem:[%s6594_s6 + $0xd28] sm:$0xff] }
 0x159   : > { %v5838_v53 = vcombine.high %v791_v23, %v795_v48  ;;  %v799_v57 = vld [vmem:[%s6594_s6 + $0xd48] sm:$0xff] }
 0x15a   : > { %4512 = vmatpush1.bf16.msra.mxu0 %v5613_v11  ;;  %v887_v11 = vld [vmem:[%s6594_s6 + $0x1008] sm:$0xff] }
 0x15b   : > { %4553 = vmatpush1.bf16.msra.mxu1 %v5741_v12  ;;  %4513 = vmatprep.subr.bf16.mxu0 %v5622_v13  ;;  %v891_v12 = vld [vmem:[%s6594_s6 + $0x1028] sm:$0xff]  ;;  %v5669_v13 = vcombine.low %v623_v2, %v627_v3 }
 0x15c   : > { %4554 = vmatprep.subr.bf16.mxu1 %v5750_v14  ;;  %v5797_v14 = vcombine.low %v751_v4, %v755_v5  ;;  %v5934_v16 = vcombine.high %v887_v11, %v891_v12  ;;  %v803_v58 = vld [vmem:[%s6594_s6 + $0xd68] sm:$0xff] }
 0x15d   : > { %v5846_v2 = vcombine.high %v799_v57, %v803_v58  ;;  %v807_v4 = vld [vmem:[%s6594_s6 + $0xd88] sm:$0xff] }
 0x15e   : > { %4514 = vmatpush1.bf16.msra.mxu0 %v5621_v22  ;;  %v895_v22 = vld [vmem:[%s6594_s6 + $0x1048] sm:$0xff] }
 0x15f   : > { %4555 = vmatpush1.bf16.msra.mxu1 %v5749_v24  ;;  %4515 = vmatprep.subr.bf16.mxu0 %v5630_v25  ;;  %v899_v24 = vld [vmem:[%s6594_s6 + $0x1068] sm:$0xff]  ;;  %v5805_v25 = vcombine.low %v759_v9, %v763_v10 }
 0x160   : > { %4556 = vmatprep.subr.bf16.mxu1 %v5758_v54  ;;  %v5933_v54 = vcombine.low %v887_v11, %v891_v12  ;;  %v5942_v27 = vcombine.high %v895_v22, %v899_v24  ;;  %v811_v5 = vld [vmem:[%s6594_s6 + $0xda8] sm:$0xff] }
 0x161   : > { %v5854_v9 = vcombine.high %v807_v4, %v811_v5  ;;  %v815_v12 = vld [vmem:[%s6594_s6 + $0xdc8] sm:$0xff] }
 0x162   : > { %4516 = vmatpush1.bf16.msra.mxu0 %v5629_v31  ;;  %v903_v31 = vld [vmem:[%s6594_s6 + $0x1088] sm:$0xff] }
 0x163   : > { %4557 = vmatpush1.bf16.msra.mxu1 %v5757_v32  ;;  %4517 = vmatprep.subr.bf16.mxu0 %v5638_v33  ;;  %v907_v32 = vld [vmem:[%s6594_s6 + $0x10a8] sm:$0xff]  ;;  %v5813_v33 = vcombine.low %v767_v18, %v771_v19 }
 0x164   : > { %4558 = vmatprep.subr.bf16.mxu1 %v5766_v34  ;;  %v5941_v34 = vcombine.low %v895_v22, %v899_v24  ;;  %v5950_v36 = vcombine.high %v903_v31, %v907_v32  ;;  %v947_v18 = vld [vmem:[%s6594_s6 + $0x11e8] sm:$0xff] }
 0x166   : > { %4518 = vmatpush1.bf16.msra.mxu0 %v5637_v42  ;;  %v911_v42 = vld [vmem:[%s6594_s6 + $0x10c8] sm:$0xff] }
 0x167   : > { %4559 = vmatpush1.bf16.msra.mxu1 %v5765_v43  ;;  %4519 = vmatprep.subr.bf16.mxu0 %v5646_v44  ;;  %v915_v43 = vld [vmem:[%s6594_s6 + $0x10e8] sm:$0xff]  ;;  %v5821_v44 = vcombine.low %v775_v55, %v779_v29 }
 0x168   : > { %4560 = vmatprep.subr.bf16.mxu1 %v5774_v45  ;;  %v5949_v45 = vcombine.low %v903_v31, %v907_v32  ;;  %v5958_v46 = vcombine.high %v911_v42, %v915_v43 }
 0x16a   : > { %4520 = vmatpush1.bf16.msra.mxu0 %v5645_v49  ;;  %v919_v49 = vld [vmem:[%s6594_s6 + $0x1108] sm:$0xff] }
 0x16b   : > { %4561 = vmatpush1.bf16.msra.mxu1 %v5773_v50  ;;  %4521 = vmatprep.subr.bf16.mxu0 %v5654_v51  ;;  %v923_v50 = vld [vmem:[%s6594_s6 + $0x1128] sm:$0xff]  ;;  %v5829_v51 = vcombine.low %v783_v38, %v787_v39 }
 0x16c   : > { %4562 = vmatprep.subr.bf16.mxu1 %v5782_v52  ;;  %v5957_v52 = vcombine.low %v911_v42, %v915_v43  ;;  %v5966_v56 = vcombine.high %v919_v49, %v923_v50 }
 0x16e   : > { %4522 = vmatpush1.bf16.msra.mxu0 %v5653_v61  ;;  %v927_v61 = vld [vmem:[%s6594_s6 + $0x1148] sm:$0xff] }
 0x16f   : > { %4563 = vmatpush1.bf16.msra.mxu1 %v5781_v62  ;;  %4523 = vmatprep.subr.bf16.mxu0 %v5662_v0  ;;  %v931_v62 = vld [vmem:[%s6594_s6 + $0x1168] sm:$0xff]  ;;  %v5837_v0 = vcombine.low %v791_v23, %v795_v48 }
 0x170   : > { %4564 = vmatprep.subr.bf16.mxu1 %v5790_v1  ;;  %v5965_v1 = vcombine.low %v919_v49, %v923_v50  ;;  %v5974_v3 = vcombine.high %v927_v61, %v931_v62 }
 0x172   : > { %4524 = vmatpush1.bf16.msra.mxu0 %v5661_v6  ;;  %v935_v6 = vld [vmem:[%s6594_s6 + $0x1188] sm:$0xff] }
 0x173   : > { %4565 = vmatpush1.bf16.msra.mxu1 %v5789_v7  ;;  %4525 = vmatprep.subr.bf16.mxu0 %v5670_v40  ;;  %v939_v7 = vld [vmem:[%s6594_s6 + $0x11a8] sm:$0xff]  ;;  %v5845_v40 = vcombine.low %v799_v57, %v803_v58 }
 0x174   : > { %4566 = vmatprep.subr.bf16.mxu1 %v5798_v8  ;;  %v5973_v8 = vcombine.low %v927_v61, %v931_v62  ;;  %v5982_v11 = vcombine.high %v935_v6, %v939_v7  ;;  %v5981_v55 = vcombine.low %v935_v6, %v939_v7 }
 0x176   : > { %4526 = vmatpush1.bf16.msra.mxu0 %v5669_v13  ;;  %v819_v13 = vld [vmem:[%s6594_s6 + $0xde8] sm:$0xff] }
 0x177   : > { %4567 = vmatpush1.bf16.msra.mxu1 %v5797_v14  ;;  %4577 = vmatprep.subr.bf16.mxu0 %v5806_v15  ;;  %v5862_v29 = vcombine.high %v815_v12, %v819_v13  ;;  %v5861_v38 = vcombine.low %v815_v12, %v819_v13 }
 0x178   : > { %4618 = vmatprep.subr.bf16.mxu1 %v5934_v16  ;;  %v943_v16 = vld [vmem:[%s6594_s6 + $0x11c8] sm:$0xff] }
 0x179   : > { %4528 = vmatmul.mubr.bf16.vlgmr.msra.gmra.mrb[12].mxu0 %v6725_v21  ;;  %v5990_v32 = vcombine.high %v943_v16, %v947_v18  ;;  %v5989_v39 = vcombine.low %v943_v16, %v947_v18  ;;  %v867_v16 = vld [vmem:[%s6594_s6 + $0xf68] sm:$0xff] }
 0x17a   : > { %4569 = vmatmul.mubr.bf16.vlgmr.msra.gmra.mrb[12].mxu1 %v6806_v37  ;;  %4578 = vmatpush1.bf16.msra.mxu0 %v5805_v25  ;;  %v5853_v25 = vcombine.low %v807_v4, %v811_v5  ;;  %v991_v18 = vld [vmem:[%s6594_s6 + $0x1348] sm:$0xff] }
 0x17b   : > { %4619 = vmatpush1.bf16.msra.mxu1 %v5933_v54  ;;  %4579 = vmatprep.subr.bf16.mxu0 %v5814_v26 }
 0x17c   : > { %4620 = vmatprep.subr.bf16.mxu1 %v5942_v27  ;;  %4609 = vmatprep.mubr.bf16.mxu0 %v6741_v30 }
 0x17d   : > { %4650 = vmatprep.mubr.bf16.mxu1 %v6821_v47 }
 0x17e   : > { %4580 = vmatpush1.bf16.msra.mxu0 %v5813_v33  ;;  %v823_v33 = vld [vmem:[%s6594_s6 + $0xe08] sm:$0xff] }
 0x17f   : > { %4621 = vmatpush1.bf16.msra.mxu1 %v5941_v34  ;;  %4581 = vmatprep.subr.bf16.mxu0 %v5822_v35  ;;  %v827_v34 = vld [vmem:[%s6594_s6 + $0xe28] sm:$0xff] }
 0x180   : > { %4622 = vmatprep.subr.bf16.mxu1 %v5950_v36  ;;  %v951_v35 = vld [vmem:[%s6594_s6 + $0x1208] sm:$0xff]  ;;  %v5870_v42 = vcombine.high %v823_v33, %v827_v34  ;;  %v5869_v23 = vcombine.low %v823_v33, %v827_v34 }
 0x181   : > { %v955_v36 = vld [vmem:[%s6594_s6 + $0x1228] sm:$0xff] }
 0x182   : > { %4582 = vmatpush1.bf16.msra.mxu0 %v5821_v44  ;;  %v5998_v43 = vcombine.high %v951_v35, %v955_v36  ;;  %v831_v44 = vld [vmem:[%s6594_s6 + $0xe48] sm:$0xff]  ;;  %v5997_v48 = vcombine.low %v951_v35, %v955_v36 }
 0x183   : > { %4623 = vmatpush1.bf16.msra.mxu1 %v5949_v45  ;;  %4583 = vmatprep.subr.bf16.mxu0 %v5830_v20  ;;  %v835_v45 = vld [vmem:[%s6594_s6 + $0xe68] sm:$0xff] }
 0x184   : > { %4624 = vmatprep.subr.bf16.mxu1 %v5958_v46  ;;  %v959_v20 = vld [vmem:[%s6594_s6 + $0x1248] sm:$0xff]  ;;  %v5878_v49 = vcombine.high %v831_v44, %v835_v45  ;;  %v5877_v57 = vcombine.low %v831_v44, %v835_v45 }
 0x185   : > { %v963_v46 = vld [vmem:[%s6594_s6 + $0x1268] sm:$0xff] }
 0x186   : > { %4584 = vmatpush1.bf16.msra.mxu0 %v5829_v51  ;;  %v6006_v50 = vcombine.high %v959_v20, %v963_v46  ;;  %v839_v51 = vld [vmem:[%s6594_s6 + $0xe88] sm:$0xff]  ;;  %v6005_v58 = vcombine.low %v959_v20, %v963_v46 }
 0x187   : > { %4625 = vmatpush1.bf16.msra.mxu1 %v5957_v52  ;;  %4585 = vmatprep.subr.bf16.mxu0 %v5838_v53  ;;  %v843_v52 = vld [vmem:[%s6594_s6 + $0xea8] sm:$0xff] }
 0x188   : > { %4626 = vmatprep.subr.bf16.mxu1 %v5966_v56  ;;  %v967_v53 = vld [vmem:[%s6594_s6 + $0x1288] sm:$0xff]  ;;  %v5886_v61 = vcombine.high %v839_v51, %v843_v52  ;;  %v5885_v4 = vcombine.low %v839_v51, %v843_v52 }
 0x189   : > { %v971_v56 = vld [vmem:[%s6594_s6 + $0x12a8] sm:$0xff] }
 0x18a   : > { %4586 = vmatpush1.bf16.msra.mxu0 %v5837_v0  ;;  %v6014_v62 = vcombine.high %v967_v53, %v971_v56  ;;  %v847_v0 = vld [vmem:[%s6594_s6 + $0xec8] sm:$0xff]  ;;  %v6013_v5 = vcombine.low %v967_v53, %v971_v56 }
 0x18b   : > { %4627 = vmatpush1.bf16.msra.mxu1 %v5965_v1  ;;  %4587 = vmatprep.subr.bf16.mxu0 %v5846_v2  ;;  %v4283_v10 = vpop.f32.mrb[0].mxu0  ;;  %v851_v1 = vld [vmem:[%s6594_s6 + $0xee8] sm:$0xff] }
 0x18c   : > { %4628 = vmatprep.subr.bf16.mxu1 %v5974_v3  ;;  %v4285_v15 = vpop.f32.mrb[1].mxu0  ;;  %v975_v2 = vld [vmem:[%s6594_s6 + $0x12c8] sm:$0xff]  ;;  %v5894_v6 = vcombine.high %v847_v0, %v851_v1 }
 0x18d   : > { %v4324_v14 = vpop.f32.mrb[0].mxu1  ;;  %v4287_v24 = vpop.f32.mrb[2].mxu0  ;;  %v979_v3 = vld [vmem:[%s6594_s6 + $0x12e8] sm:$0xff] }
 0x18e   : > { %v6989_v19 = vadd.f32 %v4324_v14, %v4283_v10  ;;  %v4326_v22 = vpop.f32.mrb[1].mxu1  ;;  %4588 = vmatpush1.bf16.msra.mxu0 %v5845_v40  ;;  %v4288_v27 = vpop.f32.mrb[3].mxu0  ;;  %v6022_v7 = vcombine.high %v975_v2, %v979_v3  ;;  %v855_v40 = vld [vmem:[%s6594_s6 + $0xf08] sm:$0xff]  ;;  %v6021_v12 = vcombine.low %v975_v2, %v979_v3 }
 0x18f   : > { %v6991_v54 = vadd.f32 %v4326_v22, %v4285_v15  ;;  %v4328_v26 = vpop.f32.mrb[2].mxu1  ;;  %4629 = vmatpush1.bf16.msra.mxu1 %v5973_v8  ;;  %4589 = vmatprep.subr.bf16.mxu0 %v5854_v9  ;;  %v859_v8 = vld [vmem:[%s6594_s6 + $0xf28] sm:$0xff] }
 0x190   : > { %v4329_v31 = vpop.f32.mrb[3].mxu1  ;;  %4630 = vmatprep.subr.bf16.mxu1 %v5982_v11  ;;  %v983_v9 = vld [vmem:[%s6594_s6 + $0x1308] sm:$0xff]  ;;  %v5893_v11 = vcombine.low %v847_v0, %v851_v1  ;;  %v5902_v13 = vcombine.high %v855_v40, %v859_v8  ;;  %v5901_v24 = vcombine.low %v855_v40, %v859_v8 }
 0x191   : > { %v987_v10 = vld [vmem:[%s6594_s6 + $0x1328] sm:$0xff] }
 0x192   : > { %4590 = vmatpush1.bf16.msra.mxu0 %v5853_v25  ;;  %v6030_v14 = vcombine.high %v983_v9, %v987_v10  ;;  %v863_v15 = vld [vmem:[%s6594_s6 + $0xf48] sm:$0xff]  ;;  %v6029_v25 = vcombine.low %v983_v9, %v987_v10 }
 0x193   : > { %4631 = vmatpush1.bf16.msra.mxu1 %v5981_v55  ;;  %4591 = vmatprep.subr.bf16.mxu0 %v5862_v29  ;;  %v995_v22 = vld [vmem:[%s6594_s6 + $0x1368] sm:$0xff]  ;;  %v5910_v26 = vcombine.high %v863_v15, %v867_v16  ;;  %v5909_v33 = vcombine.low %v863_v15, %v867_v16 }
 0x194   : > { %4632 = vmatprep.subr.bf16.mxu1 %v5990_v32  ;;  %v6038_v27 = vcombine.high %v991_v18, %v995_v22  ;;  %v871_v55 = vld [vmem:[%s6594_s6 + $0xf88] sm:$0xff]  ;;  %v6037_v34 = vcombine.low %v991_v18, %v995_v22 }
 0x195   : > { %v875_v29 = vld [vmem:[%s6594_s6 + $0xfa8] sm:$0xff] }
 0x196   : > { %4592 = vmatpush1.bf16.msra.mxu0 %v5861_v38  ;;  %v999_v31 = vld [vmem:[%s6594_s6 + $0x1388] sm:$0xff]  ;;  %v5918_v35 = vcombine.high %v871_v55, %v875_v29  ;;  %v5917_v44 = vcombine.low %v871_v55, %v875_v29 }
 0x197   : > { %4633 = vmatpush1.bf16.msra.mxu1 %v5989_v39  ;;  %4593 = vmatprep.subr.bf16.mxu0 %v5870_v42  ;;  %v1003_v32 = vld [vmem:[%s6594_s6 + $0x13a8] sm:$0xff] }
 0x198   : > { %4634 = vmatprep.subr.bf16.mxu1 %v5998_v43  ;;  %v6046_v36 = vcombine.high %v999_v31, %v1003_v32  ;;  %v879_v38 = vld [vmem:[%s6594_s6 + $0xfc8] sm:$0xff]  ;;  %v6045_v45 = vcombine.low %v999_v31, %v1003_v32 }
 0x199   : > { %v883_v39 = vld [vmem:[%s6594_s6 + $0xfe8] sm:$0xff] }
 0x19a   : > { %4594 = vmatpush1.bf16.msra.mxu0 %v5869_v23  ;;  %v1007_v42 = vld [vmem:[%s6594_s6 + $0x13c8] sm:$0xff]  ;;  %v5926_v20 = vcombine.high %v879_v38, %v883_v39  ;;  %v376_v23 = vld [vmem:[%s6594_s6 + $0x10] sm:$0xff]  ;;  %v5925_v51 = vcombine.low %v879_v38, %v883_v39 }
 0x19b   : > { %4635 = vmatpush1.bf16.msra.mxu1 %v5997_v48  ;;  %4595 = vmatprep.subr.bf16.mxu0 %v5878_v49  ;;  %v1011_v43 = vld [vmem:[%s6594_s6 + $0x13e8] sm:$0xff]  ;;  %v380_v48 = vld [vmem:[%s6594_s6 + $0x30] sm:$0xff] }
 0x19c   : > { %4636 = vmatprep.subr.bf16.mxu1 %v6006_v50  ;;  %v6054_v46 = vcombine.high %v1007_v42, %v1011_v43  ;;  %v504_v49 = vld [vmem:[%s6594_s6 + $0x410] sm:$0xff]  ;;  %v6053_v52 = vcombine.low %v1007_v42, %v1011_v43  ;;  %v5424_v53 = vcombine.high %v376_v23, %v380_v48  ;;  %v5423_v0 = vcombine.low %v376_v23, %v380_v48 }
 0x19d   : > { %v508_v50 = vld [vmem:[%s6594_s6 + $0x430] sm:$0xff] }
 0x19e   : > { %4596 = vmatpush1.bf16.msra.mxu0 %v5877_v57  ;;  %v5552_v56 = vcombine.high %v504_v49, %v508_v50  ;;  %v384_v57 = vld [vmem:[%s6594_s6 + $0x50] sm:$0xff]  ;;  %v5551_v1 = vcombine.low %v504_v49, %v508_v50 }
 0x19f   : > { %4637 = vmatpush1.bf16.msra.mxu1 %v6005_v58  ;;  %4597 = vmatprep.subr.bf16.mxu0 %v5886_v61  ;;  %v388_v58 = vld [vmem:[%s6594_s6 + $0x70] sm:$0xff] }
 0x1a0   : > { %4638 = vmatprep.subr.bf16.mxu1 %v6014_v62  ;;  %v512_v61 = vld [vmem:[%s6594_s6 + $0x450] sm:$0xff]  ;;  %v5432_v2 = vcombine.high %v384_v57, %v388_v58  ;;  %v5431_v40 = vcombine.low %v384_v57, %v388_v58 }
 0x1a1   : > { %v516_v62 = vld [vmem:[%s6594_s6 + $0x470] sm:$0xff] }
 0x1a2   : > { %4598 = vmatpush1.bf16.msra.mxu0 %v5885_v4  ;;  %v5560_v3 = vcombine.high %v512_v61, %v516_v62  ;;  %v392_v4 = vld [vmem:[%s6594_s6 + $0x90] sm:$0xff]  ;;  %v5559_v8 = vcombine.low %v512_v61, %v516_v62 }
 0x1a3   : > { %4639 = vmatpush1.bf16.msra.mxu1 %v6013_v5  ;;  %4599 = vmatprep.subr.bf16.mxu0 %v5894_v6  ;;  %v396_v5 = vld [vmem:[%s6594_s6 + $0xb0] sm:$0xff] }
 0x1a4   : > { %4640 = vmatprep.subr.bf16.mxu1 %v6022_v7  ;;  %v520_v6 = vld [vmem:[%s6594_s6 + $0x490] sm:$0xff]  ;;  %v5440_v9 = vcombine.high %v392_v4, %v396_v5  ;;  %v5439_v15 = vcombine.low %v392_v4, %v396_v5 }
 0x1a5   : > { %v524_v7 = vld [vmem:[%s6594_s6 + $0x4b0] sm:$0xff] }
 0x1a6   : > { %4600 = vmatpush1.bf16.msra.mxu0 %v5893_v11  ;;  %v5568_v10 = vcombine.high %v520_v6, %v524_v7  ;;  %v400_v11 = vld [vmem:[%s6594_s6 + $0xd0] sm:$0xff]  ;;  %v5567_v16 = vcombine.low %v520_v6, %v524_v7 }
 0x1a7   : > { %4641 = vmatpush1.bf16.msra.mxu1 %v6021_v12  ;;  %4601 = vmatprep.subr.bf16.mxu0 %v5902_v13  ;;  %v404_v12 = vld [vmem:[%s6594_s6 + $0xf0] sm:$0xff] }
 0x1a8   : > { %4642 = vmatprep.subr.bf16.mxu1 %v6030_v14  ;;  %v528_v13 = vld [vmem:[%s6594_s6 + $0x4d0] sm:$0xff]  ;;  %v5448_v18 = vcombine.high %v400_v11, %v404_v12  ;;  %v5447_v55 = vcombine.low %v400_v11, %v404_v12 }
 0x1a9   : > { %v532_v14 = vld [vmem:[%s6594_s6 + $0x4f0] sm:$0xff] }
 0x1aa   : > { %4602 = vmatpush1.bf16.msra.mxu0 %v5901_v24  ;;  %v5576_v22 = vcombine.high %v528_v13, %v532_v14  ;;  %v408_v24 = vld [vmem:[%s6594_s6 + $0x110] sm:$0xff]  ;;  %v5575_v29 = vcombine.low %v528_v13, %v532_v14 }
 0x1ab   : > { %4643 = vmatpush1.bf16.msra.mxu1 %v6029_v25  ;;  %4603 = vmatprep.subr.bf16.mxu0 %v5910_v26  ;;  %v412_v25 = vld [vmem:[%s6594_s6 + $0x130] sm:$0xff] }
 0x1ac   : > { %4644 = vmatprep.subr.bf16.mxu1 %v6038_v27  ;;  %v536_v26 = vld [vmem:[%s6594_s6 + $0x510] sm:$0xff]  ;;  %v5456_v31 = vcombine.high %v408_v24, %v412_v25  ;;  %v5455_v38 = vcombine.low %v408_v24, %v412_v25 }
 0x1ad   : > { %v540_v27 = vld [vmem:[%s6594_s6 + $0x530] sm:$0xff] }
 0x1ae   : > { %4604 = vmatpush1.bf16.msra.mxu0 %v5909_v33  ;;  %v5584_v32 = vcombine.high %v536_v26, %v540_v27  ;;  %v416_v33 = vld [vmem:[%s6594_s6 + $0x150] sm:$0xff]  ;;  %v5583_v39 = vcombine.low %v536_v26, %v540_v27 }
 0x1af   : > { %4645 = vmatpush1.bf16.msra.mxu1 %v6037_v34  ;;  %4605 = vmatprep.subr.bf16.mxu0 %v5918_v35  ;;  %v420_v34 = vld [vmem:[%s6594_s6 + $0x170] sm:$0xff] }
 0x1b0   : > { %4646 = vmatprep.subr.bf16.mxu1 %v6046_v36  ;;  %v544_v35 = vld [vmem:[%s6594_s6 + $0x550] sm:$0xff]  ;;  %v5464_v42 = vcombine.high %v416_v33, %v420_v34  ;;  %v5463_v23 = vcombine.low %v416_v33, %v420_v34 }
 0x1b1   : > { %v548_v36 = vld [vmem:[%s6594_s6 + $0x570] sm:$0xff] }
 0x1b2   : > { %4606 = vmatpush1.bf16.msra.mxu0 %v5917_v44  ;;  %v5592_v43 = vcombine.high %v544_v35, %v548_v36  ;;  %v424_v44 = vld [vmem:[%s6594_s6 + $0x190] sm:$0xff]  ;;  %v5591_v48 = vcombine.low %v544_v35, %v548_v36 }
 0x1b3   : > { %4647 = vmatpush1.bf16.msra.mxu1 %v6045_v45  ;;  %4607 = vmatprep.subr.bf16.mxu0 %v5926_v20  ;;  %v428_v45 = vld [vmem:[%s6594_s6 + $0x1b0] sm:$0xff] }
 0x1b4   : > { %4648 = vmatprep.subr.bf16.mxu1 %v6054_v46  ;;  %v552_v20 = vld [vmem:[%s6594_s6 + $0x590] sm:$0xff]  ;;  %v5472_v49 = vcombine.high %v424_v44, %v428_v45 }
 0x1b5   : > { %v556_v46 = vld [vmem:[%s6594_s6 + $0x5b0] sm:$0xff] }
 0x1b6   : > { %4608 = vmatpush1.bf16.msra.mxu0 %v5925_v51  ;;  %v5600_v51 = vcombine.high %v552_v20, %v556_v46  ;;  %v560_v61 = vld [vmem:[%s6594_s6 + $0x5d0] sm:$0xff] }
 0x1b7   : > { %4649 = vmatpush1.bf16.msra.mxu1 %v6053_v52  ;;  %4659 = vmatprep.subr.bf16.mxu0 %v5424_v53  ;;  %v432_v52 = vld [vmem:[%s6594_s6 + $0x1d0] sm:$0xff] }
 0x1b8   : > { %4700 = vmatprep.subr.bf16.mxu1 %v5552_v56  ;;  %v436_v53 = vld [vmem:[%s6594_s6 + $0x1f0] sm:$0xff] }
 0x1b9   : > { %4610 = vmatmul.mubr.bf16.vlgmr.msra.gmra.mrb[16].mxu0 %v6815_v41  ;;  %v564_v62 = vld [vmem:[%s6594_s6 + $0x5f0] sm:$0xff]  ;;  %v5480_v7 = vcombine.high %v432_v52, %v436_v53  ;;  %v5479_v13 = vcombine.low %v432_v52, %v436_v53 }
 0x1ba   : > { %4651 = vmatmul.mubr.bf16.vlgmr.msra.gmra.mrb[16].mxu1 %v6889_v63  ;;  %4660 = vmatpush1.bf16.msra.mxu0 %v5423_v0  ;;  %v568_v11 = vld [vmem:[%s6594_s6 + $0x610] sm:$0xff]  ;;  %v5607_v14 = vcombine.low %v560_v61, %v564_v62 }
 0x1bb   : > { %4701 = vmatpush1.bf16.msra.mxu1 %v5551_v1  ;;  %4661 = vmatprep.subr.bf16.mxu0 %v5432_v2  ;;  %v572_v12 = vld [vmem:[%s6594_s6 + $0x630] sm:$0xff] }
 0x1bc   : > { %4702 = vmatprep.subr.bf16.mxu1 %v5560_v3  ;;  %4691 = vmatprep.mubr.bf16.mxu0 %v6666_v59  ;;  %v5471_v3 = vcombine.low %v424_v44, %v428_v45  ;;  %v576_v24 = vld [vmem:[%s6594_s6 + $0x650] sm:$0xff]  ;;  %v5615_v27 = vcombine.low %v568_v11, %v572_v12 }
 0x1bd   : > { %4732 = vmatprep.mubr.bf16.mxu1 %v6670_v60  ;;  %v580_v25 = vld [vmem:[%s6594_s6 + $0x670] sm:$0xff] }
 0x1be   : > { %4662 = vmatpush1.bf16.msra.mxu0 %v5431_v40  ;;  %v584_v33 = vld [vmem:[%s6594_s6 + $0x690] sm:$0xff]  ;;  %v5623_v36 = vcombine.low %v576_v24, %v580_v25 }
 0x1bf   : > { %4703 = vmatpush1.bf16.msra.mxu1 %v5559_v8  ;;  %4663 = vmatprep.subr.bf16.mxu0 %v5440_v9  ;;  %v5608_v8 = vcombine.high %v560_v61, %v564_v62  ;;  %v440_v9 = vld [vmem:[%s6594_s6 + $0x210] sm:$0xff] }
 0x1c0   : > { %4704 = vmatprep.subr.bf16.mxu1 %v5568_v10  ;;  %v444_v10 = vld [vmem:[%s6594_s6 + $0x230] sm:$0xff] }
 0x1c1   : > { %v5487_v26 = vcombine.low %v440_v9, %v444_v10  ;;  %v588_v34 = vld [vmem:[%s6594_s6 + $0x6b0] sm:$0xff] }
 0x1c2   : > { %4664 = vmatpush1.bf16.msra.mxu0 %v5439_v15  ;;  %v5488_v15 = vcombine.high %v440_v9, %v444_v10  ;;  %v592_v44 = vld [vmem:[%s6594_s6 + $0x6d0] sm:$0xff] }
 0x1c3   : > { %4705 = vmatpush1.bf16.msra.mxu1 %v5567_v16  ;;  %4665 = vmatprep.subr.bf16.mxu0 %v5448_v18  ;;  %v5616_v16 = vcombine.high %v568_v11, %v572_v12  ;;  %v448_v18 = vld [vmem:[%s6594_s6 + $0x250] sm:$0xff] }
 0x1c4   : > { %4706 = vmatprep.subr.bf16.mxu1 %v5576_v22  ;;  %v452_v22 = vld [vmem:[%s6594_s6 + $0x270] sm:$0xff] }
 0x1c5   : > { %v5495_v35 = vcombine.low %v448_v18, %v452_v22  ;;  %v596_v45 = vld [vmem:[%s6594_s6 + $0x6f0] sm:$0xff] }
 0x1c6   : > { %4666 = vmatpush1.bf16.msra.mxu0 %v5447_v55  ;;  %v5496_v55 = vcombine.high %v448_v18, %v452_v22  ;;  %v604_v52 = vld [vmem:[%s6594_s6 + $0x730] sm:$0xff] }
 0x1c7   : > { %4707 = vmatpush1.bf16.msra.mxu1 %v5575_v29  ;;  %4667 = vmatprep.subr.bf16.mxu0 %v5456_v31  ;;  %v5624_v29 = vcombine.high %v576_v24, %v580_v25  ;;  %v456_v31 = vld [vmem:[%s6594_s6 + $0x290] sm:$0xff] }
 0x1c8   : > { %4708 = vmatprep.subr.bf16.mxu1 %v5584_v32  ;;  %v460_v32 = vld [vmem:[%s6594_s6 + $0x2b0] sm:$0xff] }
 0x1c9   : > { %v480_v61 = vld [vmem:[%s6594_s6 + $0x350] sm:$0xff] }
 0x1ca   : > { %4668 = vmatpush1.bf16.msra.mxu0 %v5455_v38  ;;  %v5504_v38 = vcombine.high %v456_v31, %v460_v32  ;;  %v484_v62 = vld [vmem:[%s6594_s6 + $0x370] sm:$0xff] }
 0x1cb   : > { %4709 = vmatpush1.bf16.msra.mxu1 %v5583_v39  ;;  %4669 = vmatprep.subr.bf16.mxu0 %v5464_v42  ;;  %v5632_v39 = vcombine.high %v584_v33, %v588_v34  ;;  %v464_v42 = vld [vmem:[%s6594_s6 + $0x2d0] sm:$0xff]  ;;  %v5527_v9 = vcombine.low %v480_v61, %v484_v62 }
 0x1cc   : > { %v4365_v50 = vpop.f32.mrb[4].mxu0  ;;  %4710 = vmatprep.subr.bf16.mxu1 %v5592_v43  ;;  %v468_v43 = vld [vmem:[%s6594_s6 + $0x2f0] sm:$0xff] }
 0x1cd   : > { %v4366_v56 = vadd.f32 %v4365_v50, %v6989_v19  ;;  %v4406_v57 = vpop.f32.mrb[4].mxu1  ;;  %v4367_v58 = vpop.f32.mrb[5].mxu0  ;;  %v5599_v19 = vcombine.low %v552_v20, %v556_v46  ;;  %v5503_v20 = vcombine.low %v456_v31, %v460_v32  ;;  %v5631_v46 = vcombine.low %v584_v33, %v588_v34  ;;  %v476_v50 = vld [vmem:[%s6594_s6 + $0x330] sm:$0xff] }
 0x1ce   : > { %v4368_v0 = vadd.f32 %v4367_v58, %v6991_v54  ;;  %v4408_v1 = vpop.f32.mrb[5].mxu1  ;;  %v4369_v2 = vpop.f32.mrb[6].mxu0  ;;  %4670 = vmatpush1.bf16.msra.mxu0 %v5463_v23  ;;  %v5512_v23 = vcombine.high %v464_v42, %v468_v43  ;;  %v5511_v53 = vcombine.low %v464_v42, %v468_v43 }
 0x1cf   : > { %v7063_v4 = vadd.f32 %v4406_v57, %v4366_v56  ;;  %v4410_v5 = vpop.f32.mrb[6].mxu1  ;;  %4711 = vmatpush1.bf16.msra.mxu1 %v5591_v48  ;;  %v4370_v6 = vpop.f32.mrb[7].mxu0  ;;  %4671 = vmatprep.subr.bf16.mxu0 %v5472_v49  ;;  %v5640_v48 = vcombine.high %v592_v44, %v596_v45  ;;  %v472_v49 = vld [vmem:[%s6594_s6 + $0x310] sm:$0xff]  ;;  %v5639_v56 = vcombine.low %v592_v44, %v596_v45 }
 0x1d0   : > { %v7065_v40 = vadd.f32 %v4408_v1, %v4368_v0  ;;  %v4411_v54 = vpop.f32.mrb[7].mxu1  ;;  %4712 = vmatprep.subr.bf16.mxu1 %v5600_v51  ;;  %v600_v51 = vld [vmem:[%s6594_s6 + $0x710] sm:$0xff]  ;;  %v5520_v57 = vcombine.high %v472_v49, %v476_v50  ;;  %v5519_v2 = vcombine.low %v472_v49, %v476_v50  ;;  %v5528_v5 = vcombine.high %v480_v61, %v484_v62 }
 0x1d1   : > { %v5648_v58 = vcombine.high %v600_v51, %v604_v52  ;;  %v608_v0 = vld [vmem:[%s6594_s6 + $0x750] sm:$0xff] }
 0x1d2   : > { %4672 = vmatpush1.bf16.msra.mxu0 %v5471_v3  ;;  %v612_v1 = vld [vmem:[%s6594_s6 + $0x770] sm:$0xff]  ;;  %v5647_v3 = vcombine.low %v600_v51, %v604_v52 }
 0x1d3   : > { %4713 = vmatpush1.bf16.msra.mxu1 %v5599_v19  ;;  %4673 = vmatprep.subr.bf16.mxu0 %v5480_v7  ;;  %v5656_v6 = vcombine.high %v608_v0, %v612_v1  ;;  %v488_v19 = vld [vmem:[%s6594_s6 + $0x390] sm:$0xff]  ;;  %v5655_v10 = vcombine.low %v608_v0, %v612_v1 }
 0x1d4   : > { %4714 = vmatprep.subr.bf16.mxu1 %v5608_v8  ;;  %v492_v7 = vld [vmem:[%s6594_s6 + $0x3b0] sm:$0xff] }
 0x1d5   : > { %v616_v54 = vld [vmem:[%s6594_s6 + $0x790] sm:$0xff]  ;;  %v5536_v11 = vcombine.high %v488_v19, %v492_v7  ;;  %v5535_v18 = vcombine.low %v488_v19, %v492_v7 }
 0x1d6   : > { %4674 = vmatpush1.bf16.msra.mxu0 %v5479_v13  ;;  %v620_v8 = vld [vmem:[%s6594_s6 + $0x7b0] sm:$0xff] }
 0x1d7   : > { %4715 = vmatpush1.bf16.msra.mxu1 %v5607_v14  ;;  %4675 = vmatprep.subr.bf16.mxu0 %v5488_v15  ;;  %v5664_v12 = vcombine.high %v616_v54, %v620_v8  ;;  %v496_v13 = vld [vmem:[%s6594_s6 + $0x3d0] sm:$0xff]  ;;  %v5663_v22 = vcombine.low %v616_v54, %v620_v8 }
 0x1d8   : > { %4716 = vmatprep.subr.bf16.mxu1 %v5616_v16  ;;  %v500_v14 = vld [vmem:[%s6594_s6 + $0x3f0] sm:$0xff] }
 0x1d9   : > { %v624_v15 = vld [vmem:[%s6594_s6 + $0x7d0] sm:$0xff]  ;;  %v5544_v24 = vcombine.high %v496_v13, %v500_v14  ;;  %v5543_v31 = vcombine.low %v496_v13, %v500_v14 }
 0x1da   : > { %4676 = vmatpush1.bf16.msra.mxu0 %v5487_v26  ;;  %v628_v16 = vld [vmem:[%s6594_s6 + $0x7f0] sm:$0xff] }
 0x1db   : > { %4717 = vmatpush1.bf16.msra.mxu1 %v5615_v27  ;;  %4677 = vmatprep.subr.bf16.mxu0 %v5496_v55  ;;  %v5672_v25 = vcombine.high %v624_v15, %v628_v16  ;;  %v632_v26 = vld [vmem:[%s6594_s6 + $0x810] sm:$0xff]  ;;  %v5671_v32 = vcombine.low %v624_v15, %v628_v16 }
 0x1dc   : > { %4718 = vmatprep.subr.bf16.mxu1 %v5624_v29  ;;  %v636_v27 = vld [vmem:[%s6594_s6 + $0x830] sm:$0xff] }
 0x1dd   : > { %v760_v55 = vld [vmem:[%s6594_s6 + $0xc10] sm:$0xff]  ;;  %v5680_v33 = vcombine.high %v632_v26, %v636_v27  ;;  %v5679_v42 = vcombine.low %v632_v26, %v636_v27 }
 0x1de   : > { %4678 = vmatpush1.bf16.msra.mxu0 %v5495_v35  ;;  %v764_v29 = vld [vmem:[%s6594_s6 + $0xc30] sm:$0xff] }
 0x1df   : > { %4719 = vmatpush1.bf16.msra.mxu1 %v5623_v36  ;;  %4679 = vmatprep.subr.bf16.mxu0 %v5504_v38  ;;  %v5808_v34 = vcombine.high %v760_v55, %v764_v29  ;;  %v640_v35 = vld [vmem:[%s6594_s6 + $0x850] sm:$0xff]  ;;  %v5807_v43 = vcombine.low %v760_v55, %v764_v29  ;;  %v361_v29 = vld [vmem:[#allocation2] sm:$0xff] }
 0x1e0   : > { %4720 = vmatprep.subr.bf16.mxu1 %v5632_v39  ;;  %v644_v36 = vld [vmem:[%s6594_s6 + $0x870] sm:$0xff] }
 0x1e1   : > { %v768_v38 = vld [vmem:[%s6594_s6 + $0xc50] sm:$0xff]  ;;  %v5688_v44 = vcombine.high %v640_v35, %v644_v36  ;;  %v5687_v49 = vcombine.low %v640_v35, %v644_v36 }
 0x1e2   : > { %4680 = vmatpush1.bf16.msra.mxu0 %v5503_v20  ;;  %v772_v39 = vld [vmem:[%s6594_s6 + $0xc70] sm:$0xff] }
 0x1e3   : > { %4721 = vmatpush1.bf16.msra.mxu1 %v5631_v46  ;;  %4681 = vmatprep.subr.bf16.mxu0 %v5512_v23  ;;  %v5816_v45 = vcombine.high %v768_v38, %v772_v39  ;;  %v648_v20 = vld [vmem:[%s6594_s6 + $0x890] sm:$0xff]  ;;  %v5815_v50 = vcombine.low %v768_v38, %v772_v39  ;;  %v362_v38 = vld [vmem:[#allocation2 + $0x8] sm:$0xff] }
 0x1e4   : > { %4722 = vmatprep.subr.bf16.mxu1 %v5640_v48  ;;  %v652_v46 = vld [vmem:[%s6594_s6 + $0x8b0] sm:$0xff] }
 0x1e5   : > { %v776_v23 = vld [vmem:[%s6594_s6 + $0xc90] sm:$0xff]  ;;  %v5696_v51 = vcombine.high %v648_v20, %v652_v46  ;;  %v5695_v61 = vcombine.low %v648_v20, %v652_v46 }
 0x1e6   : > { %4682 = vmatpush1.bf16.msra.mxu0 %v5511_v53  ;;  %v780_v48 = vld [vmem:[%s6594_s6 + $0xcb0] sm:$0xff] }
 0x1e7   : > { %4723 = vmatpush1.bf16.msra.mxu1 %v5639_v56  ;;  %4683 = vmatprep.subr.bf16.mxu0 %v5520_v57  ;;  %v5824_v52 = vcombine.high %v776_v23, %v780_v48  ;;  %v656_v53 = vld [vmem:[%s6594_s6 + $0x8d0] sm:$0xff]  ;;  %v5823_v62 = vcombine.low %v776_v23, %v780_v48 }
 0x1e8   : > { %4724 = vmatprep.subr.bf16.mxu1 %v5648_v58  ;;  %v660_v56 = vld [vmem:[%s6594_s6 + $0x8f0] sm:$0xff] }
 0x1e9   : > { %v784_v57 = vld [vmem:[%s6594_s6 + $0xcd0] sm:$0xff]  ;;  %v5704_v0 = vcombine.high %v656_v53, %v660_v56  ;;  %v5703_v19 = vcombine.low %v656_v53, %v660_v56 }
 0x1ea   : > { %4684 = vmatpush1.bf16.msra.mxu0 %v5519_v2  ;;  %v788_v58 = vld [vmem:[%s6594_s6 + $0xcf0] sm:$0xff] }
 0x1eb   : > { %4725 = vmatpush1.bf16.msra.mxu1 %v5647_v3  ;;  %4685 = vmatprep.subr.bf16.mxu0 %v5528_v5  ;;  %v5832_v1 = vcombine.high %v784_v57, %v788_v58  ;;  %v664_v2 = vld [vmem:[%s6594_s6 + $0x910] sm:$0xff]  ;;  %v5831_v7 = vcombine.low %v784_v57, %v788_v58 }
 0x1ec   : > { %4726 = vmatprep.subr.bf16.mxu1 %v5656_v6  ;;  %v668_v3 = vld [vmem:[%s6594_s6 + $0x930] sm:$0xff] }
 0x1ed   : > { %v792_v5 = vld [vmem:[%s6594_s6 + $0xd10] sm:$0xff]  ;;  %v5712_v54 = vcombine.high %v664_v2, %v668_v3  ;;  %v5711_v13 = vcombine.low %v664_v2, %v668_v3 }
 0x1ee   : > { %4686 = vmatpush1.bf16.msra.mxu0 %v5527_v9  ;;  %v796_v6 = vld [vmem:[%s6594_s6 + $0xd30] sm:$0xff] }
 0x1ef   : > { %4727 = vmatpush1.bf16.msra.mxu1 %v5655_v10  ;;  %4687 = vmatprep.subr.bf16.mxu0 %v5536_v11  ;;  %v5840_v8 = vcombine.high %v792_v5, %v796_v6  ;;  %v672_v9 = vld [vmem:[%s6594_s6 + $0x950] sm:$0xff]  ;;  %v5839_v14 = vcombine.low %v792_v5, %v796_v6 }
 0x1f0   : > { %4728 = vmatprep.subr.bf16.mxu1 %v5664_v12  ;;  %v676_v10 = vld [vmem:[%s6594_s6 + $0x970] sm:$0xff] }
 0x1f1   : > { %v800_v11 = vld [vmem:[%s6594_s6 + $0xd50] sm:$0xff]  ;;  %v5720_v15 = vcombine.high %v672_v9, %v676_v10  ;;  %v5719_v26 = vcombine.low %v672_v9, %v676_v10 }
 0x1f2   : > { %4688 = vmatpush1.bf16.msra.mxu0 %v5535_v18  ;;  %v804_v12 = vld [vmem:[%s6594_s6 + $0xd70] sm:$0xff] }
 0x1f3   : > { %4729 = vmatpush1.bf16.msra.mxu1 %v5663_v22  ;;  %4689 = vmatprep.subr.bf16.mxu0 %v5544_v24  ;;  %v5848_v16 = vcombine.high %v800_v11, %v804_v12  ;;  %v680_v18 = vld [vmem:[%s6594_s6 + $0x990] sm:$0xff]  ;;  %v5847_v27 = vcombine.low %v800_v11, %v804_v12 }
 0x1f4   : > { %4730 = vmatprep.subr.bf16.mxu1 %v5672_v25  ;;  %v684_v22 = vld [vmem:[%s6594_s6 + $0x9b0] sm:$0xff] }
 0x1f5   : > { %v808_v24 = vld [vmem:[%s6594_s6 + $0xd90] sm:$0xff]  ;;  %v5728_v55 = vcombine.high %v680_v18, %v684_v22  ;;  %v5727_v46 = vcombine.low %v680_v18, %v684_v22 }
 0x1f6   : > { %4690 = vmatpush1.bf16.msra.mxu0 %v5543_v31  ;;  %v812_v25 = vld [vmem:[%s6594_s6 + $0xdb0] sm:$0xff] }
 0x1f7   : > { %4731 = vmatpush1.bf16.msra.mxu1 %v5671_v32  ;;  %4741 = vmatprep.subr.bf16.mxu0 %v5680_v33  ;;  %v5856_v32 = vcombine.high %v808_v24, %v812_v25  ;;  %v688_v33 = vld [vmem:[%s6594_s6 + $0x9d0] sm:$0xff] }
 0x1f8   : > { %4782 = vmatprep.subr.bf16.mxu1 %v5808_v34  ;;  %v692_v34 = vld [vmem:[%s6594_s6 + $0x9f0] sm:$0xff] }
 0x1f9   : > { %4692 = vmatmul.mubr.bf16.vlgmr.msra.gmra.mrb[20].mxu0 %v6716_v17  ;;  %v696_v53 = vld [vmem:[%s6594_s6 + $0xa10] sm:$0xff] }
 0x1fa   : > { %4733 = vmatmul.mubr.bf16.vlgmr.msra.gmra.mrb[20].mxu1 %v6725_v21  ;;  %4742 = vmatpush1.bf16.msra.mxu0 %v5679_v42  ;;  %v816_v42 = vld [vmem:[%s6594_s6 + $0xdd0] sm:$0xff] }
 0x1fb   : > { %4783 = vmatpush1.bf16.msra.mxu1 %v5807_v43  ;;  %4743 = vmatprep.subr.bf16.mxu0 %v5688_v44  ;;  %v820_v43 = vld [vmem:[%s6594_s6 + $0xdf0] sm:$0xff] }
 0x1fc   : > { %4784 = vmatprep.subr.bf16.mxu1 %v5816_v45  ;;  %4773 = vmatprep.mubr.bf16.mxu0 %v6734_v28  ;;  %v700_v56 = vld [vmem:[%s6594_s6 + $0xa30] sm:$0xff] }
 0x1fd   : > { %4814 = vmatprep.mubr.bf16.mxu1 %v6741_v30  ;;  %v824_v57 = vld [vmem:[%s6594_s6 + $0xe10] sm:$0xff] }
 0x1fe   : > { %4744 = vmatpush1.bf16.msra.mxu0 %v5687_v49  ;;  %v5855_v49 = vcombine.low %v808_v24, %v812_v25  ;;  %v828_v58 = vld [vmem:[%s6594_s6 + $0xe30] sm:$0xff] }
 0x1ff   : > { %4785 = vmatpush1.bf16.msra.mxu1 %v5815_v50  ;;  %4745 = vmatprep.subr.bf16.mxu0 %v5696_v51  ;;  %v5736_v50 = vcombine.high %v688_v33, %v692_v34  ;;  %v704_v2 = vld [vmem:[%s6594_s6 + $0xa50] sm:$0xff] }
 0x200   : > { %4786 = vmatprep.subr.bf16.mxu1 %v5824_v52  ;;  %v708_v3 = vld [vmem:[%s6594_s6 + $0xa70] sm:$0xff] }
 0x201   : > { %v832_v5 = vld [vmem:[%s6594_s6 + $0xe50] sm:$0xff] }
 0x202   : > { %4746 = vmatpush1.bf16.msra.mxu0 %v5695_v61  ;;  %v5735_v61 = vcombine.low %v688_v33, %v692_v34  ;;  %v836_v6 = vld [vmem:[%s6594_s6 + $0xe70] sm:$0xff] }
 0x203   : > { %4787 = vmatpush1.bf16.msra.mxu1 %v5823_v62  ;;  %4747 = vmatprep.subr.bf16.mxu0 %v5704_v0  ;;  %v5863_v62 = vcombine.low %v816_v42, %v820_v43  ;;  %v5744_v0 = vcombine.high %v696_v53, %v700_v56  ;;  %v712_v9 = vld [vmem:[%s6594_s6 + $0xa90] sm:$0xff] }
 0x204   : > { %4788 = vmatprep.subr.bf16.mxu1 %v5832_v1  ;;  %v5872_v1 = vcombine.high %v824_v57, %v828_v58  ;;  %v716_v10 = vld [vmem:[%s6594_s6 + $0xab0] sm:$0xff] }
 0x205   : > { %v840_v11 = vld [vmem:[%s6594_s6 + $0xe90] sm:$0xff] }
 0x206   : > { %4748 = vmatpush1.bf16.msra.mxu0 %v5703_v19  ;;  %v5743_v19 = vcombine.low %v696_v53, %v700_v56  ;;  %v844_v12 = vld [vmem:[%s6594_s6 + $0xeb0] sm:$0xff] }
 0x207   : > { %4789 = vmatpush1.bf16.msra.mxu1 %v5831_v7  ;;  %4749 = vmatprep.subr.bf16.mxu0 %v5712_v54  ;;  %v5871_v7 = vcombine.low %v824_v57, %v828_v58  ;;  %v5752_v54 = vcombine.high %v704_v2, %v708_v3  ;;  %v720_v18 = vld [vmem:[%s6594_s6 + $0xad0] sm:$0xff] }
 0x208   : > { %4790 = vmatprep.subr.bf16.mxu1 %v5840_v8  ;;  %v5880_v8 = vcombine.high %v832_v5, %v836_v6  ;;  %v724_v22 = vld [vmem:[%s6594_s6 + $0xaf0] sm:$0xff] }
 0x209   : > { %v848_v24 = vld [vmem:[%s6594_s6 + $0xed0] sm:$0xff] }
 0x20a   : > { %4750 = vmatpush1.bf16.msra.mxu0 %v5711_v13  ;;  %v5751_v13 = vcombine.low %v704_v2, %v708_v3  ;;  %v852_v25 = vld [vmem:[%s6594_s6 + $0xef0] sm:$0xff] }
 0x20b   : > { %4791 = vmatpush1.bf16.msra.mxu1 %v5839_v14  ;;  %4751 = vmatprep.subr.bf16.mxu0 %v5720_v15  ;;  %v5879_v14 = vcombine.low %v832_v5, %v836_v6  ;;  %v5760_v15 = vcombine.high %v712_v9, %v716_v10  ;;  %v856_v33 = vld [vmem:[%s6594_s6 + $0xf10] sm:$0xff] }
 0x20c   : > { %v4447_v31 = vpop.f32.mrb[8].mxu0  ;;  %4792 = vmatprep.subr.bf16.mxu1 %v5848_v16  ;;  %v5888_v16 = vcombine.high %v840_v11, %v844_v12  ;;  %v860_v34 = vld [vmem:[%s6594_s6 + $0xf30] sm:$0xff] }
 0x20d   : > { %v4448_v35 = vadd.f32 %v4447_v31, %v7063_v4  ;;  %v7134_v36 = vpop.f32.mrb[8].mxu1  ;;  %v4449_v39 = vpop.f32.mrb[9].mxu0  ;;  %v728_v31 = vld [vmem:[%s6594_s6 + $0xb10] sm:$0xff] }
 0x20e   : > { %v4450_v44 = vadd.f32 %v4449_v39, %v7065_v40  ;;  %v7139_v45 = vpop.f32.mrb[9].mxu1  ;;  %v4451_v20 = vpop.f32.mrb[10].mxu0  ;;  %4752 = vmatpush1.bf16.msra.mxu0 %v5719_v26  ;;  %v5864_v40 = vcombine.high %v816_v42, %v820_v43  ;;  %v5759_v26 = vcombine.low %v712_v9, %v716_v10  ;;  %v5904_v42 = vcombine.high %v856_v33, %v860_v34  ;;  %v736_v43 = vld [vmem:[%s6594_s6 + $0xb50] sm:$0xff] }
 0x20f   : > { %v5069_v23 = vadd.f32 %v4448_v35, %v361_v29  ;;  %v4492_v48 = vpop.f32.mrb[10].mxu1  ;;  %4793 = vmatpush1.bf16.msra.mxu1 %v5847_v27  ;;  %v4452_v4 = vpop.f32.mrb[11].mxu0  ;;  %4753 = vmatprep.subr.bf16.mxu0 %v5728_v55  ;;  %v5887_v27 = vcombine.low %v840_v11, %v844_v12  ;;  %v5768_v55 = vcombine.high %v720_v18, %v724_v22  ;;  %v864_v20 = vld [vmem:[%s6594_s6 + $0xf50] sm:$0xff] }
 0x210   : > { %v5070_v51 = vadd.f32 %v4450_v44, %v362_v38  ;;  %v4493_v52 = vpop.f32.mrb[11].mxu1  ;;  %4794 = vmatprep.subr.bf16.mxu1 %v5856_v32  ;;  %v5896_v29 = vcombine.high %v848_v24, %v852_v25  ;;  %v732_v32 = vld [vmem:[%s6594_s6 + $0xb30] sm:$0xff]  ;;  %v5767_v35 = vcombine.low %v720_v18, %v724_v22  ;;  %v5895_v38 = vcombine.low %v848_v24, %v852_v25 }
 0x211   : > { %5077 = vst [vmem:[#allocation2] sm:$0xff] %v5069_v23  ;;  %v5776_v39 = vcombine.high %v728_v31, %v732_v32  ;;  %v740_v44 = vld [vmem:[%s6594_s6 + $0xb70] sm:$0xff]  ;;  %v5775_v23 = vcombine.low %v728_v31, %v732_v32  ;;  %v5903_v48 = vcombine.low %v856_v33, %v860_v34 }
 0x212   : > { %5078 = vst [vmem:[#allocation2 + $0x8] sm:$0xff] %v5070_v51  ;;  %4754 = vmatpush1.bf16.msra.mxu0 %v5727_v46  ;;  %v868_v46 = vld [vmem:[%s6594_s6 + $0xf70] sm:$0xff]  ;;  %v5784_v4 = vcombine.high %v736_v43, %v740_v44  ;;  %v5783_v53 = vcombine.low %v736_v43, %v740_v44 }
 0x213   : > { %4795 = vmatpush1.bf16.msra.mxu1 %v5855_v49  ;;  %4755 = vmatprep.subr.bf16.mxu0 %v5736_v50  ;;  %v5912_v49 = vcombine.high %v864_v20, %v868_v46  ;;  %v744_v50 = vld [vmem:[%s6594_s6 + $0xb90] sm:$0xff]  ;;  %v5911_v56 = vcombine.low %v864_v20, %v868_v46 }
 0x214   : > { %4796 = vmatprep.subr.bf16.mxu1 %v5864_v40  ;;  %v748_v51 = vld [vmem:[%s6594_s6 + $0xbb0] sm:$0xff] }
 0x215   : > { %v872_v52 = vld [vmem:[%s6594_s6 + $0xf90] sm:$0xff]  ;;  %v5792_v57 = vcombine.high %v744_v50, %v748_v51  ;;  %v5791_v2 = vcombine.low %v744_v50, %v748_v51 }
 0x216   : > { %4756 = vmatpush1.bf16.msra.mxu0 %v5735_v61  ;;  %v876_v40 = vld [vmem:[%s6594_s6 + $0xfb0] sm:$0xff] }
 0x217   : > { %4797 = vmatpush1.bf16.msra.mxu1 %v5863_v62  ;;  %4757 = vmatprep.subr.bf16.mxu0 %v5744_v0  ;;  %v5920_v58 = vcombine.high %v872_v52, %v876_v40  ;;  %v752_v61 = vld [vmem:[%s6594_s6 + $0xbd0] sm:$0xff]  ;;  %v5919_v3 = vcombine.low %v872_v52, %v876_v40 }
 0x218   : > { %4798 = vmatprep.subr.bf16.mxu1 %v5872_v1  ;;  %v756_v62 = vld [vmem:[%s6594_s6 + $0xbf0] sm:$0xff] }
 0x219   : > { %v880_v0 = vld [vmem:[%s6594_s6 + $0xfd0] sm:$0xff]  ;;  %v5800_v5 = vcombine.high %v752_v61, %v756_v62  ;;  %v5799_v9 = vcombine.low %v752_v61, %v756_v62 }
 0x21a   : > { %4758 = vmatpush1.bf16.msra.mxu0 %v5743_v19  ;;  %v884_v1 = vld [vmem:[%s6594_s6 + $0xff0] sm:$0xff] }
 0x21b   : > { %4799 = vmatpush1.bf16.msra.mxu1 %v5871_v7  ;;  %4759 = vmatprep.subr.bf16.mxu0 %v5752_v54  ;;  %v5928_v6 = vcombine.high %v880_v0, %v884_v1  ;;  %v888_v19 = vld [vmem:[%s6594_s6 + $0x1010] sm:$0xff]  ;;  %v377_v54 = vld [vmem:[%s6594_s6 + $0x18] sm:$0xff]  ;;  %v5927_v10 = vcombine.low %v880_v0, %v884_v1 }
 0x21c   : > { %4800 = vmatprep.subr.bf16.mxu1 %v5880_v8  ;;  %v892_v7 = vld [vmem:[%s6594_s6 + $0x1030] sm:$0xff]  ;;  %v381_v8 = vld [vmem:[%s6594_s6 + $0x38] sm:$0xff] }
 0x21d   : > { %v5936_v11 = vcombine.high %v888_v19, %v892_v7  ;;  %v5426_v12 = vcombine.high %v377_v54, %v381_v8  ;;  %v5935_v18 = vcombine.low %v888_v19, %v892_v7  ;;  %v5425_v22 = vcombine.low %v377_v54, %v381_v8  ;;  %v928_v40 = vld [vmem:[%s6594_s6 + $0x1150] sm:$0xff] }
 0x21e   : > { %4760 = vmatpush1.bf16.msra.mxu0 %v5751_v13  ;;  %v896_v13 = vld [vmem:[%s6594_s6 + $0x1050] sm:$0xff] }
 0x21f   : > { %4801 = vmatpush1.bf16.msra.mxu1 %v5879_v14  ;;  %4761 = vmatprep.subr.bf16.mxu0 %v5760_v15  ;;  %v900_v14 = vld [vmem:[%s6594_s6 + $0x1070] sm:$0xff]  ;;  %v385_v15 = vld [vmem:[%s6594_s6 + $0x58] sm:$0xff] }
 0x220   : > { %4802 = vmatprep.subr.bf16.mxu1 %v5888_v16  ;;  %v389_v16 = vld [vmem:[%s6594_s6 + $0x78] sm:$0xff]  ;;  %v5944_v24 = vcombine.high %v896_v13, %v900_v14  ;;  %v5943_v31 = vcombine.low %v896_v13, %v900_v14  ;;  %v936_v1 = vld [vmem:[%s6594_s6 + $0x1190] sm:$0xff] }
 0x221   : > { %v5434_v25 = vcombine.high %v385_v15, %v389_v16  ;;  %v5433_v32 = vcombine.low %v385_v15, %v389_v16  ;;  %v433_v14 = vld [vmem:[%s6594_s6 + $0x1d8] sm:$0xff] }
 0x222   : > { %4762 = vmatpush1.bf16.msra.mxu0 %v5759_v26  ;;  %v904_v26 = vld [vmem:[%s6594_s6 + $0x1090] sm:$0xff]  ;;  %v437_v15 = vld [vmem:[%s6594_s6 + $0x1f8] sm:$0xff] }
 0x223   : > { %4803 = vmatpush1.bf16.msra.mxu1 %v5887_v27  ;;  %4763 = vmatprep.subr.bf16.mxu0 %v5768_v55  ;;  %v908_v27 = vld [vmem:[%s6594_s6 + $0x10b0] sm:$0xff]  ;;  %v393_v55 = vld [vmem:[%s6594_s6 + $0x98] sm:$0xff] }
 0x224   : > { %4804 = vmatprep.subr.bf16.mxu1 %v5896_v29  ;;  %v397_v29 = vld [vmem:[%s6594_s6 + $0xb8] sm:$0xff]  ;;  %v5952_v33 = vcombine.high %v904_v26, %v908_v27  ;;  %v5951_v43 = vcombine.low %v904_v26, %v908_v27 }
 0x225   : > { %v5442_v34 = vcombine.high %v393_v55, %v397_v29  ;;  %v5441_v44 = vcombine.low %v393_v55, %v397_v29 }
 0x226   : > { %4764 = vmatpush1.bf16.msra.mxu0 %v5767_v35  ;;  %v912_v35 = vld [vmem:[%s6594_s6 + $0x10d0] sm:$0xff] }
 0x227   : > { %4805 = vmatpush1.bf16.msra.mxu1 %v5895_v38  ;;  %4765 = vmatprep.subr.bf16.mxu0 %v5776_v39  ;;  %v916_v38 = vld [vmem:[%s6594_s6 + $0x10f0] sm:$0xff]  ;;  %v401_v39 = vld [vmem:[%s6594_s6 + $0xd8] sm:$0xff] }
 0x228   : > { %4806 = vmatprep.subr.bf16.mxu1 %v5904_v42  ;;  %v405_v42 = vld [vmem:[%s6594_s6 + $0xf8] sm:$0xff]  ;;  %v5960_v20 = vcombine.high %v912_v35, %v916_v38  ;;  %v5959_v50 = vcombine.low %v912_v35, %v916_v38 }
 0x229   : > { %v5450_v46 = vcombine.high %v401_v39, %v405_v42  ;;  %v445_v35 = vld [vmem:[%s6594_s6 + $0x238] sm:$0xff] }
 0x22a   : > { %4766 = vmatpush1.bf16.msra.mxu0 %v5775_v23  ;;  %v920_v23 = vld [vmem:[%s6594_s6 + $0x1110] sm:$0xff] }
 0x22b   : > { %4807 = vmatpush1.bf16.msra.mxu1 %v5903_v48  ;;  %4767 = vmatprep.subr.bf16.mxu0 %v5784_v4  ;;  %v924_v48 = vld [vmem:[%s6594_s6 + $0x1130] sm:$0xff]  ;;  %v409_v4 = vld [vmem:[%s6594_s6 + $0x118] sm:$0xff] }
 0x22c   : > { %4808 = vmatprep.subr.bf16.mxu1 %v5912_v49  ;;  %v413_v49 = vld [vmem:[%s6594_s6 + $0x138] sm:$0xff]  ;;  %v5968_v51 = vcombine.high %v920_v23, %v924_v48 }
 0x22d   : > { %v5458_v52 = vcombine.high %v409_v4, %v413_v49  ;;  %v5457_v61 = vcombine.low %v409_v4, %v413_v49 }
 0x22e   : > { %4768 = vmatpush1.bf16.msra.mxu0 %v5783_v53  ;;  %v932_v53 = vld [vmem:[%s6594_s6 + $0x1170] sm:$0xff] }
 0x22f   : > { %4809 = vmatpush1.bf16.msra.mxu1 %v5911_v56  ;;  %4769 = vmatprep.subr.bf16.mxu0 %v5792_v57  ;;  %v417_v56 = vld [vmem:[%s6594_s6 + $0x158] sm:$0xff]  ;;  %v5976_v62 = vcombine.high %v928_v40, %v932_v53 }
 0x230   : > { %4810 = vmatprep.subr.bf16.mxu1 %v5920_v58  ;;  %v421_v57 = vld [vmem:[%s6594_s6 + $0x178] sm:$0xff]  ;;  %v5967_v58 = vcombine.low %v920_v23, %v924_v48 }
 0x231   : > { %v5466_v0 = vcombine.high %v417_v56, %v421_v57  ;;  %v5465_v19 = vcombine.low %v417_v56, %v421_v57  ;;  %v453_v23 = vld [vmem:[%s6594_s6 + $0x278] sm:$0xff] }
 0x232   : > { %4770 = vmatpush1.bf16.msra.mxu0 %v5791_v2  ;;  %v940_v2 = vld [vmem:[%s6594_s6 + $0x11b0] sm:$0xff] }
 0x233   : > { %4811 = vmatpush1.bf16.msra.mxu1 %v5919_v3  ;;  %4771 = vmatprep.subr.bf16.mxu0 %v5800_v5  ;;  %v425_v3 = vld [vmem:[%s6594_s6 + $0x198] sm:$0xff]  ;;  %v5984_v7 = vcombine.high %v936_v1, %v940_v2 }
 0x234   : > { %4812 = vmatprep.subr.bf16.mxu1 %v5928_v6  ;;  %v429_v5 = vld [vmem:[%s6594_s6 + $0x1b8] sm:$0xff]  ;;  %v5975_v6 = vcombine.low %v928_v40, %v932_v53 }
 0x235   : > { %v5474_v8 = vcombine.high %v425_v3, %v429_v5  ;;  %v461_v40 = vld [vmem:[%s6594_s6 + $0x2b8] sm:$0xff] }
 0x236   : > { %4772 = vmatpush1.bf16.msra.mxu0 %v5799_v9  ;;  %v944_v9 = vld [vmem:[%s6594_s6 + $0x11d0] sm:$0xff] }
 0x237   : > { %4813 = vmatpush1.bf16.msra.mxu1 %v5927_v10  ;;  %4823 = vmatprep.subr.bf16.mxu0 %v5936_v11  ;;  %v948_v10 = vld [vmem:[%s6594_s6 + $0x11f0] sm:$0xff] }
 0x238   : > { %4864 = vmatprep.subr.bf16.mxu1 %v5426_v12  ;;  %v5992_v55 = vcombine.high %v944_v9, %v948_v10  ;;  %v5991_v38 = vcombine.low %v944_v9, %v948_v10 }
 0x239   : > { %4774 = vmatmul.mubr.bf16.vlgmr.msra.gmra.mrb[24].mxu0 %v6806_v37 }
 0x23a   : > { %4815 = vmatmul.mubr.bf16.vlgmr.msra.gmra.mrb[24].mxu1 %v6815_v41  ;;  %4824 = vmatpush1.bf16.msra.mxu0 %v5935_v18 }
 0x23b   : > { %4865 = vmatpush1.bf16.msra.mxu1 %v5425_v22  ;;  %4825 = vmatprep.subr.bf16.mxu0 %v5944_v24  ;;  %v5983_v24 = vcombine.low %v936_v1, %v940_v2  ;;  %v469_v1 = vld [vmem:[%s6594_s6 + $0x2f8] sm:$0xff] }
 0x23c   : > { %4866 = vmatprep.subr.bf16.mxu1 %v5434_v25  ;;  %4855 = vmatprep.mubr.bf16.mxu0 %v6821_v47 }
 0x23d   : > { %4896 = vmatprep.mubr.bf16.mxu1 %v6666_v59  ;;  %v5449_v59 = vcombine.low %v401_v39, %v405_v42  ;;  %v5481_v39 = vcombine.low %v433_v14, %v437_v15 }
 0x23e   : > { %4826 = vmatpush1.bf16.msra.mxu0 %v5943_v31  ;;  %v5482_v31 = vcombine.high %v433_v14, %v437_v15  ;;  %v996_v14 = vld [vmem:[%s6594_s6 + $0x1370] sm:$0xff]  ;;  %v481_v15 = vld [vmem:[%s6594_s6 + $0x358] sm:$0xff] }
 0x23f   : > { %4867 = vmatpush1.bf16.msra.mxu1 %v5433_v32  ;;  %4827 = vmatprep.subr.bf16.mxu0 %v5952_v33  ;;  %v952_v32 = vld [vmem:[%s6594_s6 + $0x1210] sm:$0xff] }
 0x240   : > { %4868 = vmatprep.subr.bf16.mxu1 %v5442_v34  ;;  %v956_v33 = vld [vmem:[%s6594_s6 + $0x1230] sm:$0xff]  ;;  %v441_v34 = vld [vmem:[%s6594_s6 + $0x218] sm:$0xff] }
 0x241   : > { %v6000_v42 = vcombine.high %v952_v32, %v956_v33  ;;  %v5999_v48 = vcombine.low %v952_v32, %v956_v33  ;;  %v5489_v4 = vcombine.low %v441_v34, %v445_v35 }
 0x242   : > { %4828 = vmatpush1.bf16.msra.mxu0 %v5951_v43  ;;  %v5490_v43 = vcombine.high %v441_v34, %v445_v35  ;;  %v1008_v35 = vld [vmem:[%s6594_s6 + $0x13d0] sm:$0xff] }
 0x243   : > { %4869 = vmatpush1.bf16.msra.mxu1 %v5441_v44  ;;  %4829 = vmatprep.subr.bf16.mxu0 %v5960_v20  ;;  %v960_v44 = vld [vmem:[%s6594_s6 + $0x1250] sm:$0xff] }
 0x244   : > { %4870 = vmatprep.subr.bf16.mxu1 %v5450_v46  ;;  %v964_v20 = vld [vmem:[%s6594_s6 + $0x1270] sm:$0xff]  ;;  %v449_v46 = vld [vmem:[%s6594_s6 + $0x258] sm:$0xff] }
 0x245   : > { %v6008_v49 = vcombine.high %v960_v44, %v964_v20  ;;  %v6007_v53 = vcombine.low %v960_v44, %v964_v20  ;;  %v5497_v56 = vcombine.low %v449_v46, %v453_v23 }
 0x246   : > { %4830 = vmatpush1.bf16.msra.mxu0 %v5959_v50  ;;  %v5498_v50 = vcombine.high %v449_v46, %v453_v23  ;;  %v505_v23 = vld [vmem:[%s6594_s6 + $0x418] sm:$0xff] }
 0x247   : > { %4871 = vmatpush1.bf16.msra.mxu1 %v5449_v59  ;;  %4831 = vmatprep.subr.bf16.mxu0 %v5968_v51  ;;  %v968_v59 = vld [vmem:[%s6594_s6 + $0x1290] sm:$0xff] }
 0x248   : > { %4872 = vmatprep.subr.bf16.mxu1 %v5458_v52  ;;  %v972_v51 = vld [vmem:[%s6594_s6 + $0x12b0] sm:$0xff]  ;;  %v457_v52 = vld [vmem:[%s6594_s6 + $0x298] sm:$0xff] }
 0x249   : > { %v6016_v57 = vcombine.high %v968_v59, %v972_v51  ;;  %v6015_v2 = vcombine.low %v968_v59, %v972_v51 }
 0x24a   : > { %4832 = vmatpush1.bf16.msra.mxu0 %v5967_v58  ;;  %v5506_v58 = vcombine.high %v457_v52, %v461_v40 }
 0x24b   : > { %4873 = vmatpush1.bf16.msra.mxu1 %v5457_v61  ;;  %4833 = vmatprep.subr.bf16.mxu0 %v5976_v62  ;;  %v976_v61 = vld [vmem:[%s6594_s6 + $0x12d0] sm:$0xff] }
 0x24c   : > { %v4529_v54 = vpop.f32.mrb[12].mxu0  ;;  %4874 = vmatprep.subr.bf16.mxu1 %v5466_v0  ;;  %v980_v62 = vld [vmem:[%s6594_s6 + $0x12f0] sm:$0xff]  ;;  %v465_v0 = vld [vmem:[%s6594_s6 + $0x2d8] sm:$0xff] }
 0x24d   : > { %v4530_v11 = vadd.f32 %v4529_v54, %v7134_v36  ;;  %v4570_v12 = vpop.f32.mrb[12].mxu1  ;;  %v4531_v13 = vpop.f32.mrb[13].mxu0  ;;  %v5473_v36 = vcombine.low %v425_v3, %v429_v5  ;;  %v5505_v3 = vcombine.low %v457_v52, %v461_v40  ;;  %v6024_v5 = vcombine.high %v976_v61, %v980_v62  ;;  %v473_v54 = vld [vmem:[%s6594_s6 + $0x318] sm:$0xff] }
 0x24e   : > { %v4532_v16 = vadd.f32 %v4531_v13, %v7139_v45  ;;  %v4572_v18 = vpop.f32.mrb[13].mxu1  ;;  %v4533_v22 = vpop.f32.mrb[14].mxu0  ;;  %4834 = vmatpush1.bf16.msra.mxu0 %v5975_v6  ;;  %v5514_v6 = vcombine.high %v465_v0, %v469_v1  ;;  %v6023_v9 = vcombine.low %v976_v61, %v980_v62  ;;  %v5513_v10 = vcombine.low %v465_v0, %v469_v1  ;;  %v992_v13 = vld [vmem:[%s6594_s6 + $0x1350] sm:$0xff]  ;;  %v513_v40 = vld [vmem:[%s6594_s6 + $0x458] sm:$0xff] }
 0x24f   : > { %v7211_v25 = vadd.f32 %v4570_v12, %v4530_v11  ;;  %v4574_v26 = vpop.f32.mrb[14].mxu1  ;;  %4875 = vmatpush1.bf16.msra.mxu1 %v5465_v19  ;;  %v4534_v27 = vpop.f32.mrb[15].mxu0  ;;  %4835 = vmatprep.subr.bf16.mxu0 %v5984_v7  ;;  %v984_v19 = vld [vmem:[%s6594_s6 + $0x1310] sm:$0xff]  ;;  %v521_v1 = vld [vmem:[%s6594_s6 + $0x498] sm:$0xff] }
 0x250   : > { %v7213_v29 = vadd.f32 %v4572_v18, %v4532_v16  ;;  %v4575_v45 = vpop.f32.mrb[15].mxu1  ;;  %4876 = vmatprep.subr.bf16.mxu1 %v5474_v8  ;;  %v988_v7 = vld [vmem:[%s6594_s6 + $0x1330] sm:$0xff]  ;;  %v477_v8 = vld [vmem:[%s6594_s6 + $0x338] sm:$0xff] }
 0x251   : > { %v6032_v11 = vcombine.high %v984_v19, %v988_v7  ;;  %v5522_v12 = vcombine.high %v473_v54, %v477_v8  ;;  %v485_v16 = vld [vmem:[%s6594_s6 + $0x378] sm:$0xff]  ;;  %v6031_v18 = vcombine.low %v984_v19, %v988_v7  ;;  %v5521_v22 = vcombine.low %v473_v54, %v477_v8  ;;  %v1000_v27 = vld [vmem:[%s6594_s6 + $0x1390] sm:$0xff] }
 0x252   : > { %4836 = vmatpush1.bf16.msra.mxu0 %v5983_v24  ;;  %v6040_v24 = vcombine.high %v992_v13, %v996_v14  ;;  %v5530_v26 = vcombine.high %v481_v15, %v485_v16  ;;  %v493_v45 = vld [vmem:[%s6594_s6 + $0x3b8] sm:$0xff]  ;;  %v5529_v32 = vcombine.low %v481_v15, %v485_v16 }
 0x253   : > { %4877 = vmatpush1.bf16.msra.mxu1 %v5473_v36  ;;  %4837 = vmatprep.subr.bf16.mxu0 %v5992_v55  ;;  %v1004_v36 = vld [vmem:[%s6594_s6 + $0x13b0] sm:$0xff]  ;;  %v489_v55 = vld [vmem:[%s6594_s6 + $0x398] sm:$0xff] }
 0x254   : > { %4878 = vmatprep.subr.bf16.mxu1 %v5482_v31  ;;  %v6039_v31 = vcombine.low %v992_v13, %v996_v14  ;;  %v6048_v33 = vcombine.high %v1000_v27, %v1004_v36  ;;  %v5538_v34 = vcombine.high %v489_v55, %v493_v45  ;;  %v5537_v44 = vcombine.low %v489_v55, %v493_v45  ;;  %v529_v8 = vld [vmem:[%s6594_s6 + $0x4d8] sm:$0xff] }
 0x255   : > { %v537_v15 = vld [vmem:[%s6594_s6 + $0x518] sm:$0xff] }
 0x256   : > { %4838 = vmatpush1.bf16.msra.mxu0 %v5991_v38  ;;  %v1012_v38 = vld [vmem:[%s6594_s6 + $0x13f0] sm:$0xff]  ;;  %v541_v16 = vld [vmem:[%s6594_s6 + $0x538] sm:$0xff] }
 0x257   : > { %4879 = vmatpush1.bf16.msra.mxu1 %v5481_v39  ;;  %4839 = vmatprep.subr.bf16.mxu0 %v6000_v42  ;;  %v497_v39 = vld [vmem:[%s6594_s6 + $0x3d8] sm:$0xff]  ;;  %v6056_v20 = vcombine.high %v1008_v35, %v1012_v38 }
 0x258   : > { %4880 = vmatprep.subr.bf16.mxu1 %v5490_v43  ;;  %v501_v42 = vld [vmem:[%s6594_s6 + $0x3f8] sm:$0xff]  ;;  %v6047_v43 = vcombine.low %v1000_v27, %v1004_v36 }
 0x259   : > { %v5546_v46 = vcombine.high %v497_v39, %v501_v42  ;;  %v5545_v59 = vcombine.low %v497_v39, %v501_v42  ;;  %v545_v27 = vld [vmem:[%s6594_s6 + $0x558] sm:$0xff] }
 0x25a   : > { %4840 = vmatpush1.bf16.msra.mxu0 %v5999_v48  ;;  %v509_v48 = vld [vmem:[%s6594_s6 + $0x438] sm:$0xff] }
 0x25b   : > { %4881 = vmatpush1.bf16.msra.mxu1 %v5489_v4  ;;  %4841 = vmatprep.subr.bf16.mxu0 %v6008_v49  ;;  %v633_v4 = vld [vmem:[%s6594_s6 + $0x818] sm:$0xff]  ;;  %v5554_v51 = vcombine.high %v505_v23, %v509_v48 }
 0x25c   : > { %4882 = vmatprep.subr.bf16.mxu1 %v5498_v50  ;;  %v637_v49 = vld [vmem:[%s6594_s6 + $0x838] sm:$0xff]  ;;  %v6055_v50 = vcombine.low %v1008_v35, %v1012_v38 }
 0x25d   : > { %v5682_v52 = vcombine.high %v633_v4, %v637_v49  ;;  %v5681_v61 = vcombine.low %v633_v4, %v637_v49  ;;  %v549_v36 = vld [vmem:[%s6594_s6 + $0x578] sm:$0xff] }
 0x25e   : > { %4842 = vmatpush1.bf16.msra.mxu0 %v6007_v53  ;;  %v517_v53 = vld [vmem:[%s6594_s6 + $0x478] sm:$0xff] }
 0x25f   : > { %4883 = vmatpush1.bf16.msra.mxu1 %v5497_v56  ;;  %4843 = vmatprep.subr.bf16.mxu0 %v6016_v57  ;;  %v641_v56 = vld [vmem:[%s6594_s6 + $0x858] sm:$0xff]  ;;  %v5562_v62 = vcombine.high %v513_v40, %v517_v53 }
 0x260   : > { %4884 = vmatprep.subr.bf16.mxu1 %v5506_v58  ;;  %v645_v57 = vld [vmem:[%s6594_s6 + $0x878] sm:$0xff]  ;;  %v5553_v58 = vcombine.low %v505_v23, %v509_v48 }
 0x261   : > { %v5690_v0 = vcombine.high %v641_v56, %v645_v57  ;;  %v5689_v19 = vcombine.low %v641_v56, %v645_v57  ;;  %v673_v55 = vld [vmem:[%s6594_s6 + $0x958] sm:$0xff] }
 0x262   : > { %4844 = vmatpush1.bf16.msra.mxu0 %v6015_v2  ;;  %v525_v2 = vld [vmem:[%s6594_s6 + $0x4b8] sm:$0xff] }
 0x263   : > { %4885 = vmatpush1.bf16.msra.mxu1 %v5505_v3  ;;  %4845 = vmatprep.subr.bf16.mxu0 %v6024_v5  ;;  %v649_v3 = vld [vmem:[%s6594_s6 + $0x898] sm:$0xff]  ;;  %v5570_v7 = vcombine.high %v521_v1, %v525_v2 }
 0x264   : > { %4886 = vmatprep.subr.bf16.mxu1 %v5514_v6  ;;  %v653_v5 = vld [vmem:[%s6594_s6 + $0x8b8] sm:$0xff]  ;;  %v5561_v6 = vcombine.low %v513_v40, %v517_v53  ;;  %v363_v40 = vld [vmem:[#allocation2 + $0x10] sm:$0xff] }
 0x265   : > { %v5698_v54 = vcombine.high %v649_v3, %v653_v5  ;;  %v677_v45 = vld [vmem:[%s6594_s6 + $0x978] sm:$0xff] }
 0x266   : > { %4846 = vmatpush1.bf16.msra.mxu0 %v6023_v9  ;;  %v533_v9 = vld [vmem:[%s6594_s6 + $0x4f8] sm:$0xff] }
 0x267   : > { %4887 = vmatpush1.bf16.msra.mxu1 %v5513_v10  ;;  %4847 = vmatprep.subr.bf16.mxu0 %v6032_v11  ;;  %v657_v10 = vld [vmem:[%s6594_s6 + $0x8d8] sm:$0xff]  ;;  %v5578_v13 = vcombine.high %v529_v8, %v533_v9 }
 0x268   : > { %4888 = vmatprep.subr.bf16.mxu1 %v5522_v12  ;;  %v661_v11 = vld [vmem:[%s6594_s6 + $0x8f8] sm:$0xff]  ;;  %v5697_v12 = vcombine.low %v649_v3, %v653_v5 }
 0x269   : > { %v5706_v14 = vcombine.high %v657_v10, %v661_v11  ;;  %v553_v35 = vld [vmem:[%s6594_s6 + $0x598] sm:$0xff] }
 0x26a   : > { %4848 = vmatpush1.bf16.msra.mxu0 %v6031_v18  ;;  %v665_v18 = vld [vmem:[%s6594_s6 + $0x918] sm:$0xff] }
 0x26b   : > { %4889 = vmatpush1.bf16.msra.mxu1 %v5521_v22  ;;  %4849 = vmatprep.subr.bf16.mxu0 %v6040_v24  ;;  %v5577_v22 = vcombine.low %v529_v8, %v533_v9  ;;  %v5586_v24 = vcombine.high %v537_v15, %v541_v16  ;;  %v557_v38 = vld [vmem:[%s6594_s6 + $0x5b8] sm:$0xff] }
 0x26c   : > { %4890 = vmatprep.subr.bf16.mxu1 %v5530_v26  ;;  %v681_v39 = vld [vmem:[%s6594_s6 + $0x998] sm:$0xff] }
 0x26d   : > { %v685_v42 = vld [vmem:[%s6594_s6 + $0x9b8] sm:$0xff] }
 0x26e   : > { %4850 = vmatpush1.bf16.msra.mxu0 %v6039_v31  ;;  %v5585_v31 = vcombine.low %v537_v15, %v541_v16  ;;  %v5730_v23 = vcombine.high %v681_v39, %v685_v42  ;;  %v561_v48 = vld [vmem:[%s6594_s6 + $0x5d8] sm:$0xff] }
 0x26f   : > { %4891 = vmatpush1.bf16.msra.mxu1 %v5529_v32  ;;  %4851 = vmatprep.subr.bf16.mxu0 %v6048_v33  ;;  %v5594_v33 = vcombine.high %v545_v27, %v549_v36  ;;  %v565_v4 = vld [vmem:[%s6594_s6 + $0x5f8] sm:$0xff] }
 0x270   : > { %4892 = vmatprep.subr.bf16.mxu1 %v5538_v34  ;;  %v5722_v34 = vcombine.high %v673_v55, %v677_v45  ;;  %v701_v8 = vld [vmem:[%s6594_s6 + $0xa38] sm:$0xff] }
 0x271   : > { %v705_v15 = vld [vmem:[%s6594_s6 + $0xa58] sm:$0xff] }
 0x272   : > { %4852 = vmatpush1.bf16.msra.mxu0 %v6047_v43  ;;  %v5593_v43 = vcombine.low %v545_v27, %v549_v36  ;;  %v709_v16 = vld [vmem:[%s6594_s6 + $0xa78] sm:$0xff] }
 0x273   : > { %4893 = vmatpush1.bf16.msra.mxu1 %v5537_v44  ;;  %4853 = vmatprep.subr.bf16.mxu0 %v6056_v20  ;;  %v5721_v44 = vcombine.low %v673_v55, %v677_v45  ;;  %v5602_v20 = vcombine.high %v553_v35, %v557_v38  ;;  %v713_v27 = vld [vmem:[%s6594_s6 + $0xa98] sm:$0xff]  ;;  %v5753_v45 = vcombine.low %v705_v15, %v709_v16 }
 0x274   : > { %4894 = vmatprep.subr.bf16.mxu1 %v5546_v46  ;;  %v717_v36 = vld [vmem:[%s6594_s6 + $0xab8] sm:$0xff] }
 0x276   : > { %4854 = vmatpush1.bf16.msra.mxu0 %v6055_v50 }
 0x277   : > { %4895 = vmatpush1.bf16.msra.mxu1 %v5545_v59  ;;  %4905 = vmatprep.subr.bf16.mxu0 %v5554_v51  ;;  %v689_v51 = vld [vmem:[%s6594_s6 + $0x9d8] sm:$0xff] }
 0x278   : > { %4946 = vmatprep.subr.bf16.mxu1 %v5682_v52  ;;  %v693_v52 = vld [vmem:[%s6594_s6 + $0x9f8] sm:$0xff] }
 0x279   : > { %4856 = vmatmul.mubr.bf16.vlgmr.msra.gmra.mrb[28].mxu0 %v6889_v63 }
 0x27a   : > { %4897 = vmatmul.mubr.bf16.vlgmr.msra.gmra.mrb[28].mxu1 %v6716_v17  ;;  %4906 = vmatpush1.bf16.msra.mxu0 %v5553_v58  ;;  %v5569_v17 = vcombine.low %v521_v1, %v525_v2  ;;  %v5601_v58 = vcombine.low %v553_v35, %v557_v38  ;;  %v5729_v1 = vcombine.low %v681_v39, %v685_v42  ;;  %v721_v35 = vld [vmem:[%s6594_s6 + $0xad8] sm:$0xff] }
 0x27b   : > { %4947 = vmatpush1.bf16.msra.mxu1 %v5681_v61  ;;  %4907 = vmatprep.subr.bf16.mxu0 %v5562_v62  ;;  %v364_v62 = vld [vmem:[#allocation2 + $0x18] sm:$0xff]  ;;  %v5610_v2 = vcombine.high %v561_v48, %v565_v4  ;;  %v5761_v42 = vcombine.low %v713_v27, %v717_v36 }
 0x27c   : > { %4948 = vmatprep.subr.bf16.mxu1 %v5690_v0  ;;  %4937 = vmatprep.mubr.bf16.mxu0 %v6670_v60  ;;  %v669_v60 = vld [vmem:[%s6594_s6 + $0x938] sm:$0xff] }
 0x27d   : > { %4978 = vmatprep.mubr.bf16.mxu1 %v6734_v28  ;;  %v5705_v28 = vcombine.low %v657_v10, %v661_v11  ;;  %v5714_v26 = vcombine.high %v665_v18, %v669_v60  ;;  %v5713_v32 = vcombine.low %v665_v18, %v669_v60  ;;  %v5609_v10 = vcombine.low %v561_v48, %v565_v4  ;;  %v725_v38 = vld [vmem:[%s6594_s6 + $0xaf8] sm:$0xff] }
 0x27e   : > { %4908 = vmatpush1.bf16.msra.mxu0 %v5561_v6  ;;  %v569_v6 = vld [vmem:[%s6594_s6 + $0x618] sm:$0xff]  ;;  %v5737_v11 = vcombine.low %v689_v51, %v693_v52 }
 0x27f   : > { %4949 = vmatpush1.bf16.msra.mxu1 %v5689_v19  ;;  %4909 = vmatprep.subr.bf16.mxu0 %v5570_v7  ;;  %v573_v19 = vld [vmem:[%s6594_s6 + $0x638] sm:$0xff] }
 0x280   : > { %4950 = vmatprep.subr.bf16.mxu1 %v5698_v54  ;;  %v697_v54 = vld [vmem:[%s6594_s6 + $0xa18] sm:$0xff]  ;;  %v5617_v18 = vcombine.low %v569_v6, %v573_v19 }
 0x281   : > { %v5745_v60 = vcombine.low %v697_v54, %v701_v8  ;;  %v733_v48 = vld [vmem:[%s6594_s6 + $0xb38] sm:$0xff] }
 0x282   : > { %4910 = vmatpush1.bf16.msra.mxu0 %v5569_v17  ;;  %v5618_v17 = vcombine.high %v569_v6, %v573_v19  ;;  %v625_v6 = vld [vmem:[%s6594_s6 + $0x7d8] sm:$0xff] }
 0x283   : > { %4951 = vmatpush1.bf16.msra.mxu1 %v5697_v12  ;;  %4911 = vmatprep.subr.bf16.mxu0 %v5578_v13  ;;  %v5746_v12 = vcombine.high %v697_v54, %v701_v8  ;;  %v577_v13 = vld [vmem:[%s6594_s6 + $0x658] sm:$0xff] }
 0x284   : > { %4952 = vmatprep.subr.bf16.mxu1 %v5706_v14  ;;  %v581_v14 = vld [vmem:[%s6594_s6 + $0x678] sm:$0xff] }
 0x285   : > { %v5625_v55 = vcombine.low %v577_v13, %v581_v14  ;;  %v629_v19 = vld [vmem:[%s6594_s6 + $0x7f8] sm:$0xff] }
 0x286   : > { %4912 = vmatpush1.bf16.msra.mxu0 %v5577_v22  ;;  %v5626_v22 = vcombine.high %v577_v13, %v581_v14  ;;  %v757_v54 = vld [vmem:[%s6594_s6 + $0xbf8] sm:$0xff] }
 0x287   : > { %4953 = vmatpush1.bf16.msra.mxu1 %v5705_v28  ;;  %4913 = vmatprep.subr.bf16.mxu0 %v5586_v24  ;;  %v5754_v28 = vcombine.high %v705_v15, %v709_v16  ;;  %v585_v24 = vld [vmem:[%s6594_s6 + $0x698] sm:$0xff]  ;;  %v5673_v15 = vcombine.low %v625_v6, %v629_v19 }
 0x288   : > { %4954 = vmatprep.subr.bf16.mxu1 %v5714_v26  ;;  %v589_v26 = vld [vmem:[%s6594_s6 + $0x6b8] sm:$0xff] }
 0x289   : > { %v5633_v39 = vcombine.low %v585_v24, %v589_v26  ;;  %v889_v13 = vld [vmem:[%s6594_s6 + $0x1018] sm:$0xff] }
 0x28a   : > { %4914 = vmatpush1.bf16.msra.mxu0 %v5585_v31  ;;  %v5634_v31 = vcombine.high %v585_v24, %v589_v26  ;;  %v893_v14 = vld [vmem:[%s6594_s6 + $0x1038] sm:$0xff] }
 0x28b   : > { %4955 = vmatpush1.bf16.msra.mxu1 %v5713_v32  ;;  %4915 = vmatprep.subr.bf16.mxu0 %v5594_v33  ;;  %v5762_v32 = vcombine.high %v713_v27, %v717_v36  ;;  %v593_v33 = vld [vmem:[%s6594_s6 + $0x6d8] sm:$0xff]  ;;  %v5937_v36 = vcombine.low %v889_v13, %v893_v14 }
 0x28c   : > { %v4611_v46 = vpop.f32.mrb[16].mxu0  ;;  %4956 = vmatprep.subr.bf16.mxu1 %v5722_v34  ;;  %v597_v34 = vld [vmem:[%s6594_s6 + $0x6f8] sm:$0xff] }
 0x28d   : > { %v4612_v49 = vadd.f32 %v4611_v46, %v7211_v25  ;;  %v4652_v50 = vpop.f32.mrb[16].mxu1  ;;  %v4613_v59 = vpop.f32.mrb[17].mxu0  ;;  %v605_v46 = vld [vmem:[%s6594_s6 + $0x738] sm:$0xff]  ;;  %v5641_v4 = vcombine.low %v593_v33, %v597_v34 }
 0x28e   : > { %v4614_v53 = vadd.f32 %v4613_v59, %v7213_v29  ;;  %v4654_v56 = vpop.f32.mrb[17].mxu1  ;;  %v4615_v57 = vpop.f32.mrb[18].mxu0  ;;  %4916 = vmatpush1.bf16.msra.mxu0 %v5593_v43  ;;  %v5738_v29 = vcombine.high %v689_v51, %v693_v52  ;;  %v5642_v43 = vcombine.high %v593_v33, %v597_v34  ;;  %v609_v51 = vld [vmem:[%s6594_s6 + $0x758] sm:$0xff] }
 0x28f   : > { %v4653_v61 = vadd.f32 %v4652_v50, %v4612_v49  ;;  %v4656_v0 = vpop.f32.mrb[18].mxu1  ;;  %4957 = vmatpush1.bf16.msra.mxu1 %v5721_v44  ;;  %v4616_v25 = vpop.f32.mrb[19].mxu0  ;;  %4917 = vmatprep.subr.bf16.mxu0 %v5602_v20  ;;  %v5770_v44 = vcombine.high %v721_v35, %v725_v38  ;;  %v601_v20 = vld [vmem:[%s6594_s6 + $0x718] sm:$0xff]  ;;  %v5769_v49 = vcombine.low %v721_v35, %v725_v38 }
 0x290   : > { %v4655_v3 = vadd.f32 %v4654_v56, %v4614_v53  ;;  %v4657_v5 = vpop.f32.mrb[19].mxu1  ;;  %4958 = vmatprep.subr.bf16.mxu1 %v5730_v23  ;;  %v729_v23 = vld [vmem:[%s6594_s6 + $0xb18] sm:$0xff]  ;;  %v5650_v50 = vcombine.high %v601_v20, %v605_v46  ;;  %v5649_v56 = vcombine.low %v601_v20, %v605_v46 }
 0x291   : > { %v5071_v7 = vadd.f32 %v4653_v61, %v363_v40  ;;  %v5778_v59 = vcombine.high %v729_v23, %v733_v48  ;;  %v613_v52 = vld [vmem:[%s6594_s6 + $0x778] sm:$0xff]  ;;  %v5777_v57 = vcombine.low %v729_v23, %v733_v48 }
 0x292   : > { %v5072_v9 = vadd.f32 %v4655_v3, %v364_v62  ;;  %4918 = vmatpush1.bf16.msra.mxu0 %v5601_v58  ;;  %v737_v40 = vld [vmem:[%s6594_s6 + $0xb58] sm:$0xff]  ;;  %v5658_v58 = vcombine.high %v609_v51, %v613_v52 }
 0x293   : > { %5079 = vst [vmem:[#allocation2 + $0x10] sm:$0xff] %v5071_v7  ;;  %4959 = vmatpush1.bf16.msra.mxu1 %v5729_v1  ;;  %4919 = vmatprep.subr.bf16.mxu0 %v5610_v2  ;;  %v741_v53 = vld [vmem:[%s6594_s6 + $0xb78] sm:$0xff]  ;;  %v5657_v2 = vcombine.low %v609_v51, %v613_v52 }
 0x294   : > { %5080 = vst [vmem:[#allocation2 + $0x18] sm:$0xff] %v5072_v9  ;;  %4960 = vmatprep.subr.bf16.mxu1 %v5738_v29  ;;  %v5786_v61 = vcombine.high %v737_v40, %v741_v53  ;;  %v617_v62 = vld [vmem:[%s6594_s6 + $0x798] sm:$0xff]  ;;  %v5785_v3 = vcombine.low %v737_v40, %v741_v53 }
 0x295   : > { %v621_v0 = vld [vmem:[%s6594_s6 + $0x7b8] sm:$0xff] }
 0x296   : > { %4920 = vmatpush1.bf16.msra.mxu0 %v5609_v10  ;;  %v745_v25 = vld [vmem:[%s6594_s6 + $0xb98] sm:$0xff]  ;;  %v5666_v5 = vcombine.high %v617_v62, %v621_v0  ;;  %v5665_v8 = vcombine.low %v617_v62, %v621_v0  ;;  %v5674_v10 = vcombine.high %v625_v6, %v629_v19 }
 0x297   : > { %4961 = vmatpush1.bf16.msra.mxu1 %v5737_v11  ;;  %4921 = vmatprep.subr.bf16.mxu0 %v5618_v17  ;;  %v749_v1 = vld [vmem:[%s6594_s6 + $0xbb8] sm:$0xff] }
 0x298   : > { %4962 = vmatprep.subr.bf16.mxu1 %v5746_v12  ;;  %v5794_v29 = vcombine.high %v745_v25, %v749_v1  ;;  %v753_v7 = vld [vmem:[%s6594_s6 + $0xbd8] sm:$0xff]  ;;  %v5793_v9 = vcombine.low %v745_v25, %v749_v1 }
 0x299   : > { %v5802_v11 = vcombine.high %v753_v7, %v757_v54  ;;  %v761_v17 = vld [vmem:[%s6594_s6 + $0xc18] sm:$0xff]  ;;  %v5801_v16 = vcombine.low %v753_v7, %v757_v54 }
 0x29a   : > { %4922 = vmatpush1.bf16.msra.mxu0 %v5617_v18  ;;  %v765_v12 = vld [vmem:[%s6594_s6 + $0xc38] sm:$0xff] }
 0x29b   : > { %4963 = vmatpush1.bf16.msra.mxu1 %v5745_v60  ;;  %4923 = vmatprep.subr.bf16.mxu0 %v5626_v22  ;;  %v5810_v18 = vcombine.high %v761_v17, %v765_v12  ;;  %v5938_v60 = vcombine.high %v889_v13, %v893_v14  ;;  %v769_v22 = vld [vmem:[%s6594_s6 + $0xc58] sm:$0xff]  ;;  %v5809_v27 = vcombine.low %v761_v17, %v765_v12 }
 0x29c   : > { %4964 = vmatprep.subr.bf16.mxu1 %v5754_v28  ;;  %v773_v28 = vld [vmem:[%s6594_s6 + $0xc78] sm:$0xff] }
 0x29d   : > { %v897_v24 = vld [vmem:[%s6594_s6 + $0x1058] sm:$0xff]  ;;  %v5817_v35 = vcombine.low %v769_v22, %v773_v28 }
 0x29e   : > { %4924 = vmatpush1.bf16.msra.mxu0 %v5625_v55  ;;  %v901_v26 = vld [vmem:[%s6594_s6 + $0x1078] sm:$0xff]  ;;  %v5818_v55 = vcombine.high %v769_v22, %v773_v28 }
 0x29f   : > { %4965 = vmatpush1.bf16.msra.mxu1 %v5753_v45  ;;  %4925 = vmatprep.subr.bf16.mxu0 %v5634_v31  ;;  %v5946_v45 = vcombine.high %v897_v24, %v901_v26  ;;  %v777_v31 = vld [vmem:[%s6594_s6 + $0xc98] sm:$0xff]  ;;  %v5945_v38 = vcombine.low %v897_v24, %v901_v26 }
 0x2a0   : > { %4966 = vmatprep.subr.bf16.mxu1 %v5762_v32  ;;  %v781_v32 = vld [vmem:[%s6594_s6 + $0xcb8] sm:$0xff] }
 0x2a1   : > { %v905_v33 = vld [vmem:[%s6594_s6 + $0x1098] sm:$0xff] }
 0x2a2   : > { %4926 = vmatpush1.bf16.msra.mxu0 %v5633_v39  ;;  %v909_v34 = vld [vmem:[%s6594_s6 + $0x10b8] sm:$0xff]  ;;  %v5826_v39 = vcombine.high %v777_v31, %v781_v32 }
 0x2a3   : > { %4967 = vmatpush1.bf16.msra.mxu1 %v5761_v42  ;;  %4927 = vmatprep.subr.bf16.mxu0 %v5642_v43  ;;  %v5954_v42 = vcombine.high %v905_v33, %v909_v34  ;;  %v785_v43 = vld [vmem:[%s6594_s6 + $0xcd8] sm:$0xff]  ;;  %v5953_v46 = vcombine.low %v905_v33, %v909_v34 }
 0x2a4   : > { %4968 = vmatprep.subr.bf16.mxu1 %v5770_v44  ;;  %v789_v44 = vld [vmem:[%s6594_s6 + $0xcf8] sm:$0xff] }
 0x2a5   : > { %v917_v20 = vld [vmem:[%s6594_s6 + $0x10f8] sm:$0xff]  ;;  %v5834_v23 = vcombine.high %v785_v43, %v789_v44 }
 0x2a6   : > { %4928 = vmatpush1.bf16.msra.mxu0 %v5641_v4  ;;  %v793_v4 = vld [vmem:[%s6594_s6 + $0xd18] sm:$0xff] }
 0x2a7   : > { %4969 = vmatpush1.bf16.msra.mxu1 %v5769_v49  ;;  %4929 = vmatprep.subr.bf16.mxu0 %v5650_v50  ;;  %v797_v49 = vld [vmem:[%s6594_s6 + $0xd38] sm:$0xff] }
 0x2a8   : > { %4970 = vmatprep.subr.bf16.mxu1 %v5778_v59  ;;  %v921_v50 = vld [vmem:[%s6594_s6 + $0x1118] sm:$0xff]  ;;  %v5833_v59 = vcombine.low %v785_v43, %v789_v44  ;;  %v5842_v51 = vcombine.high %v793_v4, %v797_v49 }
 0x2a9   : > { %v801_v40 = vld [vmem:[%s6594_s6 + $0xd58] sm:$0xff] }
 0x2aa   : > { %4930 = vmatpush1.bf16.msra.mxu0 %v5649_v56  ;;  %v805_v53 = vld [vmem:[%s6594_s6 + $0xd78] sm:$0xff] }
 0x2ab   : > { %4971 = vmatpush1.bf16.msra.mxu1 %v5777_v57  ;;  %4931 = vmatprep.subr.bf16.mxu0 %v5658_v58  ;;  %v929_v56 = vld [vmem:[%s6594_s6 + $0x1158] sm:$0xff]  ;;  %v5841_v58 = vcombine.low %v793_v4, %v797_v49  ;;  %v5850_v62 = vcombine.high %v801_v40, %v805_v53 }
 0x2ac   : > { %4972 = vmatprep.subr.bf16.mxu1 %v5786_v61  ;;  %v933_v57 = vld [vmem:[%s6594_s6 + $0x1178] sm:$0xff] }
 0x2ad   : > { %v5978_v0 = vcombine.high %v929_v56, %v933_v57  ;;  %v809_v25 = vld [vmem:[%s6594_s6 + $0xd98] sm:$0xff] }
 0x2ae   : > { %4932 = vmatpush1.bf16.msra.mxu0 %v5657_v2  ;;  %v813_v1 = vld [vmem:[%s6594_s6 + $0xdb8] sm:$0xff] }
 0x2af   : > { %4973 = vmatpush1.bf16.msra.mxu1 %v5785_v3  ;;  %4933 = vmatprep.subr.bf16.mxu0 %v5666_v5  ;;  %v937_v2 = vld [vmem:[%s6594_s6 + $0x1198] sm:$0xff]  ;;  %v5849_v5 = vcombine.low %v801_v40, %v805_v53  ;;  %v5858_v6 = vcombine.high %v809_v25, %v813_v1 }
 0x2b0   : > { %4974 = vmatprep.subr.bf16.mxu1 %v5794_v29  ;;  %v941_v3 = vld [vmem:[%s6594_s6 + $0x11b8] sm:$0xff]  ;;  %v5977_v29 = vcombine.low %v929_v56, %v933_v57 }
 0x2b1   : > { %v5986_v7 = vcombine.high %v937_v2, %v941_v3  ;;  %v817_v54 = vld [vmem:[%s6594_s6 + $0xdd8] sm:$0xff]  ;;  %v5985_v22 = vcombine.low %v937_v2, %v941_v3 }
 0x2b2   : > { %4934 = vmatpush1.bf16.msra.mxu0 %v5665_v8  ;;  %v821_v8 = vld [vmem:[%s6594_s6 + $0xdf8] sm:$0xff] }
 0x2b3   : > { %4975 = vmatpush1.bf16.msra.mxu1 %v5793_v9  ;;  %4935 = vmatprep.subr.bf16.mxu0 %v5674_v10  ;;  %v949_v17 = vld [vmem:[%s6594_s6 + $0x11f8] sm:$0xff]  ;;  %v5866_v28 = vcombine.high %v817_v54, %v821_v8 }
 0x2b4   : > { %4976 = vmatprep.subr.bf16.mxu1 %v5802_v11  ;;  %v945_v11 = vld [vmem:[%s6594_s6 + $0x11d8] sm:$0xff] }
 0x2b5   : > { %v5994_v26 = vcombine.high %v945_v11, %v949_v17 }
 0x2b6   : > { %4936 = vmatpush1.bf16.msra.mxu0 %v5673_v15  ;;  %v5857_v15 = vcombine.low %v809_v25, %v813_v1 }
 0x2b7   : > { %4977 = vmatpush1.bf16.msra.mxu1 %v5801_v16  ;;  %4987 = vmatprep.subr.bf16.mxu0 %v5810_v18 }
 0x2b8   : > { %5028 = vmatprep.subr.bf16.mxu1 %v5938_v60 }
 0x2b9   : > { %4938 = vmatmul.mubr.bf16.vlgmr.msra.gmra.mrb[32].mxu0 %v6725_v21  ;;  %v913_v21 = vld [vmem:[%s6594_s6 + $0x10d8] sm:$0xff] }
 0x2ba   : > { %4979 = vmatmul.mubr.bf16.vlgmr.msra.gmra.mrb[32].mxu1 %v6806_v37  ;;  %4988 = vmatpush1.bf16.msra.mxu0 %v5809_v27  ;;  %v5825_v37 = vcombine.low %v777_v31, %v781_v32  ;;  %v5962_v48 = vcombine.high %v913_v21, %v917_v20  ;;  %v825_v27 = vld [vmem:[%s6594_s6 + $0xe18] sm:$0xff]  ;;  %v5865_v31 = vcombine.low %v817_v54, %v821_v8 }
 0x2bb   : > { %5029 = vmatpush1.bf16.msra.mxu1 %v5937_v36  ;;  %4989 = vmatprep.subr.bf16.mxu0 %v5818_v55  ;;  %v829_v36 = vld [vmem:[%s6594_s6 + $0xe38] sm:$0xff]  ;;  %v5993_v32 = vcombine.low %v945_v11, %v949_v17 }
 0x2bc   : > { %5030 = vmatprep.subr.bf16.mxu1 %v5946_v45  ;;  %5019 = vmatprep.mubr.bf16.mxu0 %v6741_v30  ;;  %v925_v30 = vld [vmem:[%s6594_s6 + $0x1138] sm:$0xff]  ;;  %v5874_v33 = vcombine.high %v825_v27, %v829_v36  ;;  %v5873_v43 = vcombine.low %v825_v27, %v829_v36 }
 0x2bd   : > { %5060 = vmatprep.mubr.bf16.mxu1 %v6821_v47  ;;  %v5961_v47 = vcombine.low %v913_v21, %v917_v20  ;;  %v5970_v52 = vcombine.high %v921_v50, %v925_v30  ;;  %v5969_v61 = vcombine.low %v921_v50, %v925_v30  ;;  %v953_v55 = vld [vmem:[%s6594_s6 + $0x1218] sm:$0xff] }
 0x2be   : > { %4990 = vmatpush1.bf16.msra.mxu0 %v5817_v35  ;;  %v957_v45 = vld [vmem:[%s6594_s6 + $0x1238] sm:$0xff] }
 0x2bf   : > { %5031 = vmatpush1.bf16.msra.mxu1 %v5945_v38  ;;  %4991 = vmatprep.subr.bf16.mxu0 %v5826_v39  ;;  %v6002_v34 = vcombine.high %v953_v55, %v957_v45  ;;  %v833_v35 = vld [vmem:[%s6594_s6 + $0xe58] sm:$0xff]  ;;  %v6001_v44 = vcombine.low %v953_v55, %v957_v45 }
 0x2c0   : > { %5032 = vmatprep.subr.bf16.mxu1 %v5954_v42  ;;  %v837_v38 = vld [vmem:[%s6594_s6 + $0xe78] sm:$0xff] }
 0x2c1   : > { %v961_v39 = vld [vmem:[%s6594_s6 + $0x1258] sm:$0xff]  ;;  %v5882_v21 = vcombine.high %v833_v35, %v837_v38  ;;  %v5881_v4 = vcombine.low %v833_v35, %v837_v38 }
 0x2c2   : > { %4992 = vmatpush1.bf16.msra.mxu0 %v5825_v37  ;;  %v965_v42 = vld [vmem:[%s6594_s6 + $0x1278] sm:$0xff] }
 0x2c3   : > { %5033 = vmatpush1.bf16.msra.mxu1 %v5953_v46  ;;  %4993 = vmatprep.subr.bf16.mxu0 %v5834_v23  ;;  %v6010_v20 = vcombine.high %v961_v39, %v965_v42  ;;  %v841_v37 = vld [vmem:[%s6594_s6 + $0xe98] sm:$0xff]  ;;  %v6009_v49 = vcombine.low %v961_v39, %v965_v42 }
 0x2c4   : > { %5034 = vmatprep.subr.bf16.mxu1 %v5962_v48  ;;  %v845_v46 = vld [vmem:[%s6594_s6 + $0xeb8] sm:$0xff] }
 0x2c5   : > { %v969_v23 = vld [vmem:[%s6594_s6 + $0x1298] sm:$0xff]  ;;  %v5890_v50 = vcombine.high %v841_v37, %v845_v46  ;;  %v5889_v40 = vcombine.low %v841_v37, %v845_v46 }
 0x2c6   : > { %4994 = vmatpush1.bf16.msra.mxu0 %v5833_v59  ;;  %v973_v48 = vld [vmem:[%s6594_s6 + $0x12b8] sm:$0xff] }
 0x2c7   : > { %5035 = vmatpush1.bf16.msra.mxu1 %v5961_v47  ;;  %4995 = vmatprep.subr.bf16.mxu0 %v5842_v51  ;;  %v6018_v30 = vcombine.high %v969_v23, %v973_v48  ;;  %v849_v59 = vld [vmem:[%s6594_s6 + $0xed8] sm:$0xff]  ;;  %v6017_v53 = vcombine.low %v969_v23, %v973_v48  ;;  %v365_v23 = vld [vmem:[#allocation2 + $0x20] sm:$0xff] }
 0x2c8   : > { %5036 = vmatprep.subr.bf16.mxu1 %v5970_v52  ;;  %v853_v47 = vld [vmem:[%s6594_s6 + $0xef8] sm:$0xff] }
 0x2c9   : > { %v977_v51 = vld [vmem:[%s6594_s6 + $0x12d8] sm:$0xff]  ;;  %v5898_v56 = vcombine.high %v849_v59, %v853_v47  ;;  %v5897_v25 = vcombine.low %v849_v59, %v853_v47 }
 0x2ca   : > { %4996 = vmatpush1.bf16.msra.mxu0 %v5841_v58  ;;  %v981_v52 = vld [vmem:[%s6594_s6 + $0x12f8] sm:$0xff] }
 0x2cb   : > { %5037 = vmatpush1.bf16.msra.mxu1 %v5969_v61  ;;  %4997 = vmatprep.subr.bf16.mxu0 %v5850_v62  ;;  %v6026_v57 = vcombine.high %v977_v51, %v981_v52  ;;  %v857_v58 = vld [vmem:[%s6594_s6 + $0xf18] sm:$0xff]  ;;  %v6025_v1 = vcombine.low %v977_v51, %v981_v52 }
 0x2cc   : > { %v4693_v19 = vpop.f32.mrb[20].mxu0  ;;  %5038 = vmatprep.subr.bf16.mxu1 %v5978_v0  ;;  %v861_v61 = vld [vmem:[%s6594_s6 + $0xf38] sm:$0xff] }
 0x2cd   : > { %v4734_v9 = vpop.f32.mrb[20].mxu1  ;;  %v4695_v10 = vpop.f32.mrb[21].mxu0  ;;  %v985_v62 = vld [vmem:[%s6594_s6 + $0x1318] sm:$0xff]  ;;  %v5906_v2 = vcombine.high %v857_v58, %v861_v61 }
 0x2ce   : > { %v7353_v12 = vadd.f32 %v4734_v9, %v4693_v19  ;;  %v4736_v13 = vpop.f32.mrb[21].mxu1  ;;  %v4697_v14 = vpop.f32.mrb[22].mxu0  ;;  %4998 = vmatpush1.bf16.msra.mxu0 %v5849_v5  ;;  %v989_v0 = vld [vmem:[%s6594_s6 + $0x1338] sm:$0xff] }
 0x2cf   : > { %v7355_v16 = vadd.f32 %v4736_v13, %v4695_v10  ;;  %v4738_v18 = vpop.f32.mrb[22].mxu1  ;;  %5039 = vmatpush1.bf16.msra.mxu1 %v5977_v29  ;;  %v4698_v60 = vpop.f32.mrb[23].mxu0  ;;  %4999 = vmatprep.subr.bf16.mxu0 %v5858_v6  ;;  %v6034_v3 = vcombine.high %v985_v62, %v989_v0  ;;  %v865_v5 = vld [vmem:[%s6594_s6 + $0xf58] sm:$0xff]  ;;  %v6033_v54 = vcombine.low %v985_v62, %v989_v0 }
 0x2d0   : > { %v4739_v24 = vpop.f32.mrb[23].mxu1  ;;  %5040 = vmatprep.subr.bf16.mxu1 %v5986_v7  ;;  %v869_v29 = vld [vmem:[%s6594_s6 + $0xf78] sm:$0xff]  ;;  %v5905_v7 = vcombine.low %v857_v58, %v861_v61 }
 0x2d1   : > { %v993_v6 = vld [vmem:[%s6594_s6 + $0x1358] sm:$0xff]  ;;  %v5914_v8 = vcombine.high %v865_v5, %v869_v29  ;;  %v5913_v14 = vcombine.low %v865_v5, %v869_v29 }
 0x2d2   : > { %5000 = vmatpush1.bf16.msra.mxu0 %v5857_v15  ;;  %v997_v19 = vld [vmem:[%s6594_s6 + $0x1378] sm:$0xff] }
 0x2d3   : > { %5041 = vmatpush1.bf16.msra.mxu1 %v5985_v22  ;;  %5001 = vmatprep.subr.bf16.mxu0 %v5866_v28  ;;  %v6042_v9 = vcombine.high %v993_v6, %v997_v19  ;;  %v873_v10 = vld [vmem:[%s6594_s6 + $0xf98] sm:$0xff]  ;;  %v6041_v15 = vcombine.low %v993_v6, %v997_v19 }
 0x2d4   : > { %5042 = vmatprep.subr.bf16.mxu1 %v5994_v26  ;;  %v877_v11 = vld [vmem:[%s6594_s6 + $0xfb8] sm:$0xff] }
 0x2d5   : > { %v1001_v17 = vld [vmem:[%s6594_s6 + $0x1398] sm:$0xff]  ;;  %v5922_v18 = vcombine.high %v873_v10, %v877_v11  ;;  %v5921_v27 = vcombine.low %v873_v10, %v877_v11 }
 0x2d6   : > { %5002 = vmatpush1.bf16.msra.mxu0 %v5865_v31  ;;  %v1005_v13 = vld [vmem:[%s6594_s6 + $0x13b8] sm:$0xff] }
 0x2d7   : > { %5043 = vmatpush1.bf16.msra.mxu1 %v5993_v32  ;;  %5003 = vmatprep.subr.bf16.mxu0 %v5874_v33  ;;  %v6050_v60 = vcombine.high %v1001_v17, %v1005_v13  ;;  %v881_v22 = vld [vmem:[%s6594_s6 + $0xfd8] sm:$0xff]  ;;  %v6049_v36 = vcombine.low %v1001_v17, %v1005_v13 }
 0x2d8   : > { %5044 = vmatprep.subr.bf16.mxu1 %v6002_v34  ;;  %v885_v28 = vld [vmem:[%s6594_s6 + $0xff8] sm:$0xff] }
 0x2d9   : > { %v1009_v24 = vld [vmem:[%s6594_s6 + $0x13d8] sm:$0xff]  ;;  %v5930_v55 = vcombine.high %v881_v22, %v885_v28  ;;  %v5929_v31 = vcombine.low %v881_v22, %v885_v28  ;;  %v5099_v22 = vlaneseq (!%p6059_p3) }
 0x2da   : > { %5004 = vmatpush1.bf16.msra.mxu0 %v5873_v43  ;;  %v1013_v26 = vld [vmem:[%s6594_s6 + $0x13f8] sm:$0xff] }
 0x2db   : > { %5045 = vmatpush1.bf16.msra.mxu1 %v6001_v44  ;;  %5005 = vmatprep.subr.bf16.mxu0 %v5882_v21  ;;  %v6058_v45 = vcombine.high %v1009_v24, %v1013_v26  ;;  %v6057_v32 = vcombine.low %v1009_v24, %v1013_v26  ;;  %v368_v11 = vld [vmem:[#allocation2 + $0x38] sm:$0xff]  ;;  %v5100_v28 = vshrl.u32 (!%p6059_p3), %v5099_v22, 7  ;;  %v5097_v24 = vld [vmem:[%s336_s15] sm:$0xff] (!%p6059_p3) }
 0x2dc   : > { %5046 = vmatprep.subr.bf16.mxu1 %v6010_v20  ;;  %v5147_v26 = vld [vmem:[%s274_s10] sm:$0xff] (!%p6059_p3) }
 0x2de   : > { %5006 = vmatpush1.bf16.msra.mxu0 %v5881_v4 }
 0x2df   : > { %5047 = vmatpush1.bf16.msra.mxu1 %v6009_v49  ;;  %5007 = vmatprep.subr.bf16.mxu0 %v5890_v50  ;;  %v366_v49 = vld [vmem:[#allocation2 + $0x28] sm:$0xff] }
 0x2e0   : > { %5048 = vmatprep.subr.bf16.mxu1 %v6018_v30 }
 0x2e2   : > { %5008 = vmatpush1.bf16.msra.mxu0 %v5889_v40 }
 0x2e3   : > { %5049 = vmatpush1.bf16.msra.mxu1 %v6017_v53  ;;  %5009 = vmatprep.subr.bf16.mxu0 %v5898_v56 }
 0x2e4   : > { %5050 = vmatprep.subr.bf16.mxu1 %v6026_v57 }
 0x2e6   : > { %5010 = vmatpush1.bf16.msra.mxu0 %v5897_v25 }
 0x2e7   : > { %5051 = vmatpush1.bf16.msra.mxu1 %v6025_v1  ;;  %5011 = vmatprep.subr.bf16.mxu0 %v5906_v2 }
 0x2e8   : > { %5052 = vmatprep.subr.bf16.mxu1 %v6034_v3 }
 0x2ea   : > { %5012 = vmatpush1.bf16.msra.mxu0 %v5905_v7  ;;  %v367_v7 = vld [vmem:[#allocation2 + $0x30] sm:$0xff] }
 0x2eb   : > { %5053 = vmatpush1.bf16.msra.mxu1 %v6033_v54  ;;  %5013 = vmatprep.subr.bf16.mxu0 %v5914_v8 }
 0x2ec   : > { %5054 = vmatprep.subr.bf16.mxu1 %v6042_v9 }
 0x2ee   : > { %5014 = vmatpush1.bf16.msra.mxu0 %v5913_v14 }
 0x2ef   : > { %5055 = vmatpush1.bf16.msra.mxu1 %v6041_v15  ;;  %5015 = vmatprep.subr.bf16.mxu0 %v5922_v18 }
 0x2f0   : > { %5056 = vmatprep.subr.bf16.mxu1 %v6050_v60 }
 0x2f2   : > { %5016 = vmatpush1.bf16.msra.mxu0 %v5921_v27  ;;  %v5101_v27 = vsub.s32 (!%p6059_p3), 0, %v5100_v28 }
 0x2f3   : > { %5057 = vmatpush1.bf16.msra.mxu1 %v6049_v36  ;;  %5017 = vmatprep.subr.bf16.mxu0 %v5930_v55  ;;  %v5105_v36 = vsub.s32 (!%p6059_p3), 1, %v5100_v28  ;;  %v5109_v55 = vsub.s32 (!%p6059_p3), 2, %v5100_v28 }
 0x2f4   : > { %5058 = vmatprep.subr.bf16.mxu1 %v6058_v45  ;;  %v5113_v45 = vsub.s32 (!%p6059_p3), 3, %v5100_v28 }
 0x2f6   : > { %5018 = vmatpush1.bf16.msra.mxu0 %v5929_v31  ;;  %v5089_v31 = vld [vmem:[#allocation2] sm:$0xff] (!%p6059_p3) }
 0x2f7   : > { %5059 = vmatpush1.bf16.msra.mxu1 %v6057_v32  ;;  %v5090_v32 = vld [vmem:[#allocation2 + $0x8] sm:$0xff] (!%p6059_p3) }
 0x2f9   : > { %5020 = vmatmul.mubr.bf16.vlgmr.msra.gmra.mrb[36].mxu0 %v6815_v41 }
 0x2fa   : > { %5061 = vmatmul.mubr.bf16.vlgmr.msra.gmra.mrb[36].mxu1 %v6889_v63 }
 0x30c   : > { %v4775_v33 = vpop.f32.mrb[24].mxu0 }
 0x30d   : > { %v4776_v34 = vadd.f32 %v4775_v33, %v7353_v12  ;;  %v4816_v35 = vpop.f32.mrb[24].mxu1  ;;  %v4777_v38 = vpop.f32.mrb[25].mxu0  ;;  %v5117_v33 = vsub.s32 (!%p6059_p3), 4, %v5100_v28 }
 0x30e   : > { %v4778_v39 = vadd.f32 %v4777_v38, %v7355_v16  ;;  %v4818_v42 = vpop.f32.mrb[25].mxu1  ;;  %v4779_v43 = vpop.f32.mrb[26].mxu0  ;;  %v5129_v38 = vsub.s32 (!%p6059_p3), 7, %v5100_v28 }
 0x30f   : > { %v4817_v44 = vadd.f32 %v4816_v35, %v4776_v34  ;;  %v4820_v21 = vpop.f32.mrb[26].mxu1  ;;  %v4780_v20 = vpop.f32.mrb[27].mxu0  ;;  %v5121_v34 = vsub.s32 (!%p6059_p3), 5, %v5100_v28  ;;  %v5125_v35 = vsub.s32 (!%p6059_p3), 6, %v5100_v28  ;;  %v5152_v43 = vrot.slane (!%p6059_p3), %v5147_v26, %v5101_v27 }
 0x310   : > { %v4819_v37 = vadd.f32 %v4818_v42, %v4778_v39  ;;  %v4821_v46 = vpop.f32.mrb[27].mxu1  ;;  %v5102_v39 = vrot.slane (!%p6059_p3), %v5097_v24, %v5101_v27  ;;  %v5106_v42 = vrot.slane (!%p6059_p3), %v5097_v24, %v5105_v36  ;;  %v5091_v21 = vld [vmem:[#allocation2 + $0x10] sm:$0xff] (!%p6059_p3)  ;;  %v5092_v20 = vld [vmem:[#allocation2 + $0x18] sm:$0xff] (!%p6059_p3) }
 0x311   : > { %v5114_v46 = vrot.slane (!%p6059_p3), %v5097_v24, %v5113_v45 }
 0x34c   : > { %v4857_v48 = vpop.f32.mrb[28].mxu0 }
 0x34d   : > { %v4858_v4 = vadd.f32 %v4857_v48, %v4817_v44  ;;  %v4898_v41 = vpop.f32.mrb[28].mxu1  ;;  %v4859_v63 = vpop.f32.mrb[29].mxu0  ;;  %v5156_v44 = vrot.slane (!%p6059_p3), %v5147_v26, %v5105_v36  ;;  %v5164_v48 = vrot.slane (!%p6059_p3), %v5147_v26, %v5113_v45 }
 0x34e   : > { %v4860_v50 = vadd.f32 %v4859_v63, %v4819_v37  ;;  %v4900_v30 = vpop.f32.mrb[29].mxu1  ;;  %v4861_v12 = vpop.f32.mrb[30].mxu0  ;;  %v5110_v37 = vrot.slane (!%p6059_p3), %v5097_v24, %v5109_v55  ;;  %v5140_v63 = vmul.f32 (!%p6059_p3), %v5106_v42, %v5090_v32 }
 0x34f   : > { %v5073_v59 = vadd.f32 %v4858_v4, %v365_v23  ;;  %v4902_v47 = vpop.f32.mrb[30].mxu1  ;;  %v4862_v51 = vpop.f32.mrb[31].mxu0  ;;  %v5160_v23 = vrot.slane (!%p6059_p3), %v5147_v26, %v5109_v55 }
 0x350   : > { %v5074_v16 = vadd.f32 %v4860_v50, %v366_v49  ;;  %v4903_v52 = vpop.f32.mrb[31].mxu1  ;;  %v5139_v49 = vmul.f32 (!%p6059_p3), %v5102_v39, %v5089_v31  ;;  %v5118_v50 = vrot.slane (!%p6059_p3), %v5097_v24, %v5117_v33  ;;  %v5141_v12 = vmul.f32 (!%p6059_p3), %v5110_v37, %v5091_v21 }
 0x351   : > { %5081 = vst [vmem:[#allocation2 + $0x20] sm:$0xff] %v5073_v59  ;;  %v5142_v59 = vmul.f32 (!%p6059_p3), %v5114_v46, %v5092_v20  ;;  %v5168_v47 = vrot.slane (!%p6059_p3), %v5147_v26, %v5117_v33  ;;  %v5172_v51 = vrot.slane (!%p6059_p3), %v5147_v26, %v5121_v34  ;;  %v5190_v52 = vadd.f32 (!%p6059_p3), %v5156_v44, %v5140_v63 }
 0x352   : > { %5082 = vst [vmem:[#allocation2 + $0x28] sm:$0xff] %v5074_v16  ;;  %v5189_v16 = vadd.f32 (!%p6059_p3), %v5152_v43, %v5139_v49 }
 0x358   : > { %v5093_v4 = vld [vmem:[#allocation2 + $0x20] sm:$0xff] (!%p6059_p3) }
 0x38c   : > { %v4939_v40 = vpop.f32.mrb[32].mxu0 }
 0x38d   : > { %v4940_v53 = vadd.f32 %v4939_v40, %v4898_v41  ;;  %v4980_v56 = vpop.f32.mrb[32].mxu1  ;;  %v4941_v57 = vpop.f32.mrb[33].mxu0  ;;  %v5094_v41 = vld [vmem:[#allocation2 + $0x28] sm:$0xff] (!%p6059_p3)  ;;  %v5143_v40 = vmul.f32 (!%p6059_p3), %v5118_v50, %v5093_v4 }
 0x38e   : > { %v4942_v58 = vadd.f32 %v4941_v57, %v4900_v30  ;;  %v4982_v61 = vpop.f32.mrb[33].mxu1  ;;  %v4943_v62 = vpop.f32.mrb[34].mxu0  ;;  %v5122_v30 = vrot.slane (!%p6059_p3), %v5097_v24, %v5121_v34 }
 0x38f   : > { %v4981_v0 = vadd.f32 %v4980_v56, %v4940_v53  ;;  %v4984_v25 = vpop.f32.mrb[34].mxu1  ;;  %v4944_v1 = vpop.f32.mrb[35].mxu0  ;;  %v5126_v62 = vrot.slane (!%p6059_p3), %v5097_v24, %v5125_v35 }
 0x390   : > { %v4983_v2 = vadd.f32 %v4982_v61, %v4942_v58  ;;  %v4985_v3 = vpop.f32.mrb[35].mxu1  ;;  %v5144_v53 = vmul.f32 (!%p6059_p3), %v5122_v30, %v5094_v41  ;;  %v5191_v58 = vadd.f32 (!%p6059_p3), %v5160_v23, %v5141_v12  ;;  %v5192_v61 = vadd.f32 (!%p6059_p3), %v5164_v48, %v5142_v59 }
 0x391   : > { %v5197_v25 = vmax.f32 (!%p6059_p3), %v5189_v16, 0.0  ;;  %v5198_v1 = vmax.f32 (!%p6059_p3), %v5190_v52, 0.0 }
 0x392   : > { %v5194_v3 = vadd.f32 (!%p6059_p3), %v5172_v51, %v5144_v53 }
 0x3cc   : > { %v5021_v5 = vpop.f32.mrb[36].mxu0 }
 0x3cd   : > { %v5022_v29 = vadd.f32 %v5021_v5, %v4981_v0  ;;  %v5062_v6 = vpop.f32.mrb[36].mxu1  ;;  %v5023_v19 = vpop.f32.mrb[37].mxu0  ;;  %v5130_v0 = vrot.slane (!%p6059_p3), %v5097_v24, %v5129_v38  ;;  %v5199_v5 = vmax.f32 (!%p6059_p3), %v5191_v58, 0.0 }
 0x3ce   : > { %v5024_v54 = vadd.f32 %v5023_v19, %v4983_v2  ;;  %v5064_v8 = vpop.f32.mrb[37].mxu1  ;;  %v5025_v9 = vpop.f32.mrb[38].mxu0  ;;  %5088 = sbr.rel (%p6059_p3) target bundleno = 997 (0x3e5), region = 52  ;;  %v5193_v2 = vadd.f32 (!%p6059_p3), %v5168_v47, %v5143_v40 }
 0x3cf   : > { %v5063_v10 = vadd.f32 %v5062_v6, %v5022_v29  ;;  %v5066_v17 = vpop.f32.mrb[38].mxu1  ;;  %v5026_v13 = vpop.f32.mrb[39].mxu0  ;;  %v5200_v29 = vmax.f32 (!%p6059_p3), %v5192_v61, 0.0  ;;  %v5176_v9 = vrot.slane (!%p6059_p3), %v5147_v26, %v5125_v35 }
 0x3d0   : > { %v5065_v14 = vadd.f32 %v5064_v8, %v5024_v54  ;;  %v5067_v15 = vpop.f32.mrb[39].mxu1  ;;  %v5201_v54 = vmax.f32 (!%p6059_p3), %v5193_v2, 0.0  ;;  %v5202_v8 = vmax.f32 (!%p6059_p3), %v5194_v3, 0.0 }
 0x3d1   : > { %v5075_v18 = vadd.f32 %v5063_v10, %v367_v7  ;;  %v6068_v7 = vpack.c.bf16 (!%p6059_p3), %v5198_v1, %v5197_v25  ;;  %v6069_v10 = vpack.c.bf16 (!%p6059_p3), %v5200_v29, %v5199_v5 }
 0x3d2   : > { %v5076_v60 = vadd.f32 %v5065_v14, %v368_v11  ;;  %v5180_v11 = vrot.slane (!%p6059_p3), %v5147_v26, %v5129_v38  ;;  %v6070_v17 = vpack.c.bf16 (!%p6059_p3), %v5202_v8, %v5201_v54 }
 0x3d3   : > { %5083 = vst [vmem:[#allocation2 + $0x30] sm:$0xff] %v5075_v18  ;;  %5237 = vst [vmem:[%s6620_s0] sm:$0xff] (!%p6059_p3), %v6068_v7 }
 0x3d4   : > { %5084 = vst [vmem:[#allocation2 + $0x38] sm:$0xff] %v5076_v60  ;;  %5238 = vst [vmem:[%s6620_s0 + $0x8] sm:$0xff] (!%p6059_p3), %v6069_v10 }
 0x3d5   : > { %5239 = vst [vmem:[%s6620_s0 + $0x10] sm:$0xff] %v6070_v17 }
 0x3da   : > { %v5095_v56 = vld [vmem:[#allocation2 + $0x30] sm:$0xff] }
 0x3db   : > { %v5096_v57 = vld [vmem:[#allocation2 + $0x38] sm:$0xff]  ;;  %v5145_v6 = vmul.f32 %v5126_v62, %v5095_v56 }
 0x3dc   : > { %v5146_v19 = vmul.f32 %v5130_v0, %v5096_v57 }
 0x3dd   : > { %v5195_v13 = vadd.f32 %v5176_v9, %v5145_v6 }
 0x3de   : > { %v5196_v14 = vadd.f32 %v5180_v11, %v5146_v19 }
 0x3df   : > { %v5203_v15 = vmax.f32 %v5195_v13, 0.0 }
 0x3e0   : > { %v5204_v18 = vmax.f32 %v5196_v14, 0.0 }
 0x3e2   : > { %v6071_v60 = vpack.c.bf16 %v5204_v18, %v5203_v15 }
 0x3e4   : > { %5240 = vst [vmem:[%s6620_s0 + $0x18] sm:$0xff] %v6071_v60 }
 0x3e5 PF: > { %s20_s25 = sadd.s32 1, %s6342_s25   ;;  %s7468_s9 = sld [smem:[#allocation9_spill]] }
 0x3e6   : > { %p17_p11 = scmp.ge.s32.totalorder %s20_s25, 22   ;;  %s7469_s15 = smov %s6306_s16 }
 0x3e7   : > { %s7470_s16 = smov %s6310_s17  ;;  %s7471_s17 = smov %s6543_s14 }
 0x3e8   : > { %s7472_s18 = smov %s6318_s19  ;;  %s7473_s19 = smov %s6322_s20 }
 0x3e9   : > { %s7474_s20 = smov %s6548_s5  ;;  %s7475_s21 = smov %s6334_s23 }
 0x3ea   : > { %s7476_s22 = smov %s6338_s24  ;;  %s7477_s23 = smov %s7480_s26 }
 0x3eb   : > { %s7478_s24 = smov %s7468_s9  ;;  %19 = sbr.rel (!%p17_p11) target bundleno = 12 (0xc), region = 103 }
 0x3f2   :  { %5271 = vsyncpa [#allocation4], 1 }
 0x3f3   :  { %5273 = vsyncpa [#allocation4 + $0x1], 1 }
 0x3f4   :  { %5274 = vsyncpa [#allocation6], 1 }
 0x3f5   :  { %5276 = vsyncpa [#allocation6 + $0x1], 1 }

</bundles_post_ra>
